<compile_context>
chip_gen: v7x
topology: tpu7x:2x2x1
jax: 0.10.0
libtpu: 0.0.40
codegen_flags: <defaults>
</compile_context>

<pallas_src>
import jax
import jax.numpy as jnp
from jax import lax
from jax.experimental import pallas as pl
from jax.experimental.pallas import tpu as pltpu

LEAK = 0.2                      # LeakyReLU negative slope used everywhere in the module
BN_EPS = 1e-5                   # nn.BatchNorm2d default eps
VMEM_LIMIT = 32 * 1024 * 1024   # explicit budget, valid on v5e/v6e/v7x


# ----------------------------------------------------------------------------- helpers
def _round_up(x, m):
    return (x + m - 1) // m * m


def _pick_tk(k_pad):
    """Largest multiple-of-128 divisor of k_pad that is <= 2048."""
    kf = k_pad // 128
    best = 1
    for d in range(1, kf + 1):
        if kf % d == 0 and 128 * d <= 2048:
            best = d
    return 128 * best


# ----------------------------------------------------------------------------- GEMM kernel
def _make_gemm_kernel(nk, use_act, emit_stats):
    """GEMM kernel builder.

    nk == 1 : 2-D grid (M, N), no scratch accumulator (review item: drop redundant acc).
    nk  > 1 : 3-D grid (M, N, K) with resident bf16 output + f32 VMEM accumulator.
    emit_stats: also write per-M-tile (sum, sumsq) rows (for BatchNorm), computed from
    the f32 accumulator in the epilogue.
    """

    def epilogue(acc, o_ref, st_ref):
        y = acc                                           # f32 math (v5e-safe)
        if use_act:
            y = jnp.where(y >= 0, y, LEAK * y)            # LeakyReLU(0.2)
        o_ref[...] = y.astype(o_ref.dtype)                # bf16 store
        if emit_stats:
            st_ref[...] = jnp.zeros_like(st_ref)
            st_ref[0:1, :] = jnp.sum(acc, axis=0, keepdims=True)
            st_ref[1:2, :] = jnp.sum(acc * acc, axis=0, keepdims=True)

    if nk == 1:
        def kernel_1k(x_ref, w_ref, o_ref, *maybe_st):
            st_ref = maybe_st[0] if emit_stats else None
            acc = jnp.dot(x_ref[...], w_ref[...], preferred_element_type=jnp.float32)
            epilogue(acc, o_ref, st_ref)
        return kernel_1k

    def kernel_nk(x_ref, w_ref, o_ref, *rest):
        if emit_stats:
            st_ref, acc_ref = rest
        else:
            (acc_ref,) = rest
            st_ref = None

        @pl.when(pl.program_id(2) == 0)
        def _init():
            acc_ref[...] = jnp.zeros_like(acc_ref)

        acc_ref[...] += jnp.dot(x_ref[...], w_ref[...],
                                preferred_element_type=jnp.float32)

        @pl.when(pl.program_id(2) == pl.num_programs(2) - 1)
        def _finalize():
            epilogue(acc_ref[...], o_ref, st_ref)

    return kernel_nk


def pallas_gemm(x, w_prepared, *, act, emit_stats):
    """x: (M, K) bf16 (unpadded).  w_prepared: (K, N_pad) bf16 (pre-padded at init).

    Returns (y_pad bf16 (M_pad, N_pad), stats f32 (MT*8, N_pad) or None, (TM, TN)).
    Row 0 / row 1 of each 8-row stats group = per-M-tile channel sum / sum-of-squares.
    Padded M rows are zero so they contribute nothing to the statistics (exact stats).
    """
    M, K = x.shape
    Kw, N_pad = w_prepared.shape
    assert Kw == K and N_pad % 128 == 0

    TM = min(512, _round_up(M, 8))
    M_pad = _round_up(M, TM)
    TN = min(512, N_pad)
    if N_pad % TN:
        TN = 128
    MT, NT = M_pad // TM, N_pad // TN

    if K <= 2048:                       # single K tile: no K padding (full-dim block)
        TK, K_pad = K, K
    else:
        K_pad = _round_up(K, 128)
        TK = _pick_tk(K_pad)
    nk = K_pad // TK

    xp = x
    if M_pad > M or K_pad > K:
        xp = jnp.pad(x, ((0, M_pad - M), (0, K_pad - K)))
    wp = w_prepared
    if K_pad > K:                       # never hit for this model's shapes
        wp = jnp.pad(w_prepared, ((0, K_pad - K), (0, 0)))

    kernel = _make_gemm_kernel(nk=nk, use_act=act, emit_stats=emit_stats)

    y_shape = jax.ShapeDtypeStruct((M_pad, N_pad), jnp.bfloat16)
    st_shape = jax.ShapeDtypeStruct((MT * 8, N_pad), jnp.float32)

    if nk == 1:
        grid = (MT, NT)
        in_specs = [pl.BlockSpec((TM, TK), lambda m, n: (m, 0)),
                    pl.BlockSpec((TK, TN), lambda m, n: (0, n))]
        y_spec = pl.BlockSpec((TM, TN), lambda m, n: (m, n))
        st_spec = pl.BlockSpec((8, TN), lambda m, n: (m, n))
        scratch = []
        dims = ("parallel", "parallel")
    else:
        grid = (MT, NT, nk)
        in_specs = [pl.BlockSpec((TM, TK), lambda m, n, k: (m, k)),
                    pl.BlockSpec((TK, TN), lambda m, n, k: (k, n))]
        y_spec = pl.BlockSpec((TM, TN), lambda m, n, k: (m, n))
        st_spec = pl.BlockSpec((8, TN), lambda m, n, k: (m, n))
        scratch = [pltpu.VMEM((TM, TN), jnp.float32)]
        dims = ("parallel", "parallel", "arbitrary")

    if emit_stats:
        out_shape = (y_shape, st_shape)
        out_specs = (y_spec, st_spec)
    else:
        out_shape = y_shape
        out_specs = y_spec

    res = pl.pallas_call(
        kernel,
        grid=grid,
        out_shape=out_shape,
        in_specs=in_specs,
        out_specs=out_specs,
        scratch_shapes=scratch,
        compiler_params=pltpu.CompilerParams(
            dimension_semantics=dims,
            vmem_limit_bytes=VMEM_LIMIT),
    )(xp, wp)

    if emit_stats:
        y_pad, stats = res
    else:
        y_pad, stats = res, None
    return y_pad, stats, (TM, TN)


# ----------------------------------------------------------------------------- BatchNorm
def fold_bn(stats, m_real, gamma, beta):
    """Reduce per-tile partials and fold BN into a single per-channel scale/shift."""
    n_pad = stats.shape[1]
    st = stats.reshape(-1, 8, n_pad)
    ssum = jnp.sum(st[:, 0, :], axis=0)
    ssq = jnp.sum(st[:, 1, :], axis=0)
    mean = ssum / m_real
    # TODO(synk): E[x^2]-E[x]^2 in f32 is cancellation-prone vs PyTorch's formulation.
    var = jnp.maximum(ssq / m_real - mean * mean, 0.0)
    inv = lax.rsqrt(var + BN_EPS)
    n = gamma.shape[0]
    g = jnp.zeros((n_pad,), jnp.float32).at[:n].set(gamma.astype(jnp.float32))
    b = jnp.zeros((n_pad,), jnp.float32).at[:n].set(beta.astype(jnp.float32))
    a = g * inv                      # scale
    s = b - mean * a                 # shift
    return jnp.zeros((8, n_pad), jnp.float32).at[0, :].set(a).at[1, :].set(s)


def _bn_apply_kernel(y_ref, p_ref, o_ref):
    """y*scale + shift, LeakyReLU(0.2); f32 math, bf16 store."""
    y = y_ref[...].astype(jnp.float32)
    z = y * p_ref[0:1, :] + p_ref[1:2, :]
    o_ref[...] = jnp.where(z >= 0, z, LEAK * z).astype(o_ref.dtype)


def pallas_bn_lrelu_apply(y_pad, p, tm, tn):
    M_pad, N_pad = y_pad.shape
    return pl.pallas_call(
        _bn_apply_kernel,
        grid=(M_pad // tm, N_pad // tn),
        out_shape=jax.ShapeDtypeStruct((M_pad, N_pad), jnp.bfloat16),
        in_specs=[pl.BlockSpec((tm, tn), lambda m, n: (m, n)),
                  pl.BlockSpec((8, tn), lambda m, n: (0, n))],
        out_specs=pl.BlockSpec((tm, tn), lambda m, n: (m, n)),
        compiler_params=pltpu.CompilerParams(
            dimension_semantics=("parallel", "parallel"),
            vmem_limit_bytes=VMEM_LIMIT),
    )(y_pad, p)


# ----------------------------------------------------------------------------- JAX glue (NHWC)
def im2col_nhwc(x, kh, kw, stride, padding):
    """x: (B, H, W, C) NHWC bf16 -> patches (B*Ho*Wo, kh*kw*C), K ordered (kh, kw, C)."""
    if padding > 0:
        x = jnp.pad(x, ((0, 0), (padding, padding), (padding, padding), (0, 0)))
    B, H, W, C = x.shape
    Ho = (H - kh) // stride + 1
    Wo = (W - kw) // stride + 1
    if kh == 1 and kw == 1 and stride == 1:
        return x.reshape(B * Ho * Wo, C), Ho, Wo          # 1x1 conv: pure reshape
    cols = []
    for i in range(kh):
        for j in range(kw):
            cols.append(x[:, i:i + stride * (Ho - 1) + 1:stride,
                              j:j + stride * (Wo - 1) + 1:stride, :])
    p = jnp.stack(cols, axis=3)                           # (B, Ho, Wo, kh*kw, C)
    return p.reshape(B * Ho * Wo, kh * kw * C), Ho, Wo


def conv2d_layer(x, arrs, m, *, stride, padding, use_act=True):
    """Conv2d (+BN +LeakyReLU).  x: NHWC bf16.  Returns NHWC bf16."""
    B = x.shape[0]
    kh, kw, cout = m['kh'], m['kw'], m['cout']
    patches, Ho, Wo = im2col_nhwc(x, kh, kw, stride, padding)
    M = B * Ho * Wo
    if m['use_norm']:
        # BN layers in this module never carry a conv bias and always end in LeakyReLU.
        y_pad, stats, (tm, tn) = pallas_gemm(patches, arrs['w'], act=False, emit_stats=True)
        p = fold_bn(stats, M, arrs['gamma'], arrs['beta'])
        y_pad = pallas_bn_lrelu_apply(y_pad, p, tm, tn)
    else:
        y_pad, _, _ = pallas_gemm(patches, arrs['w'], act=use_act, emit_stats=False)
    return y_pad[:M, :cout].reshape(B, Ho, Wo, cout)


# ----------------------------------------------------------------------------- parameters
def init_params(key, num_chan, hid_dim, sent_dim, emb_dim):
    """Raw parameters in PyTorch layout (Cout, Cin, kh, kw)."""
    enc_dim = hid_dim * 4
    ks = list(jax.random.split(key, 16))
    n = lambda k, shape, std=0.02, mean=0.0: mean + std * jax.random.normal(k, shape, jnp.float32)
    p = {}
    # context_emb_pipe_64: Linear(sent_dim, emb_dim) + LeakyReLU
    p['ctx_w'] = n(ks[0], (sent_dim, emb_dim))
    p['ctx_b'] = jnp.zeros((emb_dim,), jnp.float32)
    # img_encoder_64 (ImageDown, input_size=64, cur_dim=128)
    p['e1_w'] = n(ks[1], (128, num_chan, 3, 3))                         # no norm, no bias
    p['e2_w'] = n(ks[2], (256, 128, 3, 3))
    p['e2_g'] = n(ks[3], (256,), mean=1.0); p['e2_b'] = jnp.zeros((256,), jnp.float32)
    p['e3_w'] = n(ks[4], (512, 256, 3, 3))
    p['e3_g'] = n(ks[5], (512,), mean=1.0); p['e3_b'] = jnp.zeros((512,), jnp.float32)
    p['e4_w'] = n(ks[6], (enc_dim, 512, 5, 5))
    p['e4_g'] = n(ks[7], (enc_dim,), mean=1.0); p['e4_b'] = jnp.zeros((enc_dim,), jnp.float32)
    # pair_disc_64 (DiscClassifier(enc_dim, emb_dim, kernel_size=4))
    p['p1_w'] = n(ks[8], (enc_dim, enc_dim + emb_dim, 1, 1))
    p['p1_g'] = n(ks[9], (enc_dim,), mean=1.0); p['p1_b'] = jnp.zeros((enc_dim,), jnp.float32)
    p['p2_w'] = n(ks[10], (1, enc_dim, 4, 4))
    p['p2_b'] = n(ks[11], (1,))
    # local_img_disc_64: Conv2d(enc_dim, 1, k=4, bias=True)
    p['l_w'] = n(ks[12], (1, enc_dim, 4, 4))
    p['l_b'] = n(ks[13], (1,))
    return p


def prepare_params(raw):
    """One-time weight re-layout (transpose -> (K, N_pad), bf16 cast, N pad).
    Returns (arrays pytree for jit, static metadata dict closed over by the forward)."""
    def conv(wname, gname=None, bname=None):
        w = raw[wname]
        cout, cin, kh, kw = w.shape
        n_pad = _round_up(cout, 128)
        mat = jnp.transpose(w, (2, 3, 1, 0)).reshape(kh * kw * cin, cout).astype(jnp.bfloat16)
        if n_pad > cout:
            mat = jnp.pad(mat, ((0, 0), (0, n_pad - cout)))
        arrs = {'w': mat}
        if gname is not None:
            arrs['gamma'] = raw[gname].astype(jnp.float32)
            arrs['beta'] = raw[bname].astype(jnp.float32)
        meta = {'kh': kh, 'kw': kw, 'cin': cin, 'cout': cout, 'use_norm': gname is not None}
        return arrs, meta

    arrs, meta = {}, {}
    for name, keys in [('e1', ('e1_w', None, None)),
                       ('e2', ('e2_w', 'e2_g', 'e2_b')),
                       ('e3', ('e3_w', 'e3_g', 'e3_b')),
                       ('e4', ('e4_w', 'e4_g', 'e4_b')),
                       ('p1', ('p1_w', 'p1_g', 'p1_b'))]:
        arrs[name], meta[name] = conv(*keys)

    def head(wname):  # (1, Cin, kh, kw) -> (kh*kw*Cin, 1) f32, K order (kh, kw, Cin)
        w = raw[wname]
        return jnp.transpose(w, (2, 3, 1, 0)).reshape(-1, 1).astype(jnp.float32)

    arrs['ctx_w'] = raw['ctx_w'].astype(jnp.float32)
    arrs['ctx_b'] = raw['ctx_b'].astype(jnp.float32)
    arrs['p2_w'] = head('p2_w'); arrs['p2_b'] = raw['p2_b'].astype(jnp.float32)
    arrs['l_w'] = head('l_w');   arrs['l_b'] = raw['l_b'].astype(jnp.float32)
    return arrs, meta


# ----------------------------------------------------------------------------- forward (64 scale)
def make_forward(meta):
    def forward(params, images, embedding):
        """images: (B, C, 64, 64) NCHW f32 ; embedding: (B, sent_dim) f32."""
        B = embedding.shape[0]

        # context_emb_pipe_64: tiny (M=B, N=emb_dim) -> plain dot per review.
        s = jnp.dot(embedding, params['ctx_w']) + params['ctx_b']
        sent_code = jnp.where(s >= 0, s, LEAK * s)

        # NHWC + bf16 end-to-end (single layout/dtype conversion at the input)
        x = jnp.transpose(images, (0, 2, 3, 1)).astype(jnp.bfloat16)

        # img_encoder_64: 64 -> 32 -> 16 -> 8 -> 4
        x = conv2d_layer(x, params['e1'], meta['e1'], stride=2, padding=1, use_act=True)
        x = conv2d_layer(x, params['e2'], meta['e2'], stride=2, padding=1)
        x = conv2d_layer(x, params['e3'], meta['e3'], stride=2, padding=1)
        img_code = conv2d_layer(x, params['e4'], meta['e4'], stride=1, padding=0)
        # img_code: (B, 4, 4, enc_dim) NHWC bf16

        # pair_disc_64
        H, W = img_code.shape[1], img_code.shape[2]
        emb_dim = sent_code.shape[1]
        sent_exp = jnp.broadcast_to(
            sent_code.astype(jnp.bfloat16)[:, None, None, :], (B, H, W, emb_dim))
        comp_inp = jnp.concatenate([img_code, sent_exp], axis=-1)       # (B, 4, 4, enc+emb)
        h = conv2d_layer(comp_inp, params['p1'], meta['p1'], stride=1, padding=0)

        # 4x4 valid conv to 1 channel == dot over the flattened (H, W, C) window.
        pair = jnp.dot(h.reshape(B, -1).astype(jnp.float32), params['p2_w']) + params['p2_b']
        pair_disc_out = pair.reshape(-1, 1)                              # (B, 1)

        # local_img_disc_64
        local = jnp.dot(img_code.reshape(B, -1).astype(jnp.float32),
                        params['l_w']) + params['l_b']
        local_img_disc_out = local.reshape(B, 1, 1, 1)                   # (B, 1, 1, 1) NCHW
        return pair_disc_out, local_img_disc_out
    return forward


# ----------------------------------------------------------------------------- main
if __name__ == "__main__":
    B, num_chan, img_size = 2, 3, 64
    hid_dim, sent_dim, emb_dim = 4, 10, 8        # enc_dim = hid_dim * 4 = 16

    key = jax.random.PRNGKey(0)
    k_params, k_img, k_emb = jax.random.split(key, 3)

    raw = init_params(k_params, num_chan, hid_dim, sent_dim, emb_dim)
    params, meta = prepare_params(raw)           # one-time weight re-layout, outside jit

    images = jax.random.normal(k_img, (B, num_chan, img_size, img_size), jnp.float32)
    embedding = jax.random.normal(k_emb, (B, sent_dim), jnp.float32)

    fwd = jax.jit(make_forward(meta))
    pair_out, local_out = fwd(params, images, embedding)
    jax.block_until_ready((pair_out, local_out))

    assert pair_out.shape == (B, 1)
    assert local_out.shape == (B, 1, 1, 1)
    assert jnp.all(jnp.isfinite(pair_out)) and jnp.all(jnp.isfinite(local_out))
    print("KERNEL_OK")
</pallas_src>

<mosaic_0001>
module attributes {stable_mosaic.version = 11 : i64} {
  func.func @kernel_1k(%arg0: i32, %arg1: i32, %arg2: memref<512x27xbf16, #tpu.memory_space<vmem>>, %arg3: memref<27x128xbf16, #tpu.memory_space<vmem>>, %arg4: memref<512x128xbf16, #tpu.memory_space<vmem>>) attributes {dimension_semantics = [#tpu.dimension_semantics<parallel>, #tpu.dimension_semantics<parallel>], iteration_bounds = array<i64: 4, 1>, scalar_prefetch = 0 : i64, scratch_operands = 0 : i64, tpu.core_type = #tpu.core_type<tc>, window_params = [{transform_indices = @transform_0, window_bounds = array<i64: 512, 27>}, {transform_indices = @transform_1, window_bounds = array<i64: 27, 128>}, {transform_indices = @transform_2, window_bounds = array<i64: 512, 128>}]} {
    %c0 = arith.constant 0 : index
    %c0_0 = arith.constant 0 : index
    %0 = vector.load %arg2[%c0, %c0_0] : memref<512x27xbf16, #tpu.memory_space<vmem>>, vector<512x27xbf16>
    %c0_1 = arith.constant 0 : index
    %c0_2 = arith.constant 0 : index
    %1 = vector.load %arg3[%c0_1, %c0_2] : memref<27x128xbf16, #tpu.memory_space<vmem>>, vector<27x128xbf16>
    %cst = arith.constant dense<0.000000e+00> : vector<512x128xf32>
    %2 = tpu.matmul %0, %1, %cst {dimension_numbers = #tpu.dot_dimension_numbers<[1], [0], [0], [1], [0, 0, 1, 1], [], []>} : vector<512x27xbf16>, vector<27x128xbf16>, vector<512x128xf32> -> vector<512x128xf32>
    %cst_3 = arith.constant 0.000000e+00 : f32
    %3 = vector.broadcast %cst_3 : f32 to vector<512x128xf32>
    %4 = arith.cmpf oge, %2, %3 : vector<512x128xf32>
    %cst_4 = arith.constant 2.000000e-01 : f32
    %5 = vector.broadcast %cst_4 : f32 to vector<512x128xf32>
    %6 = arith.mulf %5, %2 : vector<512x128xf32>
    %7 = arith.select %4, %2, %6 : vector<512x128xi1>, vector<512x128xf32>
    %8 = arith.truncf %7 : vector<512x128xf32> to vector<512x128xbf16>
    %c0_5 = arith.constant 0 : index
    %c0_6 = arith.constant 0 : index
    %9 = vector.load %arg4[%c0_5, %c0_6] : memref<512x128xbf16, #tpu.memory_space<vmem>>, vector<512x128xbf16>
    tpu.vector_store %arg4[%c0_5, %c0_6], %8 {strides = array<i32>} : memref<512x128xbf16, #tpu.memory_space<vmem>>, vector<512x128xbf16>,
    return
  }
  func.func @transform_0(%arg0: i32, %arg1: i32) -> (i32, i32) {
    %c0_i32 = arith.constant 0 : i32
    %c0_i32_0 = arith.constant 0 : i32
    return %arg0, %c0_i32 : i32, i32
  }
  func.func @transform_1(%arg0: i32, %arg1: i32) -> (i32, i32) {
    %c0_i32 = arith.constant 0 : i32
    %c0_i32_0 = arith.constant 0 : i32
    return %c0_i32, %arg1 : i32, i32
  }
  func.func @transform_2(%arg0: i32, %arg1: i32) -> (i32, i32) {
    %c0_i32 = arith.constant 0 : i32
    return %arg0, %arg1 : i32, i32
  }
}

module attributes {stable_mosaic.version = 11 : i64} {
  func.func @kernel_1k(%arg0: i32, %arg1: i32, %arg2: memref<512x1152xbf16, #tpu.memory_space<vmem>>, %arg3: memref<1152x256xbf16, #tpu.memory_space<vmem>>, %arg4: memref<512x256xbf16, #tpu.memory_space<vmem>>, %arg5: memref<8x256xf32, #tpu.memory_space<vmem>>) attributes {dimension_semantics = [#tpu.dimension_semantics<parallel>, #tpu.dimension_semantics<parallel>], iteration_bounds = array<i64: 1, 1>, scalar_prefetch = 0 : i64, scratch_operands = 0 : i64, tpu.core_type = #tpu.core_type<tc>, window_params = [{transform_indices = @transform_0, window_bounds = array<i64: 512, 1152>}, {transform_indices = @transform_1, window_bounds = array<i64: 1152, 256>}, {transform_indices = @transform_2, window_bounds = array<i64: 512, 256>}, {transform_indices = @transform_3, window_bounds = array<i64: 8, 256>}]} {
    %c0 = arith.constant 0 : index
    %c0_0 = arith.constant 0 : index
    %0 = vector.load %arg2[%c0, %c0_0] : memref<512x1152xbf16, #tpu.memory_space<vmem>>, vector<512x1152xbf16>
    %c0_1 = arith.constant 0 : index
    %c0_2 = arith.constant 0 : index
    %1 = vector.load %arg3[%c0_1, %c0_2] : memref<1152x256xbf16, #tpu.memory_space<vmem>>, vector<1152x256xbf16>
    %cst = arith.constant dense<0.000000e+00> : vector<512x256xf32>
    %2 = tpu.matmul %0, %1, %cst {dimension_numbers = #tpu.dot_dimension_numbers<[1], [0], [0], [1], [0, 0, 1, 1], [], []>} : vector<512x1152xbf16>, vector<1152x256xbf16>, vector<512x256xf32> -> vector<512x256xf32>
    %3 = arith.truncf %2 : vector<512x256xf32> to vector<512x256xbf16>
    %c0_3 = arith.constant 0 : index
    %c0_4 = arith.constant 0 : index
    %4 = vector.load %arg4[%c0_3, %c0_4] : memref<512x256xbf16, #tpu.memory_space<vmem>>, vector<512x256xbf16>
    tpu.vector_store %arg4[%c0_3, %c0_4], %3 {strides = array<i32>} : memref<512x256xbf16, #tpu.memory_space<vmem>>, vector<512x256xbf16>,
    %cst_5 = arith.constant 0.000000e+00 : f32
    %5 = vector.broadcast %cst_5 : f32 to vector<8x256xf32>
    %c0_6 = arith.constant 0 : index
    %c0_7 = arith.constant 0 : index
    %6 = vector.load %arg5[%c0_6, %c0_7] : memref<8x256xf32, #tpu.memory_space<vmem>>, vector<8x256xf32>
    tpu.vector_store %arg5[%c0_6, %c0_7], %5 {strides = array<i32>} : memref<8x256xf32, #tpu.memory_space<vmem>>, vector<8x256xf32>,
    %cst_8 = arith.constant dense<0.000000e+00> : vector<256xf32>
    %7 = vector.multi_reduction <add>, %2, %cst_8 [0] : vector<512x256xf32> to vector<256xf32>
    %8 = vector.shape_cast %7 : vector<256xf32> to vector<1x256xf32>
    %c0_9 = arith.constant 0 : index
    %c0_10 = arith.constant 0 : index
    %9 = vector.load %arg5[%c0_9, %c0_10] : memref<8x256xf32, #tpu.memory_space<vmem>>, vector<1x256xf32>
    tpu.vector_store %arg5[%c0_9, %c0_10], %8 {strides = array<i32>} : memref<8x256xf32, #tpu.memory_space<vmem>>, vector<1x256xf32>,
    %10 = arith.mulf %2, %2 : vector<512x256xf32>
    %cst_11 = arith.constant dense<0.000000e+00> : vector<256xf32>
    %11 = vector.multi_reduction <add>, %10, %cst_11 [0] : vector<512x256xf32> to vector<256xf32>
    %12 = vector.shape_cast %11 : vector<256xf32> to vector<1x256xf32>
    %c1 = arith.constant 1 : index
    %c0_12 = arith.constant 0 : index
    %13 = vector.load %arg5[%c1, %c0_12] : memref<8x256xf32, #tpu.memory_space<vmem>>, vector<1x256xf32>
    tpu.vector_store %arg5[%c1, %c0_12], %12 {strides = array<i32>} : memref<8x256xf32, #tpu.memory_space<vmem>>, vector<1x256xf32>,
    return
  }
  func.func @transform_0(%arg0: i32, %arg1: i32) -> (i32, i32) {
    %c0_i32 = arith.constant 0 : i32
    %c0_i32_0 = arith.constant 0 : i32
    return %arg0, %c0_i32 : i32, i32
  }
  func.func @transform_1(%arg0: i32, %arg1: i32) -> (i32, i32) {
    %c0_i32 = arith.constant 0 : i32
    %c0_i32_0 = arith.constant 0 : i32
    return %c0_i32, %arg1 : i32, i32
  }
  func.func @transform_2(%arg0: i32, %arg1: i32) -> (i32, i32) {
    %c0_i32 = arith.constant 0 : i32
    return %arg0, %arg1 : i32, i32
  }
  func.func @transform_3(%arg0: i32, %arg1: i32) -> (i32, i32) {
    %c0_i32 = arith.constant 0 : i32
    return %arg0, %arg1 : i32, i32
  }
}

module attributes {stable_mosaic.version = 11 : i64} {
  func.func @_bn_apply_kernel(%arg0: i32, %arg1: i32, %arg2: memref<512x256xbf16, #tpu.memory_space<vmem>>, %arg3: memref<8x256xf32, #tpu.memory_space<vmem>>, %arg4: memref<512x256xbf16, #tpu.memory_space<vmem>>) attributes {dimension_semantics = [#tpu.dimension_semantics<parallel>, #tpu.dimension_semantics<parallel>], iteration_bounds = array<i64: 1, 1>, scalar_prefetch = 0 : i64, scratch_operands = 0 : i64, tpu.core_type = #tpu.core_type<tc>, window_params = [{transform_indices = @transform_0, window_bounds = array<i64: 512, 256>}, {transform_indices = @transform_1, window_bounds = array<i64: 8, 256>}, {transform_indices = @transform_2, window_bounds = array<i64: 512, 256>}]} {
    %c0 = arith.constant 0 : index
    %c0_0 = arith.constant 0 : index
    %0 = vector.load %arg2[%c0, %c0_0] : memref<512x256xbf16, #tpu.memory_space<vmem>>, vector<512x256xbf16>
    %1 = arith.extf %0 : vector<512x256xbf16> to vector<512x256xf32>
    %c0_1 = arith.constant 0 : index
    %c0_2 = arith.constant 0 : index
    %2 = vector.load %arg3[%c0_1, %c0_2] : memref<8x256xf32, #tpu.memory_space<vmem>>, vector<1x256xf32>
    %3 = vector.broadcast %2 : vector<1x256xf32> to vector<512x256xf32>
    %4 = arith.mulf %1, %3 : vector<512x256xf32>
    %c1 = arith.constant 1 : index
    %c0_3 = arith.constant 0 : index
    %5 = vector.load %arg3[%c1, %c0_3] : memref<8x256xf32, #tpu.memory_space<vmem>>, vector<1x256xf32>
    %6 = vector.broadcast %5 : vector<1x256xf32> to vector<512x256xf32>
    %7 = arith.addf %4, %6 : vector<512x256xf32>
    %cst = arith.constant 0.000000e+00 : f32
    %8 = vector.broadcast %cst : f32 to vector<512x256xf32>
    %9 = arith.cmpf oge, %7, %8 : vector<512x256xf32>
    %cst_4 = arith.constant 2.000000e-01 : f32
    %10 = vector.broadcast %cst_4 : f32 to vector<512x256xf32>
    %11 = arith.mulf %10, %7 : vector<512x256xf32>
    %12 = arith.select %9, %7, %11 : vector<512x256xi1>, vector<512x256xf32>
    %13 = arith.truncf %12 : vector<512x256xf32> to vector<512x256xbf16>
    %c0_5 = arith.constant 0 : index
    %c0_6 = arith.constant 0 : index
    %14 = vector.load %arg4[%c0_5, %c0_6] : memref<512x256xbf16, #tpu.memory_space<vmem>>, vector<512x256xbf16>
    tpu.vector_store %arg4[%c0_5, %c0_6], %13 {strides = array<i32>} : memref<512x256xbf16, #tpu.memory_space<vmem>>, vector<512x256xbf16>,
    return
  }
  func.func @transform_0(%arg0: i32, %arg1: i32) -> (i32, i32) {
    %c0_i32 = arith.constant 0 : i32
    return %arg0, %arg1 : i32, i32
  }
  func.func @transform_1(%arg0: i32, %arg1: i32) -> (i32, i32) {
    %c0_i32 = arith.constant 0 : i32
    %c0_i32_0 = arith.constant 0 : i32
    return %c0_i32, %arg1 : i32, i32
  }
  func.func @transform_2(%arg0: i32, %arg1: i32) -> (i32, i32) {
    %c0_i32 = arith.constant 0 : i32
    return %arg0, %arg1 : i32, i32
  }
}

module attributes {stable_mosaic.version = 11 : i64} {
  func.func @kernel_nk(%arg0: i32, %arg1: i32, %arg2: i32, %arg3: memref<128x1152xbf16, #tpu.memory_space<vmem>>, %arg4: memref<1152x512xbf16, #tpu.memory_space<vmem>>, %arg5: memref<128x512xbf16, #tpu.memory_space<vmem>>, %arg6: memref<8x512xf32, #tpu.memory_space<vmem>>, %arg7: memref<128x512xf32, #tpu.memory_space<vmem>>) attributes {dimension_semantics = [#tpu.dimension_semantics<parallel>, #tpu.dimension_semantics<parallel>, #tpu.dimension_semantics<arbitrary>], iteration_bounds = array<i64: 1, 1, 2>, scalar_prefetch = 0 : i64, scratch_operands = 1 : i64, tpu.core_type = #tpu.core_type<tc>, window_params = [{transform_indices = @transform_0, window_bounds = array<i64: 128, 1152>}, {transform_indices = @transform_1, window_bounds = array<i64: 1152, 512>}, {transform_indices = @transform_2, window_bounds = array<i64: 128, 512>}, {transform_indices = @transform_3, window_bounds = array<i64: 8, 512>}]} {
    %c0_i32 = arith.constant 0 : i32
    %0 = arith.cmpi eq, %arg2, %c0_i32 : i32
    %1 = arith.extui %0 : i1 to i32
    %c0_i32_0 = arith.constant 0 : i32
    %2 = arith.cmpi ne, %1, %c0_i32_0 : i32
    scf.if %2 {
      %cst_9 = arith.constant 0.000000e+00 : f32
      %12 = vector.broadcast %cst_9 : f32 to vector<128x512xf32>
      %c0_10 = arith.constant 0 : index
      %c0_11 = arith.constant 0 : index
      %13 = vector.load %arg7[%c0_10, %c0_11] : memref<128x512xf32, #tpu.memory_space<vmem>>, vector<128x512xf32>
      tpu.vector_store %arg7[%c0_10, %c0_11], %12 {strides = array<i32>} : memref<128x512xf32, #tpu.memory_space<vmem>>, vector<128x512xf32>,
    } else {
    }
    %c0 = arith.constant 0 : index
    %c0_1 = arith.constant 0 : index
    %3 = vector.load %arg7[%c0, %c0_1] : memref<128x512xf32, #tpu.memory_space<vmem>>, vector<128x512xf32>
    %c0_2 = arith.constant 0 : index
    %c0_3 = arith.constant 0 : index
    %4 = vector.load %arg3[%c0_2, %c0_3] : memref<128x1152xbf16, #tpu.memory_space<vmem>>, vector<128x1152xbf16>
    %c0_4 = arith.constant 0 : index
    %c0_5 = arith.constant 0 : index
    %5 = vector.load %arg4[%c0_4, %c0_5] : memref<1152x512xbf16, #tpu.memory_space<vmem>>, vector<1152x512xbf16>
    %cst = arith.constant dense<0.000000e+00> : vector<128x512xf32>
    %6 = tpu.matmul %4, %5, %cst {dimension_numbers = #tpu.dot_dimension_numbers<[1], [0], [0], [1], [0, 0, 1, 1], [], []>} : vector<128x1152xbf16>, vector<1152x512xbf16>, vector<128x512xf32> -> vector<128x512xf32>
    %7 = arith.addf %3, %6 : vector<128x512xf32>
    %c0_6 = arith.constant 0 : index
    %c0_7 = arith.constant 0 : index
    %8 = vector.load %arg7[%c0_6, %c0_7] : memref<128x512xf32, #tpu.memory_space<vmem>>, vector<128x512xf32>
    tpu.vector_store %arg7[%c0_6, %c0_7], %7 {strides = array<i32>} : memref<128x512xf32, #tpu.memory_space<vmem>>, vector<128x512xf32>,
    %c1_i32 = arith.constant 1 : i32
    %9 = arith.cmpi eq, %arg2, %c1_i32 : i32
    %10 = arith.extui %9 : i1 to i32
    %c0_i32_8 = arith.constant 0 : i32
    %11 = arith.cmpi ne, %10, %c0_i32_8 : i32
    scf.if %11 {
      %c0_9 = arith.constant 0 : index
      %c0_10 = arith.constant 0 : index
      %12 = vector.load %arg7[%c0_9, %c0_10] : memref<128x512xf32, #tpu.memory_space<vmem>>, vector<128x512xf32>
      %13 = arith.truncf %12 : vector<128x512xf32> to vector<128x512xbf16>
      %c0_11 = arith.constant 0 : index
      %c0_12 = arith.constant 0 : index
      %14 = vector.load %arg5[%c0_11, %c0_12] : memref<128x512xbf16, #tpu.memory_space<vmem>>, vector<128x512xbf16>
      tpu.vector_store %arg5[%c0_11, %c0_12], %13 {strides = array<i32>} : memref<128x512xbf16, #tpu.memory_space<vmem>>, vector<128x512xbf16>,
      %cst_13 = arith.constant 0.000000e+00 : f32
      %15 = vector.broadcast %cst_13 : f32 to vector<8x512xf32>
      %c0_14 = arith.constant 0 : index
      %c0_15 = arith.constant 0 : index
      %16 = vector.load %arg6[%c0_14, %c0_15] : memref<8x512xf32, #tpu.memory_space<vmem>>, vector<8x512xf32>
      tpu.vector_store %arg6[%c0_14, %c0_15], %15 {strides = array<i32>} : memref<8x512xf32, #tpu.memory_space<vmem>>, vector<8x512xf32>,
      %cst_16 = arith.constant dense<0.000000e+00> : vector<512xf32>
      %17 = vector.multi_reduction <add>, %12, %cst_16 [0] : vector<128x512xf32> to vector<512xf32>
      %18 = vector.shape_cast %17 : vector<512xf32> to vector<1x512xf32>
      %c0_17 = arith.constant 0 : index
      %c0_18 = arith.constant 0 : index
      %19 = vector.load %arg6[%c0_17, %c0_18] : memref<8x512xf32, #tpu.memory_space<vmem>>, vector<1x512xf32>
      tpu.vector_store %arg6[%c0_17, %c0_18], %18 {strides = array<i32>} : memref<8x512xf32, #tpu.memory_space<vmem>>, vector<1x512xf32>,
      %20 = arith.mulf %12, %12 : vector<128x512xf32>
      %cst_19 = arith.constant dense<0.000000e+00> : vector<512xf32>
      %21 = vector.multi_reduction <add>, %20, %cst_19 [0] : vector<128x512xf32> to vector<512xf32>
      %22 = vector.shape_cast %21 : vector<512xf32> to vector<1x512xf32>
      %c1 = arith.constant 1 : index
      %c0_20 = arith.constant 0 : index
      %23 = vector.load %arg6[%c1, %c0_20] : memref<8x512xf32, #tpu.memory_space<vmem>>, vector<1x512xf32>
      tpu.vector_store %arg6[%c1, %c0_20], %22 {strides = array<i32>} : memref<8x512xf32, #tpu.memory_space<vmem>>, vector<1x512xf32>,
    } else {
    }
    return
  }
  func.func @transform_0(%arg0: i32, %arg1: i32, %arg2: i32) -> (i32, i32) {
    %c0_i32 = arith.constant 0 : i32
    return %arg0, %arg2 : i32, i32
  }
  func.func @transform_1(%arg0: i32, %arg1: i32, %arg2: i32) -> (i32, i32) {
    %c0_i32 = arith.constant 0 : i32
    return %arg2, %arg1 : i32, i32
  }
  func.func @transform_2(%arg0: i32, %arg1: i32, %arg2: i32) -> (i32, i32) {
    %c0_i32 = arith.constant 0 : i32
    return %arg0, %arg1 : i32, i32
  }
  func.func @transform_3(%arg0: i32, %arg1: i32, %arg2: i32) -> (i32, i32) {
    %c0_i32 = arith.constant 0 : i32
    return %arg0, %arg1 : i32, i32
  }
}

module attributes {stable_mosaic.version = 11 : i64} {
  func.func @_bn_apply_kernel(%arg0: i32, %arg1: i32, %arg2: memref<128x512xbf16, #tpu.memory_space<vmem>>, %arg3: memref<8x512xf32, #tpu.memory_space<vmem>>, %arg4: memref<128x512xbf16, #tpu.memory_space<vmem>>) attributes {dimension_semantics = [#tpu.dimension_semantics<parallel>, #tpu.dimension_semantics<parallel>], iteration_bounds = array<i64: 1, 1>, scalar_prefetch = 0 : i64, scratch_operands = 0 : i64, tpu.core_type = #tpu.core_type<tc>, window_params = [{transform_indices = @transform_0, window_bounds = array<i64: 128, 512>}, {transform_indices = @transform_1, window_bounds = array<i64: 8, 512>}, {transform_indices = @transform_2, window_bounds = array<i64: 128, 512>}]} {
    %c0 = arith.constant 0 : index
    %c0_0 = arith.constant 0 : index
    %0 = vector.load %arg2[%c0, %c0_0] : memref<128x512xbf16, #tpu.memory_space<vmem>>, vector<128x512xbf16>
    %1 = arith.extf %0 : vector<128x512xbf16> to vector<128x512xf32>
    %c0_1 = arith.constant 0 : index
    %c0_2 = arith.constant 0 : index
    %2 = vector.load %arg3[%c0_1, %c0_2] : memref<8x512xf32, #tpu.memory_space<vmem>>, vector<1x512xf32>
    %3 = vector.broadcast %2 : vector<1x512xf32> to vector<128x512xf32>
    %4 = arith.mulf %1, %3 : vector<128x512xf32>
    %c1 = arith.constant 1 : index
    %c0_3 = arith.constant 0 : index
    %5 = vector.load %arg3[%c1, %c0_3] : memref<8x512xf32, #tpu.memory_space<vmem>>, vector<1x512xf32>
    %6 = vector.broadcast %5 : vector<1x512xf32> to vector<128x512xf32>
    %7 = arith.addf %4, %6 : vector<128x512xf32>
    %cst = arith.constant 0.000000e+00 : f32
    %8 = vector.broadcast %cst : f32 to vector<128x512xf32>
    %9 = arith.cmpf oge, %7, %8 : vector<128x512xf32>
    %cst_4 = arith.constant 2.000000e-01 : f32
    %10 = vector.broadcast %cst_4 : f32 to vector<128x512xf32>
    %11 = arith.mulf %10, %7 : vector<128x512xf32>
    %12 = arith.select %9, %7, %11 : vector<128x512xi1>, vector<128x512xf32>
    %13 = arith.truncf %12 : vector<128x512xf32> to vector<128x512xbf16>
    %c0_5 = arith.constant 0 : index
    %c0_6 = arith.constant 0 : index
    %14 = vector.load %arg4[%c0_5, %c0_6] : memref<128x512xbf16, #tpu.memory_space<vmem>>, vector<128x512xbf16>
    tpu.vector_store %arg4[%c0_5, %c0_6], %13 {strides = array<i32>} : memref<128x512xbf16, #tpu.memory_space<vmem>>, vector<128x512xbf16>,
    return
  }
  func.func @transform_0(%arg0: i32, %arg1: i32) -> (i32, i32) {
    %c0_i32 = arith.constant 0 : i32
    return %arg0, %arg1 : i32, i32
  }
  func.func @transform_1(%arg0: i32, %arg1: i32) -> (i32, i32) {
    %c0_i32 = arith.constant 0 : i32
    %c0_i32_0 = arith.constant 0 : i32
    return %c0_i32, %arg1 : i32, i32
  }
  func.func @transform_2(%arg0: i32, %arg1: i32) -> (i32, i32) {
    %c0_i32 = arith.constant 0 : i32
    return %arg0, %arg1 : i32, i32
  }
}

module attributes {stable_mosaic.version = 11 : i64} {
  func.func @kernel_nk(%arg0: i32, %arg1: i32, %arg2: i32, %arg3: memref<32x1280xbf16, #tpu.memory_space<vmem>>, %arg4: memref<1280x128xbf16, #tpu.memory_space<vmem>>, %arg5: memref<32x128xbf16, #tpu.memory_space<vmem>>, %arg6: memref<8x128xf32, #tpu.memory_space<vmem>>, %arg7: memref<32x128xf32, #tpu.memory_space<vmem>>) attributes {dimension_semantics = [#tpu.dimension_semantics<parallel>, #tpu.dimension_semantics<parallel>, #tpu.dimension_semantics<arbitrary>], iteration_bounds = array<i64: 1, 1, 10>, scalar_prefetch = 0 : i64, scratch_operands = 1 : i64, tpu.core_type = #tpu.core_type<tc>, window_params = [{transform_indices = @transform_0, window_bounds = array<i64: 32, 1280>}, {transform_indices = @transform_1, window_bounds = array<i64: 1280, 128>}, {transform_indices = @transform_2, window_bounds = array<i64: 32, 128>}, {transform_indices = @transform_3, window_bounds = array<i64: 8, 128>}]} {
    %c0_i32 = arith.constant 0 : i32
    %0 = arith.cmpi eq, %arg2, %c0_i32 : i32
    %1 = arith.extui %0 : i1 to i32
    %c0_i32_0 = arith.constant 0 : i32
    %2 = arith.cmpi ne, %1, %c0_i32_0 : i32
    scf.if %2 {
      %cst_9 = arith.constant 0.000000e+00 : f32
      %12 = vector.broadcast %cst_9 : f32 to vector<32x128xf32>
      %c0_10 = arith.constant 0 : index
      %c0_11 = arith.constant 0 : index
      %13 = vector.load %arg7[%c0_10, %c0_11] : memref<32x128xf32, #tpu.memory_space<vmem>>, vector<32x128xf32>
      tpu.vector_store %arg7[%c0_10, %c0_11], %12 {strides = array<i32>} : memref<32x128xf32, #tpu.memory_space<vmem>>, vector<32x128xf32>,
    } else {
    }
    %c0 = arith.constant 0 : index
    %c0_1 = arith.constant 0 : index
    %3 = vector.load %arg7[%c0, %c0_1] : memref<32x128xf32, #tpu.memory_space<vmem>>, vector<32x128xf32>
    %c0_2 = arith.constant 0 : index
    %c0_3 = arith.constant 0 : index
    %4 = vector.load %arg3[%c0_2, %c0_3] : memref<32x1280xbf16, #tpu.memory_space<vmem>>, vector<32x1280xbf16>
    %c0_4 = arith.constant 0 : index
    %c0_5 = arith.constant 0 : index
    %5 = vector.load %arg4[%c0_4, %c0_5] : memref<1280x128xbf16, #tpu.memory_space<vmem>>, vector<1280x128xbf16>
    %cst = arith.constant dense<0.000000e+00> : vector<32x128xf32>
    %6 = tpu.matmul %4, %5, %cst {dimension_numbers = #tpu.dot_dimension_numbers<[1], [0], [0], [1], [0, 0, 1, 1], [], []>} : vector<32x1280xbf16>, vector<1280x128xbf16>, vector<32x128xf32> -> vector<32x128xf32>
    %7 = arith.addf %3, %6 : vector<32x128xf32>
    %c0_6 = arith.constant 0 : index
    %c0_7 = arith.constant 0 : index
    %8 = vector.load %arg7[%c0_6, %c0_7] : memref<32x128xf32, #tpu.memory_space<vmem>>, vector<32x128xf32>
    tpu.vector_store %arg7[%c0_6, %c0_7], %7 {strides = array<i32>} : memref<32x128xf32, #tpu.memory_space<vmem>>, vector<32x128xf32>,
    %c9_i32 = arith.constant 9 : i32
    %9 = arith.cmpi eq, %arg2, %c9_i32 : i32
    %10 = arith.extui %9 : i1 to i32
    %c0_i32_8 = arith.constant 0 : i32
    %11 = arith.cmpi ne, %10, %c0_i32_8 : i32
    scf.if %11 {
      %c0_9 = arith.constant 0 : index
      %c0_10 = arith.constant 0 : index
      %12 = vector.load %arg7[%c0_9, %c0_10] : memref<32x128xf32, #tpu.memory_space<vmem>>, vector<32x128xf32>
      %13 = arith.truncf %12 : vector<32x128xf32> to vector<32x128xbf16>
      %c0_11 = arith.constant 0 : index
      %c0_12 = arith.constant 0 : index
      %14 = vector.load %arg5[%c0_11, %c0_12] : memref<32x128xbf16, #tpu.memory_space<vmem>>, vector<32x128xbf16>
      tpu.vector_store %arg5[%c0_11, %c0_12], %13 {strides = array<i32>} : memref<32x128xbf16, #tpu.memory_space<vmem>>, vector<32x128xbf16>,
      %cst_13 = arith.constant 0.000000e+00 : f32
      %15 = vector.broadcast %cst_13 : f32 to vector<8x128xf32>
      %c0_14 = arith.constant 0 : index
      %c0_15 = arith.constant 0 : index
      %16 = vector.load %arg6[%c0_14, %c0_15] : memref<8x128xf32, #tpu.memory_space<vmem>>, vector<8x128xf32>
      tpu.vector_store %arg6[%c0_14, %c0_15], %15 {strides = array<i32>} : memref<8x128xf32, #tpu.memory_space<vmem>>, vector<8x128xf32>,
      %cst_16 = arith.constant dense<0.000000e+00> : vector<128xf32>
      %17 = vector.multi_reduction <add>, %12, %cst_16 [0] : vector<32x128xf32> to vector<128xf32>
      %18 = vector.shape_cast %17 : vector<128xf32> to vector<1x128xf32>
      %c0_17 = arith.constant 0 : index
      %c0_18 = arith.constant 0 : index
      %19 = vector.load %arg6[%c0_17, %c0_18] : memref<8x128xf32, #tpu.memory_space<vmem>>, vector<1x128xf32>
      tpu.vector_store %arg6[%c0_17, %c0_18], %18 {strides = array<i32>} : memref<8x128xf32, #tpu.memory_space<vmem>>, vector<1x128xf32>,
      %20 = arith.mulf %12, %12 : vector<32x128xf32>
      %cst_19 = arith.constant dense<0.000000e+00> : vector<128xf32>
      %21 = vector.multi_reduction <add>, %20, %cst_19 [0] : vector<32x128xf32> to vector<128xf32>
      %22 = vector.shape_cast %21 : vector<128xf32> to vector<1x128xf32>
      %c1 = arith.constant 1 : index
      %c0_20 = arith.constant 0 : index
      %23 = vector.load %arg6[%c1, %c0_20] : memref<8x128xf32, #tpu.memory_space<vmem>>, vector<1x128xf32>
      tpu.vector_store %arg6[%c1, %c0_20], %22 {strides = array<i32>} : memref<8x128xf32, #tpu.memory_space<vmem>>, vector<1x128xf32>,
    } else {
    }
    return
  }
  func.func @transform_0(%arg0: i32, %arg1: i32, %arg2: i32) -> (i32, i32) {
    %c0_i32 = arith.constant 0 : i32
    return %arg0, %arg2 : i32, i32
  }
  func.func @transform_1(%arg0: i32, %arg1: i32, %arg2: i32) -> (i32, i32) {
    %c0_i32 = arith.constant 0 : i32
    return %arg2, %arg1 : i32, i32
  }
  func.func @transform_2(%arg0: i32, %arg1: i32, %arg2: i32) -> (i32, i32) {
    %c0_i32 = arith.constant 0 : i32
    return %arg0, %arg1 : i32, i32
  }
  func.func @transform_3(%arg0: i32, %arg1: i32, %arg2: i32) -> (i32, i32) {
    %c0_i32 = arith.constant 0 : i32
    return %arg0, %arg1 : i32, i32
  }
}

module attributes {stable_mosaic.version = 11 : i64} {
  func.func @_bn_apply_kernel(%arg0: i32, %arg1: i32, %arg2: memref<32x128xbf16, #tpu.memory_space<vmem>>, %arg3: memref<8x128xf32, #tpu.memory_space<vmem>>, %arg4: memref<32x128xbf16, #tpu.memory_space<vmem>>) attributes {dimension_semantics = [#tpu.dimension_semantics<parallel>, #tpu.dimension_semantics<parallel>], iteration_bounds = array<i64: 1, 1>, scalar_prefetch = 0 : i64, scratch_operands = 0 : i64, tpu.core_type = #tpu.core_type<tc>, window_params = [{transform_indices = @transform_0, window_bounds = array<i64: 32, 128>}, {transform_indices = @transform_1, window_bounds = array<i64: 8, 128>}, {transform_indices = @transform_2, window_bounds = array<i64: 32, 128>}]} {
    %c0 = arith.constant 0 : index
    %c0_0 = arith.constant 0 : index
    %0 = vector.load %arg2[%c0, %c0_0] : memref<32x128xbf16, #tpu.memory_space<vmem>>, vector<32x128xbf16>
    %1 = arith.extf %0 : vector<32x128xbf16> to vector<32x128xf32>
    %c0_1 = arith.constant 0 : index
    %c0_2 = arith.constant 0 : index
    %2 = vector.load %arg3[%c0_1, %c0_2] : memref<8x128xf32, #tpu.memory_space<vmem>>, vector<1x128xf32>
    %3 = vector.broadcast %2 : vector<1x128xf32> to vector<32x128xf32>
    %4 = arith.mulf %1, %3 : vector<32x128xf32>
    %c1 = arith.constant 1 : index
    %c0_3 = arith.constant 0 : index
    %5 = vector.load %arg3[%c1, %c0_3] : memref<8x128xf32, #tpu.memory_space<vmem>>, vector<1x128xf32>
    %6 = vector.broadcast %5 : vector<1x128xf32> to vector<32x128xf32>
    %7 = arith.addf %4, %6 : vector<32x128xf32>
    %cst = arith.constant 0.000000e+00 : f32
    %8 = vector.broadcast %cst : f32 to vector<32x128xf32>
    %9 = arith.cmpf oge, %7, %8 : vector<32x128xf32>
    %cst_4 = arith.constant 2.000000e-01 : f32
    %10 = vector.broadcast %cst_4 : f32 to vector<32x128xf32>
    %11 = arith.mulf %10, %7 : vector<32x128xf32>
    %12 = arith.select %9, %7, %11 : vector<32x128xi1>, vector<32x128xf32>
    %13 = arith.truncf %12 : vector<32x128xf32> to vector<32x128xbf16>
    %c0_5 = arith.constant 0 : index
    %c0_6 = arith.constant 0 : index
    %14 = vector.load %arg4[%c0_5, %c0_6] : memref<32x128xbf16, #tpu.memory_space<vmem>>, vector<32x128xbf16>
    tpu.vector_store %arg4[%c0_5, %c0_6], %13 {strides = array<i32>} : memref<32x128xbf16, #tpu.memory_space<vmem>>, vector<32x128xbf16>,
    return
  }
  func.func @transform_0(%arg0: i32, %arg1: i32) -> (i32, i32) {
    %c0_i32 = arith.constant 0 : i32
    return %arg0, %arg1 : i32, i32
  }
  func.func @transform_1(%arg0: i32, %arg1: i32) -> (i32, i32) {
    %c0_i32 = arith.constant 0 : i32
    %c0_i32_0 = arith.constant 0 : i32
    return %c0_i32, %arg1 : i32, i32
  }
  func.func @transform_2(%arg0: i32, %arg1: i32) -> (i32, i32) {
    %c0_i32 = arith.constant 0 : i32
    return %arg0, %arg1 : i32, i32
  }
}

module attributes {stable_mosaic.version = 11 : i64} {
  func.func @kernel_1k(%arg0: i32, %arg1: i32, %arg2: memref<32x24xbf16, #tpu.memory_space<vmem>>, %arg3: memref<24x128xbf16, #tpu.memory_space<vmem>>, %arg4: memref<32x128xbf16, #tpu.memory_space<vmem>>, %arg5: memref<8x128xf32, #tpu.memory_space<vmem>>) attributes {dimension_semantics = [#tpu.dimension_semantics<parallel>, #tpu.dimension_semantics<parallel>], iteration_bounds = array<i64: 1, 1>, scalar_prefetch = 0 : i64, scratch_operands = 0 : i64, tpu.core_type = #tpu.core_type<tc>, window_params = [{transform_indices = @transform_0, window_bounds = array<i64: 32, 24>}, {transform_indices = @transform_1, window_bounds = array<i64: 24, 128>}, {transform_indices = @transform_2, window_bounds = array<i64: 32, 128>}, {transform_indices = @transform_3, window_bounds = array<i64: 8, 128>}]} {
    %c0 = arith.constant 0 : index
    %c0_0 = arith.constant 0 : index
    %0 = vector.load %arg2[%c0, %c0_0] : memref<32x24xbf16, #tpu.memory_space<vmem>>, vector<32x24xbf16>
    %c0_1 = arith.constant 0 : index
    %c0_2 = arith.constant 0 : index
    %1 = vector.load %arg3[%c0_1, %c0_2] : memref<24x128xbf16, #tpu.memory_space<vmem>>, vector<24x128xbf16>
    %cst = arith.constant dense<0.000000e+00> : vector<32x128xf32>
    %2 = tpu.matmul %0, %1, %cst {dimension_numbers = #tpu.dot_dimension_numbers<[1], [0], [0], [1], [0, 0, 1, 1], [], []>} : vector<32x24xbf16>, vector<24x128xbf16>, vector<32x128xf32> -> vector<32x128xf32>
    %3 = arith.truncf %2 : vector<32x128xf32> to vector<32x128xbf16>
    %c0_3 = arith.constant 0 : index
    %c0_4 = arith.constant 0 : index
    %4 = vector.load %arg4[%c0_3, %c0_4] : memref<32x128xbf16, #tpu.memory_space<vmem>>, vector<32x128xbf16>
    tpu.vector_store %arg4[%c0_3, %c0_4], %3 {strides = array<i32>} : memref<32x128xbf16, #tpu.memory_space<vmem>>, vector<32x128xbf16>,
    %cst_5 = arith.constant 0.000000e+00 : f32
    %5 = vector.broadcast %cst_5 : f32 to vector<8x128xf32>
    %c0_6 = arith.constant 0 : index
    %c0_7 = arith.constant 0 : index
    %6 = vector.load %arg5[%c0_6, %c0_7] : memref<8x128xf32, #tpu.memory_space<vmem>>, vector<8x128xf32>
    tpu.vector_store %arg5[%c0_6, %c0_7], %5 {strides = array<i32>} : memref<8x128xf32, #tpu.memory_space<vmem>>, vector<8x128xf32>,
    %cst_8 = arith.constant dense<0.000000e+00> : vector<128xf32>
    %7 = vector.multi_reduction <add>, %2, %cst_8 [0] : vector<32x128xf32> to vector<128xf32>
    %8 = vector.shape_cast %7 : vector<128xf32> to vector<1x128xf32>
    %c0_9 = arith.constant 0 : index
    %c0_10 = arith.constant 0 : index
    %9 = vector.load %arg5[%c0_9, %c0_10] : memref<8x128xf32, #tpu.memory_space<vmem>>, vector<1x128xf32>
    tpu.vector_store %arg5[%c0_9, %c0_10], %8 {strides = array<i32>} : memref<8x128xf32, #tpu.memory_space<vmem>>, vector<1x128xf32>,
    %10 = arith.mulf %2, %2 : vector<32x128xf32>
    %cst_11 = arith.constant dense<0.000000e+00> : vector<128xf32>
    %11 = vector.multi_reduction <add>, %10, %cst_11 [0] : vector<32x128xf32> to vector<128xf32>
    %12 = vector.shape_cast %11 : vector<128xf32> to vector<1x128xf32>
    %c1 = arith.constant 1 : index
    %c0_12 = arith.constant 0 : index
    %13 = vector.load %arg5[%c1, %c0_12] : memref<8x128xf32, #tpu.memory_space<vmem>>, vector<1x128xf32>
    tpu.vector_store %arg5[%c1, %c0_12], %12 {strides = array<i32>} : memref<8x128xf32, #tpu.memory_space<vmem>>, vector<1x128xf32>,
    return
  }
  func.func @transform_0(%arg0: i32, %arg1: i32) -> (i32, i32) {
    %c0_i32 = arith.constant 0 : i32
    %c0_i32_0 = arith.constant 0 : i32
    return %arg0, %c0_i32 : i32, i32
  }
  func.func @transform_1(%arg0: i32, %arg1: i32) -> (i32, i32) {
    %c0_i32 = arith.constant 0 : i32
    %c0_i32_0 = arith.constant 0 : i32
    return %c0_i32, %arg1 : i32, i32
  }
  func.func @transform_2(%arg0: i32, %arg1: i32) -> (i32, i32) {
    %c0_i32 = arith.constant 0 : i32
    return %arg0, %arg1 : i32, i32
  }
  func.func @transform_3(%arg0: i32, %arg1: i32) -> (i32, i32) {
    %c0_i32 = arith.constant 0 : i32
    return %arg0, %arg1 : i32, i32
  }
}

</mosaic_0001>

<bundles_post_ra>
// kernel: forward.9
= control target key start
LH: loop header
LB: loop body
LE: loop exit
PB: predicated region body
PF: predicated region fallthrough
CT: control target
= control target key end

     0   :  { %s2021_s9 = smov 0   ;;  %s2023_s10 = smov 0   ;;  %s2183_s0 = inlined_call_operand.vmem [shape: bf16[2048,27], index: 0, kind: input, shape index: {}]   ;;  %s2184_s1 = inlined_call_operand.vmem [shape: bf16[27,128], index: 1, kind: input, shape index: {}]   ;;  %s2185_s2 = inlined_call_operand.vmem [shape: bf16[2048,128], index: 2, kind: output, shape index: {}]  }
   0x1   :  { %s2025_s11 = smov 0  }
   0x2 LB: > { %s24_s12 = sadd.s32 1, %s1999_s10  ;;  %p1424_p0 = scmp.ge.s32.totalorder %s2003_s11, 1  ;;  %s2003_s11 = sphi %s2025_s11, %s12_s11   ;;  %s1999_s10 = sphi %s2023_s10, %s2187_s10   ;;  %s1995_s9 = sphi %s2021_s9, %s2186_s9  }
   0x3   : > { %p26_p1 = scmp.ge.s32.totalorder %s24_s12, 4  ;;  %p136_p2 = scmp.lt.s32.totalorder %s2003_s11, 5 }
   0x5   : > { %s2189_s12 = smov (%p26_p1, %s24_s12), 0  ;;  %p137_p3 = pnand %p1424_p0, %p136_p2 }
   0x6   : > { %v1947_v0 = vld [vmem:[%s2184_s1] sm:$0xff] (!%p137_p3)   ;;  %vm521_vm0 = vcmask (!%p137_p3), 1044480   ;;  %v1948_v1 = vld [vmem:[%s2184_s1 + $0x8] sm:$0x3f] (!%p137_p3)   ;;  %vm522_vm1 = vcmask (!%p137_p3), 1045504   ;;  %s1425_s17 = sshll.u32 (!%p137_p3), %s1995_s9, 6 }
   0x7   : > { %140 = sbr.rel (%p137_p3) target bundleno = 298 (0x12a), region = 28  ;;  %1850 = vmatprep.subr.bf16.mxu0 (!%p137_p3), %v1947_v0  ;;  %1918 = vmatprep.subr.bf16.mxu1 (!%p137_p3), %v1947_v0  ;;  %v2005_v2 = vmov (!%p137_p3), 65535   ;;  %p166_p4 = scmp.lt.s32.totalorder (!%p137_p3), %s1425_s17, 255  ;;  %vm424_vm2 = vcmask (!%p137_p3), 220160  }
   0x8   : > { %1851 = vmatpush3.bf16.msra.mxu0 (!%p137_p3), %v1947_v0  ;;  %1920 = vmatpush3.bf16.msra.mxu1 (!%p137_p3), %v1947_v0  ;;  %v523_v3 = vsel (!%p137_p3), %vm521_vm0, 4294967295, %v2005_v2 }
   0x9   : > { %v524_v4 = vsel (!%p137_p3), %vm522_vm1, %v523_v3, 0 }
   0xa   : > { %v526_v5 = vand.u32 (!%p137_p3), %v1948_v1, %v524_v4 }
   0xc   : > { %1852 = vmatprep.subr.bf16.mxu0 (!%p137_p3), %v526_v5  ;;  %1919 = vmatprep.subr.bf16.mxu1 (!%p137_p3), %v526_v5 }
   0xd   : > { %1853 = vmatpush3.bf16.msra.mxu0 (!%p137_p3), %v526_v5  ;;  %1921 = vmatpush3.bf16.msra.mxu1 (!%p137_p3), %v526_v5 }
   0xe   : > { %s2191_s17 = smov (!%p166_p4, %s1425_s17), 255 }
   0xf   : > { %s1426_s18 = sshll.u32 %s2191_s17, 2 }
  0x10   : > { %s2053_s21 = scalar_lea.vmem %s2183_s0, %s1426_s18  ;;  %s2124_s24 = scalar_lea.vmem %s2185_s2, %s1426_s18 }
  0x11   : > { %v1949_v6 = vld [vmem:[%s2053_s21] sm:$0xff]   ;;  %v1951_v8 = vld [vmem:[%s2053_s21 + $0x8] sm:$0xff]   ;;  %v1953_v10 = vld [vmem:[%s2053_s21 + $0x10] sm:$0xff]  }
  0x12   : > { %v1950_v7 = vld [vmem:[%s2053_s21 + $0x80] sm:$0xff]   ;;  %1854 = vmatprep.mubr.msk.bf16.mxu0 %vm424_vm2, %v1949_v6  ;;  %v1952_v9 = vld [vmem:[%s2053_s21 + $0x88] sm:$0xff]   ;;  %v1954_v11 = vld [vmem:[%s2053_s21 + $0x90] sm:$0xff]  }
  0x13   : > { %1886 = vmatprep.mubr.msk.bf16.mxu1 %vm424_vm2, %v1950_v7  ;;  %1855 = vmatmul.mubr.msk.bf16.vlgmr.msra.gmra.mrb[0].mxu0 %vm424_vm2, %v1951_v8  ;;  %v1955_v12 = vld [vmem:[%s2053_s21 + $0x18] sm:$0xff]   ;;  %v1957_v14 = vld [vmem:[%s2053_s21 + $0x20] sm:$0xff]   ;;  %v1959_v16 = vld [vmem:[%s2053_s21 + $0x28] sm:$0xff]  }
  0x14   : > { %1887 = vmatmul.mubr.msk.bf16.vlgmr.msra.gmra.mrb[0].mxu1 %vm424_vm2, %v1952_v9  ;;  %1858 = vmatprep.mubr.msk.bf16.mxu0 %vm424_vm2, %v1953_v10  ;;  %v1956_v13 = vld [vmem:[%s2053_s21 + $0x98] sm:$0xff]   ;;  %v1958_v15 = vld [vmem:[%s2053_s21 + $0xa0] sm:$0xff]   ;;  %v1960_v17 = vld [vmem:[%s2053_s21 + $0xa8] sm:$0xff]  }
  0x15   : > { %1890 = vmatprep.mubr.msk.bf16.mxu1 %vm424_vm2, %v1954_v11  ;;  %v1961_v18 = vld [vmem:[%s2053_s21 + $0x30] sm:$0xff]   ;;  %v1963_v20 = vld [vmem:[%s2053_s21 + $0x38] sm:$0xff]   ;;  %v1965_v22 = vld [vmem:[%s2053_s21 + $0x40] sm:$0xff]  }
  0x16   : > { %v1962_v19 = vld [vmem:[%s2053_s21 + $0xb0] sm:$0xff]   ;;  %v1964_v21 = vld [vmem:[%s2053_s21 + $0xb8] sm:$0xff]   ;;  %v1966_v23 = vld [vmem:[%s2053_s21 + $0xc0] sm:$0xff]  }
  0x17   : > { %v1967_v24 = vld [vmem:[%s2053_s21 + $0x48] sm:$0xff]   ;;  %v1969_v26 = vld [vmem:[%s2053_s21 + $0x50] sm:$0xff]   ;;  %v1971_v28 = vld [vmem:[%s2053_s21 + $0x58] sm:$0xff]  }
  0x18   : > { %v1968_v25 = vld [vmem:[%s2053_s21 + $0xc8] sm:$0xff]   ;;  %v1970_v27 = vld [vmem:[%s2053_s21 + $0xd0] sm:$0xff]   ;;  %v1972_v29 = vld [vmem:[%s2053_s21 + $0xd8] sm:$0xff]  }
  0x19   : > { %v1973_v30 = vld [vmem:[%s2053_s21 + $0x60] sm:$0xff]   ;;  %v1975_v32 = vld [vmem:[%s2053_s21 + $0x68] sm:$0xff]   ;;  %v1977_v34 = vld [vmem:[%s2053_s21 + $0x70] sm:$0xff]  }
  0x1a   : > { %v1974_v31 = vld [vmem:[%s2053_s21 + $0xe0] sm:$0xff]   ;;  %v1976_v33 = vld [vmem:[%s2053_s21 + $0xe8] sm:$0xff]   ;;  %v1978_v35 = vld [vmem:[%s2053_s21 + $0xf0] sm:$0xff]  }
  0x1b   : > { %1859 = vmatmul.mubr.msk.bf16.gmra.mrb[4].mxu0 %vm424_vm2, %v1955_v12  ;;  %v1979_v36 = vld [vmem:[%s2053_s21 + $0x78] sm:$0xff]  }
  0x1c   : > { %1891 = vmatmul.mubr.msk.bf16.gmra.mrb[4].mxu1 %vm424_vm2, %v1956_v13  ;;  %1862 = vmatprep.mubr.msk.bf16.mxu0 %vm424_vm2, %v1957_v14  ;;  %v1980_v37 = vld [vmem:[%s2053_s21 + $0xf8] sm:$0xff]  }
  0x1d   : > { %1894 = vmatprep.mubr.msk.bf16.mxu1 %vm424_vm2, %v1958_v15 }
  0x23   : > { %1863 = vmatmul.mubr.msk.bf16.gmra.mrb[8].mxu0 %vm424_vm2, %v1959_v16 }
  0x24   : > { %1895 = vmatmul.mubr.msk.bf16.gmra.mrb[8].mxu1 %vm424_vm2, %v1960_v17  ;;  %1866 = vmatprep.mubr.msk.bf16.mxu0 %vm424_vm2, %v1961_v18 }
  0x25   : > { %1898 = vmatprep.mubr.msk.bf16.mxu1 %vm424_vm2, %v1962_v19 }
  0x2b   : > { %1867 = vmatmul.mubr.msk.bf16.gmra.mrb[12].mxu0 %vm424_vm2, %v1963_v20 }
  0x2c   : > { %1899 = vmatmul.mubr.msk.bf16.gmra.mrb[12].mxu1 %vm424_vm2, %v1964_v21  ;;  %1870 = vmatprep.mubr.msk.bf16.mxu0 %vm424_vm2, %v1965_v22 }
  0x2d   : > { %1902 = vmatprep.mubr.msk.bf16.mxu1 %vm424_vm2, %v1966_v23 }
  0x33   : > { %1871 = vmatmul.mubr.msk.bf16.gmra.mrb[16].mxu0 %vm424_vm2, %v1967_v24 }
  0x34   : > { %1903 = vmatmul.mubr.msk.bf16.gmra.mrb[16].mxu1 %vm424_vm2, %v1968_v25  ;;  %1874 = vmatprep.mubr.msk.bf16.mxu0 %vm424_vm2, %v1969_v26 }
  0x35   : > { %1906 = vmatprep.mubr.msk.bf16.mxu1 %vm424_vm2, %v1970_v27 }
  0x3b   : > { %1875 = vmatmul.mubr.msk.bf16.gmra.mrb[20].mxu0 %vm424_vm2, %v1971_v28 }
  0x3c   : > { %1907 = vmatmul.mubr.msk.bf16.gmra.mrb[20].mxu1 %vm424_vm2, %v1972_v29  ;;  %1878 = vmatprep.mubr.msk.bf16.mxu0 %vm424_vm2, %v1973_v30 }
  0x3d   : > { %1910 = vmatprep.mubr.msk.bf16.mxu1 %vm424_vm2, %v1974_v31 }
  0x43   : > { %1879 = vmatmul.mubr.msk.bf16.gmra.mrb[24].mxu0 %vm424_vm2, %v1975_v32 }
  0x44   : > { %1911 = vmatmul.mubr.msk.bf16.gmra.mrb[24].mxu1 %vm424_vm2, %v1976_v33  ;;  %1882 = vmatprep.mubr.msk.bf16.mxu0 %vm424_vm2, %v1977_v34 }
  0x45   : > { %1914 = vmatprep.mubr.msk.bf16.mxu1 %vm424_vm2, %v1978_v35 }
  0x4b   : > { %1883 = vmatmul.mubr.msk.bf16.gmra.mrb[28].mxu0 %vm424_vm2, %v1979_v36 }
  0x4c   : > { %1915 = vmatmul.mubr.msk.bf16.gmra.mrb[28].mxu1 %vm424_vm2, %v1980_v37 }
  0xe6   : > { %v1856_v38 = vpop.f32.mrb[0].mxu0 }
  0xe7   : > { %vm819_vm3 = vcmp.ge.f32.partialorder %v1856_v38, 0.0  ;;  %v883_v39 = vmul.f32 0.2, %v1856_v38  ;;  %v1888_v40 = vpop.f32.mrb[0].mxu1  ;;  %v562_v41 = vpop.f32.mrb[1].mxu0 }
  0xe8   : > { %v915_v42 = vmul.f32 0.2, %v1888_v40  ;;  %vm851_vm4 = vcmp.ge.f32.partialorder %v1888_v40, 0.0  ;;  %vm817_vm5 = vcmp.ge.f32.partialorder %v562_v41, 0.0  ;;  %v690_v43 = vpop.f32.mrb[1].mxu1  ;;  %v1857_v44 = vpop.f32.mrb[2].mxu0 }
  0xe9   : > { %v947_v45 = vsel %vm819_vm3, %v1856_v38, %v883_v39  ;;  %v881_v46 = vmul.f32 0.2, %v562_v41  ;;  %v913_v47 = vmul.f32 0.2, %v690_v43  ;;  %v1889_v48 = vpop.f32.mrb[2].mxu1  ;;  %v565_v49 = vpop.f32.mrb[3].mxu0 }
  0xea   : > { %vm820_vm6 = vcmp.ge.f32.partialorder %v1857_v44, 0.0  ;;  %v884_v50 = vmul.f32 0.2, %v1857_v44  ;;  %vm852_vm7 = vcmp.ge.f32.partialorder %v1889_v48, 0.0  ;;  %v916_v51 = vmul.f32 0.2, %v1889_v48 }
  0xeb   : > { %v979_v52 = vsel %vm851_vm4, %v1888_v40, %v915_v42  ;;  %vm849_vm8 = vcmp.ge.f32.partialorder %v690_v43, 0.0  ;;  %vm818_vm9 = vcmp.ge.f32.partialorder %v565_v49, 0.0  ;;  %v882_v53 = vmul.f32 0.2, %v565_v49  ;;  %v693_v54 = vpop.f32.mrb[3].mxu1 }
  0xec   : > { %v948_v55 = vsel %vm820_vm6, %v1857_v44, %v884_v50  ;;  %v980_v56 = vsel %vm852_vm7, %v1889_v48, %v916_v51  ;;  %vm850_vm10 = vcmp.ge.f32.partialorder %v693_v54, 0.0  ;;  %v914_v57 = vmul.f32 0.2, %v693_v54 }
  0xed   : > { %v945_v58 = vsel %vm817_vm5, %v562_v41, %v881_v46  ;;  %v1633_v59 = vpack.c.bf16 %v948_v55, %v947_v45  ;;  %v1713_v60 = vpack.c.bf16 %v980_v56, %v979_v52  ;;  %v946_v61 = vsel %vm818_vm9, %v565_v49, %v882_v53 }
  0xee   : > { %v1860_v62 = vpop.f32.mrb[4].mxu0  ;;  %v977_v63 = vsel %vm849_vm8, %v690_v43, %v913_v47  ;;  %v1628_v0 = vpack.c.bf16 %v946_v61, %v945_v58  ;;  %v978_v1 = vsel %vm850_vm10, %v693_v54, %v914_v57 }
  0xef   : > { %v887_v2 = vmul.f32 0.2, %v1860_v62  ;;  %v1892_v3 = vpop.f32.mrb[4].mxu1  ;;  %v578_v4 = vpop.f32.mrb[5].mxu0  ;;  %1785 = vst [vmem:[%s2124_s24 + $0x8] sm:$0xff] %v1633_v59   ;;  %1801 = vst [vmem:[%s2124_s24 + $0x88] sm:$0xff] %v1713_v60   ;;  %v1708_v5 = vpack.c.bf16 %v978_v1, %v977_v63 }
  0xf0   : > { %vm823_vm11 = vcmp.ge.f32.partialorder %v1860_v62, 0.0  ;;  %vm855_vm12 = vcmp.ge.f32.partialorder %v1892_v3, 0.0  ;;  %v919_v6 = vmul.f32 0.2, %v1892_v3  ;;  %v706_v7 = vpop.f32.mrb[5].mxu1  ;;  %v1861_v8 = vpop.f32.mrb[6].mxu0  ;;  %1629 = vst [vmem:[%s2124_s24] sm:$0xff] %v1628_v0  }
  0xf1   : > { %vm821_vm13 = vcmp.ge.f32.partialorder %v578_v4, 0.0  ;;  %v885_v9 = vmul.f32 0.2, %v578_v4  ;;  %v917_v10 = vmul.f32 0.2, %v706_v7  ;;  %v1893_v11 = vpop.f32.mrb[6].mxu1  ;;  %v951_v15 = vsel %vm823_vm11, %v1860_v62, %v887_v2 }
  0xf2   : > { %1800 = vst [vmem:[%s2124_s24 + $0x80] sm:$0xff] %v1708_v5   ;;  %vm824_vm14 = vcmp.ge.f32.partialorder %v1861_v8, 0.0  ;;  %v888_v12 = vmul.f32 0.2, %v1861_v8  ;;  %vm856_vm15 = vcmp.ge.f32.partialorder %v1893_v11, 0.0  ;;  %v581_v13 = vpop.f32.mrb[7].mxu0  ;;  %v983_v20 = vsel %vm855_vm12, %v1892_v3, %v919_v6 }
  0xf3   : > { %v709_v14 = vpop.f32.mrb[7].mxu1  ;;  %vm853_vm0 = vcmp.ge.f32.partialorder %v706_v7, 0.0  ;;  %v920_v16 = vmul.f32 0.2, %v1893_v11  ;;  %vm822_vm1 = vcmp.ge.f32.partialorder %v581_v13, 0.0  ;;  %v949_v21 = vsel %vm821_vm13, %v578_v4, %v885_v9 }
  0xf4   : > { %v952_v17 = vsel %vm824_vm14, %v1861_v8, %v888_v12  ;;  %v886_v18 = vmul.f32 0.2, %v581_v13  ;;  %vm854_vm2 = vcmp.ge.f32.partialorder %v709_v14, 0.0  ;;  %v918_v19 = vmul.f32 0.2, %v709_v14 }
  0xf5   : > { %v1643_v22 = vpack.c.bf16 %v952_v17, %v951_v15  ;;  %v984_v23 = vsel %vm856_vm15, %v1893_v11, %v920_v16  ;;  %v981_v24 = vsel %vm853_vm0, %v706_v7, %v917_v10 }
  0xf6   : > { %v1723_v25 = vpack.c.bf16 %v984_v23, %v983_v20  ;;  %v950_v26 = vsel %vm822_vm1, %v581_v13, %v886_v18  ;;  %v982_v27 = vsel %vm854_vm2, %v709_v14, %v918_v19  ;;  %v1864_v28 = vpop.f32.mrb[8].mxu0 }
  0xf7   : > { %1787 = vst [vmem:[%s2124_s24 + $0x18] sm:$0xff] %v1643_v22   ;;  %v1638_v29 = vpack.c.bf16 %v950_v26, %v949_v21  ;;  %v1718_v30 = vpack.c.bf16 %v982_v27, %v981_v24  ;;  %vm827_vm3 = vcmp.ge.f32.partialorder %v1864_v28, 0.0  ;;  %v891_v31 = vmul.f32 0.2, %v1864_v28  ;;  %v1896_v32 = vpop.f32.mrb[8].mxu1  ;;  %v594_v33 = vpop.f32.mrb[9].mxu0 }
  0xf8   : > { %1803 = vst [vmem:[%s2124_s24 + $0x98] sm:$0xff] %v1723_v25   ;;  %v923_v34 = vmul.f32 0.2, %v1896_v32  ;;  %vm859_vm4 = vcmp.ge.f32.partialorder %v1896_v32, 0.0  ;;  %vm825_vm5 = vcmp.ge.f32.partialorder %v594_v33, 0.0  ;;  %v722_v35 = vpop.f32.mrb[9].mxu1 }
  0xf9   : > { %1786 = vst [vmem:[%s2124_s24 + $0x10] sm:$0xff] %v1638_v29   ;;  %1802 = vst [vmem:[%s2124_s24 + $0x90] sm:$0xff] %v1718_v30   ;;  %v1865_v36 = vpop.f32.mrb[10].mxu0  ;;  %v955_v37 = vsel %vm827_vm3, %v1864_v28, %v891_v31  ;;  %v889_v38 = vmul.f32 0.2, %v594_v33  ;;  %v1897_v40 = vpop.f32.mrb[10].mxu1 }
  0xfa   : > { %v921_v39 = vmul.f32 0.2, %v722_v35  ;;  %v597_v41 = vpop.f32.mrb[11].mxu0  ;;  %vm828_vm6 = vcmp.ge.f32.partialorder %v1865_v36, 0.0  ;;  %v892_v42 = vmul.f32 0.2, %v1865_v36  ;;  %v987_v44 = vsel %vm859_vm4, %v1896_v32, %v923_v34 }
  0xfb   : > { %vm860_vm7 = vcmp.ge.f32.partialorder %v1897_v40, 0.0  ;;  %v924_v43 = vmul.f32 0.2, %v1897_v40  ;;  %vm857_vm8 = vcmp.ge.f32.partialorder %v722_v35, 0.0  ;;  %vm826_vm9 = vcmp.ge.f32.partialorder %v597_v41, 0.0  ;;  %v725_v46 = vpop.f32.mrb[11].mxu1 }
  0xfc   : > { %v890_v45 = vmul.f32 0.2, %v597_v41  ;;  %v956_v47 = vsel %vm828_vm6, %v1865_v36, %v892_v42  ;;  %vm858_vm10 = vcmp.ge.f32.partialorder %v725_v46, 0.0  ;;  %v922_v49 = vmul.f32 0.2, %v725_v46 }
  0xfd   : > { %v988_v48 = vsel %vm860_vm7, %v1897_v40, %v924_v43  ;;  %v953_v50 = vsel %vm825_vm5, %v594_v33, %v889_v38  ;;  %v1653_v51 = vpack.c.bf16 %v956_v47, %v955_v37  ;;  %v985_v55 = vsel %vm857_vm8, %v722_v35, %v921_v39 }
  0xfe   : > { %v1733_v52 = vpack.c.bf16 %v988_v48, %v987_v44  ;;  %v954_v53 = vsel %vm826_vm9, %v597_v41, %v890_v45  ;;  %v1868_v54 = vpop.f32.mrb[12].mxu0  ;;  %v986_v57 = vsel %vm858_vm10, %v725_v46, %v922_v49 }
  0xff   : > { %v1648_v56 = vpack.c.bf16 %v954_v53, %v953_v50  ;;  %v895_v58 = vmul.f32 0.2, %v1868_v54  ;;  %v1900_v59 = vpop.f32.mrb[12].mxu1  ;;  %v610_v60 = vpop.f32.mrb[13].mxu0  ;;  %1789 = vst [vmem:[%s2124_s24 + $0x28] sm:$0xff] %v1653_v51   ;;  %v1728_v61 = vpack.c.bf16 %v986_v57, %v985_v55  ;;  %vm831_vm11 = vcmp.ge.f32.partialorder %v1868_v54, 0.0 }
 0x100   : > { %1805 = vst [vmem:[%s2124_s24 + $0xa8] sm:$0xff] %v1733_v52   ;;  %vm863_vm12 = vcmp.ge.f32.partialorder %v1900_v59, 0.0  ;;  %v927_v62 = vmul.f32 0.2, %v1900_v59  ;;  %v738_v63 = vpop.f32.mrb[13].mxu1  ;;  %v1869_v0 = vpop.f32.mrb[14].mxu0 }
 0x101   : > { %1788 = vst [vmem:[%s2124_s24 + $0x20] sm:$0xff] %v1648_v56   ;;  %vm829_vm13 = vcmp.ge.f32.partialorder %v610_v60, 0.0  ;;  %v893_v1 = vmul.f32 0.2, %v610_v60  ;;  %v925_v2 = vmul.f32 0.2, %v738_v63  ;;  %v959_v7 = vsel %vm831_vm11, %v1868_v54, %v895_v58 }
 0x102   : > { %v1901_v3 = vpop.f32.mrb[14].mxu1  ;;  %1804 = vst [vmem:[%s2124_s24 + $0xa0] sm:$0xff] %v1728_v61   ;;  %vm832_vm14 = vcmp.ge.f32.partialorder %v1869_v0, 0.0  ;;  %v896_v4 = vmul.f32 0.2, %v1869_v0  ;;  %v613_v5 = vpop.f32.mrb[15].mxu0  ;;  %v991_v12 = vsel %vm863_vm12, %v1900_v59, %v927_v62 }
 0x103   : > { %vm864_vm15 = vcmp.ge.f32.partialorder %v1901_v3, 0.0  ;;  %v741_v6 = vpop.f32.mrb[15].mxu1  ;;  %vm861_vm0 = vcmp.ge.f32.partialorder %v738_v63, 0.0  ;;  %v928_v8 = vmul.f32 0.2, %v1901_v3  ;;  %vm830_vm1 = vcmp.ge.f32.partialorder %v613_v5, 0.0 }
 0x104   : > { %v960_v9 = vsel %vm832_vm14, %v1869_v0, %v896_v4  ;;  %v894_v10 = vmul.f32 0.2, %v613_v5  ;;  %vm862_vm2 = vcmp.ge.f32.partialorder %v741_v6, 0.0  ;;  %v926_v11 = vmul.f32 0.2, %v741_v6 }
 0x105   : > { %v957_v13 = vsel %vm829_vm13, %v610_v60, %v893_v1  ;;  %v1663_v14 = vpack.c.bf16 %v960_v9, %v959_v7  ;;  %v992_v15 = vsel %vm864_vm15, %v1901_v3, %v928_v8  ;;  %v989_v16 = vsel %vm861_vm0, %v738_v63, %v925_v2 }
 0x106   : > { %v1743_v17 = vpack.c.bf16 %v992_v15, %v991_v12  ;;  %v958_v18 = vsel %vm830_vm1, %v613_v5, %v894_v10  ;;  %v990_v19 = vsel %vm862_vm2, %v741_v6, %v926_v11  ;;  %v1872_v20 = vpop.f32.mrb[16].mxu0 }
 0x107   : > { %1791 = vst [vmem:[%s2124_s24 + $0x38] sm:$0xff] %v1663_v14   ;;  %v1658_v21 = vpack.c.bf16 %v958_v18, %v957_v13  ;;  %v1738_v22 = vpack.c.bf16 %v990_v19, %v989_v16  ;;  %vm835_vm3 = vcmp.ge.f32.partialorder %v1872_v20, 0.0  ;;  %v899_v23 = vmul.f32 0.2, %v1872_v20  ;;  %v1904_v24 = vpop.f32.mrb[16].mxu1  ;;  %v626_v25 = vpop.f32.mrb[17].mxu0 }
 0x108   : > { %1807 = vst [vmem:[%s2124_s24 + $0xb8] sm:$0xff] %v1743_v17   ;;  %v931_v26 = vmul.f32 0.2, %v1904_v24  ;;  %vm867_vm4 = vcmp.ge.f32.partialorder %v1904_v24, 0.0  ;;  %vm833_vm5 = vcmp.ge.f32.partialorder %v626_v25, 0.0  ;;  %v754_v27 = vpop.f32.mrb[17].mxu1 }
 0x109   : > { %1790 = vst [vmem:[%s2124_s24 + $0x30] sm:$0xff] %v1658_v21   ;;  %1806 = vst [vmem:[%s2124_s24 + $0xb0] sm:$0xff] %v1738_v22   ;;  %v1873_v28 = vpop.f32.mrb[18].mxu0  ;;  %v963_v29 = vsel %vm835_vm3, %v1872_v20, %v899_v23  ;;  %v897_v30 = vmul.f32 0.2, %v626_v25  ;;  %v1905_v32 = vpop.f32.mrb[18].mxu1 }
 0x10a   : > { %v929_v31 = vmul.f32 0.2, %v754_v27  ;;  %v629_v33 = vpop.f32.mrb[19].mxu0  ;;  %vm836_vm6 = vcmp.ge.f32.partialorder %v1873_v28, 0.0  ;;  %v900_v34 = vmul.f32 0.2, %v1873_v28  ;;  %v995_v36 = vsel %vm867_vm4, %v1904_v24, %v931_v26 }
 0x10b   : > { %vm868_vm7 = vcmp.ge.f32.partialorder %v1905_v32, 0.0  ;;  %v932_v35 = vmul.f32 0.2, %v1905_v32  ;;  %vm865_vm8 = vcmp.ge.f32.partialorder %v754_v27, 0.0  ;;  %vm834_vm9 = vcmp.ge.f32.partialorder %v629_v33, 0.0  ;;  %v757_v38 = vpop.f32.mrb[19].mxu1 }
 0x10c   : > { %v898_v37 = vmul.f32 0.2, %v629_v33  ;;  %v964_v39 = vsel %vm836_vm6, %v1873_v28, %v900_v34  ;;  %vm866_vm10 = vcmp.ge.f32.partialorder %v757_v38, 0.0  ;;  %v930_v41 = vmul.f32 0.2, %v757_v38 }
 0x10d   : > { %v996_v40 = vsel %vm868_vm7, %v1905_v32, %v932_v35  ;;  %v961_v42 = vsel %vm833_vm5, %v626_v25, %v897_v30  ;;  %v1673_v43 = vpack.c.bf16 %v964_v39, %v963_v29  ;;  %v993_v47 = vsel %vm865_vm8, %v754_v27, %v929_v31 }
 0x10e   : > { %v1753_v44 = vpack.c.bf16 %v996_v40, %v995_v36  ;;  %v962_v45 = vsel %vm834_vm9, %v629_v33, %v898_v37  ;;  %v1876_v46 = vpop.f32.mrb[20].mxu0  ;;  %v994_v49 = vsel %vm866_vm10, %v757_v38, %v930_v41 }
 0x10f   : > { %v1668_v48 = vpack.c.bf16 %v962_v45, %v961_v42  ;;  %v903_v50 = vmul.f32 0.2, %v1876_v46  ;;  %v1908_v51 = vpop.f32.mrb[20].mxu1  ;;  %v642_v52 = vpop.f32.mrb[21].mxu0  ;;  %1793 = vst [vmem:[%s2124_s24 + $0x48] sm:$0xff] %v1673_v43   ;;  %v1748_v53 = vpack.c.bf16 %v994_v49, %v993_v47  ;;  %vm839_vm11 = vcmp.ge.f32.partialorder %v1876_v46, 0.0 }
 0x110   : > { %1809 = vst [vmem:[%s2124_s24 + $0xc8] sm:$0xff] %v1753_v44   ;;  %vm871_vm12 = vcmp.ge.f32.partialorder %v1908_v51, 0.0  ;;  %v935_v54 = vmul.f32 0.2, %v1908_v51  ;;  %v770_v55 = vpop.f32.mrb[21].mxu1  ;;  %v1877_v56 = vpop.f32.mrb[22].mxu0 }
 0x111   : > { %1792 = vst [vmem:[%s2124_s24 + $0x40] sm:$0xff] %v1668_v48   ;;  %vm837_vm13 = vcmp.ge.f32.partialorder %v642_v52, 0.0  ;;  %v901_v57 = vmul.f32 0.2, %v642_v52  ;;  %v933_v58 = vmul.f32 0.2, %v770_v55  ;;  %v967_v63 = vsel %vm839_vm11, %v1876_v46, %v903_v50 }
 0x112   : > { %v1909_v59 = vpop.f32.mrb[22].mxu1  ;;  %1808 = vst [vmem:[%s2124_s24 + $0xc0] sm:$0xff] %v1748_v53   ;;  %vm840_vm14 = vcmp.ge.f32.partialorder %v1877_v56, 0.0  ;;  %v904_v60 = vmul.f32 0.2, %v1877_v56  ;;  %v645_v61 = vpop.f32.mrb[23].mxu0  ;;  %v999_v4 = vsel %vm871_vm12, %v1908_v51, %v935_v54 }
 0x113   : > { %vm872_vm15 = vcmp.ge.f32.partialorder %v1909_v59, 0.0  ;;  %v773_v62 = vpop.f32.mrb[23].mxu1  ;;  %vm869_vm0 = vcmp.ge.f32.partialorder %v770_v55, 0.0  ;;  %v936_v0 = vmul.f32 0.2, %v1909_v59  ;;  %vm838_vm1 = vcmp.ge.f32.partialorder %v645_v61, 0.0 }
 0x114   : > { %v968_v1 = vsel %vm840_vm14, %v1877_v56, %v904_v60  ;;  %v902_v2 = vmul.f32 0.2, %v645_v61  ;;  %vm870_vm2 = vcmp.ge.f32.partialorder %v773_v62, 0.0  ;;  %v934_v3 = vmul.f32 0.2, %v773_v62 }
 0x115   : > { %v965_v5 = vsel %vm837_vm13, %v642_v52, %v901_v57  ;;  %v1683_v6 = vpack.c.bf16 %v968_v1, %v967_v63  ;;  %v1000_v7 = vsel %vm872_vm15, %v1909_v59, %v936_v0  ;;  %v997_v8 = vsel %vm869_vm0, %v770_v55, %v933_v58 }
 0x116   : > { %v1763_v9 = vpack.c.bf16 %v1000_v7, %v999_v4  ;;  %v966_v10 = vsel %vm838_vm1, %v645_v61, %v902_v2  ;;  %v998_v11 = vsel %vm870_vm2, %v773_v62, %v934_v3  ;;  %v1880_v12 = vpop.f32.mrb[24].mxu0 }
 0x117   : > { %1795 = vst [vmem:[%s2124_s24 + $0x58] sm:$0xff] %v1683_v6   ;;  %v1678_v13 = vpack.c.bf16 %v966_v10, %v965_v5  ;;  %v1758_v14 = vpack.c.bf16 %v998_v11, %v997_v8  ;;  %vm843_vm3 = vcmp.ge.f32.partialorder %v1880_v12, 0.0  ;;  %v907_v15 = vmul.f32 0.2, %v1880_v12  ;;  %v1912_v16 = vpop.f32.mrb[24].mxu1  ;;  %v658_v17 = vpop.f32.mrb[25].mxu0 }
 0x118   : > { %1811 = vst [vmem:[%s2124_s24 + $0xd8] sm:$0xff] %v1763_v9   ;;  %v939_v18 = vmul.f32 0.2, %v1912_v16  ;;  %vm875_vm4 = vcmp.ge.f32.partialorder %v1912_v16, 0.0  ;;  %vm841_vm5 = vcmp.ge.f32.partialorder %v658_v17, 0.0  ;;  %v786_v19 = vpop.f32.mrb[25].mxu1 }
 0x119   : > { %1794 = vst [vmem:[%s2124_s24 + $0x50] sm:$0xff] %v1678_v13   ;;  %1810 = vst [vmem:[%s2124_s24 + $0xd0] sm:$0xff] %v1758_v14   ;;  %v1881_v20 = vpop.f32.mrb[26].mxu0  ;;  %v971_v21 = vsel %vm843_vm3, %v1880_v12, %v907_v15  ;;  %v905_v22 = vmul.f32 0.2, %v658_v17  ;;  %v1913_v24 = vpop.f32.mrb[26].mxu1 }
 0x11a   : > { %v937_v23 = vmul.f32 0.2, %v786_v19  ;;  %v661_v25 = vpop.f32.mrb[27].mxu0  ;;  %vm844_vm6 = vcmp.ge.f32.partialorder %v1881_v20, 0.0  ;;  %v908_v26 = vmul.f32 0.2, %v1881_v20  ;;  %v1003_v28 = vsel %vm875_vm4, %v1912_v16, %v939_v18 }
 0x11b   : > { %vm876_vm7 = vcmp.ge.f32.partialorder %v1913_v24, 0.0  ;;  %v940_v27 = vmul.f32 0.2, %v1913_v24  ;;  %vm873_vm8 = vcmp.ge.f32.partialorder %v786_v19, 0.0  ;;  %vm842_vm9 = vcmp.ge.f32.partialorder %v661_v25, 0.0  ;;  %v789_v30 = vpop.f32.mrb[27].mxu1 }
 0x11c   : > { %v906_v29 = vmul.f32 0.2, %v661_v25  ;;  %v972_v31 = vsel %vm844_vm6, %v1881_v20, %v908_v26  ;;  %vm874_vm10 = vcmp.ge.f32.partialorder %v789_v30, 0.0  ;;  %v938_v33 = vmul.f32 0.2, %v789_v30 }
 0x11d   : > { %v1004_v32 = vsel %vm876_vm7, %v1913_v24, %v940_v27  ;;  %v969_v34 = vsel %vm841_vm5, %v658_v17, %v905_v22  ;;  %v1693_v35 = vpack.c.bf16 %v972_v31, %v971_v21  ;;  %v1001_v39 = vsel %vm873_vm8, %v786_v19, %v937_v23 }
 0x11e   : > { %v1773_v36 = vpack.c.bf16 %v1004_v32, %v1003_v28  ;;  %v970_v37 = vsel %vm842_vm9, %v661_v25, %v906_v29  ;;  %v1884_v38 = vpop.f32.mrb[28].mxu0  ;;  %v1002_v41 = vsel %vm874_vm10, %v789_v30, %v938_v33 }
 0x11f   : > { %v1688_v40 = vpack.c.bf16 %v970_v37, %v969_v34  ;;  %v911_v42 = vmul.f32 0.2, %v1884_v38  ;;  %v1916_v43 = vpop.f32.mrb[28].mxu1  ;;  %v674_v44 = vpop.f32.mrb[29].mxu0  ;;  %1797 = vst [vmem:[%s2124_s24 + $0x68] sm:$0xff] %v1693_v35   ;;  %v1768_v45 = vpack.c.bf16 %v1002_v41, %v1001_v39  ;;  %vm847_vm11 = vcmp.ge.f32.partialorder %v1884_v38, 0.0 }
 0x120   : > { %1813 = vst [vmem:[%s2124_s24 + $0xe8] sm:$0xff] %v1773_v36   ;;  %vm879_vm12 = vcmp.ge.f32.partialorder %v1916_v43, 0.0  ;;  %v943_v46 = vmul.f32 0.2, %v1916_v43  ;;  %v802_v47 = vpop.f32.mrb[29].mxu1  ;;  %v1885_v48 = vpop.f32.mrb[30].mxu0 }
 0x121   : > { %1796 = vst [vmem:[%s2124_s24 + $0x60] sm:$0xff] %v1688_v40   ;;  %vm845_vm13 = vcmp.ge.f32.partialorder %v674_v44, 0.0  ;;  %v909_v49 = vmul.f32 0.2, %v674_v44  ;;  %v941_v50 = vmul.f32 0.2, %v802_v47  ;;  %v975_v55 = vsel %vm847_vm11, %v1884_v38, %v911_v42 }
 0x122   : > { %v1917_v51 = vpop.f32.mrb[30].mxu1  ;;  %1812 = vst [vmem:[%s2124_s24 + $0xe0] sm:$0xff] %v1768_v45   ;;  %vm848_vm14 = vcmp.ge.f32.partialorder %v1885_v48, 0.0  ;;  %v912_v52 = vmul.f32 0.2, %v1885_v48  ;;  %v677_v53 = vpop.f32.mrb[31].mxu0  ;;  %v1007_v60 = vsel %vm879_vm12, %v1916_v43, %v943_v46 }
 0x123   : > { %vm880_vm15 = vcmp.ge.f32.partialorder %v1917_v51, 0.0  ;;  %v805_v54 = vpop.f32.mrb[31].mxu1  ;;  %vm877_vm0 = vcmp.ge.f32.partialorder %v802_v47, 0.0  ;;  %v944_v56 = vmul.f32 0.2, %v1917_v51  ;;  %vm846_vm1 = vcmp.ge.f32.partialorder %v677_v53, 0.0 }
 0x124   : > { %v976_v57 = vsel %vm848_vm14, %v1885_v48, %v912_v52  ;;  %v910_v58 = vmul.f32 0.2, %v677_v53  ;;  %vm878_vm2 = vcmp.ge.f32.partialorder %v805_v54, 0.0  ;;  %v942_v59 = vmul.f32 0.2, %v805_v54 }
 0x125   : > { %v973_v61 = vsel %vm845_vm13, %v674_v44, %v909_v49  ;;  %v1703_v62 = vpack.c.bf16 %v976_v57, %v975_v55  ;;  %v1008_v63 = vsel %vm880_vm15, %v1917_v51, %v944_v56  ;;  %v1005_v0 = vsel %vm877_vm0, %v802_v47, %v941_v50 }
 0x126   : > { %v1783_v1 = vpack.c.bf16 %v1008_v63, %v1007_v60  ;;  %v974_v2 = vsel %vm846_vm1, %v677_v53, %v910_v58  ;;  %v1006_v3 = vsel %vm878_vm2, %v805_v54, %v942_v59 }
 0x127   : > { %1799 = vst [vmem:[%s2124_s24 + $0x78] sm:$0xff] %v1703_v62   ;;  %v1698_v4 = vpack.c.bf16 %v974_v2, %v973_v61  ;;  %v1778_v5 = vpack.c.bf16 %v1006_v3, %v1005_v0 }
 0x128   : > { %1815 = vst [vmem:[%s2124_s24 + $0xf8] sm:$0xff] %v1783_v1  }
 0x129   : > { %1798 = vst [vmem:[%s2124_s24 + $0x70] sm:$0xff] %v1698_v4   ;;  %1814 = vst [vmem:[%s2124_s24 + $0xf0] sm:$0xff] %v1778_v5  }
 0x12a PF: > { %s12_s11 = sadd.s32 1, %s2003_s11   ;;  %s2186_s9 = smov %s1999_s10 }
 0x12b   : > { %p9_p5 = scmp.ge.s32.totalorder %s12_s11, 6   ;;  %s2187_s10 = smov %s2189_s12 }
 0x12d   :  { %11 = sbr.rel (!%p9_p5) target bundleno = 2 (0x2), region = 61 }

// kernel: forward.10
= control target key start
LH: loop header
LB: loop body
LE: loop exit
PB: predicated region body
PF: predicated region fallthrough
CT: control target
= control target key end

     0   :  { %s8957_s1 = inlined_call_operand.vmem [shape: bf16[1152,256], index: 1, kind: input, shape index: {}]   ;;  %s8958_s0 = inlined_call_operand.vmem [shape: bf16[512,1152], index: 0, kind: input, shape index: {}]   ;;  %s8959_s2 = inlined_call_operand.vmem [shape: bf16[512,256], index: 2, kind: output, shape index: {0}]   ;;  %s8960_s3 = inlined_call_operand.vmem [shape: f32[8,256], index: 3, kind: output, shape index: {1}]  }
   0x1   :  { %v6450_v0 = vld [vmem:[%s8957_s1 + $0x4] ss:$8 sps:$4 sm:$0xff]   ;;  %v6454_v2 = vld [vmem:[%s8957_s1] ss:$8 sps:$4 sm:$0xff]   ;;  %v6456_v4 = vld [vmem:[%s8957_s1 + $0x14] ss:$8 sps:$4 sm:$0xff]  }
   0x2   :  { %v6452_v1 = vld [vmem:[%s8957_s1 + $0x204] ss:$8 sps:$4 sm:$0xff]   ;;  %2670 = vmatprep.subr.bf16.mxu1 %v6450_v0  ;;  %v6455_v3 = vld [vmem:[%s8957_s1 + $0x200] ss:$8 sps:$4 sm:$0xff]   ;;  %v6458_v5 = vld [vmem:[%s8957_s1 + $0x214] ss:$8 sps:$4 sm:$0xff]  }
   0x3   :  { %3376 = vmatprep.subr.bf16.mxu0 %v6452_v1  ;;  %2671 = vmatpush1.bf16.msra.mxu1 %v6454_v2  ;;  %v6460_v6 = vld [vmem:[%s8957_s1 + $0x10] ss:$8 sps:$4 sm:$0xff]   ;;  %v6462_v8 = vld [vmem:[%s8957_s1 + $0x24] ss:$8 sps:$4 sm:$0xff]   ;;  %v6466_v10 = vld [vmem:[%s8957_s1 + $0x20] ss:$8 sps:$4 sm:$0xff]  }
   0x4   :  { %3377 = vmatpush1.bf16.msra.mxu0 %v6455_v3  ;;  %2672 = vmatprep.subr.bf16.mxu1 %v6456_v4  ;;  %v6461_v7 = vld [vmem:[%s8957_s1 + $0x210] ss:$8 sps:$4 sm:$0xff]   ;;  %v6464_v9 = vld [vmem:[%s8957_s1 + $0x224] ss:$8 sps:$4 sm:$0xff]   ;;  %v6467_v11 = vld [vmem:[%s8957_s1 + $0x220] ss:$8 sps:$4 sm:$0xff]  }
   0x5   :  { %3378 = vmatprep.subr.bf16.mxu0 %v6458_v5  ;;  %v6468_v12 = vld [vmem:[%s8957_s1 + $0x34] ss:$8 sps:$4 sm:$0xff]   ;;  %v6472_v14 = vld [vmem:[%s8957_s1 + $0x30] ss:$8 sps:$4 sm:$0xff]   ;;  %v6474_v16 = vld [vmem:[%s8957_s1 + $0x44] ss:$8 sps:$4 sm:$0xff]  }
   0x6   :  { %v6470_v13 = vld [vmem:[%s8957_s1 + $0x234] ss:$8 sps:$4 sm:$0xff]   ;;  %v6473_v15 = vld [vmem:[%s8957_s1 + $0x230] ss:$8 sps:$4 sm:$0xff]   ;;  %v6476_v17 = vld [vmem:[%s8957_s1 + $0x244] ss:$8 sps:$4 sm:$0xff]  }
   0x7   :  { %2673 = vmatpush1.bf16.msra.mxu1 %v6460_v6  ;;  %v6478_v18 = vld [vmem:[%s8957_s1 + $0x40] ss:$8 sps:$4 sm:$0xff]   ;;  %v6480_v20 = vld [vmem:[%s8957_s1 + $0x54] ss:$8 sps:$4 sm:$0xff]   ;;  %v6484_v22 = vld [vmem:[%s8957_s1 + $0x50] ss:$8 sps:$4 sm:$0xff]  }
   0x8   :  { %3379 = vmatpush1.bf16.msra.mxu0 %v6461_v7  ;;  %2674 = vmatprep.subr.bf16.mxu1 %v6462_v8  ;;  %v6479_v19 = vld [vmem:[%s8957_s1 + $0x240] ss:$8 sps:$4 sm:$0xff]   ;;  %v6482_v21 = vld [vmem:[%s8957_s1 + $0x254] ss:$8 sps:$4 sm:$0xff]   ;;  %v6485_v23 = vld [vmem:[%s8957_s1 + $0x250] ss:$8 sps:$4 sm:$0xff]  }
   0x9   :  { %3380 = vmatprep.subr.bf16.mxu0 %v6464_v9  ;;  %v6486_v24 = vld [vmem:[%s8957_s1 + $0x64] ss:$8 sps:$4 sm:$0xff]   ;;  %v6490_v26 = vld [vmem:[%s8957_s1 + $0x60] ss:$8 sps:$4 sm:$0xff]   ;;  %v6492_v28 = vld [vmem:[%s8957_s1 + $0x74] ss:$8 sps:$4 sm:$0xff]  }
   0xa   :  { %v6488_v25 = vld [vmem:[%s8957_s1 + $0x264] ss:$8 sps:$4 sm:$0xff]   ;;  %v6491_v27 = vld [vmem:[%s8957_s1 + $0x260] ss:$8 sps:$4 sm:$0xff]   ;;  %v6494_v29 = vld [vmem:[%s8957_s1 + $0x274] ss:$8 sps:$4 sm:$0xff]  }
   0xb   :  { %2675 = vmatpush1.bf16.msra.mxu1 %v6466_v10  ;;  %v6496_v30 = vld [vmem:[%s8957_s1 + $0x70] ss:$8 sps:$4 sm:$0xff]   ;;  %v6498_v32 = vld [vmem:[%s8957_s1 + $0x84] ss:$8 sps:$4 sm:$0xff]   ;;  %v6502_v34 = vld [vmem:[%s8957_s1 + $0x80] ss:$8 sps:$4 sm:$0xff]  }
   0xc   :  { %3381 = vmatpush1.bf16.msra.mxu0 %v6467_v11  ;;  %2676 = vmatprep.subr.bf16.mxu1 %v6468_v12  ;;  %v6497_v31 = vld [vmem:[%s8957_s1 + $0x270] ss:$8 sps:$4 sm:$0xff]   ;;  %v6500_v33 = vld [vmem:[%s8957_s1 + $0x284] ss:$8 sps:$4 sm:$0xff]   ;;  %v6503_v35 = vld [vmem:[%s8957_s1 + $0x280] ss:$8 sps:$4 sm:$0xff]  }
   0xd   :  { %3382 = vmatprep.subr.bf16.mxu0 %v6470_v13  ;;  %v6504_v36 = vld [vmem:[%s8957_s1 + $0x94] ss:$8 sps:$4 sm:$0xff]   ;;  %v6508_v38 = vld [vmem:[%s8957_s1 + $0x90] ss:$8 sps:$4 sm:$0xff]   ;;  %v6510_v40 = vld [vmem:[%s8957_s1 + $0xa4] ss:$8 sps:$4 sm:$0xff]  }
   0xe   :  { %v6506_v37 = vld [vmem:[%s8957_s1 + $0x294] ss:$8 sps:$4 sm:$0xff]   ;;  %v6509_v39 = vld [vmem:[%s8957_s1 + $0x290] ss:$8 sps:$4 sm:$0xff]   ;;  %v6512_v41 = vld [vmem:[%s8957_s1 + $0x2a4] ss:$8 sps:$4 sm:$0xff]  }
   0xf   :  { %2677 = vmatpush1.bf16.msra.mxu1 %v6472_v14  ;;  %v6514_v42 = vld [vmem:[%s8957_s1 + $0xa0] ss:$8 sps:$4 sm:$0xff]   ;;  %v6516_v44 = vld [vmem:[%s8957_s1 + $0xb4] ss:$8 sps:$4 sm:$0xff]   ;;  %v6520_v46 = vld [vmem:[%s8957_s1 + $0xb0] ss:$8 sps:$4 sm:$0xff]  }
  0x10   :  { %3383 = vmatpush1.bf16.msra.mxu0 %v6473_v15  ;;  %2678 = vmatprep.subr.bf16.mxu1 %v6474_v16  ;;  %v6515_v43 = vld [vmem:[%s8957_s1 + $0x2a0] ss:$8 sps:$4 sm:$0xff]   ;;  %v6518_v45 = vld [vmem:[%s8957_s1 + $0x2b4] ss:$8 sps:$4 sm:$0xff]   ;;  %v6521_v47 = vld [vmem:[%s8957_s1 + $0x2b0] ss:$8 sps:$4 sm:$0xff]  }
  0x11   :  { %3384 = vmatprep.subr.bf16.mxu0 %v6476_v17  ;;  %v6522_v48 = vld [vmem:[%s8957_s1 + $0xc4] ss:$8 sps:$4 sm:$0xff]   ;;  %v6551_v51 = vld [vmem:[%s8958_s0 + $0x14] ss:$36 sps:$4 sm:$0xff]   ;;  %v6526_v52 = vld [vmem:[%s8957_s1 + $0xc0] ss:$8 sps:$4 sm:$0xff]  }
  0x12   :  { %v6548_v49 = vld [vmem:[%s8958_s0 + $0x4] ss:$36 sps:$4 sm:$0xff]   ;;  %3408 = vmatprep.mubr.bf16.mxu0 %v6551_v51  ;;  %v6528_v54 = vld [vmem:[%s8957_s1 + $0xd4] ss:$8 sps:$4 sm:$0xff]   ;;  %v6532_v56 = vld [vmem:[%s8957_s1 + $0xd0] ss:$8 sps:$4 sm:$0xff]  }
  0x13   :  { %2679 = vmatpush1.bf16.msra.mxu1 %v6478_v18  ;;  %v6524_v50 = vld [vmem:[%s8957_s1 + $0x2c4] ss:$8 sps:$4 sm:$0xff]   ;;  %2702 = vmatprep.mubr.bf16.mxu1 %v6548_v49  ;;  %v6527_v53 = vld [vmem:[%s8957_s1 + $0x2c0] ss:$8 sps:$4 sm:$0xff]   ;;  %v6530_v55 = vld [vmem:[%s8957_s1 + $0x2d4] ss:$8 sps:$4 sm:$0xff]  }
  0x14   :  { %3385 = vmatpush1.bf16.msra.mxu0 %v6479_v19  ;;  %2680 = vmatprep.subr.bf16.mxu1 %v6480_v20  ;;  %v6533_v57 = vld [vmem:[%s8957_s1 + $0x2d0] ss:$8 sps:$4 sm:$0xff]   ;;  %v6534_v58 = vld [vmem:[%s8957_s1 + $0xe4] ss:$8 sps:$4 sm:$0xff]   ;;  %v6538_v60 = vld [vmem:[%s8957_s1 + $0xe0] ss:$8 sps:$4 sm:$0xff]  }
  0x15   :  { %3386 = vmatprep.subr.bf16.mxu0 %v6482_v21  ;;  %v6536_v59 = vld [vmem:[%s8957_s1 + $0x2e4] ss:$8 sps:$4 sm:$0xff]   ;;  %v6539_v61 = vld [vmem:[%s8957_s1 + $0x2e0] ss:$8 sps:$4 sm:$0xff]   ;;  %v6540_v62 = vld [vmem:[%s8957_s1 + $0xf4] ss:$8 sps:$4 sm:$0xff]  }
  0x16   :  { %v6542_v63 = vld [vmem:[%s8957_s1 + $0x2f4] ss:$8 sps:$4 sm:$0xff]   ;;  %v6544_v0 = vld [vmem:[%s8957_s1 + $0xf0] ss:$8 sps:$4 sm:$0xff]   ;;  %v6554_v2 = vld [vmem:[%s8957_s1 + $0x104] ss:$8 sps:$4 sm:$0xff]  }
  0x17   :  { %2681 = vmatpush1.bf16.msra.mxu1 %v6484_v22  ;;  %v6545_v1 = vld [vmem:[%s8957_s1 + $0x2f0] ss:$8 sps:$4 sm:$0xff]   ;;  %v6557_v3 = vld [vmem:[%s8957_s1 + $0x304] ss:$8 sps:$4 sm:$0xff]   ;;  %v6552_v6 = vld [vmem:[%s8957_s1 + $0x100] ss:$8 sps:$4 sm:$0xff]  }
  0x18   :  { %3387 = vmatpush1.bf16.msra.mxu0 %v6485_v23  ;;  %2682 = vmatprep.subr.bf16.mxu1 %v6486_v24  ;;  %v6546_v4 = vld [vmem:[%s8958_s0] ss:$36 sps:$4 sm:$0xff]   ;;  %v6549_v5 = vld [vmem:[%s8958_s0 + $0x10] ss:$36 sps:$4 sm:$0xff]   ;;  %v6562_v16 = vld [vmem:[%s8958_s0 + $0x48] ss:$36 sps:$4 sm:$0xff]  }
  0x19   :  { %3388 = vmatprep.subr.bf16.mxu0 %v6488_v25  ;;  %v6555_v7 = vld [vmem:[%s8957_s1 + $0x300] ss:$8 sps:$4 sm:$0xff]   ;;  %v6558_v8 = vld [vmem:[%s8958_s0 + $0x4c] ss:$36 sps:$4 sm:$0xff]   ;;  %v6566_v10 = vld [vmem:[%s8957_s1 + $0x314] ss:$8 sps:$4 sm:$0xff]  }
  0x1a   :  { %v6560_v9 = vld [vmem:[%s8958_s0 + $0x5c] ss:$36 sps:$4 sm:$0xff]   ;;  %v6564_v12 = vld [vmem:[%s8957_s1 + $0x310] ss:$8 sps:$4 sm:$0xff]   ;;  %v6578_v14 = vld [vmem:[%s8957_s1 + $0x324] ss:$8 sps:$4 sm:$0xff]  }
  0x1b   :  { %2683 = vmatpush1.bf16.msra.mxu1 %v6490_v26  ;;  %v6574_v11 = vld [vmem:[%s8957_s1 + $0x114] ss:$8 sps:$4 sm:$0xff]   ;;  %v6572_v13 = vld [vmem:[%s8957_s1 + $0x110] ss:$8 sps:$4 sm:$0xff]   ;;  %v6595_v15 = vld [vmem:[%s8957_s1 + $0x124] ss:$8 sps:$4 sm:$0xff]  }
  0x1c   :  { %3389 = vmatpush1.bf16.msra.mxu0 %v6491_v27  ;;  %2684 = vmatprep.subr.bf16.mxu1 %v6492_v28  ;;  %v6563_v17 = vld [vmem:[%s8958_s0 + $0x58] ss:$36 sps:$4 sm:$0xff]   ;;  %v6569_v19 = vld [vmem:[%s8958_s0 + $0xa4] ss:$36 sps:$4 sm:$0xff]   ;;  %v6571_v26 = vld [vmem:[%s8958_s0 + $0x90] ss:$36 sps:$4 sm:$0xff]  }
  0x1d   :  { %3390 = vmatprep.subr.bf16.mxu0 %v6494_v29  ;;  %v6567_v18 = vld [vmem:[%s8958_s0 + $0x94] ss:$36 sps:$4 sm:$0xff]   ;;  %v6576_v20 = vld [vmem:[%s8957_s1 + $0x320] ss:$8 sps:$4 sm:$0xff]   ;;  %v6599_v27 = vld [vmem:[%s8957_s1 + $0x344] ss:$8 sps:$4 sm:$0xff]  }
  0x1e   :  { %v6593_v21 = vld [vmem:[%s8957_s1 + $0x120] ss:$8 sps:$4 sm:$0xff]   ;;  %v6587_v22 = vld [vmem:[%s8957_s1 + $0x334] ss:$8 sps:$4 sm:$0xff]   ;;  %v6585_v24 = vld [vmem:[%s8957_s1 + $0x330] ss:$8 sps:$4 sm:$0xff]  }
  0x1f   :  { %2685 = vmatpush1.bf16.msra.mxu1 %v6496_v30  ;;  %v6616_v23 = vld [vmem:[%s8957_s1 + $0x134] ss:$8 sps:$4 sm:$0xff]   ;;  %v6614_v25 = vld [vmem:[%s8957_s1 + $0x130] ss:$8 sps:$4 sm:$0xff]   ;;  %v6575_v28 = vld [vmem:[%s8958_s0 + $0xa0] ss:$36 sps:$4 sm:$0xff]  }
  0x20   :  { %3391 = vmatpush1.bf16.msra.mxu0 %v6497_v31  ;;  %2686 = vmatprep.subr.bf16.mxu1 %v6498_v32  ;;  %v6579_v29 = vld [vmem:[%s8958_s0 + $0xdc] ss:$36 sps:$4 sm:$0xff]   ;;  %v6581_v30 = vld [vmem:[%s8958_s0 + $0xec] ss:$36 sps:$4 sm:$0xff]  }
  0x21   :  { %3392 = vmatprep.subr.bf16.mxu0 %v6500_v33  ;;  %v6597_v31 = vld [vmem:[%s8957_s1 + $0x340] ss:$8 sps:$4 sm:$0xff]   ;;  %v6608_v32 = vld [vmem:[%s8957_s1 + $0x354] ss:$8 sps:$4 sm:$0xff]   ;;  %v6600_v49 = vld [vmem:[%s8958_s0 + $0x16c] ss:$36 sps:$4 sm:$0xff]  }
  0x22   :  { %v6635_v33 = vld [vmem:[%s8957_s1 + $0x140] ss:$8 sps:$4 sm:$0xff]  }
  0x23   :  { %2687 = vmatpush1.bf16.msra.mxu1 %v6502_v34  ;;  %v6637_v34 = vld [vmem:[%s8957_s1 + $0x144] ss:$8 sps:$4 sm:$0xff]   ;;  %v6639_v51 = vld [vmem:[%s8957_s1 + $0x380] ss:$8 sps:$4 sm:$0xff]  }
  0x24   :  { %3393 = vmatpush1.bf16.msra.mxu0 %v6503_v35  ;;  %2688 = vmatprep.subr.bf16.mxu1 %v6504_v36  ;;  %v6606_v35 = vld [vmem:[%s8957_s1 + $0x350] ss:$8 sps:$4 sm:$0xff]   ;;  %v6620_v36 = vld [vmem:[%s8957_s1 + $0x364] ss:$8 sps:$4 sm:$0xff]  }
  0x25   :  { %3394 = vmatprep.subr.bf16.mxu0 %v6506_v37  ;;  %v6583_v37 = vld [vmem:[%s8958_s0 + $0xd8] ss:$36 sps:$4 sm:$0xff]  }
  0x27   :  { %2689 = vmatpush1.bf16.msra.mxu1 %v6508_v38  ;;  %v6584_v38 = vld [vmem:[%s8958_s0 + $0xe8] ss:$36 sps:$4 sm:$0xff]  }
  0x28   :  { %3395 = vmatpush1.bf16.msra.mxu0 %v6509_v39  ;;  %2690 = vmatprep.subr.bf16.mxu1 %v6510_v40  ;;  %v6588_v39 = vld [vmem:[%s8958_s0 + $0x124] ss:$36 sps:$4 sm:$0xff]   ;;  %v6590_v40 = vld [vmem:[%s8958_s0 + $0x134] ss:$36 sps:$4 sm:$0xff]  }
  0x29   :  { %3396 = vmatprep.subr.bf16.mxu0 %v6512_v41  ;;  %v6618_v41 = vld [vmem:[%s8957_s1 + $0x360] ss:$8 sps:$4 sm:$0xff]  }
  0x2b   :  { %2691 = vmatpush1.bf16.msra.mxu1 %v6514_v42  ;;  %v6629_v42 = vld [vmem:[%s8957_s1 + $0x374] ss:$8 sps:$4 sm:$0xff]  }
  0x2c   :  { %3397 = vmatpush1.bf16.msra.mxu0 %v6515_v43  ;;  %2692 = vmatprep.subr.bf16.mxu1 %v6516_v44  ;;  %v6656_v43 = vld [vmem:[%s8957_s1 + $0x150] ss:$8 sps:$4 sm:$0xff]   ;;  %v6658_v44 = vld [vmem:[%s8957_s1 + $0x154] ss:$8 sps:$4 sm:$0xff]  }
  0x2d   :  { %3398 = vmatprep.subr.bf16.mxu0 %v6518_v45  ;;  %v6627_v45 = vld [vmem:[%s8957_s1 + $0x370] ss:$8 sps:$4 sm:$0xff]  }
  0x2f   :  { %2693 = vmatpush1.bf16.msra.mxu1 %v6520_v46  ;;  %v6592_v46 = vld [vmem:[%s8958_s0 + $0x120] ss:$36 sps:$4 sm:$0xff]  }
  0x30   :  { %3399 = vmatpush1.bf16.msra.mxu0 %v6521_v47  ;;  %2694 = vmatprep.subr.bf16.mxu1 %v6522_v48  ;;  %v6641_v47 = vld [vmem:[%s8957_s1 + $0x384] ss:$8 sps:$4 sm:$0xff]   ;;  %v6596_v48 = vld [vmem:[%s8958_s0 + $0x130] ss:$36 sps:$4 sm:$0xff]  }
  0x31   :  { %3400 = vmatprep.subr.bf16.mxu0 %v6524_v50  ;;  %v6602_v50 = vld [vmem:[%s8958_s0 + $0x17c] ss:$36 sps:$4 sm:$0xff]  }
  0x33   :  { %2695 = vmatpush1.bf16.msra.mxu1 %v6526_v52  ;;  %v6650_v52 = vld [vmem:[%s8957_s1 + $0x394] ss:$8 sps:$4 sm:$0xff]  }
  0x34   :  { %3401 = vmatpush1.bf16.msra.mxu0 %v6527_v53  ;;  %2696 = vmatprep.subr.bf16.mxu1 %v6528_v54  ;;  %v6648_v53 = vld [vmem:[%s8957_s1 + $0x390] ss:$8 sps:$4 sm:$0xff]   ;;  %v6604_v54 = vld [vmem:[%s8958_s0 + $0x168] ss:$36 sps:$4 sm:$0xff]  }
  0x35   :  { %3402 = vmatprep.subr.bf16.mxu0 %v6530_v55  ;;  %v6677_v55 = vld [vmem:[%s8957_s1 + $0x160] ss:$8 sps:$4 sm:$0xff]  }
  0x37   :  { %2697 = vmatpush1.bf16.msra.mxu1 %v6532_v56  ;;  %v6662_v56 = vld [vmem:[%s8957_s1 + $0x3a4] ss:$8 sps:$4 sm:$0xff]  }
  0x38   :  { %3403 = vmatpush1.bf16.msra.mxu0 %v6533_v57  ;;  %2698 = vmatprep.subr.bf16.mxu1 %v6534_v58  ;;  %v6679_v57 = vld [vmem:[%s8957_s1 + $0x164] ss:$8 sps:$4 sm:$0xff]   ;;  %v6605_v58 = vld [vmem:[%s8958_s0 + $0x178] ss:$36 sps:$4 sm:$0xff]  }
  0x39   :  { %3404 = vmatprep.subr.bf16.mxu0 %v6536_v59  ;;  %v6609_v59 = vld [vmem:[%s8958_s0 + $0x1b4] ss:$36 sps:$4 sm:$0xff]  }
  0x3b   :  { %2699 = vmatpush1.bf16.msra.mxu1 %v6538_v60  ;;  %v6611_v60 = vld [vmem:[%s8958_s0 + $0x1c4] ss:$36 sps:$4 sm:$0xff]  }
  0x3c   :  { %3405 = vmatpush1.bf16.msra.mxu0 %v6539_v61  ;;  %2700 = vmatprep.subr.bf16.mxu1 %v6540_v62  ;;  %v6660_v61 = vld [vmem:[%s8957_s1 + $0x3a0] ss:$8 sps:$4 sm:$0xff]   ;;  %v6671_v62 = vld [vmem:[%s8957_s1 + $0x3b4] ss:$8 sps:$4 sm:$0xff]  }
  0x3d   :  { %3406 = vmatprep.subr.bf16.mxu0 %v6542_v63  ;;  %v6613_v63 = vld [vmem:[%s8958_s0 + $0x1b0] ss:$36 sps:$4 sm:$0xff]  }
  0x3f   :  { %2701 = vmatpush1.bf16.msra.mxu1 %v6544_v0  ;;  %v6617_v0 = vld [vmem:[%s8958_s0 + $0x1c0] ss:$36 sps:$4 sm:$0xff]  }
  0x40   :  { %3407 = vmatpush1.bf16.msra.mxu0 %v6545_v1  ;;  %3023 = vmatprep.subr.bf16.mxu1 %v6554_v2  ;;  %v6669_v1 = vld [vmem:[%s8957_s1 + $0x3b0] ss:$8 sps:$4 sm:$0xff]   ;;  %v6683_v2 = vld [vmem:[%s8957_s1 + $0x3c4] ss:$8 sps:$4 sm:$0xff]  }
  0x41   :  { %3729 = vmatprep.subr.bf16.mxu0 %v6557_v3  ;;  %v6621_v3 = vld [vmem:[%s8958_s0 + $0x1fc] ss:$36 sps:$4 sm:$0xff]  }
  0x42   :  { %2703 = vmatmul.mubr.bf16.vlgmr.msra.gmra.mrb[0].mxu1 %v6546_v4  ;;  %v6698_v4 = vld [vmem:[%s8957_s1 + $0x170] ss:$8 sps:$4 sm:$0xff]  }
  0x43   :  { %3409 = vmatmul.mubr.bf16.vlgmr.msra.gmra.mrb[0].mxu0 %v6549_v5  ;;  %3024 = vmatpush1.bf16.msra.mxu1 %v6552_v6  ;;  %v6700_v5 = vld [vmem:[%s8957_s1 + $0x174] ss:$8 sps:$4 sm:$0xff]   ;;  %v6623_v6 = vld [vmem:[%s8958_s0 + $0x20c] ss:$36 sps:$4 sm:$0xff]  }
  0x44   :  { %3730 = vmatpush1.bf16.msra.mxu0 %v6555_v7  ;;  %2712 = vmatprep.mubr.bf16.mxu1 %v6558_v8  ;;  %v6681_v7 = vld [vmem:[%s8957_s1 + $0x3c0] ss:$8 sps:$4 sm:$0xff]   ;;  %v6692_v8 = vld [vmem:[%s8957_s1 + $0x3d4] ss:$8 sps:$4 sm:$0xff]  }
  0x45   :  { %3418 = vmatprep.mubr.bf16.mxu0 %v6560_v9  ;;  %3731 = vmatprep.subr.bf16.mxu0 %v6566_v10  ;;  %v6625_v9 = vld [vmem:[%s8958_s0 + $0x1f8] ss:$36 sps:$4 sm:$0xff]  }
  0x46   :  { %3025 = vmatprep.subr.bf16.mxu1 %v6574_v11  ;;  %v6690_v10 = vld [vmem:[%s8957_s1 + $0x3d0] ss:$8 sps:$4 sm:$0xff]   ;;  %v6704_v11 = vld [vmem:[%s8957_s1 + $0x3e4] ss:$8 sps:$4 sm:$0xff]  }
  0x47   :  { %3026 = vmatpush1.bf16.msra.mxu1 %v6572_v13  ;;  %v6630_v13 = vld [vmem:[%s8958_s0 + $0x244] ss:$36 sps:$4 sm:$0xff]  }
  0x48   :  { %3732 = vmatpush1.bf16.msra.mxu0 %v6564_v12  ;;  %3027 = vmatprep.subr.bf16.mxu1 %v6595_v15  ;;  %v6626_v12 = vld [vmem:[%s8958_s0 + $0x208] ss:$36 sps:$4 sm:$0xff]  }
  0x49   :  { %3733 = vmatprep.subr.bf16.mxu0 %v6578_v14  ;;  %v6632_v14 = vld [vmem:[%s8958_s0 + $0x254] ss:$36 sps:$4 sm:$0xff]   ;;  %v6702_v15 = vld [vmem:[%s8957_s1 + $0x3e0] ss:$8 sps:$4 sm:$0xff]  }
  0x4a   :  { %2713 = vmatmul.mubr.bf16.gmra.mrb[4].mxu1 %v6562_v16  ;;  %v6722_v16 = vld [vmem:[%s8957_s1 + $0x184] ss:$8 sps:$4 sm:$0xff]  }
  0x4b   :  { %3419 = vmatmul.mubr.bf16.gmra.mrb[4].mxu0 %v6563_v17  ;;  %2722 = vmatprep.mubr.bf16.mxu1 %v6567_v18  ;;  %v6713_v17 = vld [vmem:[%s8957_s1 + $0x3f4] ss:$8 sps:$4 sm:$0xff]   ;;  %v6720_v18 = vld [vmem:[%s8957_s1 + $0x180] ss:$8 sps:$4 sm:$0xff]  }
  0x4c   :  { %3428 = vmatprep.mubr.bf16.mxu0 %v6569_v19  ;;  %3734 = vmatpush1.bf16.msra.mxu0 %v6576_v20  ;;  %v6634_v19 = vld [vmem:[%s8958_s0 + $0x240] ss:$36 sps:$4 sm:$0xff]   ;;  %v6711_v20 = vld [vmem:[%s8957_s1 + $0x3f0] ss:$8 sps:$4 sm:$0xff]  }
  0x4d   :  { %3028 = vmatpush1.bf16.msra.mxu1 %v6593_v21  ;;  %3735 = vmatprep.subr.bf16.mxu0 %v6587_v22  ;;  %v6725_v21 = vld [vmem:[%s8957_s1 + $0x404] ss:$8 sps:$4 sm:$0xff]   ;;  %v6638_v22 = vld [vmem:[%s8958_s0 + $0x250] ss:$36 sps:$4 sm:$0xff]  }
  0x4e   :  { %3029 = vmatprep.subr.bf16.mxu1 %v6616_v23  ;;  %v6642_v23 = vld [vmem:[%s8958_s0 + $0x28c] ss:$36 sps:$4 sm:$0xff]  }
  0x50   :  { %3736 = vmatpush1.bf16.msra.mxu0 %v6585_v24  ;;  %v6644_v24 = vld [vmem:[%s8958_s0 + $0x29c] ss:$36 sps:$4 sm:$0xff]  }
  0x51   :  { %3030 = vmatpush1.bf16.msra.mxu1 %v6614_v25  ;;  %3737 = vmatprep.subr.bf16.mxu0 %v6599_v27  ;;  %v6739_v25 = vld [vmem:[%s8957_s1 + $0x194] ss:$8 sps:$4 sm:$0xff]   ;;  %v6646_v27 = vld [vmem:[%s8958_s0 + $0x288] ss:$36 sps:$4 sm:$0xff]  }
  0x52   :  { %2723 = vmatmul.mubr.bf16.gmra.mrb[8].mxu1 %v6571_v26  ;;  %3031 = vmatprep.subr.bf16.mxu1 %v6637_v34  ;;  %v6737_v26 = vld [vmem:[%s8957_s1 + $0x190] ss:$8 sps:$4 sm:$0xff]   ;;  %v6659_v34 = vld [vmem:[%s8958_s0 + $0x2e0] ss:$36 sps:$4 sm:$0xff]  }
  0x53   :  { %3429 = vmatmul.mubr.bf16.gmra.mrb[8].mxu0 %v6575_v28  ;;  %2732 = vmatprep.mubr.bf16.mxu1 %v6579_v29  ;;  %v6647_v28 = vld [vmem:[%s8958_s0 + $0x298] ss:$36 sps:$4 sm:$0xff]  }
  0x54   :  { %3438 = vmatprep.mubr.bf16.mxu0 %v6581_v30  ;;  %3738 = vmatpush1.bf16.msra.mxu0 %v6597_v31  ;;  %v6651_v29 = vld [vmem:[%s8958_s0 + $0x2d4] ss:$36 sps:$4 sm:$0xff]   ;;  %v6752_v30 = vld [vmem:[%s8957_s1 + $0x1a0] ss:$8 sps:$4 sm:$0xff]   ;;  %v6754_v31 = vld [vmem:[%s8957_s1 + $0x1a4] ss:$8 sps:$4 sm:$0xff]  }
  0x55   :  { %3739 = vmatprep.subr.bf16.mxu0 %v6608_v32  ;;  %3032 = vmatpush1.bf16.msra.mxu1 %v6635_v33  ;;  %v6653_v32 = vld [vmem:[%s8958_s0 + $0x2e4] ss:$36 sps:$4 sm:$0xff]   ;;  %v6655_v33 = vld [vmem:[%s8958_s0 + $0x2d0] ss:$36 sps:$4 sm:$0xff]  }
  0x56   :  { %3033 = vmatprep.subr.bf16.mxu1 %v6658_v44  ;;  %v6674_v44 = vld [vmem:[%s8958_s0 + $0x374] ss:$36 sps:$4 sm:$0xff]  }
  0x58   :  { %3740 = vmatpush1.bf16.msra.mxu0 %v6606_v35  ;;  %v6663_v35 = vld [vmem:[%s8958_s0 + $0x31c] ss:$36 sps:$4 sm:$0xff]  }
  0x59   :  { %3741 = vmatprep.subr.bf16.mxu0 %v6620_v36  ;;  %3034 = vmatpush1.bf16.msra.mxu1 %v6656_v43  ;;  %v6770_v36 = vld [vmem:[%s8957_s1 + $0x1b0] ss:$8 sps:$4 sm:$0xff]   ;;  %v6672_v43 = vld [vmem:[%s8958_s0 + $0x364] ss:$36 sps:$4 sm:$0xff]  }
  0x5a   :  { %2733 = vmatmul.mubr.bf16.gmra.mrb[12].mxu1 %v6583_v37  ;;  %3035 = vmatprep.subr.bf16.mxu1 %v6679_v57  ;;  %v6772_v37 = vld [vmem:[%s8957_s1 + $0x1b4] ss:$8 sps:$4 sm:$0xff]  }
  0x5b   :  { %3439 = vmatmul.mubr.bf16.gmra.mrb[12].mxu0 %v6584_v38  ;;  %2742 = vmatprep.mubr.bf16.mxu1 %v6588_v39  ;;  %v6665_v38 = vld [vmem:[%s8958_s0 + $0x32c] ss:$36 sps:$4 sm:$0xff]   ;;  %v6785_v39 = vld [vmem:[%s8957_s1 + $0x1c0] ss:$8 sps:$4 sm:$0xff]  }
  0x5c   :  { %3448 = vmatprep.mubr.bf16.mxu0 %v6590_v40  ;;  %3742 = vmatpush1.bf16.msra.mxu0 %v6618_v41  ;;  %v6667_v40 = vld [vmem:[%s8958_s0 + $0x318] ss:$36 sps:$4 sm:$0xff]   ;;  %v6787_v41 = vld [vmem:[%s8957_s1 + $0x1c4] ss:$8 sps:$4 sm:$0xff]   ;;  %v6697_v57 = vld [vmem:[%s8958_s0 + $0x3f0] ss:$36 sps:$4 sm:$0xff]  }
  0x5d   :  { %3743 = vmatprep.subr.bf16.mxu0 %v6629_v42  ;;  %3036 = vmatpush1.bf16.msra.mxu1 %v6677_v55  ;;  %v6668_v42 = vld [vmem:[%s8958_s0 + $0x328] ss:$36 sps:$4 sm:$0xff]   ;;  %v6693_v55 = vld [vmem:[%s8958_s0 + $0x3f4] ss:$36 sps:$4 sm:$0xff]  }
  0x5e   :  { %3037 = vmatprep.subr.bf16.mxu1 %v6700_v5  ;;  %v6719_v5 = vld [vmem:[%s8958_s0 + $0x480] ss:$36 sps:$4 sm:$0xff]  }
  0x60   :  { %3744 = vmatpush1.bf16.msra.mxu0 %v6627_v45  ;;  %v6803_v45 = vld [vmem:[%s8957_s1 + $0x1d0] ss:$8 sps:$4 sm:$0xff]  }
  0x61   :  { %3745 = vmatprep.subr.bf16.mxu0 %v6641_v47  ;;  %3038 = vmatpush1.bf16.msra.mxu1 %v6698_v4  ;;  %v6805_v47 = vld [vmem:[%s8957_s1 + $0x1d4] ss:$8 sps:$4 sm:$0xff]  }
  0x62   :  { %2743 = vmatmul.mubr.bf16.gmra.mrb[16].mxu1 %v6592_v46  ;;  %3039 = vmatprep.subr.bf16.mxu1 %v6722_v16  ;;  %v6676_v46 = vld [vmem:[%s8958_s0 + $0x360] ss:$36 sps:$4 sm:$0xff]   ;;  %v6716_v4 = vld [vmem:[%s8958_s0 + $0x18] ss:$36 sps:$4 sm:$0xff]  }
  0x63   :  { %3449 = vmatmul.mubr.bf16.gmra.mrb[16].mxu0 %v6596_v48  ;;  %2752 = vmatprep.mubr.bf16.mxu1 %v6600_v49  ;;  %v6680_v48 = vld [vmem:[%s8958_s0 + $0x370] ss:$36 sps:$4 sm:$0xff]   ;;  %v6789_v16 = vld [vmem:[%s8957_s1 + $0x420] ss:$8 sps:$4 sm:$0xff]  }
  0x64   :  { %3458 = vmatprep.mubr.bf16.mxu0 %v6602_v50  ;;  %3746 = vmatpush1.bf16.msra.mxu0 %v6639_v51  ;;  %v6684_v49 = vld [vmem:[%s8958_s0 + $0x3ac] ss:$36 sps:$4 sm:$0xff]   ;;  %v6686_v50 = vld [vmem:[%s8958_s0 + $0x3bc] ss:$36 sps:$4 sm:$0xff]  }
  0x65   :  { %3747 = vmatprep.subr.bf16.mxu0 %v6650_v52  ;;  %3040 = vmatpush1.bf16.msra.mxu1 %v6720_v18  ;;  %v6818_v51 = vld [vmem:[%s8957_s1 + $0x1e0] ss:$8 sps:$4 sm:$0xff]   ;;  %v6820_v52 = vld [vmem:[%s8957_s1 + $0x1e4] ss:$8 sps:$4 sm:$0xff]   ;;  %v6822_v18 = vld [vmem:[%s8957_s1 + $0x430] ss:$8 sps:$4 sm:$0xff]  }
  0x66   :  { %3041 = vmatprep.subr.bf16.mxu1 %v6739_v25  ;;  %v6745_v25 = vld [vmem:[%s8958_s0 + $0x558] ss:$36 sps:$4 sm:$0xff]  }
  0x68   :  { %3748 = vmatpush1.bf16.msra.mxu0 %v6648_v53  ;;  %v6688_v53 = vld [vmem:[%s8958_s0 + $0x3a8] ss:$36 sps:$4 sm:$0xff]  }
  0x69   :  { %3749 = vmatprep.subr.bf16.mxu0 %v6662_v56  ;;  %3042 = vmatpush1.bf16.msra.mxu1 %v6737_v26  ;;  %v6695_v56 = vld [vmem:[%s8958_s0 + $0x404] ss:$36 sps:$4 sm:$0xff]   ;;  %v6746_v26 = vld [vmem:[%s8958_s0 + $0xf0] ss:$36 sps:$4 sm:$0xff]  }
  0x6a   :  { %2753 = vmatmul.mubr.bf16.gmra.mrb[20].mxu1 %v6604_v54  ;;  %3043 = vmatprep.subr.bf16.mxu1 %v6754_v31  ;;  %v6689_v54 = vld [vmem:[%s8958_s0 + $0x3b8] ss:$36 sps:$4 sm:$0xff]   ;;  %v6759_v31 = vld [vmem:[%s8958_s0 + $0x5ec] ss:$36 sps:$4 sm:$0xff]  }
  0x6b   :  { %3459 = vmatmul.mubr.bf16.gmra.mrb[20].mxu0 %v6605_v58  ;;  %2762 = vmatprep.mubr.bf16.mxu1 %v6609_v59  ;;  %v6701_v58 = vld [vmem:[%s8958_s0 + $0x400] ss:$36 sps:$4 sm:$0xff]  }
  0x6c   :  { %3468 = vmatprep.mubr.bf16.mxu0 %v6611_v60  ;;  %3750 = vmatpush1.bf16.msra.mxu0 %v6660_v61  ;;  %v6705_v59 = vld [vmem:[%s8958_s0 + $0x43c] ss:$36 sps:$4 sm:$0xff]   ;;  %v6707_v60 = vld [vmem:[%s8958_s0 + $0x44c] ss:$36 sps:$4 sm:$0xff]  }
  0x6d   :  { %3751 = vmatprep.subr.bf16.mxu0 %v6671_v62  ;;  %3044 = vmatpush1.bf16.msra.mxu1 %v6752_v30  ;;  %v6836_v61 = vld [vmem:[%s8957_s1 + $0x1f0] ss:$8 sps:$4 sm:$0xff]   ;;  %v6838_v62 = vld [vmem:[%s8957_s1 + $0x1f4] ss:$8 sps:$4 sm:$0xff]  }
  0x6e   :  { %3045 = vmatprep.subr.bf16.mxu1 %v6772_v37  ;;  %v6755_v30 = vld [vmem:[%s8958_s0 + $0x138] ss:$36 sps:$4 sm:$0xff]  }
  0x6f   :  { %v6765_v37 = vld [vmem:[%s8958_s0 + $0x634] ss:$36 sps:$4 sm:$0xff]  }
  0x70   :  { %3752 = vmatpush1.bf16.msra.mxu0 %v6669_v1  ;;  %v6714_v1 = vld [vmem:[%s8958_s0 + $0x484] ss:$36 sps:$4 sm:$0xff]  }
  0x71   :  { %3753 = vmatprep.subr.bf16.mxu0 %v6683_v2  ;;  %3046 = vmatpush1.bf16.msra.mxu1 %v6770_v36  ;;  %v6718_v2 = vld [vmem:[%s8958_s0 + $0x1c] ss:$36 sps:$4 sm:$0xff]  }
  0x72   :  { %2763 = vmatmul.mubr.bf16.gmra.mrb[24].mxu1 %v6613_v63  ;;  %3047 = vmatprep.subr.bf16.mxu1 %v6787_v41  ;;  %v6709_v63 = vld [vmem:[%s8958_s0 + $0x438] ss:$36 sps:$4 sm:$0xff]   ;;  %v6764_v36 = vld [vmem:[%s8958_s0 + $0x180] ss:$36 sps:$4 sm:$0xff]  }
  0x73   :  { %3469 = vmatmul.mubr.bf16.gmra.mrb[24].mxu0 %v6617_v0  ;;  %2772 = vmatprep.mubr.bf16.mxu1 %v6621_v3  ;;  %v6710_v0 = vld [vmem:[%s8958_s0 + $0x448] ss:$36 sps:$4 sm:$0xff]   ;;  %v6774_v41 = vld [vmem:[%s8958_s0 + $0x67c] ss:$36 sps:$4 sm:$0xff]  }
  0x74   :  { %3478 = vmatprep.mubr.bf16.mxu0 %v6623_v6  ;;  %3754 = vmatpush1.bf16.msra.mxu0 %v6681_v7  ;;  %v7082_v3 = vld [vmem:[%s8957_s1 + $0x204] ss:$8 sps:$4 sm:$0xff]   ;;  %v6723_v6 = vld [vmem:[%s8957_s1 + $0x400] ss:$8 sps:$4 sm:$0xff]  }
  0x75   :  { %3755 = vmatprep.subr.bf16.mxu0 %v6692_v8  ;;  %3048 = vmatpush1.bf16.msra.mxu1 %v6785_v39  ;;  %v6726_v7 = vld [vmem:[%s8958_s0 + $0x4cc] ss:$36 sps:$4 sm:$0xff]   ;;  %v6728_v8 = vld [vmem:[%s8958_s0 + $0x64] ss:$36 sps:$4 sm:$0xff]  }
  0x76   :  { %3049 = vmatprep.subr.bf16.mxu1 %v6805_v47  ;;  %v6769_v39 = vld [vmem:[%s8958_s0 + $0x630] ss:$36 sps:$4 sm:$0xff]   ;;  %v6784_v47 = vld [vmem:[%s8958_s0 + $0x6c0] ss:$36 sps:$4 sm:$0xff]  }
  0x78   :  { %3756 = vmatpush1.bf16.msra.mxu0 %v6690_v10  ;;  %v6756_v10 = vld [vmem:[%s8957_s1 + $0x410] ss:$8 sps:$4 sm:$0xff]  }
  0x79   :  { %3757 = vmatprep.subr.bf16.mxu0 %v6704_v11  ;;  %3050 = vmatpush1.bf16.msra.mxu1 %v6803_v45  ;;  %v6730_v11 = vld [vmem:[%s8958_s0 + $0x4c8] ss:$36 sps:$4 sm:$0xff]  }
  0x7a   :  { %2773 = vmatmul.mubr.bf16.gmra.mrb[28].mxu1 %v6625_v9  ;;  %3051 = vmatprep.subr.bf16.mxu1 %v6820_v52  ;;  %v6758_v9 = vld [vmem:[%s8957_s1 + $0x414] ss:$8 sps:$4 sm:$0xff]   ;;  %v6780_v45 = vld [vmem:[%s8958_s0 + $0x6c4] ss:$36 sps:$4 sm:$0xff]  }
  0x7b   :  { %3479 = vmatmul.mubr.bf16.gmra.mrb[28].mxu0 %v6626_v12  ;;  %2782 = vmatprep.mubr.bf16.mxu1 %v6630_v13  ;;  %v6731_v12 = vld [vmem:[%s8958_s0 + $0x60] ss:$36 sps:$4 sm:$0xff]  }
  0x7c   :  { %3488 = vmatprep.mubr.bf16.mxu0 %v6632_v14  ;;  %3758 = vmatpush1.bf16.msra.mxu0 %v6702_v15  ;;  %v6791_v13 = vld [vmem:[%s8957_s1 + $0x424] ss:$8 sps:$4 sm:$0xff]   ;;  %v6732_v14 = vld [vmem:[%s8958_s0 + $0x514] ss:$36 sps:$4 sm:$0xff]  }
  0x7d   :  { %3759 = vmatprep.subr.bf16.mxu0 %v6713_v17  ;;  %3052 = vmatpush1.bf16.msra.mxu1 %v6818_v51  ;;  %v6734_v15 = vld [vmem:[%s8958_s0 + $0xac] ss:$36 sps:$4 sm:$0xff]   ;;  %v6824_v17 = vld [vmem:[%s8957_s1 + $0x434] ss:$8 sps:$4 sm:$0xff]   ;;  %v6906_v51 = vld [vmem:[%s8957_s1 + $0x460] ss:$8 sps:$4 sm:$0xff]  }
  0x7e   :  { %3053 = vmatprep.subr.bf16.mxu1 %v6838_v62  ;;  %v6908_v52 = vld [vmem:[%s8957_s1 + $0x464] ss:$8 sps:$4 sm:$0xff]   ;;  %v6812_v62 = vld [vmem:[%s8958_s0 + $0x330] ss:$36 sps:$4 sm:$0xff]  }
  0x80   :  { %3760 = vmatpush1.bf16.msra.mxu0 %v6711_v20  ;;  %v6736_v20 = vld [vmem:[%s8958_s0 + $0x510] ss:$36 sps:$4 sm:$0xff]  }
  0x81   :  { %4082 = vmatprep.subr.bf16.mxu0 %v6725_v21  ;;  %3054 = vmatpush1.bf16.msra.mxu1 %v6836_v61  ;;  %v6740_v21 = vld [vmem:[%s8958_s0 + $0xa8] ss:$36 sps:$4 sm:$0xff]   ;;  %v6811_v61 = vld [vmem:[%s8958_s0 + $0x798] ss:$36 sps:$4 sm:$0xff]  }
  0x82   :  { %2783 = vmatmul.mubr.bf16.gmra.mrb[32].mxu1 %v6634_v19  ;;  %5903 = vmatprep.subr.bf16.mxu1 %v7082_v3  ;;  %v6854_v19 = vld [vmem:[%s8957_s1 + $0x444] ss:$8 sps:$4 sm:$0xff]  }
  0x83   :  { %3489 = vmatmul.mubr.bf16.gmra.mrb[32].mxu0 %v6638_v22  ;;  %2792 = vmatprep.mubr.bf16.mxu1 %v6642_v23  ;;  %v6741_v22 = vld [vmem:[%s8958_s0 + $0x55c] ss:$36 sps:$4 sm:$0xff]   ;;  %v6743_v23 = vld [vmem:[%s8958_s0 + $0xf4] ss:$36 sps:$4 sm:$0xff]   ;;  %v6825_v3 = vld [vmem:[%s8958_s0 + $0x82c] ss:$36 sps:$4 sm:$0xff]  }
  0x84   :  { %3498 = vmatprep.mubr.bf16.mxu0 %v6644_v24  ;;  %v6852_v24 = vld [vmem:[%s8957_s1 + $0x440] ss:$8 sps:$4 sm:$0xff]  }
  0x8a   :  { %2793 = vmatmul.mubr.bf16.gmra.mrb[36].mxu1 %v6646_v27  ;;  %v6747_v27 = vld [vmem:[%s8958_s0 + $0x5a4] ss:$36 sps:$4 sm:$0xff]  }
  0x8b   :  { %3499 = vmatmul.mubr.bf16.gmra.mrb[36].mxu0 %v6647_v28  ;;  %2802 = vmatprep.mubr.bf16.mxu1 %v6651_v29  ;;  %v6749_v28 = vld [vmem:[%s8958_s0 + $0x13c] ss:$36 sps:$4 sm:$0xff]  }
  0x8c   :  { %3508 = vmatprep.mubr.bf16.mxu0 %v6653_v32  ;;  %v6751_v29 = vld [vmem:[%s8958_s0 + $0x5a0] ss:$36 sps:$4 sm:$0xff]  }
  0x8d   :  { %v6761_v32 = vld [vmem:[%s8958_s0 + $0x184] ss:$36 sps:$4 sm:$0xff]  }
  0x92   :  { %2803 = vmatmul.mubr.bf16.gmra.mrb[40].mxu1 %v6655_v33  ;;  %v6879_v33 = vld [vmem:[%s8957_s1 + $0x450] ss:$8 sps:$4 sm:$0xff]  }
  0x93   :  { %3509 = vmatmul.mubr.bf16.gmra.mrb[40].mxu0 %v6659_v34  ;;  %2812 = vmatprep.mubr.bf16.mxu1 %v6663_v35  ;;  %v6881_v34 = vld [vmem:[%s8957_s1 + $0x454] ss:$8 sps:$4 sm:$0xff]   ;;  %v6763_v35 = vld [vmem:[%s8958_s0 + $0x5e8] ss:$36 sps:$4 sm:$0xff]  }
  0x94   :  { %3518 = vmatprep.mubr.bf16.mxu0 %v6665_v38  ;;  %v6767_v38 = vld [vmem:[%s8958_s0 + $0x1cc] ss:$36 sps:$4 sm:$0xff]  }
  0x9a   :  { %2813 = vmatmul.mubr.bf16.gmra.mrb[44].mxu1 %v6667_v40  ;;  %v6773_v40 = vld [vmem:[%s8958_s0 + $0x1c8] ss:$36 sps:$4 sm:$0xff]  }
  0x9b   :  { %3519 = vmatmul.mubr.bf16.gmra.mrb[44].mxu0 %v6668_v42  ;;  %2822 = vmatprep.mubr.bf16.mxu1 %v6672_v43  ;;  %v6776_v42 = vld [vmem:[%s8958_s0 + $0x214] ss:$36 sps:$4 sm:$0xff]  }
  0x9c   :  { %3528 = vmatprep.mubr.bf16.mxu0 %v6674_v44  ;;  %v6778_v43 = vld [vmem:[%s8958_s0 + $0x678] ss:$36 sps:$4 sm:$0xff]   ;;  %v6779_v44 = vld [vmem:[%s8958_s0 + $0x210] ss:$36 sps:$4 sm:$0xff]  }
  0xa2   :  { %2823 = vmatmul.mubr.bf16.gmra.mrb[48].mxu1 %v6676_v46  ;;  %v6782_v46 = vld [vmem:[%s8958_s0 + $0x25c] ss:$36 sps:$4 sm:$0xff]  }
  0xa3   :  { %3529 = vmatmul.mubr.bf16.gmra.mrb[48].mxu0 %v6680_v48  ;;  %2832 = vmatprep.mubr.bf16.mxu1 %v6684_v49  ;;  %v6788_v48 = vld [vmem:[%s8958_s0 + $0x258] ss:$36 sps:$4 sm:$0xff]   ;;  %v6792_v49 = vld [vmem:[%s8958_s0 + $0x70c] ss:$36 sps:$4 sm:$0xff]  }
  0xa4   :  { %3538 = vmatprep.mubr.bf16.mxu0 %v6686_v50  ;;  %v6794_v50 = vld [vmem:[%s8958_s0 + $0x2a4] ss:$36 sps:$4 sm:$0xff]  }
  0xaa   :  { %2833 = vmatmul.mubr.bf16.gmra.mrb[52].mxu1 %v6688_v53  ;;  %v6796_v53 = vld [vmem:[%s8958_s0 + $0x708] ss:$36 sps:$4 sm:$0xff]  }
  0xab   :  { %3539 = vmatmul.mubr.bf16.gmra.mrb[52].mxu0 %v6689_v54  ;;  %2842 = vmatprep.mubr.bf16.mxu1 %v6693_v55  ;;  %v6797_v54 = vld [vmem:[%s8958_s0 + $0x2a0] ss:$36 sps:$4 sm:$0xff]   ;;  %v6798_v55 = vld [vmem:[%s8958_s0 + $0x754] ss:$36 sps:$4 sm:$0xff]  }
  0xac   :  { %3548 = vmatprep.mubr.bf16.mxu0 %v6695_v56  ;;  %v6800_v56 = vld [vmem:[%s8958_s0 + $0x2ec] ss:$36 sps:$4 sm:$0xff]  }
  0xb2   :  { %2843 = vmatmul.mubr.bf16.gmra.mrb[56].mxu1 %v6697_v57  ;;  %v6802_v57 = vld [vmem:[%s8958_s0 + $0x750] ss:$36 sps:$4 sm:$0xff]  }
  0xb3   :  { %3549 = vmatmul.mubr.bf16.gmra.mrb[56].mxu0 %v6701_v58  ;;  %2852 = vmatprep.mubr.bf16.mxu1 %v6705_v59  ;;  %v6806_v58 = vld [vmem:[%s8958_s0 + $0x2e8] ss:$36 sps:$4 sm:$0xff]   ;;  %v6807_v59 = vld [vmem:[%s8958_s0 + $0x79c] ss:$36 sps:$4 sm:$0xff]  }
  0xb4   :  { %3558 = vmatprep.mubr.bf16.mxu0 %v6707_v60  ;;  %v6809_v60 = vld [vmem:[%s8958_s0 + $0x334] ss:$36 sps:$4 sm:$0xff]  }
  0xba   :  { %2853 = vmatmul.mubr.bf16.gmra.mrb[60].mxu1 %v6709_v63  ;;  %v6813_v63 = vld [vmem:[%s8958_s0 + $0x7e4] ss:$36 sps:$4 sm:$0xff]  }
  0xbb   :  { %3559 = vmatmul.mubr.bf16.gmra.mrb[60].mxu0 %v6710_v0  ;;  %2862 = vmatprep.mubr.bf16.mxu1 %v6714_v1  ;;  %v6815_v0 = vld [vmem:[%s8958_s0 + $0x37c] ss:$36 sps:$4 sm:$0xff]  }
  0xbc   :  { %3761 = vmatprep.mubr.bf16.mxu0 %v6718_v2  ;;  %v6817_v1 = vld [vmem:[%s8958_s0 + $0x7e0] ss:$36 sps:$4 sm:$0xff]   ;;  %v6821_v2 = vld [vmem:[%s8958_s0 + $0x378] ss:$36 sps:$4 sm:$0xff]  }
  0xc2   :  { %2863 = vmatmul.mubr.bf16.gmra.mrb[64].mxu1 %v6719_v5  ;;  %v6933_v5 = vld [vmem:[%s8957_s1 + $0x470] ss:$8 sps:$4 sm:$0xff]  }
  0xc3   :  { %3762 = vmatmul.mubr.bf16.vlgmr.msra.gmra.mrb[0].mxu0 %v6716_v4  ;;  %2872 = vmatprep.mubr.bf16.mxu1 %v6726_v7  ;;  %v6827_v4 = vld [vmem:[%s8958_s0 + $0x3c4] ss:$36 sps:$4 sm:$0xff]  }
  0xc4   :  { %4083 = vmatpush1.bf16.msra.mxu0 %v6723_v6  ;;  %3771 = vmatprep.mubr.bf16.mxu0 %v6728_v8  ;;  %v6935_v6 = vld [vmem:[%s8957_s1 + $0x474] ss:$8 sps:$4 sm:$0xff]   ;;  %v6829_v7 = vld [vmem:[%s8958_s0 + $0x828] ss:$36 sps:$4 sm:$0xff]   ;;  %v6830_v8 = vld [vmem:[%s8958_s0 + $0x3c0] ss:$36 sps:$4 sm:$0xff]  }
  0xc5   :  { %4084 = vmatprep.subr.bf16.mxu0 %v6758_v9  ;;  %v6831_v9 = vld [vmem:[%s8958_s0 + $0x874] ss:$36 sps:$4 sm:$0xff]  }
  0xc8   :  { %4085 = vmatpush1.bf16.msra.mxu0 %v6756_v10  ;;  %v6833_v10 = vld [vmem:[%s8958_s0 + $0x40c] ss:$36 sps:$4 sm:$0xff]  }
  0xc9   :  { %4086 = vmatprep.subr.bf16.mxu0 %v6791_v13  ;;  %v6840_v13 = vld [vmem:[%s8958_s0 + $0x8bc] ss:$36 sps:$4 sm:$0xff]  }
  0xca   :  { %2873 = vmatmul.mubr.bf16.gmra.mrb[68].mxu1 %v6730_v11  ;;  %v6835_v11 = vld [vmem:[%s8958_s0 + $0x870] ss:$36 sps:$4 sm:$0xff]  }
  0xcb   :  { %3772 = vmatmul.mubr.bf16.gmra.mrb[4].mxu0 %v6731_v12  ;;  %2882 = vmatprep.mubr.bf16.mxu1 %v6732_v14  ;;  %v6839_v12 = vld [vmem:[%s8958_s0 + $0x408] ss:$36 sps:$4 sm:$0xff]   ;;  %v6842_v14 = vld [vmem:[%s8958_s0 + $0x454] ss:$36 sps:$4 sm:$0xff]  }
  0xcc   :  { %3781 = vmatprep.mubr.bf16.mxu0 %v6734_v15  ;;  %4087 = vmatpush1.bf16.msra.mxu0 %v6789_v16  ;;  %v6844_v15 = vld [vmem:[%s8958_s0 + $0x8b8] ss:$36 sps:$4 sm:$0xff]   ;;  %v6845_v16 = vld [vmem:[%s8958_s0 + $0x450] ss:$36 sps:$4 sm:$0xff]  }
  0xcd   :  { %4088 = vmatprep.subr.bf16.mxu0 %v6824_v17  ;;  %v6848_v17 = vld [vmem:[%s8958_s0 + $0xc] ss:$36 sps:$4 sm:$0xff]  }
  0xd0   :  { %4089 = vmatpush1.bf16.msra.mxu0 %v6822_v18  ;;  %v6849_v18 = vld [vmem:[%s8958_s0 + $0x49c] ss:$36 sps:$4 sm:$0xff]  }
  0xd1   :  { %4090 = vmatprep.subr.bf16.mxu0 %v6854_v19  ;;  %v6846_v19 = vld [vmem:[%s8958_s0 + $0x8] ss:$36 sps:$4 sm:$0xff]  }
  0xd2   :  { %2883 = vmatmul.mubr.bf16.gmra.mrb[72].mxu1 %v6736_v20  ;;  %v6851_v20 = vld [vmem:[%s8958_s0 + $0x498] ss:$36 sps:$4 sm:$0xff]  }
  0xd3   :  { %3782 = vmatmul.mubr.bf16.gmra.mrb[8].mxu0 %v6740_v21  ;;  %2892 = vmatprep.mubr.bf16.mxu1 %v6741_v22  ;;  %v6855_v21 = vld [vmem:[%s8958_s0 + $0x54] ss:$36 sps:$4 sm:$0xff]   ;;  %v6857_v22 = vld [vmem:[%s8958_s0 + $0x4e4] ss:$36 sps:$4 sm:$0xff]  }
  0xd4   :  { %3791 = vmatprep.mubr.bf16.mxu0 %v6743_v23  ;;  %4091 = vmatpush1.bf16.msra.mxu0 %v6852_v24  ;;  %v7083_v23 = vld [vmem:[%s8957_s1 + $0x200] ss:$8 sps:$4 sm:$0xff]   ;;  %v7084_v24 = vld [vmem:[%s8957_s1 + $0x214] ss:$8 sps:$4 sm:$0xff]  }
  0xd5   :  { %4092 = vmatprep.subr.bf16.mxu0 %v6881_v34  ;;  %v6866_v34 = vld [vmem:[%s8958_s0 + $0x528] ss:$36 sps:$4 sm:$0xff]  }
  0xd8   :  { %4093 = vmatpush1.bf16.msra.mxu0 %v6879_v33  ;;  %v6865_v33 = vld [vmem:[%s8958_s0 + $0x98] ss:$36 sps:$4 sm:$0xff]  }
  0xd9   :  { %4094 = vmatprep.subr.bf16.mxu0 %v6908_v52  ;;  %v6884_v52 = vld [vmem:[%s8958_s0 + $0x604] ss:$36 sps:$4 sm:$0xff]  }
  0xda   :  { %2893 = vmatmul.mubr.bf16.gmra.mrb[76].mxu1 %v6745_v25  ;;  %v6859_v25 = vld [vmem:[%s8958_s0 + $0x50] ss:$36 sps:$4 sm:$0xff]  }
  0xdb   :  { %3792 = vmatmul.mubr.bf16.gmra.mrb[12].mxu0 %v6746_v26  ;;  %2902 = vmatprep.mubr.bf16.mxu1 %v6747_v27  ;;  %v6860_v26 = vld [vmem:[%s8958_s0 + $0x4e0] ss:$36 sps:$4 sm:$0xff]  }
  0xdc   :  { %3801 = vmatprep.mubr.bf16.mxu0 %v6749_v28  ;;  %4095 = vmatpush1.bf16.msra.mxu0 %v6906_v51  ;;  %v6861_v27 = vld [vmem:[%s8958_s0 + $0x9c] ss:$36 sps:$4 sm:$0xff]   ;;  %v6863_v28 = vld [vmem:[%s8958_s0 + $0x52c] ss:$36 sps:$4 sm:$0xff]   ;;  %v6882_v51 = vld [vmem:[%s8958_s0 + $0x174] ss:$36 sps:$4 sm:$0xff]  }
  0xdd   :  { %4096 = vmatprep.subr.bf16.mxu0 %v6935_v6  ;;  %v7106_v6 = vld [vmem:[%s8957_s1 + $0x2c4] ss:$8 sps:$4 sm:$0xff]  }
  0xe0   :  { %4097 = vmatpush1.bf16.msra.mxu0 %v6933_v5  ;;  %v7105_v5 = vld [vmem:[%s8957_s1 + $0x2b0] ss:$8 sps:$4 sm:$0xff]  }
  0xe2   :  { %2903 = vmatmul.mubr.bf16.gmra.mrb[80].mxu1 %v6751_v29  ;;  %v7085_v29 = vld [vmem:[%s8957_s1 + $0x210] ss:$8 sps:$4 sm:$0xff]  }
  0xe3   :  { %3802 = vmatmul.mubr.bf16.gmra.mrb[16].mxu0 %v6755_v30  ;;  %2912 = vmatprep.mubr.bf16.mxu1 %v6759_v31  ;;  %v7086_v30 = vld [vmem:[%s8957_s1 + $0x224] ss:$8 sps:$4 sm:$0xff]   ;;  %v7087_v31 = vld [vmem:[%s8957_s1 + $0x220] ss:$8 sps:$4 sm:$0xff]  }
  0xe4   :  { %3811 = vmatprep.mubr.bf16.mxu0 %v6761_v32  ;;  %v7088_v32 = vld [vmem:[%s8957_s1 + $0x234] ss:$8 sps:$4 sm:$0xff]  }
  0xea   :  { %2913 = vmatmul.mubr.bf16.gmra.mrb[84].mxu1 %v6763_v35  ;;  %v6867_v35 = vld [vmem:[%s8958_s0 + $0xe4] ss:$36 sps:$4 sm:$0xff]  }
  0xeb   :  { %3812 = vmatmul.mubr.bf16.gmra.mrb[20].mxu0 %v6764_v36  ;;  %2922 = vmatprep.mubr.bf16.mxu1 %v6765_v37  ;;  %v6869_v36 = vld [vmem:[%s8958_s0 + $0x574] ss:$36 sps:$4 sm:$0xff]  }
  0xec   :  { %3821 = vmatprep.mubr.bf16.mxu0 %v6767_v38  ;;  %v7089_v37 = vld [vmem:[%s8957_s1 + $0x230] ss:$8 sps:$4 sm:$0xff]   ;;  %v7090_v38 = vld [vmem:[%s8957_s1 + $0x244] ss:$8 sps:$4 sm:$0xff]  }
  0xf2   :  { %2923 = vmatmul.mubr.bf16.gmra.mrb[88].mxu1 %v6769_v39  ;;  %v7091_v39 = vld [vmem:[%s8957_s1 + $0x240] ss:$8 sps:$4 sm:$0xff]  }
  0xf3   :  { %3822 = vmatmul.mubr.bf16.gmra.mrb[24].mxu0 %v6773_v40  ;;  %2932 = vmatprep.mubr.bf16.mxu1 %v6774_v41  ;;  %v7092_v40 = vld [vmem:[%s8957_s1 + $0x254] ss:$8 sps:$4 sm:$0xff]   ;;  %v6871_v41 = vld [vmem:[%s8958_s0 + $0xe0] ss:$36 sps:$4 sm:$0xff]  }
  0xf4   :  { %3831 = vmatprep.mubr.bf16.mxu0 %v6776_v42  ;;  %v6872_v42 = vld [vmem:[%s8958_s0 + $0x570] ss:$36 sps:$4 sm:$0xff]  }
  0xfa   :  { %2933 = vmatmul.mubr.bf16.gmra.mrb[92].mxu1 %v6778_v43  ;;  %v6873_v43 = vld [vmem:[%s8958_s0 + $0x12c] ss:$36 sps:$4 sm:$0xff]  }
  0xfb   :  { %3832 = vmatmul.mubr.bf16.gmra.mrb[28].mxu0 %v6779_v44  ;;  %2942 = vmatprep.mubr.bf16.mxu1 %v6780_v45  ;;  %v6875_v44 = vld [vmem:[%s8958_s0 + $0x5bc] ss:$36 sps:$4 sm:$0xff]   ;;  %v7093_v45 = vld [vmem:[%s8957_s1 + $0x250] ss:$8 sps:$4 sm:$0xff]  }
  0xfc   :  { %3841 = vmatprep.mubr.bf16.mxu0 %v6782_v46  ;;  %v7094_v46 = vld [vmem:[%s8957_s1 + $0x264] ss:$8 sps:$4 sm:$0xff]  }
 0x102   :  { %2943 = vmatmul.mubr.bf16.gmra.mrb[96].mxu1 %v6784_v47  ;;  %v7095_v47 = vld [vmem:[%s8957_s1 + $0x260] ss:$8 sps:$4 sm:$0xff]  }
 0x103   :  { %3842 = vmatmul.mubr.bf16.gmra.mrb[32].mxu0 %v6788_v48  ;;  %2952 = vmatprep.mubr.bf16.mxu1 %v6792_v49  ;;  %v7096_v48 = vld [vmem:[%s8957_s1 + $0x274] ss:$8 sps:$4 sm:$0xff]   ;;  %v6877_v49 = vld [vmem:[%s8958_s0 + $0x128] ss:$36 sps:$4 sm:$0xff]  }
 0x104   :  { %3851 = vmatprep.mubr.bf16.mxu0 %v6794_v50  ;;  %v6878_v50 = vld [vmem:[%s8958_s0 + $0x5b8] ss:$36 sps:$4 sm:$0xff]  }
 0x10a   :  { %2953 = vmatmul.mubr.bf16.gmra.mrb[100].mxu1 %v6796_v53  ;;  %v7097_v53 = vld [vmem:[%s8957_s1 + $0x270] ss:$8 sps:$4 sm:$0xff]  }
 0x10b   :  { %3852 = vmatmul.mubr.bf16.gmra.mrb[36].mxu0 %v6797_v54  ;;  %2962 = vmatprep.mubr.bf16.mxu1 %v6798_v55  ;;  %v7098_v54 = vld [vmem:[%s8957_s1 + $0x284] ss:$8 sps:$4 sm:$0xff]   ;;  %v7099_v55 = vld [vmem:[%s8957_s1 + $0x280] ss:$8 sps:$4 sm:$0xff]  }
 0x10c   :  { %3861 = vmatprep.mubr.bf16.mxu0 %v6800_v56  ;;  %v7100_v56 = vld [vmem:[%s8957_s1 + $0x294] ss:$8 sps:$4 sm:$0xff]  }
 0x112   :  { %2963 = vmatmul.mubr.bf16.gmra.mrb[104].mxu1 %v6802_v57  ;;  %v6886_v57 = vld [vmem:[%s8958_s0 + $0x170] ss:$36 sps:$4 sm:$0xff]  }
 0x113   :  { %3862 = vmatmul.mubr.bf16.gmra.mrb[40].mxu0 %v6806_v58  ;;  %2972 = vmatprep.mubr.bf16.mxu1 %v6807_v59  ;;  %v6887_v58 = vld [vmem:[%s8958_s0 + $0x600] ss:$36 sps:$4 sm:$0xff]  }
 0x114   :  { %3871 = vmatprep.mubr.bf16.mxu0 %v6809_v60  ;;  %v6888_v59 = vld [vmem:[%s8958_s0 + $0x1bc] ss:$36 sps:$4 sm:$0xff]   ;;  %v6890_v60 = vld [vmem:[%s8958_s0 + $0x64c] ss:$36 sps:$4 sm:$0xff]  }
 0x11a   :  { %2973 = vmatmul.mubr.bf16.gmra.mrb[108].mxu1 %v6811_v61  ;;  %v7101_v61 = vld [vmem:[%s8957_s1 + $0x290] ss:$8 sps:$4 sm:$0xff]  }
 0x11b   :  { %3872 = vmatmul.mubr.bf16.gmra.mrb[44].mxu0 %v6812_v62  ;;  %2982 = vmatprep.mubr.bf16.mxu1 %v6813_v63  ;;  %v7102_v62 = vld [vmem:[%s8957_s1 + $0x2a4] ss:$8 sps:$4 sm:$0xff]   ;;  %v7103_v63 = vld [vmem:[%s8957_s1 + $0x2a0] ss:$8 sps:$4 sm:$0xff]  }
 0x11c   :  { %3881 = vmatprep.mubr.bf16.mxu0 %v6815_v0  ;;  %v7104_v0 = vld [vmem:[%s8957_s1 + $0x2b4] ss:$8 sps:$4 sm:$0xff]  }
 0x122   :  { %2983 = vmatmul.mubr.bf16.gmra.mrb[112].mxu1 %v6817_v1  ;;  %v6892_v1 = vld [vmem:[%s8958_s0 + $0x1b8] ss:$36 sps:$4 sm:$0xff]  }
 0x123   :  { %3882 = vmatmul.mubr.bf16.gmra.mrb[48].mxu0 %v6821_v2  ;;  %2992 = vmatprep.mubr.bf16.mxu1 %v6825_v3  ;;  %v6893_v2 = vld [vmem:[%s8958_s0 + $0x648] ss:$36 sps:$4 sm:$0xff]  }
 0x124   :  { %3891 = vmatprep.mubr.bf16.mxu0 %v6827_v4  ;;  %v6894_v3 = vld [vmem:[%s8958_s0 + $0x204] ss:$36 sps:$4 sm:$0xff]   ;;  %v6896_v4 = vld [vmem:[%s8958_s0 + $0x694] ss:$36 sps:$4 sm:$0xff]  }
 0x12a   :  { %2993 = vmatmul.mubr.bf16.gmra.mrb[116].mxu1 %v6829_v7  ;;  %v7107_v7 = vld [vmem:[%s8957_s1 + $0x2c0] ss:$8 sps:$4 sm:$0xff]  }
 0x12b   :  { %3892 = vmatmul.mubr.bf16.gmra.mrb[52].mxu0 %v6830_v8  ;;  %3002 = vmatprep.mubr.bf16.mxu1 %v6831_v9  ;;  %v7108_v8 = vld [vmem:[%s8957_s1 + $0x2d4] ss:$8 sps:$4 sm:$0xff]   ;;  %v6898_v9 = vld [vmem:[%s8958_s0 + $0x200] ss:$36 sps:$4 sm:$0xff]  }
 0x12c   :  { %3901 = vmatprep.mubr.bf16.mxu0 %v6833_v10  ;;  %v6899_v10 = vld [vmem:[%s8958_s0 + $0x690] ss:$36 sps:$4 sm:$0xff]  }
 0x132   :  { %3003 = vmatmul.mubr.bf16.gmra.mrb[120].mxu1 %v6835_v11  ;;  %v6900_v11 = vld [vmem:[%s8958_s0 + $0x24c] ss:$36 sps:$4 sm:$0xff]  }
 0x133   :  { %3902 = vmatmul.mubr.bf16.gmra.mrb[56].mxu0 %v6839_v12  ;;  %3012 = vmatprep.mubr.bf16.mxu1 %v6840_v13  ;;  %v6902_v12 = vld [vmem:[%s8958_s0 + $0x6dc] ss:$36 sps:$4 sm:$0xff]   ;;  %v7109_v13 = vld [vmem:[%s8957_s1 + $0x2d0] ss:$8 sps:$4 sm:$0xff]  }
 0x134   :  { %3911 = vmatprep.mubr.bf16.mxu0 %v6842_v14  ;;  %v7110_v14 = vld [vmem:[%s8957_s1 + $0x2e4] ss:$8 sps:$4 sm:$0xff]  }
 0x13a   :  { %3013 = vmatmul.mubr.bf16.gmra.mrb[124].mxu1 %v6844_v15  ;;  %v7111_v15 = vld [vmem:[%s8957_s1 + $0x2e0] ss:$8 sps:$4 sm:$0xff]  }
 0x13b   :  { %3912 = vmatmul.mubr.bf16.gmra.mrb[60].mxu0 %v6845_v16  ;;  %3055 = vmatprep.mubr.bf16.mxu1 %v6848_v17  ;;  %v7112_v16 = vld [vmem:[%s8957_s1 + $0x2f4] ss:$8 sps:$4 sm:$0xff]   ;;  %v6904_v17 = vld [vmem:[%s8958_s0 + $0x248] ss:$36 sps:$4 sm:$0xff]  }
 0x13c   :  { %3921 = vmatprep.mubr.bf16.mxu0 %v6849_v18  ;;  %v6905_v18 = vld [vmem:[%s8958_s0 + $0x6d8] ss:$36 sps:$4 sm:$0xff]  }
 0x142   :  { %3056 = vmatmul.mubr.bf16.vlgmr.msra.gmra.mrb[0].mxu1 %v6846_v19  ;;  %v6909_v19 = vld [vmem:[%s8958_s0 + $0x294] ss:$36 sps:$4 sm:$0xff]  }
 0x143   :  { %3922 = vmatmul.mubr.bf16.gmra.mrb[64].mxu0 %v6851_v20  ;;  %5919 = vmatpush1.bf16.msra.mxu1 %v7083_v23  ;;  %v6911_v20 = vld [vmem:[%s8958_s0 + $0x724] ss:$36 sps:$4 sm:$0xff]  }
 0x144   :  { %3065 = vmatprep.mubr.bf16.mxu1 %v6855_v21  ;;  %3931 = vmatprep.mubr.bf16.mxu0 %v6857_v22  ;;  %v7113_v21 = vld [vmem:[%s8957_s1 + $0x2f0] ss:$8 sps:$4 sm:$0xff]   ;;  %v6914_v23 = vld [vmem:[%s8958_s0 + $0x720] ss:$36 sps:$4 sm:$0xff]  }
 0x145   :  { %5904 = vmatprep.subr.bf16.mxu1 %v7084_v24  ;;  %v6913_v22 = vld [vmem:[%s8958_s0 + $0x290] ss:$36 sps:$4 sm:$0xff]   ;;  %v6915_v24 = vld [vmem:[%s8958_s0 + $0x2dc] ss:$36 sps:$4 sm:$0xff]  }
 0x147   :  { %5920 = vmatpush1.bf16.msra.mxu1 %v7085_v29  ;;  %v6923_v29 = vld [vmem:[%s8958_s0 + $0x7b4] ss:$36 sps:$4 sm:$0xff]  }
 0x148   :  { %5905 = vmatprep.subr.bf16.mxu1 %v7086_v30  ;;  %v6925_v30 = vld [vmem:[%s8958_s0 + $0x320] ss:$36 sps:$4 sm:$0xff]  }
 0x14a   :  { %3066 = vmatmul.mubr.bf16.gmra.mrb[4].mxu1 %v6859_v25  ;;  %v6917_v25 = vld [vmem:[%s8958_s0 + $0x76c] ss:$36 sps:$4 sm:$0xff]  }
 0x14b   :  { %3932 = vmatmul.mubr.bf16.gmra.mrb[68].mxu0 %v6860_v26  ;;  %3075 = vmatprep.mubr.bf16.mxu1 %v6861_v27  ;;  %v6919_v26 = vld [vmem:[%s8958_s0 + $0x2d8] ss:$36 sps:$4 sm:$0xff]   ;;  %v6920_v27 = vld [vmem:[%s8958_s0 + $0x768] ss:$36 sps:$4 sm:$0xff]  }
 0x14c   :  { %3941 = vmatprep.mubr.bf16.mxu0 %v6863_v28  ;;  %5921 = vmatpush1.bf16.msra.mxu1 %v7087_v31  ;;  %v6921_v28 = vld [vmem:[%s8958_s0 + $0x324] ss:$36 sps:$4 sm:$0xff]   ;;  %v6926_v31 = vld [vmem:[%s8958_s0 + $0x7b0] ss:$36 sps:$4 sm:$0xff]  }
 0x14d   :  { %5906 = vmatprep.subr.bf16.mxu1 %v7088_v32  ;;  %v6927_v32 = vld [vmem:[%s8958_s0 + $0x36c] ss:$36 sps:$4 sm:$0xff]  }
 0x150   :  { %5922 = vmatpush1.bf16.msra.mxu1 %v7089_v37  ;;  %v6938_v37 = vld [vmem:[%s8958_s0 + $0x844] ss:$36 sps:$4 sm:$0xff]  }
 0x151   :  { %5907 = vmatprep.subr.bf16.mxu1 %v7090_v38  ;;  %v6940_v38 = vld [vmem:[%s8958_s0 + $0x3b0] ss:$36 sps:$4 sm:$0xff]  }
 0x152   :  { %3076 = vmatmul.mubr.bf16.gmra.mrb[8].mxu1 %v6865_v33  ;;  %v6929_v33 = vld [vmem:[%s8958_s0 + $0x7fc] ss:$36 sps:$4 sm:$0xff]  }
 0x153   :  { %3942 = vmatmul.mubr.bf16.gmra.mrb[72].mxu0 %v6866_v34  ;;  %3085 = vmatprep.mubr.bf16.mxu1 %v6867_v35  ;;  %v6931_v34 = vld [vmem:[%s8958_s0 + $0x368] ss:$36 sps:$4 sm:$0xff]   ;;  %v6932_v35 = vld [vmem:[%s8958_s0 + $0x7f8] ss:$36 sps:$4 sm:$0xff]  }
 0x154   :  { %3951 = vmatprep.mubr.bf16.mxu0 %v6869_v36  ;;  %5923 = vmatpush1.bf16.msra.mxu1 %v7091_v39  ;;  %v6936_v36 = vld [vmem:[%s8958_s0 + $0x3b4] ss:$36 sps:$4 sm:$0xff]   ;;  %v6941_v39 = vld [vmem:[%s8958_s0 + $0x840] ss:$36 sps:$4 sm:$0xff]  }
 0x155   :  { %5908 = vmatprep.subr.bf16.mxu1 %v7092_v40  ;;  %v6942_v40 = vld [vmem:[%s8958_s0 + $0x3fc] ss:$36 sps:$4 sm:$0xff]  }
 0x158   :  { %5924 = vmatpush1.bf16.msra.mxu1 %v7093_v45  ;;  %v6950_v45 = vld [vmem:[%s8958_s0 + $0x8d4] ss:$36 sps:$4 sm:$0xff]  }
 0x159   :  { %5909 = vmatprep.subr.bf16.mxu1 %v7094_v46  ;;  %v6952_v46 = vld [vmem:[%s8958_s0 + $0x440] ss:$36 sps:$4 sm:$0xff]  }
 0x15a   :  { %3086 = vmatmul.mubr.bf16.gmra.mrb[12].mxu1 %v6871_v41  ;;  %v6944_v41 = vld [vmem:[%s8958_s0 + $0x88c] ss:$36 sps:$4 sm:$0xff]  }
 0x15b   :  { %3952 = vmatmul.mubr.bf16.gmra.mrb[76].mxu0 %v6872_v42  ;;  %3095 = vmatprep.mubr.bf16.mxu1 %v6873_v43  ;;  %v6946_v42 = vld [vmem:[%s8958_s0 + $0x3f8] ss:$36 sps:$4 sm:$0xff]   ;;  %v6947_v43 = vld [vmem:[%s8958_s0 + $0x888] ss:$36 sps:$4 sm:$0xff]  }
 0x15c   :  { %3961 = vmatprep.mubr.bf16.mxu0 %v6875_v44  ;;  %5925 = vmatpush1.bf16.msra.mxu1 %v7095_v47  ;;  %v6948_v44 = vld [vmem:[%s8958_s0 + $0x444] ss:$36 sps:$4 sm:$0xff]   ;;  %v6953_v47 = vld [vmem:[%s8958_s0 + $0x8d0] ss:$36 sps:$4 sm:$0xff]  }
 0x15d   :  { %5910 = vmatprep.subr.bf16.mxu1 %v7096_v48  ;;  %v6954_v48 = vld [vmem:[%s8958_s0 + $0x48c] ss:$36 sps:$4 sm:$0xff]  }
 0x160   :  { %5926 = vmatpush1.bf16.msra.mxu1 %v7097_v53  ;;  %v6960_v53 = vld [vmem:[%s8958_s0 + $0x4d0] ss:$36 sps:$4 sm:$0xff]  }
 0x161   :  { %5911 = vmatprep.subr.bf16.mxu1 %v7098_v54  ;;  %v6961_v54 = vld [vmem:[%s8958_s0 + $0x68] ss:$36 sps:$4 sm:$0xff]  }
 0x162   :  { %3096 = vmatmul.mubr.bf16.gmra.mrb[16].mxu1 %v6877_v49  ;;  %v8961_v49 = vmov 0  }
 0x163   :  { %3962 = vmatmul.mubr.bf16.gmra.mrb[80].mxu0 %v6878_v50  ;;  %3105 = vmatprep.mubr.bf16.mxu1 %v6882_v51  ;;  %v6956_v50 = vld [vmem:[%s8958_s0 + $0x488] ss:$36 sps:$4 sm:$0xff]   ;;  %v6957_v51 = vld [vmem:[%s8958_s0 + $0x20] ss:$36 sps:$4 sm:$0xff]  }
 0x164   :  { %3971 = vmatprep.mubr.bf16.mxu0 %v6884_v52  ;;  %5927 = vmatpush1.bf16.msra.mxu1 %v7099_v55  ;;  %v6958_v52 = vld [vmem:[%s8958_s0 + $0x4d4] ss:$36 sps:$4 sm:$0xff]   ;;  %v6962_v55 = vld [vmem:[%s8958_s0 + $0x51c] ss:$36 sps:$4 sm:$0xff]  }
 0x165   :  { %5912 = vmatprep.subr.bf16.mxu1 %v7100_v56  ;;  %v6964_v56 = vld [vmem:[%s8958_s0 + $0x518] ss:$36 sps:$4 sm:$0xff]  }
 0x168   :  { %5928 = vmatpush1.bf16.msra.mxu1 %v7101_v61  ;;  %v6970_v61 = vld [vmem:[%s8958_s0 + $0x5ac] ss:$36 sps:$4 sm:$0xff]  }
 0x169   :  { %5913 = vmatprep.subr.bf16.mxu1 %v7102_v62  ;;  %v6972_v62 = vld [vmem:[%s8958_s0 + $0x5a8] ss:$36 sps:$4 sm:$0xff]  }
 0x16a   :  { %3106 = vmatmul.mubr.bf16.gmra.mrb[20].mxu1 %v6886_v57  ;;  %v6965_v57 = vld [vmem:[%s8958_s0 + $0xb0] ss:$36 sps:$4 sm:$0xff]  }
 0x16b   :  { %3972 = vmatmul.mubr.bf16.gmra.mrb[84].mxu0 %v6887_v58  ;;  %3115 = vmatprep.mubr.bf16.mxu1 %v6888_v59  ;;  %v6966_v58 = vld [vmem:[%s8958_s0 + $0x564] ss:$36 sps:$4 sm:$0xff]  }
 0x16c   :  { %3981 = vmatprep.mubr.bf16.mxu0 %v6890_v60  ;;  %5929 = vmatpush1.bf16.msra.mxu1 %v7103_v63  ;;  %v6968_v59 = vld [vmem:[%s8958_s0 + $0x560] ss:$36 sps:$4 sm:$0xff]   ;;  %v6969_v60 = vld [vmem:[%s8958_s0 + $0xf8] ss:$36 sps:$4 sm:$0xff]  }
 0x16d   :  { %5914 = vmatprep.subr.bf16.mxu1 %v7104_v0  ;;  %v6973_v63 = vld [vmem:[%s8958_s0 + $0x140] ss:$36 sps:$4 sm:$0xff]   ;;  %v6974_v0 = vld [vmem:[%s8958_s0 + $0x5f4] ss:$36 sps:$4 sm:$0xff]  }
 0x170   :  { %5930 = vmatpush1.bf16.msra.mxu1 %v7105_v5  ;;  %v6981_v5 = vld [vmem:[%s8958_s0 + $0x1d0] ss:$36 sps:$4 sm:$0xff]  }
 0x171   :  { %5915 = vmatprep.subr.bf16.mxu1 %v7106_v6  ;;  %v6982_v6 = vld [vmem:[%s8958_s0 + $0x684] ss:$36 sps:$4 sm:$0xff]  }
 0x172   :  { %3116 = vmatmul.mubr.bf16.gmra.mrb[24].mxu1 %v6892_v1  ;;  %v6976_v1 = vld [vmem:[%s8958_s0 + $0x5f0] ss:$36 sps:$4 sm:$0xff]  }
 0x173   :  { %3982 = vmatmul.mubr.bf16.gmra.mrb[88].mxu0 %v6893_v2  ;;  %3125 = vmatprep.mubr.bf16.mxu1 %v6894_v3  ;;  %v6977_v2 = vld [vmem:[%s8958_s0 + $0x188] ss:$36 sps:$4 sm:$0xff]   ;;  %v6978_v3 = vld [vmem:[%s8958_s0 + $0x63c] ss:$36 sps:$4 sm:$0xff]  }
 0x174   :  { %3991 = vmatprep.mubr.bf16.mxu0 %v6896_v4  ;;  %5931 = vmatpush1.bf16.msra.mxu1 %v7107_v7  ;;  %v6980_v4 = vld [vmem:[%s8958_s0 + $0x638] ss:$36 sps:$4 sm:$0xff]   ;;  %v6984_v7 = vld [vmem:[%s8958_s0 + $0x680] ss:$36 sps:$4 sm:$0xff]  }
 0x175   :  { %5916 = vmatprep.subr.bf16.mxu1 %v7108_v8  ;;  %v6985_v8 = vld [vmem:[%s8958_s0 + $0x218] ss:$36 sps:$4 sm:$0xff]  }
 0x178   :  { %5932 = vmatpush1.bf16.msra.mxu1 %v7109_v13  ;;  %v6992_v13 = vld [vmem:[%s8958_s0 + $0x710] ss:$36 sps:$4 sm:$0xff]  }
 0x179   :  { %5917 = vmatprep.subr.bf16.mxu1 %v7110_v14  ;;  %v6993_v14 = vld [vmem:[%s8958_s0 + $0x2a8] ss:$36 sps:$4 sm:$0xff]  }
 0x17a   :  { %3126 = vmatmul.mubr.bf16.gmra.mrb[28].mxu1 %v6898_v9  ;;  %v6986_v9 = vld [vmem:[%s8958_s0 + $0x6cc] ss:$36 sps:$4 sm:$0xff]  }
 0x17b   :  { %3992 = vmatmul.mubr.bf16.gmra.mrb[92].mxu0 %v6899_v10  ;;  %3135 = vmatprep.mubr.bf16.mxu1 %v6900_v11  ;;  %v6988_v10 = vld [vmem:[%s8958_s0 + $0x6c8] ss:$36 sps:$4 sm:$0xff]   ;;  %v6989_v11 = vld [vmem:[%s8958_s0 + $0x260] ss:$36 sps:$4 sm:$0xff]  }
 0x17c   :  { %4001 = vmatprep.mubr.bf16.mxu0 %v6902_v12  ;;  %5933 = vmatpush1.bf16.msra.mxu1 %v7111_v15  ;;  %v6990_v12 = vld [vmem:[%s8958_s0 + $0x714] ss:$36 sps:$4 sm:$0xff]   ;;  %v6994_v15 = vld [vmem:[%s8958_s0 + $0x75c] ss:$36 sps:$4 sm:$0xff]  }
 0x17d   :  { %5918 = vmatprep.subr.bf16.mxu1 %v7112_v16  ;;  %v6996_v16 = vld [vmem:[%s8958_s0 + $0x758] ss:$36 sps:$4 sm:$0xff]  }
 0x180   :  { %5934 = vmatpush1.bf16.msra.mxu1 %v7113_v21  ;;  %v7000_v21 = vld [vmem:[%s8958_s0 + $0x7a0] ss:$36 sps:$4 sm:$0xff]  }
 0x182   :  { %3136 = vmatmul.mubr.bf16.gmra.mrb[32].mxu1 %v6904_v17  ;;  %v6997_v17 = vld [vmem:[%s8958_s0 + $0x2f0] ss:$36 sps:$4 sm:$0xff]  }
 0x183   :  { %4002 = vmatmul.mubr.bf16.gmra.mrb[96].mxu0 %v6905_v18  ;;  %3145 = vmatprep.mubr.bf16.mxu1 %v6909_v19  ;;  %v6998_v18 = vld [vmem:[%s8958_s0 + $0x7a4] ss:$36 sps:$4 sm:$0xff]  }
 0x184   :  { %4011 = vmatprep.mubr.bf16.mxu0 %v6911_v20 }
 0x18a   :  { %3146 = vmatmul.mubr.bf16.gmra.mrb[36].mxu1 %v6913_v22  ;;  %v7001_v22 = vld [vmem:[%s8958_s0 + $0x338] ss:$36 sps:$4 sm:$0xff]  }
 0x18b   :  { %4012 = vmatmul.mubr.bf16.gmra.mrb[100].mxu0 %v6914_v23  ;;  %3155 = vmatprep.mubr.bf16.mxu1 %v6915_v24  ;;  %v7002_v24 = vld [vmem:[%s8958_s0 + $0x7ec] ss:$36 sps:$4 sm:$0xff]  }
 0x18c   :  { %4021 = vmatprep.mubr.bf16.mxu0 %v6917_v25 }
 0x192   :  { %3156 = vmatmul.mubr.bf16.gmra.mrb[40].mxu1 %v6919_v26 }
 0x193   :  { %4022 = vmatmul.mubr.bf16.gmra.mrb[104].mxu0 %v6920_v27  ;;  %3165 = vmatprep.mubr.bf16.mxu1 %v6921_v28  ;;  %v7004_v28 = vld [vmem:[%s8958_s0 + $0x7e8] ss:$36 sps:$4 sm:$0xff]  }
 0x194   :  { %4031 = vmatprep.mubr.bf16.mxu0 %v6923_v29  ;;  %v7005_v29 = vld [vmem:[%s8958_s0 + $0x380] ss:$36 sps:$4 sm:$0xff]  }
 0x19a   :  { %3166 = vmatmul.mubr.bf16.gmra.mrb[44].mxu1 %v6925_v30 }
 0x19b   :  { %4032 = vmatmul.mubr.bf16.gmra.mrb[108].mxu0 %v6926_v31  ;;  %3175 = vmatprep.mubr.bf16.mxu1 %v6927_v32  ;;  %v7006_v31 = vld [vmem:[%s8958_s0 + $0x834] ss:$36 sps:$4 sm:$0xff]  }
 0x19c   :  { %4041 = vmatprep.mubr.bf16.mxu0 %v6929_v33 }
 0x1a2   :  { %3176 = vmatmul.mubr.bf16.gmra.mrb[48].mxu1 %v6931_v34 }
 0x1a3   :  { %4042 = vmatmul.mubr.bf16.gmra.mrb[112].mxu0 %v6932_v35  ;;  %3185 = vmatprep.mubr.bf16.mxu1 %v6936_v36  ;;  %v7008_v35 = vld [vmem:[%s8958_s0 + $0x830] ss:$36 sps:$4 sm:$0xff]   ;;  %v7009_v36 = vld [vmem:[%s8958_s0 + $0x3c8] ss:$36 sps:$4 sm:$0xff]  }
 0x1a4   :  { %4051 = vmatprep.mubr.bf16.mxu0 %v6938_v37 }
 0x1aa   :  { %3186 = vmatmul.mubr.bf16.gmra.mrb[52].mxu1 %v6940_v38  ;;  %v7010_v38 = vld [vmem:[%s8958_s0 + $0x87c] ss:$36 sps:$4 sm:$0xff]  }
 0x1ab   :  { %4052 = vmatmul.mubr.bf16.gmra.mrb[116].mxu0 %v6941_v39  ;;  %3195 = vmatprep.mubr.bf16.mxu1 %v6942_v40 }
 0x1ac   :  { %4061 = vmatprep.mubr.bf16.mxu0 %v6944_v41 }
 0x1b2   :  { %3196 = vmatmul.mubr.bf16.gmra.mrb[56].mxu1 %v6946_v42  ;;  %v7012_v42 = vld [vmem:[%s8958_s0 + $0x878] ss:$36 sps:$4 sm:$0xff]  }
 0x1b3   :  { %4062 = vmatmul.mubr.bf16.gmra.mrb[120].mxu0 %v6947_v43  ;;  %3205 = vmatprep.mubr.bf16.mxu1 %v6948_v44  ;;  %v7013_v43 = vld [vmem:[%s8958_s0 + $0x410] ss:$36 sps:$4 sm:$0xff]  }
 0x1b4   :  { %4071 = vmatprep.mubr.bf16.mxu0 %v6950_v45  ;;  %v7014_v45 = vld [vmem:[%s8958_s0 + $0x8c4] ss:$36 sps:$4 sm:$0xff]  }
 0x1ba   :  { %3206 = vmatmul.mubr.bf16.gmra.mrb[60].mxu1 %v6952_v46 }
 0x1bb   :  { %4072 = vmatmul.mubr.bf16.gmra.mrb[124].mxu0 %v6953_v47  ;;  %3215 = vmatprep.mubr.bf16.mxu1 %v6954_v48 }
 0x1bc   :  { %4114 = vmatprep.mubr.bf16.mxu0 %v8961_v49 }
 0x1c2   :  { %3216 = vmatmul.mubr.bf16.gmra.mrb[64].mxu1 %v6956_v50  ;;  %v7016_v50 = vld [vmem:[%s8958_s0 + $0x8c0] ss:$36 sps:$4 sm:$0xff]  }
 0x1c3   :  { %4115 = vmatmul.mubr.bf16.vlgmr.msra.gmra.mrb[0].mxu0 %v6957_v51  ;;  %3225 = vmatprep.mubr.bf16.mxu1 %v6958_v52  ;;  %v7017_v51 = vld [vmem:[%s8958_s0 + $0x458] ss:$36 sps:$4 sm:$0xff]  }
 0x1c4   :  { %4124 = vmatprep.mubr.bf16.mxu0 %v8961_v49 }
 0x1ca   :  { %3226 = vmatmul.mubr.bf16.gmra.mrb[68].mxu1 %v6960_v53  ;;  %v7020_v53 = vld [vmem:[%s8958_s0 + $0x494] ss:$36 sps:$4 sm:$0xff]  }
 0x1cb   :  { %4125 = vmatmul.mubr.bf16.gmra.mrb[4].mxu0 %v6961_v54  ;;  %3235 = vmatprep.mubr.bf16.mxu1 %v6962_v55 }
 0x1cc   :  { %4134 = vmatprep.mubr.bf16.mxu0 %v8961_v49 }
 0x1d2   :  { %3236 = vmatmul.mubr.bf16.gmra.mrb[72].mxu1 %v6964_v56 }
 0x1d3   :  { %4135 = vmatmul.mubr.bf16.gmra.mrb[8].mxu0 %v6965_v57  ;;  %3245 = vmatprep.mubr.bf16.mxu1 %v6966_v58  ;;  %v7018_v57 = vld [vmem:[%s8958_s0 + $0x490] ss:$36 sps:$4 sm:$0xff]   ;;  %v7021_v58 = vld [vmem:[%s8958_s0 + $0x4a0] ss:$36 sps:$4 sm:$0xff]  }
 0x1d4   :  { %4144 = vmatprep.mubr.bf16.mxu0 %v8961_v49 }
 0x1da   :  { %3246 = vmatmul.mubr.bf16.gmra.mrb[76].mxu1 %v6968_v59 }
 0x1db   :  { %4145 = vmatmul.mubr.bf16.gmra.mrb[12].mxu0 %v6969_v60  ;;  %3255 = vmatprep.mubr.bf16.mxu1 %v6970_v61  ;;  %v7022_v60 = vld [vmem:[%s8958_s0 + $0x4dc] ss:$36 sps:$4 sm:$0xff]  }
 0x1dc   :  { %4154 = vmatprep.mubr.bf16.mxu0 %v8961_v49 }
 0x1e2   :  { %3256 = vmatmul.mubr.bf16.gmra.mrb[80].mxu1 %v6972_v62 }
 0x1e3   :  { %4155 = vmatmul.mubr.bf16.gmra.mrb[16].mxu0 %v6973_v63  ;;  %3265 = vmatprep.mubr.bf16.mxu1 %v6974_v0  ;;  %v7024_v0 = vld [vmem:[%s8958_s0 + $0x4d8] ss:$36 sps:$4 sm:$0xff]  }
 0x1e4   :  { %4164 = vmatprep.mubr.bf16.mxu0 %v8961_v49 }
 0x1ea   :  { %3266 = vmatmul.mubr.bf16.gmra.mrb[84].mxu1 %v6976_v1  ;;  %v7025_v1 = vld [vmem:[%s8958_s0 + $0x4e8] ss:$36 sps:$4 sm:$0xff]  }
 0x1eb   :  { %4165 = vmatmul.mubr.bf16.gmra.mrb[20].mxu0 %v6977_v2  ;;  %3275 = vmatprep.mubr.bf16.mxu1 %v6978_v3  ;;  %v7026_v3 = vld [vmem:[%s8958_s0 + $0x524] ss:$36 sps:$4 sm:$0xff]  }
 0x1ec   :  { %4174 = vmatprep.mubr.bf16.mxu0 %v8961_v49 }
 0x1f2   :  { %3276 = vmatmul.mubr.bf16.gmra.mrb[88].mxu1 %v6980_v4 }
 0x1f3   :  { %4175 = vmatmul.mubr.bf16.gmra.mrb[24].mxu0 %v6981_v5  ;;  %3285 = vmatprep.mubr.bf16.mxu1 %v6982_v6 }
 0x1f4   :  { %4184 = vmatprep.mubr.bf16.mxu0 %v8961_v49 }
 0x1fa   :  { %3286 = vmatmul.mubr.bf16.gmra.mrb[92].mxu1 %v6984_v7  ;;  %v7028_v7 = vld [vmem:[%s8958_s0 + $0x520] ss:$36 sps:$4 sm:$0xff]  }
 0x1fb   :  { %4185 = vmatmul.mubr.bf16.gmra.mrb[28].mxu0 %v6985_v8  ;;  %3295 = vmatprep.mubr.bf16.mxu1 %v6986_v9  ;;  %v7029_v8 = vld [vmem:[%s8958_s0 + $0x530] ss:$36 sps:$4 sm:$0xff]  }
 0x1fc   :  { %4194 = vmatprep.mubr.bf16.mxu0 %v8961_v49 }
 0x202   :  { %3296 = vmatmul.mubr.bf16.gmra.mrb[96].mxu1 %v6988_v10  ;;  %v7030_v10 = vld [vmem:[%s8958_s0 + $0x56c] ss:$36 sps:$4 sm:$0xff]  }
 0x203   :  { %4195 = vmatmul.mubr.bf16.gmra.mrb[32].mxu0 %v6989_v11  ;;  %3305 = vmatprep.mubr.bf16.mxu1 %v6990_v12 }
 0x204   :  { %4204 = vmatprep.mubr.bf16.mxu0 %v8961_v49 }
 0x20a   :  { %3306 = vmatmul.mubr.bf16.gmra.mrb[100].mxu1 %v6992_v13 }
 0x20b   :  { %4205 = vmatmul.mubr.bf16.gmra.mrb[36].mxu0 %v6993_v14  ;;  %3315 = vmatprep.mubr.bf16.mxu1 %v6994_v15  ;;  %v7032_v14 = vld [vmem:[%s8958_s0 + $0x568] ss:$36 sps:$4 sm:$0xff]   ;;  %v7033_v15 = vld [vmem:[%s8958_s0 + $0x578] ss:$36 sps:$4 sm:$0xff]  }
 0x20c   :  { %4214 = vmatprep.mubr.bf16.mxu0 %v8961_v49 }
 0x212   :  { %3316 = vmatmul.mubr.bf16.gmra.mrb[104].mxu1 %v6996_v16 }
 0x213   :  { %4215 = vmatmul.mubr.bf16.gmra.mrb[40].mxu0 %v6997_v17  ;;  %3325 = vmatprep.mubr.bf16.mxu1 %v6998_v18  ;;  %v7034_v17 = vld [vmem:[%s8958_s0 + $0x5b4] ss:$36 sps:$4 sm:$0xff]  }
 0x214   :  { %4224 = vmatprep.mubr.bf16.mxu0 %v8961_v49 }
 0x215   :  { %v8355_v19 = vpop.f32.mrb[0].mxu1 }
 0x216   :  { %v8357_v20 = vpop.f32.mrb[1].mxu1 }
 0x217   :  { %v8365_v23 = vpop.f32.mrb[2].mxu1 }
 0x218   :  { %v8370_v25 = vpop.f32.mrb[3].mxu1 }
 0x21a   :  { %3326 = vmatmul.mubr.bf16.gmra.mrb[108].mxu1 %v7000_v21 }
 0x21b   :  { %4225 = vmatmul.mubr.bf16.gmra.mrb[44].mxu0 %v7001_v22  ;;  %3335 = vmatprep.mubr.bf16.mxu1 %v7002_v24  ;;  %v7036_v24 = vld [vmem:[%s8958_s0 + $0x5b0] ss:$36 sps:$4 sm:$0xff]  }
 0x21c   :  { %4234 = vmatprep.mubr.bf16.mxu0 %v8961_v49 }
 0x21d   :  { %v8373_v26 = vpop.f32.mrb[4].mxu1 }
 0x21e   :  { %v8375_v27 = vpop.f32.mrb[5].mxu1 }
 0x21f   :  { %v8383_v30 = vpop.f32.mrb[6].mxu1 }
 0x220   :  { %v8388_v32 = vpop.f32.mrb[7].mxu1 }
 0x222   :  { %3336 = vmatmul.mubr.bf16.gmra.mrb[112].mxu1 %v7004_v28  ;;  %v7037_v28 = vld [vmem:[%s8958_s0 + $0x5c0] ss:$36 sps:$4 sm:$0xff]  }
 0x223   :  { %4235 = vmatmul.mubr.bf16.gmra.mrb[48].mxu0 %v7005_v29  ;;  %3345 = vmatprep.mubr.bf16.mxu1 %v7006_v31  ;;  %v7038_v31 = vld [vmem:[%s8958_s0 + $0x5fc] ss:$36 sps:$4 sm:$0xff]  }
 0x224   :  { %4244 = vmatprep.mubr.bf16.mxu0 %v8961_v49 }
 0x225   :  { %v8391_v33 = vpop.f32.mrb[8].mxu1 }
 0x226   :  { %v8393_v34 = vpop.f32.mrb[9].mxu1 }
 0x227   :  { %v8401_v37 = vpop.f32.mrb[10].mxu1 }
 0x228   :  { %v8406_v39 = vpop.f32.mrb[11].mxu1 }
 0x22a   :  { %3346 = vmatmul.mubr.bf16.gmra.mrb[116].mxu1 %v7008_v35 }
 0x22b   :  { %4245 = vmatmul.mubr.bf16.gmra.mrb[52].mxu0 %v7009_v36  ;;  %3355 = vmatprep.mubr.bf16.mxu1 %v7010_v38 }
 0x22c   :  { %4254 = vmatprep.mubr.bf16.mxu0 %v8961_v49 }
 0x22d   :  { %v8409_v40 = vpop.f32.mrb[12].mxu1 }
 0x22e   :  { %v8411_v41 = vpop.f32.mrb[13].mxu1 }
 0x22f   :  { %v8419_v44 = vpop.f32.mrb[14].mxu1 }
 0x230   :  { %v8424_v46 = vpop.f32.mrb[15].mxu1 }
 0x232   :  { %3356 = vmatmul.mubr.bf16.gmra.mrb[120].mxu1 %v7012_v42  ;;  %v7040_v42 = vld [vmem:[%s8958_s0 + $0x5f8] ss:$36 sps:$4 sm:$0xff]  }
 0x233   :  { %4255 = vmatmul.mubr.bf16.gmra.mrb[56].mxu0 %v7013_v43  ;;  %3365 = vmatprep.mubr.bf16.mxu1 %v7014_v45  ;;  %v7041_v43 = vld [vmem:[%s8958_s0 + $0x608] ss:$36 sps:$4 sm:$0xff]  }
 0x234   :  { %4264 = vmatprep.mubr.bf16.mxu0 %v8961_v49 }
 0x235   :  { %v8427_v47 = vpop.f32.mrb[16].mxu1 }
 0x236   :  { %v8429_v48 = vpop.f32.mrb[17].mxu1 }
 0x237   :  { %v8437_v52 = vpop.f32.mrb[18].mxu1 }
 0x238   :  { %v8442_v54 = vpop.f32.mrb[19].mxu1 }
 0x23a   :  { %3366 = vmatmul.mubr.bf16.gmra.mrb[124].mxu1 %v7016_v50  ;;  %v7042_v50 = vld [vmem:[%s8958_s0 + $0x644] ss:$36 sps:$4 sm:$0xff]  }
 0x23b   :  { %4265 = vmatmul.mubr.bf16.gmra.mrb[60].mxu0 %v7017_v51  ;;  %3568 = vmatprep.mubr.bf16.mxu1 %v7020_v53 }
 0x23c   :  { %4274 = vmatprep.mubr.bf16.mxu0 %v8961_v49 }
 0x23d   :  { %v8445_v55 = vpop.f32.mrb[20].mxu1 }
 0x23e   :  { %v8447_v56 = vpop.f32.mrb[21].mxu1 }
 0x23f   :  { %v8455_v59 = vpop.f32.mrb[22].mxu1 }
 0x240   :  { %v8460_v61 = vpop.f32.mrb[23].mxu1 }
 0x242   :  { %3569 = vmatmul.mubr.bf16.vlgmr.msra.gmra.mrb[64].mxu1 %v7018_v57 }
 0x243   :  { %4275 = vmatmul.mubr.bf16.gmra.mrb[64].mxu0 %v7021_v58  ;;  %3578 = vmatprep.mubr.bf16.mxu1 %v7022_v60  ;;  %v7044_v58 = vld [vmem:[%s8958_s0 + $0x640] ss:$36 sps:$4 sm:$0xff]   ;;  %v7045_v60 = vld [vmem:[%s8958_s0 + $0x650] ss:$36 sps:$4 sm:$0xff]  }
 0x244   :  { %4284 = vmatprep.mubr.bf16.mxu0 %v8961_v49 }
 0x245   :  { %v8463_v62 = vpop.f32.mrb[24].mxu1 }
 0x246   :  { %v8465_v63 = vpop.f32.mrb[25].mxu1 }
 0x247   :  { %v8473_v2 = vpop.f32.mrb[26].mxu1 }
 0x248   :  { %v8478_v4 = vpop.f32.mrb[27].mxu1 }
 0x24a   :  { %3579 = vmatmul.mubr.bf16.gmra.mrb[68].mxu1 %v7024_v0 }
 0x24b   :  { %4285 = vmatmul.mubr.bf16.gmra.mrb[68].mxu0 %v7025_v1  ;;  %3588 = vmatprep.mubr.bf16.mxu1 %v7026_v3  ;;  %v7046_v1 = vld [vmem:[%s8958_s0 + $0x68c] ss:$36 sps:$4 sm:$0xff]  }
 0x24c   :  { %4294 = vmatprep.mubr.bf16.mxu0 %v8961_v49 }
 0x24d   :  { %v8481_v5 = vpop.f32.mrb[28].mxu1 }
 0x24e   :  { %v8483_v6 = vpop.f32.mrb[29].mxu1 }
 0x24f   :  { %v8491_v9 = vpop.f32.mrb[30].mxu1 }
 0x250   :  { %v8496_v11 = vpop.f32.mrb[31].mxu1 }
 0x252   :  { %3589 = vmatmul.mubr.bf16.gmra.mrb[72].mxu1 %v7028_v7 }
 0x253   :  { %4295 = vmatmul.mubr.bf16.gmra.mrb[72].mxu0 %v7029_v8  ;;  %3598 = vmatprep.mubr.bf16.mxu1 %v7030_v10  ;;  %v7048_v10 = vld [vmem:[%s8958_s0 + $0x688] ss:$36 sps:$4 sm:$0xff]  }
 0x254   :  { %4304 = vmatprep.mubr.bf16.mxu0 %v8961_v49 }
 0x255   :  { %v8499_v12 = vpop.f32.mrb[32].mxu1 }
 0x256   :  { %v8501_v13 = vpop.f32.mrb[33].mxu1 }
 0x257   :  { %v8509_v16 = vpop.f32.mrb[34].mxu1 }
 0x258   :  { %v8514_v18 = vpop.f32.mrb[35].mxu1 }
 0x25a   :  { %3599 = vmatmul.mubr.bf16.gmra.mrb[76].mxu1 %v7032_v14  ;;  %v7049_v14 = vld [vmem:[%s8958_s0 + $0x698] ss:$36 sps:$4 sm:$0xff]  }
 0x25b   :  { %4305 = vmatmul.mubr.bf16.gmra.mrb[76].mxu0 %v7033_v15  ;;  %3608 = vmatprep.mubr.bf16.mxu1 %v7034_v17  ;;  %v7050_v17 = vld [vmem:[%s8958_s0 + $0x6d4] ss:$36 sps:$4 sm:$0xff]  }
 0x25c   :  { %4314 = vmatprep.mubr.bf16.mxu0 %v8961_v49 }
 0x25d   :  { %v8517_v21 = vpop.f32.mrb[36].mxu1 }
 0x25e   :  { %v8519_v22 = vpop.f32.mrb[37].mxu1 }
 0x25f   :  { %v8527_v29 = vpop.f32.mrb[38].mxu1 }
 0x260   :  { %v8532_v35 = vpop.f32.mrb[39].mxu1 }
 0x262   :  { %3609 = vmatmul.mubr.bf16.gmra.mrb[80].mxu1 %v7036_v24 }
 0x263   :  { %4315 = vmatmul.mubr.bf16.gmra.mrb[80].mxu0 %v7037_v28  ;;  %3618 = vmatprep.mubr.bf16.mxu1 %v7038_v31 }
 0x264   :  { %4324 = vmatprep.mubr.bf16.mxu0 %v8961_v49 }
 0x265   :  { %v8535_v36 = vpop.f32.mrb[40].mxu1 }
 0x266   :  { %v8537_v38 = vpop.f32.mrb[41].mxu1 }
 0x267   :  { %v8545_v45 = vpop.f32.mrb[42].mxu1 }
 0x268   :  { %v8550_v51 = vpop.f32.mrb[43].mxu1 }
 0x26a   :  { %3619 = vmatmul.mubr.bf16.gmra.mrb[84].mxu1 %v7040_v42  ;;  %v7052_v42 = vld [vmem:[%s8958_s0 + $0x6d0] ss:$36 sps:$4 sm:$0xff]  }
 0x26b   :  { %4325 = vmatmul.mubr.bf16.gmra.mrb[84].mxu0 %v7041_v43  ;;  %3628 = vmatprep.mubr.bf16.mxu1 %v7042_v50  ;;  %v7053_v43 = vld [vmem:[%s8958_s0 + $0x6e0] ss:$36 sps:$4 sm:$0xff]  }
 0x26c   :  { %4334 = vmatprep.mubr.bf16.mxu0 %v8961_v49 }
 0x26d   :  { %v8553_v53 = vpop.f32.mrb[44].mxu1 }
 0x26e   :  { %v8555_v57 = vpop.f32.mrb[45].mxu1 }
 0x26f   :  { %8963 = vst [vmem:[#allocation2_spill] sm:$0xff] %v8555_v57  ;;  %v8563_v0 = vpop.f32.mrb[46].mxu1 }
 0x270   :  { %8964 = vst [vmem:[#allocation3_spill] sm:$0xff] %v8563_v0  ;;  %v8568_v3 = vpop.f32.mrb[47].mxu1 }
 0x271   :  { %8965 = vst [vmem:[#allocation4_spill] sm:$0xff] %v8568_v3 }
 0x272   :  { %3629 = vmatmul.mubr.bf16.gmra.mrb[88].mxu1 %v7044_v58  ;;  %v7054_v58 = vld [vmem:[%s8958_s0 + $0x71c] ss:$36 sps:$4 sm:$0xff]  }
 0x273   :  { %4335 = vmatmul.mubr.bf16.gmra.mrb[88].mxu0 %v7045_v60  ;;  %3638 = vmatprep.mubr.bf16.mxu1 %v7046_v1 }
 0x274   :  { %4344 = vmatprep.mubr.bf16.mxu0 %v8961_v49 }
 0x275   :  { %v8571_v7 = vpop.f32.mrb[48].mxu1 }
 0x276   :  { %8966 = vst [vmem:[#allocation5_spill] sm:$0xff] %v8571_v7  ;;  %v8573_v8 = vpop.f32.mrb[49].mxu1  ;;  %v8982_v7 = vmov 0  }
 0x277   :  { %8967 = vst [vmem:[#allocation6_spill] sm:$0xff] %v8573_v8  ;;  %v8581_v15 = vpop.f32.mrb[50].mxu1 }
 0x278   :  { %8968 = vst [vmem:[#allocation7_spill] sm:$0xff] %v8581_v15  ;;  %v8586_v24 = vpop.f32.mrb[51].mxu1 }
 0x279   :  { %8969 = vst [vmem:[#allocation8_spill] sm:$0xff] %v8586_v24 }
 0x27a   :  { %3639 = vmatmul.mubr.bf16.gmra.mrb[92].mxu1 %v7048_v10 }
 0x27b   :  { %4345 = vmatmul.mubr.bf16.gmra.mrb[92].mxu0 %v7049_v14  ;;  %3648 = vmatprep.mubr.bf16.mxu1 %v7050_v17  ;;  %v7056_v14 = vld [vmem:[%s8958_s0 + $0x718] ss:$36 sps:$4 sm:$0xff]   ;;  %v7057_v17 = vld [vmem:[%s8958_s0 + $0x728] ss:$36 sps:$4 sm:$0xff]  }
 0x27c   :  { %4354 = vmatprep.mubr.bf16.mxu0 %v8961_v49 }
 0x27d   :  { %v8589_v28 = vpop.f32.mrb[52].mxu1 }
 0x27e   :  { %8970 = vst [vmem:[#allocation9_spill] sm:$0xff] %v8589_v28  ;;  %v8591_v31 = vpop.f32.mrb[53].mxu1 }
 0x27f   :  { %8971 = vst [vmem:[#allocation10_spill] sm:$0xff] %v8591_v31  ;;  %v8599_v50 = vpop.f32.mrb[54].mxu1 }
 0x280   :  { %8972 = vst [vmem:[#allocation11_spill] sm:$0xff] %v8599_v50  ;;  %v8604_v60 = vpop.f32.mrb[55].mxu1 }
 0x281   :  { %8973 = vst [vmem:[#allocation12_spill] sm:$0xff] %v8604_v60 }
 0x282   :  { %3649 = vmatmul.mubr.bf16.gmra.mrb[96].mxu1 %v7052_v42  ;;  %v7058_v42 = vld [vmem:[%s8958_s0 + $0x764] ss:$36 sps:$4 sm:$0xff]  }
 0x283   :  { %4355 = vmatmul.mubr.bf16.gmra.mrb[96].mxu0 %v7053_v43  ;;  %3658 = vmatprep.mubr.bf16.mxu1 %v7054_v58 }
 0x284   :  { %4364 = vmatprep.mubr.bf16.mxu0 %v8961_v49 }
 0x285   :  { %v8607_v1 = vpop.f32.mrb[56].mxu1 }
 0x286   :  { %8974 = vst [vmem:[#allocation13_spill] sm:$0xff] %v8607_v1  ;;  %v8609_v10 = vpop.f32.mrb[57].mxu1  ;;  %v7060_v1 = vld [vmem:[%s8958_s0 + $0x760] ss:$36 sps:$4 sm:$0xff]  }
 0x287   :  { %8975 = vst [vmem:[#allocation14_spill] sm:$0xff] %v8609_v10  ;;  %v8617_v50 = vpop.f32.mrb[58].mxu1 }
 0x288   :  { %8976 = vst [vmem:[#allocation15_spill] sm:$0xff] %v8617_v50  ;;  %v8622_v43 = vpop.f32.mrb[59].mxu1  ;;  %v7061_v50 = vld [vmem:[%s8958_s0 + $0x770] ss:$36 sps:$4 sm:$0xff]  }
 0x289   :  { %8977 = vst [vmem:[#allocation16_spill] sm:$0xff] %v8622_v43  ;;  %v7064_v43 = vld [vmem:[%s8958_s0 + $0x7a8] ss:$36 sps:$4 sm:$0xff]  }
 0x28a   :  { %3659 = vmatmul.mubr.bf16.gmra.mrb[100].mxu1 %v7056_v14  ;;  %v7062_v14 = vld [vmem:[%s8958_s0 + $0x7ac] ss:$36 sps:$4 sm:$0xff]  }
 0x28b   :  { %4365 = vmatmul.mubr.bf16.gmra.mrb[100].mxu0 %v7057_v17  ;;  %3668 = vmatprep.mubr.bf16.mxu1 %v7058_v42 }
 0x28c   :  { %4374 = vmatprep.mubr.bf16.mxu0 %v8961_v49 }
 0x28d   :  { %v8625_v58 = vpop.f32.mrb[60].mxu1 }
 0x28e   :  { %8978 = vst [vmem:[#allocation17_spill] sm:$0xff] %v8625_v58  ;;  %v8627_v10 = vpop.f32.mrb[61].mxu1 }
 0x28f   :  { %8979 = vst [vmem:[#allocation18_spill] sm:$0xff] %v8627_v10  ;;  %v8635_v60 = vpop.f32.mrb[62].mxu1 }
 0x290   :  { %8980 = vst [vmem:[#allocation19_spill] sm:$0xff] %v8635_v60  ;;  %v8640_v17 = vpop.f32.mrb[63].mxu1  ;;  %v7065_v60 = vld [vmem:[%s8958_s0 + $0x7b8] ss:$36 sps:$4 sm:$0xff]  }
 0x291   :  { %8981 = vst [vmem:[#allocation20_spill] sm:$0xff] %v8640_v17 }
 0x292   :  { %3669 = vmatmul.mubr.bf16.gmra.mrb[104].mxu1 %v7060_v1 }
 0x293   :  { %4375 = vmatmul.mubr.bf16.gmra.mrb[104].mxu0 %v7061_v50  ;;  %3678 = vmatprep.mubr.bf16.mxu1 %v7062_v14  ;;  %v7066_v50 = vld [vmem:[%s8958_s0 + $0x7f4] ss:$36 sps:$4 sm:$0xff]  }
 0x294   :  { %4384 = vmatprep.mubr.bf16.mxu0 %v8961_v49 }
 0x296   :  { %v4116_v42 = vpop.f32.mrb[0].mxu0 }
 0x297   :  { %v5935_v10 = vadd.f32 %v4116_v42, %v8355_v19  ;;  %v4118_v58 = vpop.f32.mrb[1].mxu0 }
 0x298   :  { %v5936_v31 = vadd.f32 %v4118_v58, %v8357_v20  ;;  %v4120_v17 = vpop.f32.mrb[2].mxu0 }
 0x299   :  { %v5937_v1 = vadd.f32 %v4120_v17, %v8365_v23  ;;  %v4122_v14 = vpop.f32.mrb[3].mxu0  ;;  %v5047_v19 = vmul.f32 %v5935_v10, %v5935_v10  ;;  %v7068_v17 = vld [vmem:[%s8958_s0 + $0x7f0] ss:$36 sps:$4 sm:$0xff]  }
 0x29a   :  { %v5839_v42 = vpack.c.bf16 %v5936_v31, %v5935_v10  ;;  %v5938_v49 = vadd.f32 %v4122_v14, %v8370_v25  ;;  %v5048_v28 = vmul.f32 %v5936_v31, %v5936_v31  ;;  %3679 = vmatmul.mubr.bf16.gmra.mrb[108].mxu1 %v7064_v43 }
 0x29b   :  { %v4885_v24 = vadd.f32 %v5937_v1, %v5935_v10  ;;  %v5049_v15 = vmul.f32 %v5937_v1, %v5937_v1  ;;  %4385 = vmatmul.mubr.bf16.gmra.mrb[108].mxu0 %v7065_v60  ;;  %3688 = vmatprep.mubr.bf16.mxu1 %v7066_v50  ;;  %v7070_v50 = vld [vmem:[%s8958_s0 + $0x83c] ss:$36 sps:$4 sm:$0xff]  }
 0x29c   :  { %4819 = vst [vmem:[%s8959_s2] sm:$0xff] %v5839_v42  ;;  %v5840_v20 = vpack.c.bf16 %v5938_v49, %v5937_v1  ;;  %v4954_v58 = vadd.f32 %v5938_v49, %v5936_v31  ;;  %v5050_v8 = vmul.f32 %v5938_v49, %v5938_v49  ;;  %4394 = vmatprep.mubr.bf16.mxu0 %v8982_v7  ;;  %v7069_v49 = vld [vmem:[%s8958_s0 + $0x800] ss:$36 sps:$4 sm:$0xff]  }
 0x29d   :  { %v5175_v23 = vadd.f32 %v5049_v15, %v5047_v19 }
 0x29e   :  { %4820 = vst [vmem:[%s8959_s2 + $0x8] sm:$0xff] %v5840_v20  ;;  %v5244_v25 = vadd.f32 %v5050_v8, %v5048_v28  ;;  %v4126_v10 = vpop.f32.mrb[4].mxu0 }
 0x29f   :  { %v5939_v43 = vadd.f32 %v4126_v10, %v8373_v26  ;;  %v4128_v60 = vpop.f32.mrb[5].mxu0 }
 0x2a0   :  { %v5940_v31 = vadd.f32 %v4128_v60, %v8375_v27  ;;  %v4130_v15 = vpop.f32.mrb[6].mxu0 }
 0x2a1   :  { %v4886_v8 = vadd.f32 %v5939_v43, %v4885_v24  ;;  %v5051_v28 = vmul.f32 %v5939_v43, %v5939_v43  ;;  %v5941_v26 = vadd.f32 %v4130_v15, %v8383_v30  ;;  %v4132_v1 = vpop.f32.mrb[7].mxu0 }
 0x2a2   :  { %v5841_v14 = vpack.c.bf16 %v5940_v31, %v5939_v43  ;;  %v4955_v19 = vadd.f32 %v5940_v31, %v4954_v58  ;;  %v5052_v42 = vmul.f32 %v5940_v31, %v5940_v31  ;;  %v5942_v20 = vadd.f32 %v4132_v1, %v8388_v32  ;;  %3689 = vmatmul.mubr.bf16.gmra.mrb[112].mxu1 %v7068_v17  ;;  %v7073_v17 = vld [vmem:[%s8958_s0 + $0x848] ss:$36 sps:$4 sm:$0xff]  }
 0x2a3   :  { %v5176_v10 = vadd.f32 %v5175_v23, %v5051_v28  ;;  %v4887_v3 = vadd.f32 %v5941_v26, %v4886_v8  ;;  %v5053_v0 = vmul.f32 %v5941_v26, %v5941_v26  ;;  %4395 = vmatmul.mubr.bf16.gmra.mrb[112].mxu0 %v7069_v49  ;;  %3698 = vmatprep.mubr.bf16.mxu1 %v7070_v50  ;;  %v7074_v31 = vld [vmem:[%s8958_s0 + $0x884] ss:$36 sps:$4 sm:$0xff]  }
 0x2a4   :  { %4821 = vst [vmem:[%s8959_s2 + $0x10] sm:$0xff] %v5841_v14  ;;  %v5245_v27 = vadd.f32 %v5244_v25, %v5052_v42  ;;  %v5842_v24 = vpack.c.bf16 %v5942_v20, %v5941_v26  ;;  %v4956_v60 = vadd.f32 %v5942_v20, %v4955_v19  ;;  %v5054_v57 = vmul.f32 %v5942_v20, %v5942_v20  ;;  %v7072_v25 = vld [vmem:[%s8958_s0 + $0x838] ss:$36 sps:$4 sm:$0xff]  }
 0x2a5   :  { %v5177_v30 = vadd.f32 %v5176_v10, %v5053_v0  ;;  %4404 = vmatprep.mubr.bf16.mxu0 %v8982_v7 }
 0x2a6   :  { %4822 = vst [vmem:[%s8959_s2 + $0x18] sm:$0xff] %v5842_v24  ;;  %v5246_v32 = vadd.f32 %v5245_v27, %v5054_v57  ;;  %v4136_v58 = vpop.f32.mrb[8].mxu0 }
 0x2a7   :  { %v5943_v23 = vadd.f32 %v4136_v58, %v8391_v33  ;;  %v4138_v43 = vpop.f32.mrb[9].mxu0 }
 0x2a8   :  { %v5944_v0 = vadd.f32 %v4138_v43, %v8393_v34  ;;  %v4140_v49 = vpop.f32.mrb[10].mxu0  ;;  %v7078_v43 = vld [vmem:[%s8958_s0 + $0x8cc] ss:$36 sps:$4 sm:$0xff]  }
 0x2a9   :  { %v4888_v57 = vadd.f32 %v5943_v23, %v4887_v3  ;;  %v5055_v15 = vmul.f32 %v5943_v23, %v5943_v23  ;;  %v5945_v33 = vadd.f32 %v4140_v49, %v8401_v37  ;;  %v4142_v50 = vpop.f32.mrb[11].mxu0 }
 0x2aa   :  { %v5843_v8 = vpack.c.bf16 %v5944_v0, %v5943_v23  ;;  %v4957_v28 = vadd.f32 %v5944_v0, %v4956_v60  ;;  %v5056_v26 = vmul.f32 %v5944_v0, %v5944_v0  ;;  %v5946_v1 = vadd.f32 %v4142_v50, %v8406_v39  ;;  %3699 = vmatmul.mubr.bf16.gmra.mrb[116].mxu1 %v7072_v25 }
 0x2ab   :  { %v5178_v14 = vadd.f32 %v5177_v30, %v5055_v15  ;;  %v4889_v19 = vadd.f32 %v5945_v33, %v4888_v57  ;;  %v5057_v42 = vmul.f32 %v5945_v33, %v5945_v33  ;;  %4405 = vmatmul.mubr.bf16.gmra.mrb[116].mxu0 %v7073_v17  ;;  %3708 = vmatprep.mubr.bf16.mxu1 %v7074_v31  ;;  %v7076_v30 = vld [vmem:[%s8958_s0 + $0x880] ss:$36 sps:$4 sm:$0xff]  }
 0x2ac   :  { %4823 = vst [vmem:[%s8959_s2 + $0x20] sm:$0xff] %v5843_v8  ;;  %v5247_v34 = vadd.f32 %v5246_v32, %v5056_v26  ;;  %v5844_v3 = vpack.c.bf16 %v5946_v1, %v5945_v33  ;;  %v4958_v20 = vadd.f32 %v5946_v1, %v4957_v28  ;;  %v5058_v10 = vmul.f32 %v5946_v1, %v5946_v1  ;;  %v7077_v32 = vld [vmem:[%s8958_s0 + $0x890] ss:$36 sps:$4 sm:$0xff]  }
 0x2ad   :  { %v5179_v37 = vadd.f32 %v5178_v14, %v5057_v42  ;;  %4414 = vmatprep.mubr.bf16.mxu0 %v8982_v7 }
 0x2ae   :  { %4824 = vst [vmem:[%s8959_s2 + $0x28] sm:$0xff] %v5844_v3  ;;  %v5248_v39 = vadd.f32 %v5247_v34, %v5058_v10  ;;  %v4146_v27 = vpop.f32.mrb[12].mxu0  ;;  %v7080_v34 = vld [vmem:[%s8958_s0 + $0x8c8] ss:$36 sps:$4 sm:$0xff]   ;;  %v7081_v3 = vld [vmem:[%s8958_s0 + $0x8d8] ss:$36 sps:$4 sm:$0xff]  }
 0x2af   :  { %v5947_v24 = vadd.f32 %v4146_v27, %v8409_v40  ;;  %v4148_v60 = vpop.f32.mrb[13].mxu0 }
 0x2b0   :  { %v5948_v58 = vadd.f32 %v4148_v60, %v8411_v41  ;;  %v4150_v23 = vpop.f32.mrb[14].mxu0 }
 0x2b1   :  { %v4890_v25 = vadd.f32 %v5947_v24, %v4889_v19  ;;  %v5059_v17 = vmul.f32 %v5947_v24, %v5947_v24  ;;  %v5949_v40 = vadd.f32 %v4150_v23, %v8419_v44  ;;  %v4152_v0 = vpop.f32.mrb[15].mxu0 }
 0x2b2   :  { %v5845_v49 = vpack.c.bf16 %v5948_v58, %v5947_v24  ;;  %v4959_v31 = vadd.f32 %v5948_v58, %v4958_v20  ;;  %v5060_v57 = vmul.f32 %v5948_v58, %v5948_v58  ;;  %v5950_v15 = vadd.f32 %v4152_v0, %v8424_v46  ;;  %3709 = vmatmul.mubr.bf16.gmra.mrb[120].mxu1 %v7076_v30 }
 0x2b3   :  { %v5180_v33 = vadd.f32 %v5179_v37, %v5059_v17  ;;  %v4891_v50 = vadd.f32 %v5949_v40, %v4890_v25  ;;  %v5061_v8 = vmul.f32 %v5949_v40, %v5949_v40  ;;  %4415 = vmatmul.mubr.bf16.gmra.mrb[120].mxu0 %v7077_v32  ;;  %3718 = vmatprep.mubr.bf16.mxu1 %v7078_v43 }
 0x2b4   :  { %4825 = vst [vmem:[%s8959_s2 + $0x30] sm:$0xff] %v5845_v49  ;;  %v5249_v41 = vadd.f32 %v5248_v39, %v5060_v57  ;;  %v5846_v28 = vpack.c.bf16 %v5950_v15, %v5949_v40  ;;  %v4960_v26 = vadd.f32 %v5950_v15, %v4959_v31  ;;  %v5062_v1 = vmul.f32 %v5950_v15, %v5950_v15 }
 0x2b5   :  { %v5181_v44 = vadd.f32 %v5180_v33, %v5061_v8  ;;  %4424 = vmatprep.mubr.bf16.mxu0 %v8982_v7 }
 0x2b6   :  { %4826 = vst [vmem:[%s8959_s2 + $0x38] sm:$0xff] %v5846_v28  ;;  %v5250_v46 = vadd.f32 %v5249_v41, %v5062_v1  ;;  %v4156_v14 = vpop.f32.mrb[16].mxu0 }
 0x2b7   :  { %v5951_v19 = vadd.f32 %v4156_v14, %v8427_v47  ;;  %v4158_v42 = vpop.f32.mrb[17].mxu0 }
 0x2b8   :  { %v5952_v20 = vadd.f32 %v4158_v42, %v8429_v48  ;;  %v4160_v7 = vpop.f32.mrb[18].mxu0 }
 0x2b9   :  { %v4892_v10 = vadd.f32 %v5951_v19, %v4891_v50  ;;  %v5063_v37 = vmul.f32 %v5951_v19, %v5951_v19  ;;  %v5953_v39 = vadd.f32 %v4160_v7, %v8437_v52  ;;  %v4162_v27 = vpop.f32.mrb[19].mxu0 }
 0x2ba   :  { %v5847_v24 = vpack.c.bf16 %v5952_v20, %v5951_v19  ;;  %v4961_v60 = vadd.f32 %v5952_v20, %v4960_v26  ;;  %v5064_v47 = vmul.f32 %v5952_v20, %v5952_v20  ;;  %v5954_v30 = vadd.f32 %v4162_v27, %v8442_v54  ;;  %3719 = vmatmul.mubr.bf16.gmra.mrb[124].mxu1 %v7080_v34 }
 0x2bb   :  { %v5182_v32 = vadd.f32 %v5181_v44, %v5063_v37  ;;  %v4893_v58 = vadd.f32 %v5953_v39, %v4892_v10  ;;  %v5065_v23 = vmul.f32 %v5953_v39, %v5953_v39  ;;  %4425 = vmatmul.mubr.bf16.gmra.mrb[124].mxu0 %v7081_v3 }
 0x2bc   :  { %4827 = vst [vmem:[%s8959_s2 + $0x40] sm:$0xff] %v5847_v24  ;;  %v5251_v48 = vadd.f32 %v5250_v46, %v5064_v47  ;;  %v5848_v43 = vpack.c.bf16 %v5954_v30, %v5953_v39  ;;  %v4962_v25 = vadd.f32 %v5954_v30, %v4961_v60  ;;  %v5066_v17 = vmul.f32 %v5954_v30, %v5954_v30 }
 0x2bd   :  { %v5183_v52 = vadd.f32 %v5182_v32, %v5065_v23 }
 0x2be   :  { %4828 = vst [vmem:[%s8959_s2 + $0x48] sm:$0xff] %v5848_v43  ;;  %v5252_v40 = vadd.f32 %v5251_v48, %v5066_v17  ;;  %v4166_v54 = vpop.f32.mrb[20].mxu0 }
 0x2bf   :  { %v5955_v0 = vadd.f32 %v4166_v54, %v8445_v55  ;;  %v4168_v49 = vpop.f32.mrb[21].mxu0 }
 0x2c0   :  { %v5956_v31 = vadd.f32 %v4168_v49, %v8447_v56  ;;  %v4170_v57 = vpop.f32.mrb[22].mxu0 }
 0x2c1   :  { %v4894_v15 = vadd.f32 %v5955_v0, %v4893_v58  ;;  %v5067_v33 = vmul.f32 %v5955_v0, %v5955_v0  ;;  %v5957_v50 = vadd.f32 %v4170_v57, %v8455_v59  ;;  %v4172_v8 = vpop.f32.mrb[23].mxu0 }
 0x2c2   :  { %v5849_v41 = vpack.c.bf16 %v5956_v31, %v5955_v0  ;;  %v4963_v28 = vadd.f32 %v5956_v31, %v4962_v25  ;;  %v5068_v26 = vmul.f32 %v5956_v31, %v5956_v31  ;;  %v5958_v1 = vadd.f32 %v4172_v8, %v8460_v61 }
 0x2c3   :  { %v5184_v44 = vadd.f32 %v5183_v52, %v5067_v33  ;;  %v4895_v46 = vadd.f32 %v5957_v50, %v4894_v15  ;;  %v5069_v14 = vmul.f32 %v5957_v50, %v5957_v50 }
 0x2c4   :  { %4829 = vst [vmem:[%s8959_s2 + $0x50] sm:$0xff] %v5849_v41  ;;  %v5253_v55 = vadd.f32 %v5252_v40, %v5068_v26  ;;  %v5850_v56 = vpack.c.bf16 %v5958_v1, %v5957_v50  ;;  %v4964_v19 = vadd.f32 %v5958_v1, %v4963_v28  ;;  %v5070_v42 = vmul.f32 %v5958_v1, %v5958_v1 }
 0x2c5   :  { %v5185_v34 = vadd.f32 %v5184_v44, %v5069_v14 }
 0x2c6   :  { %4830 = vst [vmem:[%s8959_s2 + $0x58] sm:$0xff] %v5850_v56  ;;  %v5254_v59 = vadd.f32 %v5253_v55, %v5070_v42  ;;  %v4176_v3 = vpop.f32.mrb[24].mxu0 }
 0x2c7   :  { %v5959_v61 = vadd.f32 %v4176_v3, %v8463_v62  ;;  %v4178_v20 = vpop.f32.mrb[25].mxu0 }
 0x2c8   :  { %v5960_v7 = vadd.f32 %v4178_v20, %v8465_v63  ;;  %v4180_v10 = vpop.f32.mrb[26].mxu0 }
 0x2c9   :  { %v4896_v37 = vadd.f32 %v5959_v61, %v4895_v46  ;;  %v5071_v39 = vmul.f32 %v5959_v61, %v5959_v61  ;;  %v5961_v27 = vadd.f32 %v4180_v10, %v8473_v2  ;;  %v4182_v24 = vpop.f32.mrb[27].mxu0 }
 0x2ca   :  { %v5851_v60 = vpack.c.bf16 %v5960_v7, %v5959_v61  ;;  %v4965_v47 = vadd.f32 %v5960_v7, %v4964_v19  ;;  %v5072_v30 = vmul.f32 %v5960_v7, %v5960_v7  ;;  %v5962_v32 = vadd.f32 %v4182_v24, %v8478_v4 }
 0x2cb   :  { %v5186_v58 = vadd.f32 %v5185_v34, %v5071_v39  ;;  %v4897_v23 = vadd.f32 %v5961_v27, %v4896_v37  ;;  %v5073_v48 = vmul.f32 %v5961_v27, %v5961_v27 }
 0x2cc   :  { %4831 = vst [vmem:[%s8959_s2 + $0x60] sm:$0xff] %v5851_v60  ;;  %v5255_v62 = vadd.f32 %v5254_v59, %v5072_v30  ;;  %v5852_v63 = vpack.c.bf16 %v5962_v32, %v5961_v27  ;;  %v4966_v43 = vadd.f32 %v5962_v32, %v4965_v47  ;;  %v5074_v25 = vmul.f32 %v5962_v32, %v5962_v32 }
 0x2cd   :  { %v5187_v17 = vadd.f32 %v5186_v58, %v5073_v48 }
 0x2ce   :  { %4832 = vst [vmem:[%s8959_s2 + $0x68] sm:$0xff] %v5852_v63  ;;  %v5256_v2 = vadd.f32 %v5255_v62, %v5074_v25  ;;  %v4186_v52 = vpop.f32.mrb[28].mxu0 }
 0x2cf   :  { %v5963_v4 = vadd.f32 %v4186_v52, %v8481_v5  ;;  %v4188_v40 = vpop.f32.mrb[29].mxu0 }
 0x2d0   :  { %v5964_v54 = vadd.f32 %v4188_v40, %v8483_v6  ;;  %v4190_v0 = vpop.f32.mrb[30].mxu0 }
 0x2d1   :  { %v4898_v49 = vadd.f32 %v5963_v4, %v4897_v23  ;;  %v5075_v31 = vmul.f32 %v5963_v4, %v5963_v4  ;;  %v5965_v57 = vadd.f32 %v4190_v0, %v8491_v9  ;;  %v4192_v15 = vpop.f32.mrb[31].mxu0 }
 0x2d2   :  { %v5853_v33 = vpack.c.bf16 %v5964_v54, %v5963_v4  ;;  %v4967_v50 = vadd.f32 %v5964_v54, %v4966_v43  ;;  %v5076_v8 = vmul.f32 %v5964_v54, %v5964_v54  ;;  %v5966_v41 = vadd.f32 %v4192_v15, %v8496_v11 }
 0x2d3   :  { %v5188_v28 = vadd.f32 %v5187_v17, %v5075_v31  ;;  %v4899_v26 = vadd.f32 %v5965_v57, %v4898_v49  ;;  %v5077_v1 = vmul.f32 %v5965_v57, %v5965_v57 }
 0x2d4   :  { %4833 = vst [vmem:[%s8959_s2 + $0x70] sm:$0xff] %v5853_v33  ;;  %v5257_v5 = vadd.f32 %v5256_v2, %v5076_v8  ;;  %v5854_v6 = vpack.c.bf16 %v5966_v41, %v5965_v57  ;;  %v4968_v44 = vadd.f32 %v5966_v41, %v4967_v50  ;;  %v5078_v46 = vmul.f32 %v5966_v41, %v5966_v41 }
 0x2d5   :  { %v5189_v14 = vadd.f32 %v5188_v28, %v5077_v1 }
 0x2d6   :  { %4834 = vst [vmem:[%s8959_s2 + $0x78] sm:$0xff] %v5854_v6  ;;  %v5258_v9 = vadd.f32 %v5257_v5, %v5078_v46  ;;  %v4196_v55 = vpop.f32.mrb[32].mxu0 }
 0x2d7   :  { %v5967_v11 = vadd.f32 %v4196_v55, %v8499_v12  ;;  %v4198_v56 = vpop.f32.mrb[33].mxu0 }
 0x2d8   :  { %v5968_v19 = vadd.f32 %v4198_v56, %v8501_v13  ;;  %v4200_v42 = vpop.f32.mrb[34].mxu0 }
 0x2d9   :  { %v4900_v34 = vadd.f32 %v5967_v11, %v4899_v26  ;;  %v5079_v59 = vmul.f32 %v5967_v11, %v5967_v11  ;;  %v5969_v3 = vadd.f32 %v4200_v42, %v8509_v16  ;;  %v4202_v61 = vpop.f32.mrb[35].mxu0 }
 0x2da   :  { %v5855_v20 = vpack.c.bf16 %v5968_v19, %v5967_v11  ;;  %v4969_v7 = vadd.f32 %v5968_v19, %v4968_v44  ;;  %v5080_v10 = vmul.f32 %v5968_v19, %v5968_v19  ;;  %v5970_v37 = vadd.f32 %v4202_v61, %v8514_v18 }
 0x2db   :  { %v5190_v39 = vadd.f32 %v5189_v14, %v5079_v59  ;;  %v4901_v27 = vadd.f32 %v5969_v3, %v4900_v34  ;;  %v5081_v24 = vmul.f32 %v5969_v3, %v5969_v3  ;;  %v8983_v59 = vld [vmem:[#allocation2_spill] sm:$0xff] }
 0x2dc   :  { %4835 = vst [vmem:[%s8959_s2 + $0x80] sm:$0xff] %v5855_v20  ;;  %v5259_v12 = vadd.f32 %v5258_v9, %v5080_v10  ;;  %v5856_v13 = vpack.c.bf16 %v5970_v37, %v5969_v3  ;;  %v4970_v60 = vadd.f32 %v5970_v37, %v4969_v7  ;;  %v5082_v47 = vmul.f32 %v5970_v37, %v5970_v37  ;;  %v8984_v10 = vld [vmem:[#allocation3_spill] sm:$0xff] }
 0x2dd   :  { %v5191_v30 = vadd.f32 %v5190_v39, %v5081_v24 }
 0x2de   :  { %4836 = vst [vmem:[%s8959_s2 + $0x88] sm:$0xff] %v5856_v13  ;;  %v5260_v16 = vadd.f32 %v5259_v12, %v5082_v47  ;;  %v4206_v32 = vpop.f32.mrb[36].mxu0  ;;  %v8985_v13 = vld [vmem:[#allocation4_spill] sm:$0xff] }
 0x2df   :  { %v5971_v18 = vadd.f32 %v4206_v32, %v8517_v21  ;;  %v4208_v58 = vpop.f32.mrb[37].mxu0 }
 0x2e0   :  { %v5972_v23 = vadd.f32 %v4208_v58, %v8519_v22  ;;  %v4210_v48 = vpop.f32.mrb[38].mxu0 }
 0x2e1   :  { %v4902_v62 = vadd.f32 %v5971_v18, %v4901_v27  ;;  %v5083_v63 = vmul.f32 %v5971_v18, %v5971_v18  ;;  %v5973_v43 = vadd.f32 %v4210_v48, %v8527_v29  ;;  %v4212_v25 = vpop.f32.mrb[39].mxu0 }
 0x2e2   :  { %v5857_v17 = vpack.c.bf16 %v5972_v23, %v5971_v18  ;;  %v4971_v2 = vadd.f32 %v5972_v23, %v4970_v60  ;;  %v5084_v52 = vmul.f32 %v5972_v23, %v5972_v23  ;;  %v5974_v4 = vadd.f32 %v4212_v25, %v8532_v35 }
 0x2e3   :  { %v5192_v40 = vadd.f32 %v5191_v30, %v5083_v63  ;;  %v4903_v54 = vadd.f32 %v5973_v43, %v4902_v62  ;;  %v5085_v0 = vmul.f32 %v5973_v43, %v5973_v43  ;;  %v8986_v63 = vld [vmem:[#allocation5_spill] sm:$0xff] }
 0x2e4   :  { %4837 = vst [vmem:[%s8959_s2 + $0x90] sm:$0xff] %v5857_v17  ;;  %v5261_v21 = vadd.f32 %v5260_v16, %v5084_v52  ;;  %v5858_v22 = vpack.c.bf16 %v5974_v4, %v5973_v43  ;;  %v4972_v49 = vadd.f32 %v5974_v4, %v4971_v2  ;;  %v5086_v31 = vmul.f32 %v5974_v4, %v5974_v4  ;;  %v8987_v17 = vld [vmem:[#allocation6_spill] sm:$0xff] }
 0x2e5   :  { %v5193_v57 = vadd.f32 %v5192_v40, %v5085_v0 }
 0x2e6   :  { %4838 = vst [vmem:[%s8959_s2 + $0x98] sm:$0xff] %v5858_v22  ;;  %v5262_v29 = vadd.f32 %v5261_v21, %v5086_v31  ;;  %v4216_v15 = vpop.f32.mrb[40].mxu0 }
 0x2e7   :  { %v5975_v35 = vadd.f32 %v4216_v15, %v8535_v36  ;;  %v4218_v33 = vpop.f32.mrb[41].mxu0 }
 0x2e8   :  { %v5976_v50 = vadd.f32 %v4218_v33, %v8537_v38  ;;  %v4220_v8 = vpop.f32.mrb[42].mxu0 }
 0x2e9   :  { %v4904_v41 = vadd.f32 %v5975_v35, %v4903_v54  ;;  %v5087_v28 = vmul.f32 %v5975_v35, %v5975_v35  ;;  %v5977_v26 = vadd.f32 %v4220_v8, %v8545_v45  ;;  %v4222_v1 = vpop.f32.mrb[43].mxu0  ;;  %v8988_v54 = vld [vmem:[#allocation7_spill] sm:$0xff] }
 0x2ea   :  { %v5859_v5 = vpack.c.bf16 %v5976_v50, %v5975_v35  ;;  %v4973_v6 = vadd.f32 %v5976_v50, %v4972_v49  ;;  %v5088_v44 = vmul.f32 %v5976_v50, %v5976_v50  ;;  %v5978_v46 = vadd.f32 %v4222_v1, %v8550_v51 }
 0x2eb   :  { %v5194_v14 = vadd.f32 %v5193_v57, %v5087_v28  ;;  %v4905_v9 = vadd.f32 %v5977_v26, %v4904_v41  ;;  %v5089_v55 = vmul.f32 %v5977_v26, %v5977_v26  ;;  %v8989_v57 = vld [vmem:[#allocation8_spill] sm:$0xff] }
 0x2ec   :  { %4839 = vst [vmem:[%s8959_s2 + $0xa0] sm:$0xff] %v5859_v5  ;;  %v5263_v36 = vadd.f32 %v5262_v29, %v5088_v44  ;;  %v5860_v38 = vpack.c.bf16 %v5978_v46, %v5977_v26  ;;  %v4974_v11 = vadd.f32 %v5978_v46, %v4973_v6  ;;  %v5090_v56 = vmul.f32 %v5978_v46, %v5978_v46  ;;  %v8990_v6 = vld [vmem:[#allocation9_spill] sm:$0xff] }
 0x2ed   :  { %v5195_v19 = vadd.f32 %v5194_v14, %v5089_v55  ;;  %v8991_v14 = vld [vmem:[#allocation10_spill] sm:$0xff] }
 0x2ee   :  { %4840 = vst [vmem:[%s8959_s2 + $0xa8] sm:$0xff] %v5860_v38  ;;  %v5264_v45 = vadd.f32 %v5263_v36, %v5090_v56  ;;  %v4226_v42 = vpop.f32.mrb[44].mxu0 }
 0x2ef   :  { %v5979_v51 = vadd.f32 %v4226_v42, %v8553_v53  ;;  %v4228_v34 = vpop.f32.mrb[45].mxu0 }
 0x2f0   :  { %v5980_v3 = vadd.f32 %v4228_v34, %v8983_v59  ;;  %v4230_v61 = vpop.f32.mrb[46].mxu0  ;;  %v8993_v34 = vld [vmem:[#allocation12_spill] sm:$0xff] }
 0x2f1   :  { %v4906_v20 = vadd.f32 %v5979_v51, %v4905_v9  ;;  %v5091_v7 = vmul.f32 %v5979_v51, %v5979_v51  ;;  %v5981_v37 = vadd.f32 %v4230_v61, %v8984_v10  ;;  %v4232_v39 = vpop.f32.mrb[47].mxu0 }
 0x2f2   :  { %v5861_v27 = vpack.c.bf16 %v5980_v3, %v5979_v51  ;;  %v4975_v24 = vadd.f32 %v5980_v3, %v4974_v11  ;;  %v5092_v12 = vmul.f32 %v5980_v3, %v5980_v3  ;;  %v5982_v60 = vadd.f32 %v4232_v39, %v8985_v13  ;;  %v8992_v11 = vld [vmem:[#allocation11_spill] sm:$0xff]  ;;  %v8994_v13 = vld [vmem:[#allocation13_spill] sm:$0xff] }
 0x2f3   :  { %v5196_v47 = vadd.f32 %v5195_v19, %v5091_v7  ;;  %v4907_v30 = vadd.f32 %v5981_v37, %v4906_v20  ;;  %v5093_v16 = vmul.f32 %v5981_v37, %v5981_v37 }
 0x2f4   :  { %4841 = vst [vmem:[%s8959_s2 + $0xb0] sm:$0xff] %v5861_v27  ;;  %v5265_v53 = vadd.f32 %v5264_v45, %v5092_v12  ;;  %v5862_v32 = vpack.c.bf16 %v5982_v60, %v5981_v37  ;;  %v4976_v18 = vadd.f32 %v5982_v60, %v4975_v24  ;;  %v5094_v58 = vmul.f32 %v5982_v60, %v5982_v60 }
 0x2f5   :  { %v5197_v23 = vadd.f32 %v5196_v47, %v5093_v16 }
 0x2f6   :  { %4842 = vst [vmem:[%s8959_s2 + $0xb8] sm:$0xff] %v5862_v32  ;;  %v5266_v48 = vadd.f32 %v5265_v53, %v5094_v58  ;;  %v4236_v62 = vpop.f32.mrb[48].mxu0  ;;  %v8996_v58 = vld [vmem:[#allocation15_spill] sm:$0xff] }
 0x2f7   :  { %v5983_v43 = vadd.f32 %v4236_v62, %v8986_v63  ;;  %v4238_v25 = vpop.f32.mrb[49].mxu0 }
 0x2f8   :  { %v5984_v2 = vadd.f32 %v4238_v25, %v8987_v17  ;;  %v4240_v52 = vpop.f32.mrb[50].mxu0  ;;  %v8997_v25 = vld [vmem:[#allocation16_spill] sm:$0xff] }
 0x2f9   :  { %v4908_v4 = vadd.f32 %v5983_v43, %v4907_v30  ;;  %v5095_v40 = vmul.f32 %v5983_v43, %v5983_v43  ;;  %v5985_v0 = vadd.f32 %v4240_v52, %v8988_v54  ;;  %v4242_v21 = vpop.f32.mrb[51].mxu0  ;;  %v8995_v30 = vld [vmem:[#allocation14_spill] sm:$0xff] }
 0x2fa   :  { %v5863_v22 = vpack.c.bf16 %v5984_v2, %v5983_v43  ;;  %v4977_v49 = vadd.f32 %v5984_v2, %v4976_v18  ;;  %v5096_v31 = vmul.f32 %v5984_v2, %v5984_v2  ;;  %v5986_v29 = vadd.f32 %v4242_v21, %v8989_v57  ;;  %v8998_v57 = vld [vmem:[#allocation17_spill] sm:$0xff] }
 0x2fb   :  { %v5198_v15 = vadd.f32 %v5197_v23, %v5095_v40  ;;  %v4909_v35 = vadd.f32 %v5985_v0, %v4908_v4  ;;  %v5097_v33 = vmul.f32 %v5985_v0, %v5985_v0 }
 0x2fc   :  { %4843 = vst [vmem:[%s8959_s2 + $0xc0] sm:$0xff] %v5863_v22  ;;  %v5267_v50 = vadd.f32 %v5266_v48, %v5096_v31  ;;  %v5864_v8 = vpack.c.bf16 %v5986_v29, %v5985_v0  ;;  %v4978_v41 = vadd.f32 %v5986_v29, %v4977_v49  ;;  %v5098_v28 = vmul.f32 %v5986_v29, %v5986_v29 }
 0x2fd   :  { %v5199_v26 = vadd.f32 %v5198_v15, %v5097_v33 }
 0x2fe   :  { %4844 = vst [vmem:[%s8959_s2 + $0xc8] sm:$0xff] %v5864_v8  ;;  %v5268_v1 = vadd.f32 %v5267_v50, %v5098_v28  ;;  %v4246_v5 = vpop.f32.mrb[52].mxu0  ;;  %v9000_v28 = vld [vmem:[#allocation19_spill] sm:$0xff] }
 0x2ff   :  { %v5987_v44 = vadd.f32 %v4246_v5, %v8990_v6  ;;  %v4248_v46 = vpop.f32.mrb[53].mxu0 }
 0x300   :  { %v5988_v9 = vadd.f32 %v4248_v46, %v8991_v14  ;;  %v4250_v55 = vpop.f32.mrb[54].mxu0  ;;  %v9001_v46 = vld [vmem:[#allocation20_spill] sm:$0xff] }
 0x301   :  { %v4910_v36 = vadd.f32 %v5987_v44, %v4909_v35  ;;  %v5099_v38 = vmul.f32 %v5987_v44, %v5987_v44  ;;  %v5989_v56 = vadd.f32 %v4250_v55, %v8992_v11  ;;  %v4252_v19 = vpop.f32.mrb[55].mxu0  ;;  %v8999_v35 = vld [vmem:[#allocation18_spill] sm:$0xff] }
 0x302   :  { %v5865_v45 = vpack.c.bf16 %v5988_v9, %v5987_v44  ;;  %v4979_v42 = vadd.f32 %v5988_v9, %v4978_v41  ;;  %v5100_v51 = vmul.f32 %v5988_v9, %v5988_v9  ;;  %v5990_v59 = vadd.f32 %v4252_v19, %v8993_v34 }
 0x303   :  { %v5200_v3 = vadd.f32 %v5199_v26, %v5099_v38  ;;  %v4911_v61 = vadd.f32 %v5989_v56, %v4910_v36  ;;  %v5101_v20 = vmul.f32 %v5989_v56, %v5989_v56 }
 0x304   :  { %4845 = vst [vmem:[%s8959_s2 + $0xd0] sm:$0xff] %v5865_v45  ;;  %v5269_v7 = vadd.f32 %v5268_v1, %v5100_v51  ;;  %v5866_v10 = vpack.c.bf16 %v5990_v59, %v5989_v56  ;;  %v4980_v37 = vadd.f32 %v5990_v59, %v4979_v42  ;;  %v5102_v39 = vmul.f32 %v5990_v59, %v5990_v59 }
 0x305   :  { %v5201_v27 = vadd.f32 %v5200_v3, %v5101_v20 }
 0x306   :  { %4846 = vst [vmem:[%s8959_s2 + $0xd8] sm:$0xff] %v5866_v10  ;;  %v5270_v24 = vadd.f32 %v5269_v7, %v5102_v39  ;;  %v4256_v12 = vpop.f32.mrb[56].mxu0 }
 0x307   :  { %v5991_v60 = vadd.f32 %v4256_v12, %v8994_v13  ;;  %v4258_v47 = vpop.f32.mrb[57].mxu0 }
 0x308   :  { %v5992_v16 = vadd.f32 %v4258_v47, %v8995_v30  ;;  %v4260_v53 = vpop.f32.mrb[58].mxu0 }
 0x309   :  { %v4912_v32 = vadd.f32 %v5991_v60, %v4911_v61  ;;  %v5103_v18 = vmul.f32 %v5991_v60, %v5991_v60  ;;  %v5993_v23 = vadd.f32 %v4260_v53, %v8996_v58  ;;  %v4262_v48 = vpop.f32.mrb[59].mxu0 }
 0x30a   :  { %v5867_v62 = vpack.c.bf16 %v5992_v16, %v5991_v60  ;;  %v4981_v63 = vadd.f32 %v5992_v16, %v4980_v37  ;;  %v5104_v43 = vmul.f32 %v5992_v16, %v5992_v16  ;;  %v5994_v17 = vadd.f32 %v4262_v48, %v8997_v25 }
 0x30b   :  { %v5202_v2 = vadd.f32 %v5201_v27, %v5103_v18  ;;  %v4913_v52 = vadd.f32 %v5993_v23, %v4912_v32  ;;  %v5105_v4 = vmul.f32 %v5993_v23, %v5993_v23 }
 0x30c   :  { %4847 = vst [vmem:[%s8959_s2 + $0xe0] sm:$0xff] %v5867_v62  ;;  %v5271_v40 = vadd.f32 %v5270_v24, %v5104_v43  ;;  %v5868_v54 = vpack.c.bf16 %v5994_v17, %v5993_v23  ;;  %v4982_v0 = vadd.f32 %v5994_v17, %v4981_v63  ;;  %v5106_v21 = vmul.f32 %v5994_v17, %v5994_v17 }
 0x30d   :  { %v5203_v22 = vadd.f32 %v5202_v2, %v5105_v4 }
 0x30e   :  { %4848 = vst [vmem:[%s8959_s2 + $0xe8] sm:$0xff] %v5868_v54  ;;  %v5272_v49 = vadd.f32 %v5271_v40, %v5106_v21  ;;  %v4266_v31 = vpop.f32.mrb[60].mxu0 }
 0x30f   :  { %v5995_v29 = vadd.f32 %v4266_v31, %v8998_v57  ;;  %v4268_v15 = vpop.f32.mrb[61].mxu0 }
 0x310   :  { %v5996_v33 = vadd.f32 %v4268_v15, %v8999_v35  ;;  %v4270_v50 = vpop.f32.mrb[62].mxu0 }
 0x311   :  { %v4914_v8 = vadd.f32 %v5995_v29, %v4913_v52  ;;  %v5107_v41 = vmul.f32 %v5995_v29, %v5995_v29  ;;  %v5997_v26 = vadd.f32 %v4270_v50, %v9000_v28  ;;  %v4272_v1 = vpop.f32.mrb[63].mxu0 }
 0x312   :  { %v5869_v5 = vpack.c.bf16 %v5996_v33, %v5995_v29  ;;  %v4983_v6 = vadd.f32 %v5996_v33, %v4982_v0  ;;  %v5108_v44 = vmul.f32 %v5996_v33, %v5996_v33  ;;  %v5998_v14 = vadd.f32 %v4272_v1, %v9001_v46 }
 0x313   :  { %v5204_v9 = vadd.f32 %v5203_v22, %v5107_v41  ;;  %v4915_v55 = vadd.f32 %v5997_v26, %v4914_v8  ;;  %v5109_v36 = vmul.f32 %v5997_v26, %v5997_v26  ;;  %v7115_v33 = vmov 0.0  }
 0x314   :  { %4849 = vst [vmem:[%s8959_s2 + $0xf0] sm:$0xff] %v5869_v5  ;;  %v5273_v38 = vadd.f32 %v5272_v49, %v5108_v44  ;;  %v5870_v11 = vpack.c.bf16 %v5998_v14, %v5997_v26  ;;  %v4984_v56 = vadd.f32 %v5998_v14, %v4983_v6  ;;  %v5110_v19 = vmul.f32 %v5998_v14, %v5998_v14 }
 0x315   :  { %v5205_v45 = vadd.f32 %v5204_v9, %v5109_v36  ;;  %v3570_v51 = vpop.f32.mrb[64].mxu1  ;;  %4883 = vst [vmem:[%s8960_s3] sm:$0xff] %v7115_v33  ;;  %4884 = vst [vmem:[%s8960_s3 + $0x8] sm:$0xff] %v7115_v33 }
 0x316   :  { %4850 = vst [vmem:[%s8959_s2 + $0xf8] sm:$0xff] %v5870_v11  ;;  %v5274_v42 = vadd.f32 %v5273_v38, %v5110_v19  ;;  %v4276_v34 = vpop.f32.mrb[64].mxu0  ;;  %v3572_v3 = vpop.f32.mrb[65].mxu1 }
 0x317   :  { %v5999_v59 = vadd.f32 %v4276_v34, %v3570_v51  ;;  %v4278_v61 = vpop.f32.mrb[65].mxu0  ;;  %v3574_v7 = vpop.f32.mrb[66].mxu1 }
 0x318   :  { %v6000_v20 = vadd.f32 %v4278_v61, %v3572_v3  ;;  %v4280_v10 = vpop.f32.mrb[66].mxu0  ;;  %v3576_v24 = vpop.f32.mrb[67].mxu1 }
 0x319   :  { %v4916_v37 = vadd.f32 %v5999_v59, %v4915_v55  ;;  %v5111_v39 = vmul.f32 %v5999_v59, %v5999_v59  ;;  %v6001_v27 = vadd.f32 %v4280_v10, %v3574_v7  ;;  %v4282_v12 = vpop.f32.mrb[67].mxu0 }
 0x31a   :  { %v5871_v13 = vpack.c.bf16 %v6000_v20, %v5999_v59  ;;  %v4985_v60 = vadd.f32 %v6000_v20, %v4984_v56  ;;  %v5112_v47 = vmul.f32 %v6000_v20, %v6000_v20  ;;  %v6002_v30 = vadd.f32 %v4282_v12, %v3576_v24 }
 0x31b   :  { %v5206_v16 = vadd.f32 %v5205_v45, %v5111_v39  ;;  %v4917_v53 = vadd.f32 %v6001_v27, %v4916_v37  ;;  %v5113_v32 = vmul.f32 %v6001_v27, %v6001_v27 }
 0x31c   :  { %4851 = vst [vmem:[%s8959_s2 + $0x100] sm:$0xff] %v5871_v13  ;;  %v5275_v18 = vadd.f32 %v5274_v42, %v5112_v47  ;;  %v5872_v58 = vpack.c.bf16 %v6002_v30, %v6001_v27  ;;  %v4986_v23 = vadd.f32 %v6002_v30, %v4985_v60  ;;  %v5114_v48 = vmul.f32 %v6002_v30, %v6002_v30 }
 0x31d   :  { %v5207_v62 = vadd.f32 %v5206_v16, %v5113_v32  ;;  %v3580_v43 = vpop.f32.mrb[68].mxu1 }
 0x31e   :  { %4852 = vst [vmem:[%s8959_s2 + $0x108] sm:$0xff] %v5872_v58  ;;  %v5276_v63 = vadd.f32 %v5275_v18, %v5114_v48  ;;  %v4286_v25 = vpop.f32.mrb[68].mxu0  ;;  %v3582_v2 = vpop.f32.mrb[69].mxu1 }
 0x31f   :  { %v6003_v17 = vadd.f32 %v4286_v25, %v3580_v43  ;;  %v4288_v52 = vpop.f32.mrb[69].mxu0  ;;  %v3584_v40 = vpop.f32.mrb[70].mxu1 }
 0x320   :  { %v6004_v4 = vadd.f32 %v4288_v52, %v3582_v2  ;;  %v4290_v54 = vpop.f32.mrb[70].mxu0  ;;  %v3586_v49 = vpop.f32.mrb[71].mxu1 }
 0x321   :  { %v4918_v0 = vadd.f32 %v6003_v17, %v4917_v53  ;;  %v5115_v21 = vmul.f32 %v6003_v17, %v6003_v17  ;;  %v6005_v22 = vadd.f32 %v4290_v54, %v3584_v40  ;;  %v4292_v31 = vpop.f32.mrb[71].mxu0 }
 0x322   :  { %v5873_v57 = vpack.c.bf16 %v6004_v4, %v6003_v17  ;;  %v4987_v29 = vadd.f32 %v6004_v4, %v4986_v23  ;;  %v5116_v15 = vmul.f32 %v6004_v4, %v6004_v4  ;;  %v6006_v35 = vadd.f32 %v4292_v31, %v3586_v49 }
 0x323   :  { %v5208_v50 = vadd.f32 %v5207_v62, %v5115_v21  ;;  %v4919_v8 = vadd.f32 %v6005_v22, %v4918_v0  ;;  %v5117_v41 = vmul.f32 %v6005_v22, %v6005_v22 }
 0x324   :  { %4853 = vst [vmem:[%s8959_s2 + $0x110] sm:$0xff] %v5873_v57  ;;  %v5277_v28 = vadd.f32 %v5276_v63, %v5116_v15  ;;  %v5874_v26 = vpack.c.bf16 %v6006_v35, %v6005_v22  ;;  %v4988_v1 = vadd.f32 %v6006_v35, %v4987_v29  ;;  %v5118_v5 = vmul.f32 %v6006_v35, %v6006_v35 }
 0x325   :  { %v5209_v6 = vadd.f32 %v5208_v50, %v5117_v41  ;;  %v3590_v46 = vpop.f32.mrb[72].mxu1 }
 0x326   :  { %4854 = vst [vmem:[%s8959_s2 + $0x118] sm:$0xff] %v5874_v26  ;;  %v5278_v44 = vadd.f32 %v5277_v28, %v5118_v5  ;;  %v4296_v14 = vpop.f32.mrb[72].mxu0  ;;  %v3592_v55 = vpop.f32.mrb[73].mxu1 }
 0x327   :  { %v6007_v9 = vadd.f32 %v4296_v14, %v3590_v46  ;;  %v4298_v36 = vpop.f32.mrb[73].mxu0  ;;  %v3594_v11 = vpop.f32.mrb[74].mxu1 }
 0x328   :  { %v6008_v38 = vadd.f32 %v4298_v36, %v3592_v55  ;;  %v4300_v56 = vpop.f32.mrb[74].mxu0  ;;  %v3596_v51 = vpop.f32.mrb[75].mxu1 }
 0x329   :  { %v4920_v19 = vadd.f32 %v6007_v9, %v4919_v8  ;;  %v5119_v45 = vmul.f32 %v6007_v9, %v6007_v9  ;;  %v6009_v42 = vadd.f32 %v4300_v56, %v3594_v11  ;;  %v4302_v34 = vpop.f32.mrb[75].mxu0 }
 0x32a   :  { %v5875_v59 = vpack.c.bf16 %v6008_v38, %v6007_v9  ;;  %v4989_v3 = vadd.f32 %v6008_v38, %v4988_v1  ;;  %v5120_v61 = vmul.f32 %v6008_v38, %v6008_v38  ;;  %v6010_v20 = vadd.f32 %v4302_v34, %v3596_v51 }
 0x32b   :  { %v5210_v7 = vadd.f32 %v5209_v6, %v5119_v45  ;;  %v4921_v10 = vadd.f32 %v6009_v42, %v4920_v19  ;;  %v5121_v37 = vmul.f32 %v6009_v42, %v6009_v42 }
 0x32c   :  { %4855 = vst [vmem:[%s8959_s2 + $0x120] sm:$0xff] %v5875_v59  ;;  %v5279_v39 = vadd.f32 %v5278_v44, %v5120_v61  ;;  %v5876_v27 = vpack.c.bf16 %v6010_v20, %v6009_v42  ;;  %v4990_v24 = vadd.f32 %v6010_v20, %v4989_v3  ;;  %v5122_v12 = vmul.f32 %v6010_v20, %v6010_v20 }
 0x32d   :  { %v5211_v13 = vadd.f32 %v5210_v7, %v5121_v37  ;;  %v3600_v47 = vpop.f32.mrb[76].mxu1 }
 0x32e   :  { %4856 = vst [vmem:[%s8959_s2 + $0x128] sm:$0xff] %v5876_v27  ;;  %v5280_v60 = vadd.f32 %v5279_v39, %v5122_v12  ;;  %v4306_v30 = vpop.f32.mrb[76].mxu0  ;;  %v3602_v53 = vpop.f32.mrb[77].mxu1 }
 0x32f   :  { %v6011_v16 = vadd.f32 %v4306_v30, %v3600_v47  ;;  %v4308_v32 = vpop.f32.mrb[77].mxu0  ;;  %v3604_v58 = vpop.f32.mrb[78].mxu1 }
 0x330   :  { %v6012_v18 = vadd.f32 %v4308_v32, %v3602_v53  ;;  %v4310_v23 = vpop.f32.mrb[78].mxu0  ;;  %v3606_v43 = vpop.f32.mrb[79].mxu1 }
 0x331   :  { %v4922_v48 = vadd.f32 %v6011_v16, %v4921_v10  ;;  %v5123_v62 = vmul.f32 %v6011_v16, %v6011_v16  ;;  %v6013_v63 = vadd.f32 %v4310_v23, %v3604_v58  ;;  %v4312_v25 = vpop.f32.mrb[79].mxu0 }
 0x332   :  { %v5877_v17 = vpack.c.bf16 %v6012_v18, %v6011_v16  ;;  %v4991_v2 = vadd.f32 %v6012_v18, %v4990_v24  ;;  %v5124_v52 = vmul.f32 %v6012_v18, %v6012_v18  ;;  %v6014_v4 = vadd.f32 %v4312_v25, %v3606_v43 }
 0x333   :  { %v5212_v40 = vadd.f32 %v5211_v13, %v5123_v62  ;;  %v4923_v54 = vadd.f32 %v6013_v63, %v4922_v48  ;;  %v5125_v0 = vmul.f32 %v6013_v63, %v6013_v63 }
 0x334   :  { %4857 = vst [vmem:[%s8959_s2 + $0x130] sm:$0xff] %v5877_v17  ;;  %v5281_v21 = vadd.f32 %v5280_v60, %v5124_v52  ;;  %v5878_v22 = vpack.c.bf16 %v6014_v4, %v6013_v63  ;;  %v4992_v49 = vadd.f32 %v6014_v4, %v4991_v2  ;;  %v5126_v31 = vmul.f32 %v6014_v4, %v6014_v4 }
 0x335   :  { %v5213_v57 = vadd.f32 %v5212_v40, %v5125_v0  ;;  %v3610_v15 = vpop.f32.mrb[80].mxu1 }
 0x336   :  { %4858 = vst [vmem:[%s8959_s2 + $0x138] sm:$0xff] %v5878_v22  ;;  %v5282_v29 = vadd.f32 %v5281_v21, %v5126_v31  ;;  %v4316_v35 = vpop.f32.mrb[80].mxu0  ;;  %v3612_v50 = vpop.f32.mrb[81].mxu1 }
 0x337   :  { %v6015_v33 = vadd.f32 %v4316_v35, %v3610_v15  ;;  %v4318_v8 = vpop.f32.mrb[81].mxu0  ;;  %v3614_v28 = vpop.f32.mrb[82].mxu1 }
 0x338   :  { %v6016_v41 = vadd.f32 %v4318_v8, %v3612_v50  ;;  %v4320_v26 = vpop.f32.mrb[82].mxu0  ;;  %v3616_v44 = vpop.f32.mrb[83].mxu1 }
 0x339   :  { %v4924_v1 = vadd.f32 %v6015_v33, %v4923_v54  ;;  %v5127_v5 = vmul.f32 %v6015_v33, %v6015_v33  ;;  %v6017_v6 = vadd.f32 %v4320_v26, %v3614_v28  ;;  %v4322_v46 = vpop.f32.mrb[83].mxu0 }
 0x33a   :  { %v5879_v14 = vpack.c.bf16 %v6016_v41, %v6015_v33  ;;  %v4993_v9 = vadd.f32 %v6016_v41, %v4992_v49  ;;  %v5128_v55 = vmul.f32 %v6016_v41, %v6016_v41  ;;  %v6018_v36 = vadd.f32 %v4322_v46, %v3616_v44 }
 0x33b   :  { %v5214_v38 = vadd.f32 %v5213_v57, %v5127_v5  ;;  %v4925_v11 = vadd.f32 %v6017_v6, %v4924_v1  ;;  %v5129_v56 = vmul.f32 %v6017_v6, %v6017_v6 }
 0x33c   :  { %4859 = vst [vmem:[%s8959_s2 + $0x140] sm:$0xff] %v5879_v14  ;;  %v5283_v19 = vadd.f32 %v5282_v29, %v5128_v55  ;;  %v5880_v45 = vpack.c.bf16 %v6018_v36, %v6017_v6  ;;  %v4994_v42 = vadd.f32 %v6018_v36, %v4993_v9  ;;  %v5130_v51 = vmul.f32 %v6018_v36, %v6018_v36 }
 0x33d   :  { %v5215_v34 = vadd.f32 %v5214_v38, %v5129_v56  ;;  %v3620_v3 = vpop.f32.mrb[84].mxu1 }
 0x33e   :  { %4860 = vst [vmem:[%s8959_s2 + $0x148] sm:$0xff] %v5880_v45  ;;  %v5284_v59 = vadd.f32 %v5283_v19, %v5130_v51  ;;  %v4326_v61 = vpop.f32.mrb[84].mxu0  ;;  %v3622_v7 = vpop.f32.mrb[85].mxu1 }
 0x33f   :  { %v6019_v20 = vadd.f32 %v4326_v61, %v3620_v3  ;;  %v4328_v10 = vpop.f32.mrb[85].mxu0  ;;  %v3624_v39 = vpop.f32.mrb[86].mxu1 }
 0x340   :  { %v6020_v37 = vadd.f32 %v4328_v10, %v3622_v7  ;;  %v4330_v27 = vpop.f32.mrb[86].mxu0  ;;  %v3626_v60 = vpop.f32.mrb[87].mxu1 }
 0x341   :  { %v4926_v24 = vadd.f32 %v6019_v20, %v4925_v11  ;;  %v5131_v12 = vmul.f32 %v6019_v20, %v6019_v20  ;;  %v6021_v13 = vadd.f32 %v4330_v27, %v3624_v39  ;;  %v4332_v47 = vpop.f32.mrb[87].mxu0 }
 0x342   :  { %v5881_v30 = vpack.c.bf16 %v6020_v37, %v6019_v20  ;;  %v4995_v16 = vadd.f32 %v6020_v37, %v4994_v42  ;;  %v5132_v53 = vmul.f32 %v6020_v37, %v6020_v37  ;;  %v6022_v32 = vadd.f32 %v4332_v47, %v3626_v60 }
 0x343   :  { %v5216_v18 = vadd.f32 %v5215_v34, %v5131_v12  ;;  %v4927_v58 = vadd.f32 %v6021_v13, %v4926_v24  ;;  %v5133_v23 = vmul.f32 %v6021_v13, %v6021_v13 }
 0x344   :  { %4861 = vst [vmem:[%s8959_s2 + $0x150] sm:$0xff] %v5881_v30  ;;  %v5285_v48 = vadd.f32 %v5284_v59, %v5132_v53  ;;  %v5882_v62 = vpack.c.bf16 %v6022_v32, %v6021_v13  ;;  %v4996_v63 = vadd.f32 %v6022_v32, %v4995_v16  ;;  %v5134_v43 = vmul.f32 %v6022_v32, %v6022_v32 }
 0x345   :  { %v5217_v25 = vadd.f32 %v5216_v18, %v5133_v23  ;;  %v3630_v2 = vpop.f32.mrb[88].mxu1 }
 0x346   :  { %4862 = vst [vmem:[%s8959_s2 + $0x158] sm:$0xff] %v5882_v62  ;;  %v5286_v17 = vadd.f32 %v5285_v48, %v5134_v43  ;;  %v4336_v52 = vpop.f32.mrb[88].mxu0  ;;  %v3632_v40 = vpop.f32.mrb[89].mxu1 }
 0x347   :  { %v6023_v4 = vadd.f32 %v4336_v52, %v3630_v2  ;;  %v4338_v54 = vpop.f32.mrb[89].mxu0  ;;  %v3634_v21 = vpop.f32.mrb[90].mxu1 }
 0x348   :  { %v6024_v0 = vadd.f32 %v4338_v54, %v3632_v40  ;;  %v4340_v22 = vpop.f32.mrb[90].mxu0  ;;  %v3636_v29 = vpop.f32.mrb[91].mxu1 }
 0x349   :  { %v4928_v49 = vadd.f32 %v6023_v4, %v4927_v58  ;;  %v5135_v31 = vmul.f32 %v6023_v4, %v6023_v4  ;;  %v6025_v57 = vadd.f32 %v4340_v22, %v3634_v21  ;;  %v4342_v15 = vpop.f32.mrb[91].mxu0 }
 0x34a   :  { %v5883_v35 = vpack.c.bf16 %v6024_v0, %v6023_v4  ;;  %v4997_v33 = vadd.f32 %v6024_v0, %v4996_v63  ;;  %v5136_v50 = vmul.f32 %v6024_v0, %v6024_v0  ;;  %v6026_v8 = vadd.f32 %v4342_v15, %v3636_v29 }
 0x34b   :  { %v5218_v41 = vadd.f32 %v5217_v25, %v5135_v31  ;;  %v4929_v28 = vadd.f32 %v6025_v57, %v4928_v49  ;;  %v5137_v26 = vmul.f32 %v6025_v57, %v6025_v57 }
 0x34c   :  { %4863 = vst [vmem:[%s8959_s2 + $0x160] sm:$0xff] %v5883_v35  ;;  %v5287_v1 = vadd.f32 %v5286_v17, %v5136_v50  ;;  %v5884_v5 = vpack.c.bf16 %v6026_v8, %v6025_v57  ;;  %v4998_v6 = vadd.f32 %v6026_v8, %v4997_v33  ;;  %v5138_v44 = vmul.f32 %v6026_v8, %v6026_v8 }
 0x34d   :  { %v5219_v46 = vadd.f32 %v5218_v41, %v5137_v26  ;;  %v3640_v9 = vpop.f32.mrb[92].mxu1 }
 0x34e   :  { %4864 = vst [vmem:[%s8959_s2 + $0x168] sm:$0xff] %v5884_v5  ;;  %v5288_v14 = vadd.f32 %v5287_v1, %v5138_v44  ;;  %v4346_v55 = vpop.f32.mrb[92].mxu0  ;;  %v3642_v38 = vpop.f32.mrb[93].mxu1 }
 0x34f   :  { %v6027_v36 = vadd.f32 %v4346_v55, %v3640_v9  ;;  %v4348_v11 = vpop.f32.mrb[93].mxu0  ;;  %v3644_v19 = vpop.f32.mrb[94].mxu1 }
 0x350   :  { %v6028_v56 = vadd.f32 %v4348_v11, %v3642_v38  ;;  %v4350_v45 = vpop.f32.mrb[94].mxu0  ;;  %v3646_v59 = vpop.f32.mrb[95].mxu1 }
 0x351   :  { %v4930_v42 = vadd.f32 %v6027_v36, %v4929_v28  ;;  %v5139_v51 = vmul.f32 %v6027_v36, %v6027_v36  ;;  %v6029_v34 = vadd.f32 %v4350_v45, %v3644_v19  ;;  %v4352_v3 = vpop.f32.mrb[95].mxu0 }
 0x352   :  { %v5885_v61 = vpack.c.bf16 %v6028_v56, %v6027_v36  ;;  %v4999_v20 = vadd.f32 %v6028_v56, %v4998_v6  ;;  %v5140_v7 = vmul.f32 %v6028_v56, %v6028_v56  ;;  %v6030_v10 = vadd.f32 %v4352_v3, %v3646_v59 }
 0x353   :  { %v5220_v37 = vadd.f32 %v5219_v46, %v5139_v51  ;;  %v4931_v39 = vadd.f32 %v6029_v34, %v4930_v42  ;;  %v5141_v27 = vmul.f32 %v6029_v34, %v6029_v34 }
 0x354   :  { %4865 = vst [vmem:[%s8959_s2 + $0x170] sm:$0xff] %v5885_v61  ;;  %v5289_v24 = vadd.f32 %v5288_v14, %v5140_v7  ;;  %v5886_v12 = vpack.c.bf16 %v6030_v10, %v6029_v34  ;;  %v5000_v13 = vadd.f32 %v6030_v10, %v4999_v20  ;;  %v5142_v60 = vmul.f32 %v6030_v10, %v6030_v10 }
 0x355   :  { %v5221_v47 = vadd.f32 %v5220_v37, %v5141_v27  ;;  %v3650_v16 = vpop.f32.mrb[96].mxu1 }
 0x356   :  { %4866 = vst [vmem:[%s8959_s2 + $0x178] sm:$0xff] %v5886_v12  ;;  %v5290_v30 = vadd.f32 %v5289_v24, %v5142_v60  ;;  %v4356_v53 = vpop.f32.mrb[96].mxu0  ;;  %v3652_v18 = vpop.f32.mrb[97].mxu1 }
 0x357   :  { %v6031_v32 = vadd.f32 %v4356_v53, %v3650_v16  ;;  %v4358_v58 = vpop.f32.mrb[97].mxu0  ;;  %v3654_v48 = vpop.f32.mrb[98].mxu1 }
 0x358   :  { %v6032_v23 = vadd.f32 %v4358_v58, %v3652_v18  ;;  %v4360_v62 = vpop.f32.mrb[98].mxu0  ;;  %v3656_v17 = vpop.f32.mrb[99].mxu1 }
 0x359   :  { %v4932_v63 = vadd.f32 %v6031_v32, %v4931_v39  ;;  %v5143_v43 = vmul.f32 %v6031_v32, %v6031_v32  ;;  %v6033_v25 = vadd.f32 %v4360_v62, %v3654_v48  ;;  %v4362_v2 = vpop.f32.mrb[99].mxu0 }
 0x35a   :  { %v5887_v52 = vpack.c.bf16 %v6032_v23, %v6031_v32  ;;  %v5001_v4 = vadd.f32 %v6032_v23, %v5000_v13  ;;  %v5144_v40 = vmul.f32 %v6032_v23, %v6032_v23  ;;  %v6034_v54 = vadd.f32 %v4362_v2, %v3656_v17 }
 0x35b   :  { %v5222_v0 = vadd.f32 %v5221_v47, %v5143_v43  ;;  %v4933_v21 = vadd.f32 %v6033_v25, %v4932_v63  ;;  %v5145_v22 = vmul.f32 %v6033_v25, %v6033_v25 }
 0x35c   :  { %4867 = vst [vmem:[%s8959_s2 + $0x180] sm:$0xff] %v5887_v52  ;;  %v5291_v49 = vadd.f32 %v5290_v30, %v5144_v40  ;;  %v5888_v31 = vpack.c.bf16 %v6034_v54, %v6033_v25  ;;  %v5002_v57 = vadd.f32 %v6034_v54, %v5001_v4  ;;  %v5146_v29 = vmul.f32 %v6034_v54, %v6034_v54 }
 0x35d   :  { %v5223_v15 = vadd.f32 %v5222_v0, %v5145_v22  ;;  %v3660_v33 = vpop.f32.mrb[100].mxu1 }
 0x35e   :  { %4868 = vst [vmem:[%s8959_s2 + $0x188] sm:$0xff] %v5888_v31  ;;  %v5292_v35 = vadd.f32 %v5291_v49, %v5146_v29  ;;  %v4366_v50 = vpop.f32.mrb[100].mxu0  ;;  %v3662_v41 = vpop.f32.mrb[101].mxu1 }
 0x35f   :  { %v6035_v8 = vadd.f32 %v4366_v50, %v3660_v33  ;;  %v4368_v28 = vpop.f32.mrb[101].mxu0  ;;  %v3664_v1 = vpop.f32.mrb[102].mxu1 }
 0x360   :  { %v6036_v26 = vadd.f32 %v4368_v28, %v3662_v41  ;;  %v4370_v5 = vpop.f32.mrb[102].mxu0  ;;  %v3666_v14 = vpop.f32.mrb[103].mxu1 }
 0x361   :  { %v4934_v6 = vadd.f32 %v6035_v8, %v4933_v21  ;;  %v5147_v44 = vmul.f32 %v6035_v8, %v6035_v8  ;;  %v6037_v46 = vadd.f32 %v4370_v5, %v3664_v1  ;;  %v4372_v9 = vpop.f32.mrb[103].mxu0 }
 0x362   :  { %v5889_v55 = vpack.c.bf16 %v6036_v26, %v6035_v8  ;;  %v5003_v36 = vadd.f32 %v6036_v26, %v5002_v57  ;;  %v5148_v38 = vmul.f32 %v6036_v26, %v6036_v26  ;;  %v6038_v11 = vadd.f32 %v4372_v9, %v3666_v14 }
 0x363   :  { %v5224_v56 = vadd.f32 %v5223_v15, %v5147_v44  ;;  %v4935_v19 = vadd.f32 %v6037_v46, %v4934_v6  ;;  %v5149_v45 = vmul.f32 %v6037_v46, %v6037_v46 }
 0x364   :  { %4869 = vst [vmem:[%s8959_s2 + $0x190] sm:$0xff] %v5889_v55  ;;  %v5293_v42 = vadd.f32 %v5292_v35, %v5148_v38  ;;  %v5890_v51 = vpack.c.bf16 %v6038_v11, %v6037_v46  ;;  %v5004_v34 = vadd.f32 %v6038_v11, %v5003_v36  ;;  %v5150_v59 = vmul.f32 %v6038_v11, %v6038_v11 }
 0x365   :  { %v5225_v3 = vadd.f32 %v5224_v56, %v5149_v45  ;;  %v3670_v20 = vpop.f32.mrb[104].mxu1 }
 0x366   :  { %4870 = vst [vmem:[%s8959_s2 + $0x198] sm:$0xff] %v5890_v51  ;;  %v5294_v61 = vadd.f32 %v5293_v42, %v5150_v59  ;;  %v4376_v7 = vpop.f32.mrb[104].mxu0  ;;  %v3672_v37 = vpop.f32.mrb[105].mxu1 }
 0x367   :  { %v6039_v10 = vadd.f32 %v4376_v7, %v3670_v20  ;;  %v4378_v39 = vpop.f32.mrb[105].mxu0  ;;  %v3674_v24 = vpop.f32.mrb[106].mxu1 }
 0x368   :  { %v6040_v27 = vadd.f32 %v4378_v39, %v3672_v37  ;;  %v4380_v12 = vpop.f32.mrb[106].mxu0  ;;  %v3676_v30 = vpop.f32.mrb[107].mxu1 }
 0x369   :  { %v4936_v13 = vadd.f32 %v6039_v10, %v4935_v19  ;;  %v5151_v60 = vmul.f32 %v6039_v10, %v6039_v10  ;;  %v6041_v47 = vadd.f32 %v4380_v12, %v3674_v24  ;;  %v4382_v16 = vpop.f32.mrb[107].mxu0 }
 0x36a   :  { %v5891_v53 = vpack.c.bf16 %v6040_v27, %v6039_v10  ;;  %v5005_v32 = vadd.f32 %v6040_v27, %v5004_v34  ;;  %v5152_v18 = vmul.f32 %v6040_v27, %v6040_v27  ;;  %v6042_v58 = vadd.f32 %v4382_v16, %v3676_v30 }
 0x36b   :  { %v5226_v23 = vadd.f32 %v5225_v3, %v5151_v60  ;;  %v4937_v48 = vadd.f32 %v6041_v47, %v4936_v13  ;;  %v5153_v62 = vmul.f32 %v6041_v47, %v6041_v47 }
 0x36c   :  { %4871 = vst [vmem:[%s8959_s2 + $0x1a0] sm:$0xff] %v5891_v53  ;;  %v5295_v63 = vadd.f32 %v5294_v61, %v5152_v18  ;;  %v5892_v43 = vpack.c.bf16 %v6042_v58, %v6041_v47  ;;  %v5006_v25 = vadd.f32 %v6042_v58, %v5005_v32  ;;  %v5154_v17 = vmul.f32 %v6042_v58, %v6042_v58 }
 0x36d   :  { %v5227_v2 = vadd.f32 %v5226_v23, %v5153_v62  ;;  %v3680_v4 = vpop.f32.mrb[108].mxu1 }
 0x36e   :  { %4872 = vst [vmem:[%s8959_s2 + $0x1a8] sm:$0xff] %v5892_v43  ;;  %v5296_v52 = vadd.f32 %v5295_v63, %v5154_v17  ;;  %v4386_v40 = vpop.f32.mrb[108].mxu0  ;;  %v3682_v0 = vpop.f32.mrb[109].mxu1 }
 0x36f   :  { %v6043_v54 = vadd.f32 %v4386_v40, %v3680_v4  ;;  %v4388_v21 = vpop.f32.mrb[109].mxu0  ;;  %v3684_v49 = vpop.f32.mrb[110].mxu1 }
 0x370   :  { %v6044_v22 = vadd.f32 %v4388_v21, %v3682_v0  ;;  %v4390_v31 = vpop.f32.mrb[110].mxu0  ;;  %v3686_v35 = vpop.f32.mrb[111].mxu1 }
 0x371   :  { %v4938_v57 = vadd.f32 %v6043_v54, %v4937_v48  ;;  %v5155_v29 = vmul.f32 %v6043_v54, %v6043_v54  ;;  %v6045_v15 = vadd.f32 %v4390_v31, %v3684_v49  ;;  %v4392_v33 = vpop.f32.mrb[111].mxu0 }
 0x372   :  { %v5893_v50 = vpack.c.bf16 %v6044_v22, %v6043_v54  ;;  %v5007_v8 = vadd.f32 %v6044_v22, %v5006_v25  ;;  %v5156_v41 = vmul.f32 %v6044_v22, %v6044_v22  ;;  %v6046_v28 = vadd.f32 %v4392_v33, %v3686_v35 }
 0x373   :  { %v5228_v26 = vadd.f32 %v5227_v2, %v5155_v29  ;;  %v4939_v1 = vadd.f32 %v6045_v15, %v4938_v57  ;;  %v5157_v5 = vmul.f32 %v6045_v15, %v6045_v15 }
 0x374   :  { %4873 = vst [vmem:[%s8959_s2 + $0x1b0] sm:$0xff] %v5893_v50  ;;  %v5297_v6 = vadd.f32 %v5296_v52, %v5156_v41  ;;  %v5894_v44 = vpack.c.bf16 %v6046_v28, %v6045_v15  ;;  %v5008_v46 = vadd.f32 %v6046_v28, %v5007_v8  ;;  %v5158_v14 = vmul.f32 %v6046_v28, %v6046_v28 }
 0x375   :  { %v5229_v9 = vadd.f32 %v5228_v26, %v5157_v5  ;;  %v3690_v36 = vpop.f32.mrb[112].mxu1 }
 0x376   :  { %4874 = vst [vmem:[%s8959_s2 + $0x1b8] sm:$0xff] %v5894_v44  ;;  %v5298_v55 = vadd.f32 %v5297_v6, %v5158_v14  ;;  %v4396_v38 = vpop.f32.mrb[112].mxu0  ;;  %v3692_v56 = vpop.f32.mrb[113].mxu1 }
 0x377   :  { %v6047_v11 = vadd.f32 %v4396_v38, %v3690_v36  ;;  %v4398_v19 = vpop.f32.mrb[113].mxu0  ;;  %v3694_v42 = vpop.f32.mrb[114].mxu1 }
 0x378   :  { %v6048_v45 = vadd.f32 %v4398_v19, %v3692_v56  ;;  %v4400_v51 = vpop.f32.mrb[114].mxu0  ;;  %v3696_v61 = vpop.f32.mrb[115].mxu1 }
 0x379   :  { %v4940_v34 = vadd.f32 %v6047_v11, %v4939_v1  ;;  %v5159_v59 = vmul.f32 %v6047_v11, %v6047_v11  ;;  %v6049_v3 = vadd.f32 %v4400_v51, %v3694_v42  ;;  %v4402_v20 = vpop.f32.mrb[115].mxu0 }
 0x37a   :  { %v5895_v7 = vpack.c.bf16 %v6048_v45, %v6047_v11  ;;  %v5009_v10 = vadd.f32 %v6048_v45, %v5008_v46  ;;  %v5160_v37 = vmul.f32 %v6048_v45, %v6048_v45  ;;  %v6050_v39 = vadd.f32 %v4402_v20, %v3696_v61 }
 0x37b   :  { %v5230_v27 = vadd.f32 %v5229_v9, %v5159_v59  ;;  %v4941_v24 = vadd.f32 %v6049_v3, %v4940_v34  ;;  %v5161_v12 = vmul.f32 %v6049_v3, %v6049_v3 }
 0x37c   :  { %4875 = vst [vmem:[%s8959_s2 + $0x1c0] sm:$0xff] %v5895_v7  ;;  %v5299_v13 = vadd.f32 %v5298_v55, %v5160_v37  ;;  %v5896_v60 = vpack.c.bf16 %v6050_v39, %v6049_v3  ;;  %v5010_v47 = vadd.f32 %v6050_v39, %v5009_v10  ;;  %v5162_v30 = vmul.f32 %v6050_v39, %v6050_v39 }
 0x37d   :  { %v5231_v16 = vadd.f32 %v5230_v27, %v5161_v12  ;;  %v3700_v32 = vpop.f32.mrb[116].mxu1 }
 0x37e   :  { %4876 = vst [vmem:[%s8959_s2 + $0x1c8] sm:$0xff] %v5896_v60  ;;  %v5300_v53 = vadd.f32 %v5299_v13, %v5162_v30  ;;  %v4406_v18 = vpop.f32.mrb[116].mxu0  ;;  %v3702_v23 = vpop.f32.mrb[117].mxu1 }
 0x37f   :  { %v6051_v58 = vadd.f32 %v4406_v18, %v3700_v32  ;;  %v4408_v48 = vpop.f32.mrb[117].mxu0  ;;  %v3704_v63 = vpop.f32.mrb[118].mxu1 }
 0x380   :  { %v6052_v62 = vadd.f32 %v4408_v48, %v3702_v23  ;;  %v4410_v43 = vpop.f32.mrb[118].mxu0  ;;  %v3706_v52 = vpop.f32.mrb[119].mxu1 }
 0x381   :  { %v4942_v25 = vadd.f32 %v6051_v58, %v4941_v24  ;;  %v5163_v17 = vmul.f32 %v6051_v58, %v6051_v58  ;;  %v6053_v2 = vadd.f32 %v4410_v43, %v3704_v63  ;;  %v4412_v4 = vpop.f32.mrb[119].mxu0 }
 0x382   :  { %v5897_v40 = vpack.c.bf16 %v6052_v62, %v6051_v58  ;;  %v5011_v54 = vadd.f32 %v6052_v62, %v5010_v47  ;;  %v5164_v0 = vmul.f32 %v6052_v62, %v6052_v62  ;;  %v6054_v21 = vadd.f32 %v4412_v4, %v3706_v52 }
 0x383   :  { %v5232_v22 = vadd.f32 %v5231_v16, %v5163_v17  ;;  %v4943_v49 = vadd.f32 %v6053_v2, %v4942_v25  ;;  %v5165_v31 = vmul.f32 %v6053_v2, %v6053_v2 }
 0x384   :  { %4877 = vst [vmem:[%s8959_s2 + $0x1d0] sm:$0xff] %v5897_v40  ;;  %v5301_v57 = vadd.f32 %v5300_v53, %v5164_v0  ;;  %v5898_v29 = vpack.c.bf16 %v6054_v21, %v6053_v2  ;;  %v5012_v15 = vadd.f32 %v6054_v21, %v5011_v54  ;;  %v5166_v35 = vmul.f32 %v6054_v21, %v6054_v21 }
 0x385   :  { %v5233_v33 = vadd.f32 %v5232_v22, %v5165_v31  ;;  %v3710_v8 = vpop.f32.mrb[120].mxu1  ;;  %v7116_v31 = vmov 1966171168  }
 0x386   :  { %4878 = vst [vmem:[%s8959_s2 + $0x1d8] sm:$0xff] %v5898_v29  ;;  %v5302_v50 = vadd.f32 %v5301_v57, %v5166_v35  ;;  %v4416_v41 = vpop.f32.mrb[120].mxu0  ;;  %v3712_v26 = vpop.f32.mrb[121].mxu1  ;;  %v5027_v57 = vunpack.c.l.s4 %v7116_v31  ;;  %v5029_v29 = vlaneseq }
 0x387   :  { %v6055_v28 = vadd.f32 %v4416_v41, %v3710_v8  ;;  %v4418_v1 = vpop.f32.mrb[121].mxu0  ;;  %v3714_v6 = vpop.f32.mrb[122].mxu1 }
 0x388   :  { %v6056_v5 = vadd.f32 %v4418_v1, %v3712_v26  ;;  %v4420_v44 = vpop.f32.mrb[122].mxu0  ;;  %v3716_v55 = vpop.f32.mrb[123].mxu1  ;;  %v5028_v1 = vunpack.c.0.s8 %v5027_v57  ;;  %vm5043_vm0 = vcmp.lt.s32.totalorder %v5029_v29, 256 }
 0x389   :  { %v4944_v46 = vadd.f32 %v6055_v28, %v4943_v49  ;;  %v5167_v14 = vmul.f32 %v6055_v28, %v6055_v28  ;;  %v6057_v9 = vadd.f32 %v4420_v44, %v3714_v6  ;;  %v4422_v36 = vpop.f32.mrb[123].mxu0 }
 0x38a   :  { %v5899_v38 = vpack.c.bf16 %v6056_v5, %v6055_v28  ;;  %v5013_v11 = vadd.f32 %v6056_v5, %v5012_v15  ;;  %v5168_v56 = vmul.f32 %v6056_v5, %v6056_v5  ;;  %v6058_v19 = vadd.f32 %v4422_v36, %v3716_v55 }
 0x38b   :  { %v5234_v45 = vadd.f32 %v5233_v33, %v5167_v14  ;;  %v4945_v42 = vadd.f32 %v6057_v9, %v4944_v46  ;;  %v5169_v51 = vmul.f32 %v6057_v9, %v6057_v9  ;;  %v5030_v5 = vshrl.u32 %v5029_v29, 7 }
 0x38c   :  { %4879 = vst [vmem:[%s8959_s2 + $0x1e0] sm:$0xff] %v5899_v38  ;;  %v5303_v34 = vadd.f32 %v5302_v50, %v5168_v56  ;;  %v5900_v59 = vpack.c.bf16 %v6058_v19, %v6057_v9  ;;  %v5014_v3 = vadd.f32 %v6058_v19, %v5013_v11  ;;  %v5170_v61 = vmul.f32 %v6058_v19, %v6058_v19 }
 0x38d   :  { %v5235_v20 = vadd.f32 %v5234_v45, %v5169_v51  ;;  %v3720_v10 = vpop.f32.mrb[124].mxu1  ;;  %v5031_v11 = vsub.s32 %v5028_v1, %v5030_v5 }
 0x38e   :  { %4880 = vst [vmem:[%s8959_s2 + $0x1e8] sm:$0xff] %v5900_v59  ;;  %v5304_v7 = vadd.f32 %v5303_v34, %v5170_v61  ;;  %v4426_v37 = vpop.f32.mrb[124].mxu0  ;;  %v3722_v27 = vpop.f32.mrb[125].mxu1 }
 0x38f   :  { %v6059_v39 = vadd.f32 %v4426_v37, %v3720_v10  ;;  %v4428_v24 = vpop.f32.mrb[125].mxu0  ;;  %v3724_v13 = vpop.f32.mrb[126].mxu1 }
 0x390   :  { %v6060_v12 = vadd.f32 %v4428_v24, %v3722_v27  ;;  %v4430_v60 = vpop.f32.mrb[126].mxu0  ;;  %v3726_v53 = vpop.f32.mrb[127].mxu1 }
 0x391   :  { %v4946_v47 = vadd.f32 %v6059_v39, %v4945_v42  ;;  %v5171_v30 = vmul.f32 %v6059_v39, %v6059_v39  ;;  %v6061_v16 = vadd.f32 %v4430_v60, %v3724_v13  ;;  %v4432_v32 = vpop.f32.mrb[127].mxu0 }
 0x392   :  { %v5901_v18 = vpack.c.bf16 %v6060_v12, %v6059_v39  ;;  %v5015_v58 = vadd.f32 %v6060_v12, %v5014_v3  ;;  %v5172_v23 = vmul.f32 %v6060_v12, %v6060_v12  ;;  %v6062_v48 = vadd.f32 %v4432_v32, %v3726_v53 }
 0x393   :  { %v5236_v62 = vadd.f32 %v5235_v20, %v5171_v30  ;;  %v4947_v63 = vadd.f32 %v6061_v16, %v4946_v47  ;;  %v5173_v43 = vmul.f32 %v6061_v16, %v6061_v16 }
 0x394   :  { %4881 = vst [vmem:[%s8959_s2 + $0x1f0] sm:$0xff] %v5901_v18  ;;  %v5305_v25 = vadd.f32 %v5304_v7, %v5172_v23  ;;  %v5902_v17 = vpack.c.bf16 %v6062_v48, %v6061_v16  ;;  %v5016_v2 = vadd.f32 %v6062_v48, %v5015_v58  ;;  %v5174_v52 = vmul.f32 %v6062_v48, %v6062_v48 }
 0x395   :  { %v4948_v4 = vrot.slane %v4947_v63, 4  ;;  %v5237_v40 = vadd.f32 %v5236_v62, %v5173_v43 }
 0x396   :  { %4882 = vst [vmem:[%s8959_s2 + $0x1f8] sm:$0xff] %v5902_v17  ;;  %v5017_v54 = vrot.slane %v5016_v2, 4  ;;  %v5306_v0 = vadd.f32 %v5305_v25, %v5174_v52 }
 0x397   :  { %v4949_v21 = vadd.f32 %v4948_v4, %v4947_v63  ;;  %v5238_v22 = vrot.slane %v5237_v40, 4 }
 0x398   :  { %v5018_v49 = vadd.f32 %v5017_v54, %v5016_v2  ;;  %v5307_v15 = vrot.slane %v5306_v0, 4 }
 0x399   :  { %v4950_v35 = vrot.slane %v4949_v21, 2  ;;  %v5239_v33 = vadd.f32 %v5238_v22, %v5237_v40 }
 0x39a   :  { %v5019_v50 = vrot.slane %v5018_v49, 2  ;;  %v5308_v8 = vadd.f32 %v5307_v15, %v5306_v0 }
 0x39b   :  { %v4951_v41 = vadd.f32 %v4950_v35, %v4949_v21  ;;  %v5240_v28 = vrot.slane %v5239_v33, 2 }
 0x39c   :  { %v5020_v26 = vadd.f32 %v5019_v50, %v5018_v49  ;;  %v5309_v6 = vrot.slane %v5308_v8, 2 }
 0x39d   :  { %v4952_v44 = vrot.slane %v4951_v41, 1  ;;  %v5241_v46 = vadd.f32 %v5240_v28, %v5239_v33 }
 0x39e   :  { %v5021_v14 = vrot.slane %v5020_v26, 1  ;;  %v5310_v9 = vadd.f32 %v5309_v6, %v5308_v8 }
 0x39f   :  { %v4953_v55 = vadd.f32 %v4952_v44, %v4951_v41  ;;  %v5242_v36 = vrot.slane %v5241_v46, 1 }
 0x3a0   :  { %v5022_v38 = vadd.f32 %v5021_v14, %v5020_v26  ;;  %v5311_v56 = vrot.slane %v5310_v9, 1 }
 0x3a1   :  { %v5243_v19 = vadd.f32 %v5242_v36, %v5241_v46 }
 0x3a2   :  { %v5025_v45 = vcombine.low %v4953_v55, %v5022_v38  ;;  %v5312_v42 = vadd.f32 %v5311_v56, %v5310_v9 }
 0x3a4   :  { %v5032_v51 = vrot.slane %v5025_v45, %v5031_v11  ;;  %v5315_v34 = vcombine.low %v5243_v19, %v5312_v42 }
 0x3a6   :  { %v5039_v59 = vrot.slane %v5032_v51, %v5031_v11  ;;  %v5322_v3 = vrot.slane %v5315_v34, %v5031_v11 }
 0x3a8   :  { %5045 = vst.msk [vmem:[%s8960_s3] ss:$8 sm:$0x3] %vm5043_vm0, %v5039_v59  ;;  %v5329_v61 = vrot.slane %v5322_v3, %v5031_v11 }
 0x3aa   :  { %5838 = vst.msk [vmem:[%s8960_s3 + $0x1] ss:$8 sm:$0x3] %vm5043_vm0, %v5329_v61 }

// kernel: forward.11
= control target key start
LH: loop header
LB: loop body
LE: loop exit
PB: predicated region body
PF: predicated region fallthrough
CT: control target
= control target key end

     0   :  { %v205_v0 = vlaneseq  ;;  %s2148_s0 = inlined_call_operand.vmem [shape: bf16[512,256], index: 0, kind: input, shape index: {}]   ;;  %s2149_s1 = inlined_call_operand.vmem [shape: f32[8,256], index: 1, kind: input, shape index: {}]   ;;  %s2150_s2 = inlined_call_operand.vmem [shape: bf16[512,256], index: 2, kind: output, shape index: {}]  }
   0x1   :  { %v11_v1 = vld [vmem:[%s2148_s0] sm:$0xff]  ;;  %v12_v3 = vld [vmem:[%s2148_s0 + $0x8] sm:$0xff]  ;;  %v13_v9 = vld [vmem:[%s2148_s0 + $0x10] sm:$0xff] }
   0x2   :  { %v203_v2 = vld [vmem:[%s2149_s1] ss:$8 sm:$0x3]  ;;  %v75_v4 = vunpack.c.l.bf16 %v11_v1  ;;  %v76_v5 = vunpack.c.h.bf16 %v11_v1  ;;  %v206_v6 = vshrl.u32 %v205_v0, 7  ;;  %v77_v8 = vunpack.c.l.bf16 %v12_v3  ;;  %v14_v10 = vld [vmem:[%s2148_s0 + $0x18] sm:$0xff]  ;;  %v1495_v17 = vld [vmem:[%s2148_s0 + $0x30] sm:$0xff] }
   0x3   :  { %v1320_v7 = vld [vmem:[%s2149_s1 + $0x1] ss:$8 sm:$0x3]  ;;  %v78_v11 = vunpack.c.h.bf16 %v12_v3  ;;  %v79_v12 = vunpack.c.l.bf16 %v13_v9  ;;  %v80_v13 = vunpack.c.h.bf16 %v13_v9  ;;  %v81_v14 = vunpack.c.l.bf16 %v14_v10  ;;  %v1501_v22 = vld [vmem:[%s2148_s0 + $0x38] sm:$0xff] }
   0x4   :  { %v1485_v15 = vld [vmem:[%s2148_s0 + $0x20] sm:$0xff]  ;;  %v1490_v16 = vld [vmem:[%s2148_s0 + $0x28] sm:$0xff]  ;;  %v207_v18 = vsub.s32 0, %v206_v6  ;;  %v211_v19 = vsub.s32 1, %v206_v6  ;;  %v82_v20 = vunpack.c.h.bf16 %v14_v10  ;;  %v87_v27 = vunpack.c.l.bf16 %v1495_v17 }
   0x5   :  { %v83_v21 = vunpack.c.l.bf16 %v1485_v15  ;;  %v1506_v23 = vld [vmem:[%s2148_s0 + $0x40] sm:$0xff]  ;;  %v84_v24 = vunpack.c.h.bf16 %v1485_v15  ;;  %v85_v25 = vunpack.c.l.bf16 %v1490_v16  ;;  %v86_v26 = vunpack.c.h.bf16 %v1490_v16 }
   0x6   :  { %v1512_v28 = vrot.slane %v203_v2, %v207_v18  ;;  %v1514_v29 = vrot.slane %v203_v2, %v211_v19  ;;  %v1516_v30 = vrot.slane %v1320_v7, %v207_v18  ;;  %v1518_v31 = vrot.slane %v1320_v7, %v211_v19 }
   0x7   :  { %v88_v32 = vunpack.c.h.bf16 %v1495_v17  ;;  %v89_v33 = vunpack.c.l.bf16 %v1501_v22  ;;  %v90_v34 = vunpack.c.h.bf16 %v1501_v22  ;;  %v91_v35 = vunpack.c.l.bf16 %v1506_v23 }
   0x8   :  { %v215_v36 = vmul.f32 %v1512_v28, %v75_v4  ;;  %v216_v37 = vmul.f32 %v1514_v29, %v76_v5  ;;  %v217_v38 = vmul.f32 %v1512_v28, %v77_v8  ;;  %v218_v39 = vmul.f32 %v1514_v29, %v78_v11 }
   0x9   :  { %v219_v40 = vmul.f32 %v1512_v28, %v79_v12  ;;  %v220_v41 = vmul.f32 %v1514_v29, %v80_v13  ;;  %v221_v42 = vmul.f32 %v1512_v28, %v81_v14  ;;  %v222_v43 = vmul.f32 %v1514_v29, %v82_v20 }
   0xa   :  { %v356_v44 = vadd.f32 %v1516_v30, %v215_v36  ;;  %v357_v45 = vadd.f32 %v1518_v31, %v216_v37  ;;  %v358_v46 = vadd.f32 %v1516_v30, %v217_v38  ;;  %v359_v47 = vadd.f32 %v1518_v31, %v218_v39 }
   0xb   :  { %v360_v48 = vadd.f32 %v1516_v30, %v219_v40  ;;  %v361_v49 = vadd.f32 %v1518_v31, %v220_v41  ;;  %v362_v50 = vadd.f32 %v1516_v30, %v221_v42  ;;  %v363_v51 = vadd.f32 %v1518_v31, %v222_v43  ;;  %v20_v40 = vld [vmem:[%s2148_s0 + $0x48] sm:$0xff] }
   0xc   :  { %vm484_vm0 = vcmp.ge.f32.partialorder %v356_v44, 0.0  ;;  %vm485_vm1 = vcmp.ge.f32.partialorder %v357_v45, 0.0  ;;  %v612_v52 = vmul.f32 0.2, %v356_v44  ;;  %v613_v53 = vmul.f32 0.2, %v357_v45 }
   0xd   :  { %vm486_vm2 = vcmp.ge.f32.partialorder %v358_v46, 0.0  ;;  %vm487_vm3 = vcmp.ge.f32.partialorder %v359_v47, 0.0  ;;  %v614_v54 = vmul.f32 0.2, %v358_v46  ;;  %v615_v55 = vmul.f32 0.2, %v359_v47 }
   0xe   :  { %v740_v56 = vsel %vm484_vm0, %v356_v44, %v612_v52  ;;  %v741_v57 = vsel %vm485_vm1, %v357_v45, %v613_v53  ;;  %vm488_vm4 = vcmp.ge.f32.partialorder %v360_v48, 0.0  ;;  %vm489_vm5 = vcmp.ge.f32.partialorder %v361_v49, 0.0 }
   0xf   :  { %v1385_v58 = vpack.c.bf16 %v741_v57, %v740_v56  ;;  %v742_v59 = vsel %vm486_vm2, %v358_v46, %v614_v54  ;;  %v743_v60 = vsel %vm487_vm3, %v359_v47, %v615_v55  ;;  %v616_v61 = vmul.f32 0.2, %v360_v48 }
  0x10   :  { %v1386_v62 = vpack.c.bf16 %v743_v60, %v742_v59  ;;  %v617_v63 = vmul.f32 0.2, %v361_v49  ;;  %vm490_vm6 = vcmp.ge.f32.partialorder %v362_v50, 0.0  ;;  %vm491_vm7 = vcmp.ge.f32.partialorder %v363_v51, 0.0 }
  0x11   :  { %1252 = vst [vmem:[%s2150_s2] sm:$0xff] %v1385_v58  ;;  %v744_v0 = vsel %vm488_vm4, %v360_v48, %v616_v61  ;;  %v618_v1 = vmul.f32 0.2, %v362_v50  ;;  %v619_v2 = vmul.f32 0.2, %v363_v51  ;;  %v223_v3 = vmul.f32 %v1512_v28, %v83_v21 }
  0x12   :  { %1253 = vst [vmem:[%s2150_s2 + $0x8] sm:$0xff] %v1386_v62  ;;  %v745_v4 = vsel %vm489_vm5, %v361_v49, %v617_v63  ;;  %v224_v5 = vmul.f32 %v1514_v29, %v84_v24  ;;  %v225_v6 = vmul.f32 %v1512_v28, %v85_v25  ;;  %v226_v7 = vmul.f32 %v1514_v29, %v86_v26  ;;  %v21_v49 = vld [vmem:[%s2148_s0 + $0x50] sm:$0xff] }
  0x13   :  { %v1387_v8 = vpack.c.bf16 %v745_v4, %v744_v0  ;;  %v746_v9 = vsel %vm490_vm6, %v362_v50, %v618_v1  ;;  %v747_v10 = vsel %vm491_vm7, %v363_v51, %v619_v2  ;;  %v364_v11 = vadd.f32 %v1516_v30, %v223_v3  ;;  %v22_v1 = vld [vmem:[%s2148_s0 + $0x58] sm:$0xff] }
  0x14   :  { %v1388_v12 = vpack.c.bf16 %v747_v10, %v746_v9  ;;  %v365_v13 = vadd.f32 %v1518_v31, %v224_v5  ;;  %v366_v14 = vadd.f32 %v1516_v30, %v225_v6  ;;  %v367_v15 = vadd.f32 %v1518_v31, %v226_v7 }
  0x15   :  { %1254 = vst [vmem:[%s2150_s2 + $0x10] sm:$0xff] %v1387_v8  ;;  %vm492_vm8 = vcmp.ge.f32.partialorder %v364_v11, 0.0  ;;  %v620_v16 = vmul.f32 0.2, %v364_v11  ;;  %v227_v18 = vmul.f32 %v1512_v28, %v87_v27  ;;  %v228_v19 = vmul.f32 %v1514_v29, %v88_v32 }
  0x16   :  { %1255 = vst [vmem:[%s2150_s2 + $0x18] sm:$0xff] %v1388_v12  ;;  %vm493_vm9 = vcmp.ge.f32.partialorder %v365_v13, 0.0  ;;  %v621_v20 = vmul.f32 0.2, %v365_v13  ;;  %vm494_vm10 = vcmp.ge.f32.partialorder %v366_v14, 0.0  ;;  %vm495_vm11 = vcmp.ge.f32.partialorder %v367_v15, 0.0 }
  0x17   :  { %v748_v21 = vsel %vm492_vm8, %v364_v11, %v620_v16  ;;  %v622_v24 = vmul.f32 0.2, %v366_v14  ;;  %v623_v25 = vmul.f32 0.2, %v367_v15  ;;  %v368_v26 = vadd.f32 %v1516_v30, %v227_v18  ;;  %v23_v11 = vld [vmem:[%s2148_s0 + $0x60] sm:$0xff]  ;;  %v24_v16 = vld [vmem:[%s2148_s0 + $0x68] sm:$0xff] }
  0x18   :  { %v749_v36 = vsel %vm493_vm9, %v365_v13, %v621_v20  ;;  %v369_v27 = vadd.f32 %v1518_v31, %v228_v19  ;;  %v229_v17 = vmul.f32 %v1512_v28, %v89_v33  ;;  %v230_v32 = vmul.f32 %v1514_v29, %v90_v34 }
  0x19   :  { %v1389_v37 = vpack.c.bf16 %v749_v36, %v748_v21  ;;  %v750_v38 = vsel %vm494_vm10, %v366_v14, %v622_v24  ;;  %v751_v39 = vsel %vm495_vm11, %v367_v15, %v623_v25  ;;  %vm496_vm12 = vcmp.ge.f32.partialorder %v368_v26, 0.0 }
  0x1a   :  { %v1390_v41 = vpack.c.bf16 %v751_v39, %v750_v38  ;;  %vm497_vm13 = vcmp.ge.f32.partialorder %v369_v27, 0.0  ;;  %v624_v42 = vmul.f32 0.2, %v368_v26  ;;  %v625_v43 = vmul.f32 0.2, %v369_v27 }
  0x1b   :  { %1256 = vst [vmem:[%s2150_s2 + $0x20] sm:$0xff] %v1389_v37  ;;  %v370_v22 = vadd.f32 %v1516_v30, %v229_v17  ;;  %v371_v33 = vadd.f32 %v1518_v31, %v230_v32  ;;  %v92_v34 = vunpack.c.h.bf16 %v1506_v23  ;;  %v231_v44 = vmul.f32 %v1512_v28, %v91_v35 }
  0x1c   :  { %1257 = vst [vmem:[%s2150_s2 + $0x28] sm:$0xff] %v1390_v41  ;;  %v752_v45 = vsel %vm496_vm12, %v368_v26, %v624_v42  ;;  %v753_v46 = vsel %vm497_vm13, %v369_v27, %v625_v43  ;;  %v93_v47 = vunpack.c.l.bf16 %v20_v40  ;;  %v94_v48 = vunpack.c.h.bf16 %v20_v40 }
  0x1d   :  { %v1391_v50 = vpack.c.bf16 %v753_v46, %v752_v45  ;;  %vm498_vm14 = vcmp.ge.f32.partialorder %v370_v22, 0.0  ;;  %vm499_vm15 = vcmp.ge.f32.partialorder %v371_v33, 0.0  ;;  %v626_v51 = vmul.f32 0.2, %v370_v22 }
  0x1e   :  { %v627_v52 = vmul.f32 0.2, %v371_v33  ;;  %v232_v23 = vmul.f32 %v1514_v29, %v92_v34  ;;  %v372_v35 = vadd.f32 %v1516_v30, %v231_v44  ;;  %v233_v53 = vmul.f32 %v1512_v28, %v93_v47 }
  0x1f   :  { %1258 = vst [vmem:[%s2150_s2 + $0x30] sm:$0xff] %v1391_v50  ;;  %v754_v54 = vsel %vm498_vm14, %v370_v22, %v626_v51  ;;  %v234_v55 = vmul.f32 %v1514_v29, %v94_v48  ;;  %v95_v56 = vunpack.c.l.bf16 %v21_v49  ;;  %v96_v57 = vunpack.c.h.bf16 %v21_v49  ;;  %v25_v22 = vld [vmem:[%s2148_s0 + $0x70] sm:$0xff] }
  0x20   :  { %v755_v58 = vsel %vm499_vm15, %v371_v33, %v627_v52  ;;  %v373_v59 = vadd.f32 %v1518_v31, %v232_v23  ;;  %vm500_vm0 = vcmp.ge.f32.partialorder %v372_v35, 0.0  ;;  %v628_v60 = vmul.f32 0.2, %v372_v35 }
  0x21   :  { %v1392_v61 = vpack.c.bf16 %v755_v58, %v754_v54  ;;  %v374_v62 = vadd.f32 %v1516_v30, %v233_v53  ;;  %v375_v63 = vadd.f32 %v1518_v31, %v234_v55  ;;  %v235_v0 = vmul.f32 %v1512_v28, %v95_v56 }
  0x22   :  { %vm501_vm1 = vcmp.ge.f32.partialorder %v373_v59, 0.0  ;;  %v629_v2 = vmul.f32 0.2, %v373_v59  ;;  %v756_v3 = vsel %vm500_vm0, %v372_v35, %v628_v60  ;;  %v236_v4 = vmul.f32 %v1514_v29, %v96_v57  ;;  %v26_v35 = vld [vmem:[%s2148_s0 + $0x78] sm:$0xff] }
  0x23   :  { %1259 = vst [vmem:[%s2150_s2 + $0x38] sm:$0xff] %v1392_v61  ;;  %vm502_vm2 = vcmp.ge.f32.partialorder %v374_v62, 0.0  ;;  %vm503_vm3 = vcmp.ge.f32.partialorder %v375_v63, 0.0  ;;  %v630_v5 = vmul.f32 0.2, %v374_v62  ;;  %v376_v8 = vadd.f32 %v1516_v30, %v235_v0 }
  0x24   :  { %v631_v6 = vmul.f32 0.2, %v375_v63  ;;  %v757_v7 = vsel %vm501_vm1, %v373_v59, %v629_v2  ;;  %v377_v9 = vadd.f32 %v1518_v31, %v236_v4  ;;  %v97_v10 = vunpack.c.l.bf16 %v22_v1  ;;  %v27_v59 = vld [vmem:[%s2148_s0 + $0x80] sm:$0xff] }
  0x25   :  { %v1393_v12 = vpack.c.bf16 %v757_v7, %v756_v3  ;;  %v758_v13 = vsel %vm502_vm2, %v374_v62, %v630_v5  ;;  %v98_v15 = vunpack.c.h.bf16 %v22_v1  ;;  %vm504_vm4 = vcmp.ge.f32.partialorder %v376_v8, 0.0 }
  0x26   :  { %v759_v14 = vsel %vm503_vm3, %v375_v63, %v631_v6  ;;  %vm505_vm5 = vcmp.ge.f32.partialorder %v377_v9, 0.0  ;;  %v632_v19 = vmul.f32 0.2, %v376_v8  ;;  %v633_v20 = vmul.f32 0.2, %v377_v9 }
  0x27   :  { %v1394_v18 = vpack.c.bf16 %v759_v14, %v758_v13  ;;  %1260 = vst [vmem:[%s2150_s2 + $0x40] sm:$0xff] %v1393_v12  ;;  %v237_v21 = vmul.f32 %v1512_v28, %v97_v10  ;;  %v238_v24 = vmul.f32 %v1514_v29, %v98_v15  ;;  %v99_v25 = vunpack.c.l.bf16 %v23_v11 }
  0x28   :  { %v760_v26 = vsel %vm504_vm4, %v376_v8, %v632_v19  ;;  %v100_v36 = vunpack.c.h.bf16 %v23_v11  ;;  %v101_v27 = vunpack.c.l.bf16 %v24_v16  ;;  %v102_v17 = vunpack.c.h.bf16 %v24_v16  ;;  %v28_v8 = vld [vmem:[%s2148_s0 + $0x88] sm:$0xff] }
  0x29   :  { %1261 = vst [vmem:[%s2150_s2 + $0x48] sm:$0xff] %v1394_v18  ;;  %v761_v32 = vsel %vm505_vm5, %v377_v9, %v633_v20  ;;  %v378_v37 = vadd.f32 %v1516_v30, %v237_v21  ;;  %v379_v38 = vadd.f32 %v1518_v31, %v238_v24  ;;  %v239_v39 = vmul.f32 %v1512_v28, %v99_v25  ;;  %v29_v20 = vld [vmem:[%s2148_s0 + $0x90] sm:$0xff] }
  0x2a   :  { %v1395_v40 = vpack.c.bf16 %v761_v32, %v760_v26  ;;  %v240_v41 = vmul.f32 %v1514_v29, %v100_v36  ;;  %v241_v42 = vmul.f32 %v1512_v28, %v101_v27  ;;  %v242_v43 = vmul.f32 %v1514_v29, %v102_v17 }
  0x2b   :  { %vm506_vm6 = vcmp.ge.f32.partialorder %v378_v37, 0.0  ;;  %vm507_vm7 = vcmp.ge.f32.partialorder %v379_v38, 0.0  ;;  %v634_v33 = vmul.f32 0.2, %v378_v37  ;;  %v635_v34 = vmul.f32 0.2, %v379_v38 }
  0x2c   :  { %1262 = vst [vmem:[%s2150_s2 + $0x50] sm:$0xff] %v1395_v40  ;;  %v380_v44 = vadd.f32 %v1516_v30, %v239_v39  ;;  %v381_v45 = vadd.f32 %v1518_v31, %v240_v41  ;;  %v382_v46 = vadd.f32 %v1516_v30, %v241_v42  ;;  %v383_v47 = vadd.f32 %v1518_v31, %v242_v43 }
  0x2d   :  { %v762_v48 = vsel %vm506_vm6, %v378_v37, %v634_v33  ;;  %v763_v49 = vsel %vm507_vm7, %v379_v38, %v635_v34  ;;  %v103_v50 = vunpack.c.l.bf16 %v25_v22  ;;  %v104_v51 = vunpack.c.h.bf16 %v25_v22  ;;  %v30_v34 = vld [vmem:[%s2148_s0 + $0x98] sm:$0xff] }
  0x2e   :  { %v1396_v52 = vpack.c.bf16 %v763_v49, %v762_v48  ;;  %vm508_vm8 = vcmp.ge.f32.partialorder %v380_v44, 0.0  ;;  %vm509_vm9 = vcmp.ge.f32.partialorder %v381_v45, 0.0  ;;  %v636_v23 = vmul.f32 0.2, %v380_v44 }
  0x2f   :  { %v637_v53 = vmul.f32 0.2, %v381_v45  ;;  %vm510_vm10 = vcmp.ge.f32.partialorder %v382_v46, 0.0  ;;  %vm511_vm11 = vcmp.ge.f32.partialorder %v383_v47, 0.0  ;;  %v638_v54 = vmul.f32 0.2, %v382_v46 }
  0x30   :  { %1263 = vst [vmem:[%s2150_s2 + $0x58] sm:$0xff] %v1396_v52  ;;  %v764_v55 = vsel %vm508_vm8, %v380_v44, %v636_v23  ;;  %v639_v56 = vmul.f32 0.2, %v383_v47  ;;  %v243_v57 = vmul.f32 %v1512_v28, %v103_v50  ;;  %v244_v58 = vmul.f32 %v1514_v29, %v104_v51  ;;  %v31_v23 = vld [vmem:[%s2148_s0 + $0xa0] sm:$0xff] }
  0x31   :  { %v765_v60 = vsel %vm509_vm9, %v381_v45, %v637_v53  ;;  %v766_v61 = vsel %vm510_vm10, %v382_v46, %v638_v54  ;;  %v105_v62 = vunpack.c.l.bf16 %v26_v35  ;;  %v106_v63 = vunpack.c.h.bf16 %v26_v35 }
  0x32   :  { %v1397_v0 = vpack.c.bf16 %v765_v60, %v764_v55  ;;  %v767_v1 = vsel %vm511_vm11, %v383_v47, %v639_v56  ;;  %v384_v2 = vadd.f32 %v1516_v30, %v243_v57  ;;  %v385_v3 = vadd.f32 %v1518_v31, %v244_v58  ;;  %v32_v56 = vld [vmem:[%s2148_s0 + $0xa8] sm:$0xff] }
  0x33   :  { %v1398_v4 = vpack.c.bf16 %v767_v1, %v766_v61  ;;  %v245_v5 = vmul.f32 %v1512_v28, %v105_v62  ;;  %v246_v6 = vmul.f32 %v1514_v29, %v106_v63  ;;  %v107_v7 = vunpack.c.l.bf16 %v27_v59 }
  0x34   :  { %1264 = vst [vmem:[%s2150_s2 + $0x60] sm:$0xff] %v1397_v0  ;;  %vm512_vm12 = vcmp.ge.f32.partialorder %v384_v2, 0.0  ;;  %vm513_vm13 = vcmp.ge.f32.partialorder %v385_v3, 0.0  ;;  %v640_v9 = vmul.f32 0.2, %v384_v2  ;;  %v108_v13 = vunpack.c.h.bf16 %v27_v59 }
  0x35   :  { %v641_v10 = vmul.f32 0.2, %v385_v3  ;;  %1265 = vst [vmem:[%s2150_s2 + $0x68] sm:$0xff] %v1398_v4  ;;  %v386_v11 = vadd.f32 %v1516_v30, %v245_v5  ;;  %v387_v12 = vadd.f32 %v1518_v31, %v246_v6  ;;  %v247_v14 = vmul.f32 %v1512_v28, %v107_v7 }
  0x36   :  { %v768_v15 = vsel %vm512_vm12, %v384_v2, %v640_v9  ;;  %v109_v18 = vunpack.c.l.bf16 %v28_v8  ;;  %v110_v19 = vunpack.c.h.bf16 %v28_v8  ;;  %v248_v26 = vmul.f32 %v1514_v29, %v108_v13 }
  0x37   :  { %v769_v16 = vsel %vm513_vm13, %v385_v3, %v641_v10  ;;  %vm514_vm14 = vcmp.ge.f32.partialorder %v386_v11, 0.0  ;;  %vm515_vm15 = vcmp.ge.f32.partialorder %v387_v12, 0.0  ;;  %v642_v24 = vmul.f32 0.2, %v386_v11 }
  0x38   :  { %v1399_v21 = vpack.c.bf16 %v769_v16, %v768_v15  ;;  %v643_v25 = vmul.f32 0.2, %v387_v12  ;;  %v388_v36 = vadd.f32 %v1516_v30, %v247_v14  ;;  %v249_v27 = vmul.f32 %v1512_v28, %v109_v18 }
  0x39   :  { %v770_v17 = vsel %vm514_vm14, %v386_v11, %v642_v24  ;;  %v250_v32 = vmul.f32 %v1514_v29, %v110_v19  ;;  %v111_v37 = vunpack.c.l.bf16 %v29_v20  ;;  %v112_v38 = vunpack.c.h.bf16 %v29_v20  ;;  %v33_v11 = vld [vmem:[%s2148_s0 + $0xb0] sm:$0xff] }
  0x3a   :  { %1266 = vst [vmem:[%s2150_s2 + $0x70] sm:$0xff] %v1399_v21  ;;  %v771_v39 = vsel %vm515_vm15, %v387_v12, %v643_v25  ;;  %v389_v40 = vadd.f32 %v1518_v31, %v248_v26  ;;  %vm516_vm0 = vcmp.ge.f32.partialorder %v388_v36, 0.0  ;;  %v644_v41 = vmul.f32 0.2, %v388_v36 }
  0x3b   :  { %v1400_v42 = vpack.c.bf16 %v771_v39, %v770_v17  ;;  %v390_v43 = vadd.f32 %v1516_v30, %v249_v27  ;;  %v391_v22 = vadd.f32 %v1518_v31, %v250_v32  ;;  %v251_v33 = vmul.f32 %v1512_v28, %v111_v37 }
  0x3c   :  { %vm517_vm1 = vcmp.ge.f32.partialorder %v389_v40, 0.0  ;;  %v645_v44 = vmul.f32 0.2, %v389_v40  ;;  %v772_v45 = vsel %vm516_vm0, %v388_v36, %v644_v41  ;;  %v252_v46 = vmul.f32 %v1514_v29, %v112_v38  ;;  %v34_v36 = vld [vmem:[%s2148_s0 + $0xb8] sm:$0xff] }
  0x3d   :  { %1267 = vst [vmem:[%s2150_s2 + $0x78] sm:$0xff] %v1400_v42  ;;  %vm518_vm2 = vcmp.ge.f32.partialorder %v390_v43, 0.0  ;;  %vm519_vm3 = vcmp.ge.f32.partialorder %v391_v22, 0.0  ;;  %v646_v47 = vmul.f32 0.2, %v390_v43  ;;  %v392_v50 = vadd.f32 %v1516_v30, %v251_v33 }
  0x3e   :  { %v647_v48 = vmul.f32 0.2, %v391_v22  ;;  %v773_v49 = vsel %vm517_vm1, %v389_v40, %v645_v44  ;;  %v393_v51 = vadd.f32 %v1518_v31, %v252_v46  ;;  %v113_v52 = vunpack.c.l.bf16 %v30_v34  ;;  %v35_v40 = vld [vmem:[%s2148_s0 + $0xc0] sm:$0xff] }
  0x3f   :  { %v1401_v35 = vpack.c.bf16 %v773_v49, %v772_v45  ;;  %v774_v53 = vsel %vm518_vm2, %v390_v43, %v646_v47  ;;  %v114_v55 = vunpack.c.h.bf16 %v30_v34  ;;  %vm520_vm4 = vcmp.ge.f32.partialorder %v392_v50, 0.0 }
  0x40   :  { %v775_v54 = vsel %vm519_vm3, %v391_v22, %v647_v48  ;;  %vm521_vm5 = vcmp.ge.f32.partialorder %v393_v51, 0.0  ;;  %v648_v58 = vmul.f32 0.2, %v392_v50  ;;  %v649_v59 = vmul.f32 0.2, %v393_v51 }
  0x41   :  { %v1402_v57 = vpack.c.bf16 %v775_v54, %v774_v53  ;;  %1268 = vst [vmem:[%s2150_s2 + $0x80] sm:$0xff] %v1401_v35  ;;  %v253_v60 = vmul.f32 %v1512_v28, %v113_v52  ;;  %v254_v61 = vmul.f32 %v1514_v29, %v114_v55  ;;  %v115_v62 = vunpack.c.l.bf16 %v31_v23 }
  0x42   :  { %v776_v63 = vsel %vm520_vm4, %v392_v50, %v648_v58  ;;  %v116_v0 = vunpack.c.h.bf16 %v31_v23  ;;  %v117_v1 = vunpack.c.l.bf16 %v32_v56  ;;  %v118_v2 = vunpack.c.h.bf16 %v32_v56  ;;  %v36_v50 = vld [vmem:[%s2148_s0 + $0xc8] sm:$0xff] }
  0x43   :  { %1269 = vst [vmem:[%s2150_s2 + $0x88] sm:$0xff] %v1402_v57  ;;  %v777_v3 = vsel %vm521_vm5, %v393_v51, %v649_v59  ;;  %v394_v4 = vadd.f32 %v1516_v30, %v253_v60  ;;  %v395_v5 = vadd.f32 %v1518_v31, %v254_v61  ;;  %v255_v6 = vmul.f32 %v1512_v28, %v115_v62  ;;  %v37_v59 = vld [vmem:[%s2148_s0 + $0xd0] sm:$0xff] }
  0x44   :  { %v1403_v7 = vpack.c.bf16 %v777_v3, %v776_v63  ;;  %v256_v8 = vmul.f32 %v1514_v29, %v116_v0  ;;  %v257_v9 = vmul.f32 %v1512_v28, %v117_v1  ;;  %v258_v10 = vmul.f32 %v1514_v29, %v118_v2 }
  0x45   :  { %vm522_vm6 = vcmp.ge.f32.partialorder %v394_v4, 0.0  ;;  %vm523_vm7 = vcmp.ge.f32.partialorder %v395_v5, 0.0  ;;  %v650_v12 = vmul.f32 0.2, %v394_v4  ;;  %v651_v13 = vmul.f32 0.2, %v395_v5 }
  0x46   :  { %1270 = vst [vmem:[%s2150_s2 + $0x90] sm:$0xff] %v1403_v7  ;;  %v396_v14 = vadd.f32 %v1516_v30, %v255_v6  ;;  %v397_v15 = vadd.f32 %v1518_v31, %v256_v8  ;;  %v398_v16 = vadd.f32 %v1516_v30, %v257_v9  ;;  %v399_v18 = vadd.f32 %v1518_v31, %v258_v10 }
  0x47   :  { %v778_v19 = vsel %vm522_vm6, %v394_v4, %v650_v12  ;;  %v779_v20 = vsel %vm523_vm7, %v395_v5, %v651_v13  ;;  %v119_v21 = vunpack.c.l.bf16 %v33_v11  ;;  %v120_v24 = vunpack.c.h.bf16 %v33_v11  ;;  %v38_v13 = vld [vmem:[%s2148_s0 + $0xd8] sm:$0xff] }
  0x48   :  { %v1404_v25 = vpack.c.bf16 %v779_v20, %v778_v19  ;;  %vm524_vm8 = vcmp.ge.f32.partialorder %v396_v14, 0.0  ;;  %vm525_vm9 = vcmp.ge.f32.partialorder %v397_v15, 0.0  ;;  %v652_v26 = vmul.f32 0.2, %v396_v14 }
  0x49   :  { %v653_v27 = vmul.f32 0.2, %v397_v15  ;;  %vm526_vm10 = vcmp.ge.f32.partialorder %v398_v16, 0.0  ;;  %vm527_vm11 = vcmp.ge.f32.partialorder %v399_v18, 0.0  ;;  %v654_v17 = vmul.f32 0.2, %v398_v16 }
  0x4a   :  { %1271 = vst [vmem:[%s2150_s2 + $0x98] sm:$0xff] %v1404_v25  ;;  %v780_v32 = vsel %vm524_vm8, %v396_v14, %v652_v26  ;;  %v655_v37 = vmul.f32 0.2, %v399_v18  ;;  %v259_v38 = vmul.f32 %v1512_v28, %v119_v21  ;;  %v260_v39 = vmul.f32 %v1514_v29, %v120_v24  ;;  %v39_v26 = vld [vmem:[%s2148_s0 + $0xe0] sm:$0xff] }
  0x4b   :  { %v781_v41 = vsel %vm525_vm9, %v397_v15, %v653_v27  ;;  %v782_v42 = vsel %vm526_vm10, %v398_v16, %v654_v17  ;;  %v121_v43 = vunpack.c.l.bf16 %v34_v36  ;;  %v122_v22 = vunpack.c.h.bf16 %v34_v36 }
  0x4c   :  { %v1405_v33 = vpack.c.bf16 %v781_v41, %v780_v32  ;;  %v783_v34 = vsel %vm527_vm11, %v399_v18, %v655_v37  ;;  %v400_v44 = vadd.f32 %v1516_v30, %v259_v38  ;;  %v401_v45 = vadd.f32 %v1518_v31, %v260_v39  ;;  %v40_v37 = vld [vmem:[%s2148_s0 + $0xe8] sm:$0xff] }
  0x4d   :  { %v1406_v46 = vpack.c.bf16 %v783_v34, %v782_v42  ;;  %v261_v47 = vmul.f32 %v1512_v28, %v121_v43  ;;  %v262_v48 = vmul.f32 %v1514_v29, %v122_v22  ;;  %v123_v49 = vunpack.c.l.bf16 %v35_v40 }
  0x4e   :  { %1272 = vst [vmem:[%s2150_s2 + $0xa0] sm:$0xff] %v1405_v33  ;;  %vm528_vm12 = vcmp.ge.f32.partialorder %v400_v44, 0.0  ;;  %vm529_vm13 = vcmp.ge.f32.partialorder %v401_v45, 0.0  ;;  %v656_v51 = vmul.f32 0.2, %v400_v44  ;;  %v124_v53 = vunpack.c.h.bf16 %v35_v40 }
  0x4f   :  { %v657_v52 = vmul.f32 0.2, %v401_v45  ;;  %1273 = vst [vmem:[%s2150_s2 + $0xa8] sm:$0xff] %v1406_v46  ;;  %v402_v23 = vadd.f32 %v1516_v30, %v261_v47  ;;  %v403_v35 = vadd.f32 %v1518_v31, %v262_v48  ;;  %v263_v54 = vmul.f32 %v1512_v28, %v123_v49 }
  0x50   :  { %v784_v55 = vsel %vm528_vm12, %v400_v44, %v656_v51  ;;  %v125_v57 = vunpack.c.l.bf16 %v36_v50  ;;  %v126_v58 = vunpack.c.h.bf16 %v36_v50  ;;  %v264_v63 = vmul.f32 %v1514_v29, %v124_v53 }
  0x51   :  { %v785_v56 = vsel %vm529_vm13, %v401_v45, %v657_v52  ;;  %vm530_vm14 = vcmp.ge.f32.partialorder %v402_v23, 0.0  ;;  %vm531_vm15 = vcmp.ge.f32.partialorder %v403_v35, 0.0  ;;  %v658_v61 = vmul.f32 0.2, %v402_v23 }
  0x52   :  { %v1407_v60 = vpack.c.bf16 %v785_v56, %v784_v55  ;;  %v659_v62 = vmul.f32 0.2, %v403_v35  ;;  %v404_v0 = vadd.f32 %v1516_v30, %v263_v54  ;;  %v265_v1 = vmul.f32 %v1512_v28, %v125_v57 }
  0x53   :  { %v786_v2 = vsel %vm530_vm14, %v402_v23, %v658_v61  ;;  %v266_v3 = vmul.f32 %v1514_v29, %v126_v58  ;;  %v127_v4 = vunpack.c.l.bf16 %v37_v59  ;;  %v128_v5 = vunpack.c.h.bf16 %v37_v59  ;;  %v41_v23 = vld [vmem:[%s2148_s0 + $0xf0] sm:$0xff] }
  0x54   :  { %1274 = vst [vmem:[%s2150_s2 + $0xb0] sm:$0xff] %v1407_v60  ;;  %v787_v6 = vsel %vm531_vm15, %v403_v35, %v659_v62  ;;  %v405_v7 = vadd.f32 %v1518_v31, %v264_v63  ;;  %vm532_vm0 = vcmp.ge.f32.partialorder %v404_v0, 0.0  ;;  %v660_v8 = vmul.f32 0.2, %v404_v0 }
  0x55   :  { %v1408_v9 = vpack.c.bf16 %v787_v6, %v786_v2  ;;  %v406_v10 = vadd.f32 %v1516_v30, %v265_v1  ;;  %v407_v11 = vadd.f32 %v1518_v31, %v266_v3  ;;  %v267_v12 = vmul.f32 %v1512_v28, %v127_v4 }
  0x56   :  { %vm533_vm1 = vcmp.ge.f32.partialorder %v405_v7, 0.0  ;;  %v661_v14 = vmul.f32 0.2, %v405_v7  ;;  %v788_v15 = vsel %vm532_vm0, %v404_v0, %v660_v8  ;;  %v268_v16 = vmul.f32 %v1514_v29, %v128_v5  ;;  %v42_v0 = vld [vmem:[%s2148_s0 + $0xf8] sm:$0xff] }
  0x57   :  { %1275 = vst [vmem:[%s2150_s2 + $0xb8] sm:$0xff] %v1408_v9  ;;  %vm534_vm2 = vcmp.ge.f32.partialorder %v406_v10, 0.0  ;;  %vm535_vm3 = vcmp.ge.f32.partialorder %v407_v11, 0.0  ;;  %v662_v18 = vmul.f32 0.2, %v406_v10  ;;  %v408_v21 = vadd.f32 %v1516_v30, %v267_v12 }
  0x58   :  { %v663_v19 = vmul.f32 0.2, %v407_v11  ;;  %v789_v20 = vsel %vm533_vm1, %v405_v7, %v661_v14  ;;  %v409_v24 = vadd.f32 %v1518_v31, %v268_v16  ;;  %v129_v25 = vunpack.c.l.bf16 %v38_v13  ;;  %v43_v7 = vld [vmem:[%s2148_s0 + $0x100] sm:$0xff] }
  0x59   :  { %v1409_v36 = vpack.c.bf16 %v789_v20, %v788_v15  ;;  %v790_v27 = vsel %vm534_vm2, %v406_v10, %v662_v18  ;;  %v130_v32 = vunpack.c.h.bf16 %v38_v13  ;;  %vm536_vm4 = vcmp.ge.f32.partialorder %v408_v21, 0.0 }
  0x5a   :  { %v791_v17 = vsel %vm535_vm3, %v407_v11, %v663_v19  ;;  %vm537_vm5 = vcmp.ge.f32.partialorder %v409_v24, 0.0  ;;  %v664_v39 = vmul.f32 0.2, %v408_v21  ;;  %v665_v40 = vmul.f32 0.2, %v409_v24 }
  0x5b   :  { %v1410_v38 = vpack.c.bf16 %v791_v17, %v790_v27  ;;  %1276 = vst [vmem:[%s2150_s2 + $0xc0] sm:$0xff] %v1409_v36  ;;  %v269_v41 = vmul.f32 %v1512_v28, %v129_v25  ;;  %v270_v42 = vmul.f32 %v1514_v29, %v130_v32  ;;  %v131_v43 = vunpack.c.l.bf16 %v39_v26 }
  0x5c   :  { %v792_v22 = vsel %vm536_vm4, %v408_v21, %v664_v39  ;;  %v132_v33 = vunpack.c.h.bf16 %v39_v26  ;;  %v133_v34 = vunpack.c.l.bf16 %v40_v37  ;;  %v134_v44 = vunpack.c.h.bf16 %v40_v37  ;;  %v44_v21 = vld [vmem:[%s2148_s0 + $0x108] sm:$0xff] }
  0x5d   :  { %1277 = vst [vmem:[%s2150_s2 + $0xc8] sm:$0xff] %v1410_v38  ;;  %v793_v45 = vsel %vm537_vm5, %v409_v24, %v665_v40  ;;  %v410_v46 = vadd.f32 %v1516_v30, %v269_v41  ;;  %v411_v47 = vadd.f32 %v1518_v31, %v270_v42  ;;  %v271_v48 = vmul.f32 %v1512_v28, %v131_v43  ;;  %v45_v40 = vld [vmem:[%s2148_s0 + $0x110] sm:$0xff] }
  0x5e   :  { %v1411_v49 = vpack.c.bf16 %v793_v45, %v792_v22  ;;  %v272_v50 = vmul.f32 %v1514_v29, %v132_v33  ;;  %v273_v51 = vmul.f32 %v1512_v28, %v133_v34  ;;  %v274_v52 = vmul.f32 %v1514_v29, %v134_v44 }
  0x5f   :  { %vm538_vm6 = vcmp.ge.f32.partialorder %v410_v46, 0.0  ;;  %vm539_vm7 = vcmp.ge.f32.partialorder %v411_v47, 0.0  ;;  %v666_v35 = vmul.f32 0.2, %v410_v46  ;;  %v667_v53 = vmul.f32 0.2, %v411_v47 }
  0x60   :  { %1278 = vst [vmem:[%s2150_s2 + $0xd0] sm:$0xff] %v1411_v49  ;;  %v412_v54 = vadd.f32 %v1516_v30, %v271_v48  ;;  %v413_v55 = vadd.f32 %v1518_v31, %v272_v50  ;;  %v414_v56 = vadd.f32 %v1516_v30, %v273_v51  ;;  %v415_v57 = vadd.f32 %v1518_v31, %v274_v52 }
  0x61   :  { %v794_v58 = vsel %vm538_vm6, %v410_v46, %v666_v35  ;;  %v795_v59 = vsel %vm539_vm7, %v411_v47, %v667_v53  ;;  %v135_v60 = vunpack.c.l.bf16 %v41_v23  ;;  %v136_v61 = vunpack.c.h.bf16 %v41_v23  ;;  %v46_v53 = vld [vmem:[%s2148_s0 + $0x118] sm:$0xff] }
  0x62   :  { %v1412_v62 = vpack.c.bf16 %v795_v59, %v794_v58  ;;  %vm540_vm8 = vcmp.ge.f32.partialorder %v412_v54, 0.0  ;;  %vm541_vm9 = vcmp.ge.f32.partialorder %v413_v55, 0.0  ;;  %v668_v63 = vmul.f32 0.2, %v412_v54 }
  0x63   :  { %v669_v1 = vmul.f32 0.2, %v413_v55  ;;  %vm542_vm10 = vcmp.ge.f32.partialorder %v414_v56, 0.0  ;;  %vm543_vm11 = vcmp.ge.f32.partialorder %v415_v57, 0.0  ;;  %v670_v2 = vmul.f32 0.2, %v414_v56 }
  0x64   :  { %1279 = vst [vmem:[%s2150_s2 + $0xd8] sm:$0xff] %v1412_v62  ;;  %v796_v3 = vsel %vm540_vm8, %v412_v54, %v668_v63  ;;  %v671_v4 = vmul.f32 0.2, %v415_v57  ;;  %v275_v5 = vmul.f32 %v1512_v28, %v135_v60  ;;  %v276_v6 = vmul.f32 %v1514_v29, %v136_v61  ;;  %v47_v63 = vld [vmem:[%s2148_s0 + $0x120] sm:$0xff] }
  0x65   :  { %v797_v8 = vsel %vm541_vm9, %v413_v55, %v669_v1  ;;  %v798_v9 = vsel %vm542_vm10, %v414_v56, %v670_v2  ;;  %v137_v10 = vunpack.c.l.bf16 %v42_v0  ;;  %v138_v11 = vunpack.c.h.bf16 %v42_v0 }
  0x66   :  { %v1413_v12 = vpack.c.bf16 %v797_v8, %v796_v3  ;;  %v799_v13 = vsel %vm543_vm11, %v415_v57, %v671_v4  ;;  %v416_v14 = vadd.f32 %v1516_v30, %v275_v5  ;;  %v417_v15 = vadd.f32 %v1518_v31, %v276_v6  ;;  %v48_v4 = vld [vmem:[%s2148_s0 + $0x128] sm:$0xff] }
  0x67   :  { %v1414_v16 = vpack.c.bf16 %v799_v13, %v798_v9  ;;  %v277_v18 = vmul.f32 %v1512_v28, %v137_v10  ;;  %v278_v19 = vmul.f32 %v1514_v29, %v138_v11  ;;  %v139_v20 = vunpack.c.l.bf16 %v43_v7 }
  0x68   :  { %1280 = vst [vmem:[%s2150_s2 + $0xe0] sm:$0xff] %v1413_v12  ;;  %vm544_vm12 = vcmp.ge.f32.partialorder %v416_v14, 0.0  ;;  %vm545_vm13 = vcmp.ge.f32.partialorder %v417_v15, 0.0  ;;  %v672_v24 = vmul.f32 0.2, %v416_v14  ;;  %v140_v27 = vunpack.c.h.bf16 %v43_v7 }
  0x69   :  { %v673_v25 = vmul.f32 0.2, %v417_v15  ;;  %1281 = vst [vmem:[%s2150_s2 + $0xe8] sm:$0xff] %v1414_v16  ;;  %v418_v26 = vadd.f32 %v1516_v30, %v277_v18  ;;  %v419_v36 = vadd.f32 %v1518_v31, %v278_v19  ;;  %v279_v17 = vmul.f32 %v1512_v28, %v139_v20 }
  0x6a   :  { %v800_v32 = vsel %vm544_vm12, %v416_v14, %v672_v24  ;;  %v141_v38 = vunpack.c.l.bf16 %v44_v21  ;;  %v142_v39 = vunpack.c.h.bf16 %v44_v21  ;;  %v280_v22 = vmul.f32 %v1514_v29, %v140_v27 }
  0x6b   :  { %v801_v37 = vsel %vm545_vm13, %v417_v15, %v673_v25  ;;  %vm546_vm14 = vcmp.ge.f32.partialorder %v418_v26, 0.0  ;;  %vm547_vm15 = vcmp.ge.f32.partialorder %v419_v36, 0.0  ;;  %v674_v42 = vmul.f32 0.2, %v418_v26 }
  0x6c   :  { %v1415_v41 = vpack.c.bf16 %v801_v37, %v800_v32  ;;  %v675_v43 = vmul.f32 0.2, %v419_v36  ;;  %v420_v33 = vadd.f32 %v1516_v30, %v279_v17  ;;  %v281_v34 = vmul.f32 %v1512_v28, %v141_v38 }
  0x6d   :  { %v802_v44 = vsel %vm546_vm14, %v418_v26, %v674_v42  ;;  %v282_v45 = vmul.f32 %v1514_v29, %v142_v39  ;;  %v143_v46 = vunpack.c.l.bf16 %v45_v40  ;;  %v144_v47 = vunpack.c.h.bf16 %v45_v40  ;;  %v49_v26 = vld [vmem:[%s2148_s0 + $0x130] sm:$0xff] }
  0x6e   :  { %1282 = vst [vmem:[%s2150_s2 + $0xf0] sm:$0xff] %v1415_v41  ;;  %v803_v48 = vsel %vm547_vm15, %v419_v36, %v675_v43  ;;  %v421_v49 = vadd.f32 %v1518_v31, %v280_v22  ;;  %vm548_vm0 = vcmp.ge.f32.partialorder %v420_v33, 0.0  ;;  %v676_v50 = vmul.f32 0.2, %v420_v33 }
  0x6f   :  { %v1416_v51 = vpack.c.bf16 %v803_v48, %v802_v44  ;;  %v422_v52 = vadd.f32 %v1516_v30, %v281_v34  ;;  %v423_v23 = vadd.f32 %v1518_v31, %v282_v45  ;;  %v283_v35 = vmul.f32 %v1512_v28, %v143_v46 }
  0x70   :  { %vm549_vm1 = vcmp.ge.f32.partialorder %v421_v49, 0.0  ;;  %v677_v54 = vmul.f32 0.2, %v421_v49  ;;  %v804_v55 = vsel %vm548_vm0, %v420_v33, %v676_v50  ;;  %v284_v56 = vmul.f32 %v1514_v29, %v144_v47  ;;  %v50_v33 = vld [vmem:[%s2148_s0 + $0x138] sm:$0xff] }
  0x71   :  { %1283 = vst [vmem:[%s2150_s2 + $0xf8] sm:$0xff] %v1416_v51  ;;  %vm550_vm2 = vcmp.ge.f32.partialorder %v422_v52, 0.0  ;;  %vm551_vm3 = vcmp.ge.f32.partialorder %v423_v23, 0.0  ;;  %v678_v57 = vmul.f32 0.2, %v422_v52  ;;  %v424_v60 = vadd.f32 %v1516_v30, %v283_v35 }
  0x72   :  { %v679_v58 = vmul.f32 0.2, %v423_v23  ;;  %v805_v59 = vsel %vm549_vm1, %v421_v49, %v677_v54  ;;  %v425_v61 = vadd.f32 %v1518_v31, %v284_v56  ;;  %v145_v62 = vunpack.c.l.bf16 %v46_v53  ;;  %v51_v49 = vld [vmem:[%s2148_s0 + $0x140] sm:$0xff] }
  0x73   :  { %v1417_v0 = vpack.c.bf16 %v805_v59, %v804_v55  ;;  %v806_v1 = vsel %vm550_vm2, %v422_v52, %v678_v57  ;;  %v146_v3 = vunpack.c.h.bf16 %v46_v53  ;;  %vm552_vm4 = vcmp.ge.f32.partialorder %v424_v60, 0.0 }
  0x74   :  { %v807_v2 = vsel %vm551_vm3, %v423_v23, %v679_v58  ;;  %vm553_vm5 = vcmp.ge.f32.partialorder %v425_v61, 0.0  ;;  %v680_v6 = vmul.f32 0.2, %v424_v60  ;;  %v681_v7 = vmul.f32 0.2, %v425_v61 }
  0x75   :  { %v1418_v5 = vpack.c.bf16 %v807_v2, %v806_v1  ;;  %1284 = vst [vmem:[%s2150_s2 + $0x100] sm:$0xff] %v1417_v0  ;;  %v285_v8 = vmul.f32 %v1512_v28, %v145_v62  ;;  %v286_v9 = vmul.f32 %v1514_v29, %v146_v3  ;;  %v147_v10 = vunpack.c.l.bf16 %v47_v63 }
  0x76   :  { %v808_v11 = vsel %vm552_vm4, %v424_v60, %v680_v6  ;;  %v148_v12 = vunpack.c.h.bf16 %v47_v63  ;;  %v149_v13 = vunpack.c.l.bf16 %v48_v4  ;;  %v150_v14 = vunpack.c.h.bf16 %v48_v4  ;;  %v52_v60 = vld [vmem:[%s2148_s0 + $0x148] sm:$0xff] }
  0x77   :  { %1285 = vst [vmem:[%s2150_s2 + $0x108] sm:$0xff] %v1418_v5  ;;  %v809_v15 = vsel %vm553_vm5, %v425_v61, %v681_v7  ;;  %v426_v16 = vadd.f32 %v1516_v30, %v285_v8  ;;  %v427_v18 = vadd.f32 %v1518_v31, %v286_v9  ;;  %v287_v19 = vmul.f32 %v1512_v28, %v147_v10  ;;  %v53_v7 = vld [vmem:[%s2148_s0 + $0x150] sm:$0xff] }
  0x78   :  { %v1419_v20 = vpack.c.bf16 %v809_v15, %v808_v11  ;;  %v288_v21 = vmul.f32 %v1514_v29, %v148_v12  ;;  %v289_v24 = vmul.f32 %v1512_v28, %v149_v13  ;;  %v290_v25 = vmul.f32 %v1514_v29, %v150_v14 }
  0x79   :  { %vm554_vm6 = vcmp.ge.f32.partialorder %v426_v16, 0.0  ;;  %vm555_vm7 = vcmp.ge.f32.partialorder %v427_v18, 0.0  ;;  %v682_v36 = vmul.f32 0.2, %v426_v16  ;;  %v683_v27 = vmul.f32 0.2, %v427_v18 }
  0x7a   :  { %1286 = vst [vmem:[%s2150_s2 + $0x110] sm:$0xff] %v1419_v20  ;;  %v428_v17 = vadd.f32 %v1516_v30, %v287_v19  ;;  %v429_v32 = vadd.f32 %v1518_v31, %v288_v21  ;;  %v430_v37 = vadd.f32 %v1516_v30, %v289_v24  ;;  %v431_v38 = vadd.f32 %v1518_v31, %v290_v25 }
  0x7b   :  { %v810_v39 = vsel %vm554_vm6, %v426_v16, %v682_v36  ;;  %v811_v40 = vsel %vm555_vm7, %v427_v18, %v683_v27  ;;  %v151_v41 = vunpack.c.l.bf16 %v49_v26  ;;  %v152_v42 = vunpack.c.h.bf16 %v49_v26  ;;  %v54_v27 = vld [vmem:[%s2148_s0 + $0x158] sm:$0xff] }
  0x7c   :  { %v1420_v43 = vpack.c.bf16 %v811_v40, %v810_v39  ;;  %vm556_vm8 = vcmp.ge.f32.partialorder %v428_v17, 0.0  ;;  %vm557_vm9 = vcmp.ge.f32.partialorder %v429_v32, 0.0  ;;  %v684_v22 = vmul.f32 0.2, %v428_v17 }
  0x7d   :  { %v685_v34 = vmul.f32 0.2, %v429_v32  ;;  %vm558_vm10 = vcmp.ge.f32.partialorder %v430_v37, 0.0  ;;  %vm559_vm11 = vcmp.ge.f32.partialorder %v431_v38, 0.0  ;;  %v686_v44 = vmul.f32 0.2, %v430_v37 }
  0x7e   :  { %1287 = vst [vmem:[%s2150_s2 + $0x118] sm:$0xff] %v1420_v43  ;;  %v812_v45 = vsel %vm556_vm8, %v428_v17, %v684_v22  ;;  %v687_v46 = vmul.f32 0.2, %v431_v38  ;;  %v291_v47 = vmul.f32 %v1512_v28, %v151_v41  ;;  %v292_v48 = vmul.f32 %v1514_v29, %v152_v42  ;;  %v55_v22 = vld [vmem:[%s2148_s0 + $0x160] sm:$0xff] }
  0x7f   :  { %v813_v50 = vsel %vm557_vm9, %v429_v32, %v685_v34  ;;  %v814_v51 = vsel %vm558_vm10, %v430_v37, %v686_v44  ;;  %v153_v52 = vunpack.c.l.bf16 %v50_v33  ;;  %v154_v23 = vunpack.c.h.bf16 %v50_v33 }
  0x80   :  { %v1421_v35 = vpack.c.bf16 %v813_v50, %v812_v45  ;;  %v815_v53 = vsel %vm559_vm11, %v431_v38, %v687_v46  ;;  %v432_v54 = vadd.f32 %v1516_v30, %v291_v47  ;;  %v433_v55 = vadd.f32 %v1518_v31, %v292_v48  ;;  %v56_v46 = vld [vmem:[%s2148_s0 + $0x168] sm:$0xff] }
  0x81   :  { %v1422_v56 = vpack.c.bf16 %v815_v53, %v814_v51  ;;  %v293_v57 = vmul.f32 %v1512_v28, %v153_v52  ;;  %v294_v58 = vmul.f32 %v1514_v29, %v154_v23  ;;  %v155_v59 = vunpack.c.l.bf16 %v51_v49 }
  0x82   :  { %1288 = vst [vmem:[%s2150_s2 + $0x120] sm:$0xff] %v1421_v35  ;;  %vm560_vm12 = vcmp.ge.f32.partialorder %v432_v54, 0.0  ;;  %vm561_vm13 = vcmp.ge.f32.partialorder %v433_v55, 0.0  ;;  %v688_v61 = vmul.f32 0.2, %v432_v54  ;;  %v156_v1 = vunpack.c.h.bf16 %v51_v49 }
  0x83   :  { %v689_v62 = vmul.f32 0.2, %v433_v55  ;;  %1289 = vst [vmem:[%s2150_s2 + $0x128] sm:$0xff] %v1422_v56  ;;  %v434_v63 = vadd.f32 %v1516_v30, %v293_v57  ;;  %v435_v0 = vadd.f32 %v1518_v31, %v294_v58  ;;  %v295_v2 = vmul.f32 %v1512_v28, %v155_v59 }
  0x84   :  { %v816_v3 = vsel %vm560_vm12, %v432_v54, %v688_v61  ;;  %v157_v5 = vunpack.c.l.bf16 %v52_v60  ;;  %v158_v6 = vunpack.c.h.bf16 %v52_v60  ;;  %v296_v11 = vmul.f32 %v1514_v29, %v156_v1 }
  0x85   :  { %v817_v4 = vsel %vm561_vm13, %v433_v55, %v689_v62  ;;  %vm562_vm14 = vcmp.ge.f32.partialorder %v434_v63, 0.0  ;;  %vm563_vm15 = vcmp.ge.f32.partialorder %v435_v0, 0.0  ;;  %v690_v9 = vmul.f32 0.2, %v434_v63 }
  0x86   :  { %v1423_v8 = vpack.c.bf16 %v817_v4, %v816_v3  ;;  %v691_v10 = vmul.f32 0.2, %v435_v0  ;;  %v436_v12 = vadd.f32 %v1516_v30, %v295_v2  ;;  %v297_v13 = vmul.f32 %v1512_v28, %v157_v5 }
  0x87   :  { %v818_v14 = vsel %vm562_vm14, %v434_v63, %v690_v9  ;;  %v298_v15 = vmul.f32 %v1514_v29, %v158_v6  ;;  %v159_v16 = vunpack.c.l.bf16 %v53_v7  ;;  %v160_v18 = vunpack.c.h.bf16 %v53_v7  ;;  %v57_v63 = vld [vmem:[%s2148_s0 + $0x170] sm:$0xff] }
  0x88   :  { %1290 = vst [vmem:[%s2150_s2 + $0x130] sm:$0xff] %v1423_v8  ;;  %v819_v19 = vsel %vm563_vm15, %v435_v0, %v691_v10  ;;  %v437_v20 = vadd.f32 %v1518_v31, %v296_v11  ;;  %vm564_vm0 = vcmp.ge.f32.partialorder %v436_v12, 0.0  ;;  %v692_v21 = vmul.f32 0.2, %v436_v12 }
  0x89   :  { %v1424_v24 = vpack.c.bf16 %v819_v19, %v818_v14  ;;  %v438_v25 = vadd.f32 %v1516_v30, %v297_v13  ;;  %v439_v26 = vadd.f32 %v1518_v31, %v298_v15  ;;  %v299_v36 = vmul.f32 %v1512_v28, %v159_v16 }
  0x8a   :  { %vm565_vm1 = vcmp.ge.f32.partialorder %v437_v20, 0.0  ;;  %v693_v17 = vmul.f32 0.2, %v437_v20  ;;  %v820_v32 = vsel %vm564_vm0, %v436_v12, %v692_v21  ;;  %v300_v37 = vmul.f32 %v1514_v29, %v160_v18  ;;  %v58_v12 = vld [vmem:[%s2148_s0 + $0x178] sm:$0xff] }
  0x8b   :  { %1291 = vst [vmem:[%s2150_s2 + $0x138] sm:$0xff] %v1424_v24  ;;  %vm566_vm2 = vcmp.ge.f32.partialorder %v438_v25, 0.0  ;;  %vm567_vm3 = vcmp.ge.f32.partialorder %v439_v26, 0.0  ;;  %v694_v38 = vmul.f32 0.2, %v438_v25  ;;  %v440_v41 = vadd.f32 %v1516_v30, %v299_v36 }
  0x8c   :  { %v695_v39 = vmul.f32 0.2, %v439_v26  ;;  %v821_v40 = vsel %vm565_vm1, %v437_v20, %v693_v17  ;;  %v441_v42 = vadd.f32 %v1518_v31, %v300_v37  ;;  %v161_v43 = vunpack.c.l.bf16 %v54_v27  ;;  %v59_v20 = vld [vmem:[%s2148_s0 + $0x180] sm:$0xff] }
  0x8d   :  { %v1425_v33 = vpack.c.bf16 %v821_v40, %v820_v32  ;;  %v822_v34 = vsel %vm566_vm2, %v438_v25, %v694_v38  ;;  %v162_v45 = vunpack.c.h.bf16 %v54_v27  ;;  %vm568_vm4 = vcmp.ge.f32.partialorder %v440_v41, 0.0 }
  0x8e   :  { %v823_v44 = vsel %vm567_vm3, %v439_v26, %v695_v39  ;;  %vm569_vm5 = vcmp.ge.f32.partialorder %v441_v42, 0.0  ;;  %v696_v48 = vmul.f32 0.2, %v440_v41  ;;  %v697_v49 = vmul.f32 0.2, %v441_v42 }
  0x8f   :  { %v1426_v47 = vpack.c.bf16 %v823_v44, %v822_v34  ;;  %1292 = vst [vmem:[%s2150_s2 + $0x140] sm:$0xff] %v1425_v33  ;;  %v301_v50 = vmul.f32 %v1512_v28, %v161_v43  ;;  %v302_v51 = vmul.f32 %v1514_v29, %v162_v45  ;;  %v163_v52 = vunpack.c.l.bf16 %v55_v22 }
  0x90   :  { %v824_v23 = vsel %vm568_vm4, %v440_v41, %v696_v48  ;;  %v164_v35 = vunpack.c.h.bf16 %v55_v22  ;;  %v165_v53 = vunpack.c.l.bf16 %v56_v46  ;;  %v166_v54 = vunpack.c.h.bf16 %v56_v46  ;;  %v60_v41 = vld [vmem:[%s2148_s0 + $0x188] sm:$0xff] }
  0x91   :  { %1293 = vst [vmem:[%s2150_s2 + $0x148] sm:$0xff] %v1426_v47  ;;  %v825_v55 = vsel %vm569_vm5, %v441_v42, %v697_v49  ;;  %v442_v56 = vadd.f32 %v1516_v30, %v301_v50  ;;  %v443_v57 = vadd.f32 %v1518_v31, %v302_v51  ;;  %v303_v58 = vmul.f32 %v1512_v28, %v163_v52  ;;  %v61_v49 = vld [vmem:[%s2148_s0 + $0x190] sm:$0xff] }
  0x92   :  { %v1427_v59 = vpack.c.bf16 %v825_v55, %v824_v23  ;;  %v304_v60 = vmul.f32 %v1514_v29, %v164_v35  ;;  %v305_v61 = vmul.f32 %v1512_v28, %v165_v53  ;;  %v306_v62 = vmul.f32 %v1514_v29, %v166_v54 }
  0x93   :  { %vm570_vm6 = vcmp.ge.f32.partialorder %v442_v56, 0.0  ;;  %vm571_vm7 = vcmp.ge.f32.partialorder %v443_v57, 0.0  ;;  %v698_v0 = vmul.f32 0.2, %v442_v56  ;;  %v699_v1 = vmul.f32 0.2, %v443_v57 }
  0x94   :  { %1294 = vst [vmem:[%s2150_s2 + $0x150] sm:$0xff] %v1427_v59  ;;  %v444_v2 = vadd.f32 %v1516_v30, %v303_v58  ;;  %v445_v3 = vadd.f32 %v1518_v31, %v304_v60  ;;  %v446_v4 = vadd.f32 %v1516_v30, %v305_v61  ;;  %v447_v5 = vadd.f32 %v1518_v31, %v306_v62 }
  0x95   :  { %v826_v6 = vsel %vm570_vm6, %v442_v56, %v698_v0  ;;  %v827_v7 = vsel %vm571_vm7, %v443_v57, %v699_v1  ;;  %v167_v8 = vunpack.c.l.bf16 %v57_v63  ;;  %v168_v9 = vunpack.c.h.bf16 %v57_v63  ;;  %v62_v1 = vld [vmem:[%s2148_s0 + $0x198] sm:$0xff] }
  0x96   :  { %v1428_v10 = vpack.c.bf16 %v827_v7, %v826_v6  ;;  %vm572_vm8 = vcmp.ge.f32.partialorder %v444_v2, 0.0  ;;  %vm573_vm9 = vcmp.ge.f32.partialorder %v445_v3, 0.0  ;;  %v700_v11 = vmul.f32 0.2, %v444_v2 }
  0x97   :  { %v701_v13 = vmul.f32 0.2, %v445_v3  ;;  %vm574_vm10 = vcmp.ge.f32.partialorder %v446_v4, 0.0  ;;  %vm575_vm11 = vcmp.ge.f32.partialorder %v447_v5, 0.0  ;;  %v702_v14 = vmul.f32 0.2, %v446_v4 }
  0x98   :  { %1295 = vst [vmem:[%s2150_s2 + $0x158] sm:$0xff] %v1428_v10  ;;  %v828_v15 = vsel %vm572_vm8, %v444_v2, %v700_v11  ;;  %v703_v16 = vmul.f32 0.2, %v447_v5  ;;  %v307_v18 = vmul.f32 %v1512_v28, %v167_v8  ;;  %v308_v19 = vmul.f32 %v1514_v29, %v168_v9  ;;  %v63_v11 = vld [vmem:[%s2148_s0 + $0x1a0] sm:$0xff] }
  0x99   :  { %v829_v21 = vsel %vm573_vm9, %v445_v3, %v701_v13  ;;  %v830_v24 = vsel %vm574_vm10, %v446_v4, %v702_v14  ;;  %v169_v25 = vunpack.c.l.bf16 %v58_v12  ;;  %v170_v26 = vunpack.c.h.bf16 %v58_v12 }
  0x9a   :  { %v1429_v36 = vpack.c.bf16 %v829_v21, %v828_v15  ;;  %v831_v27 = vsel %vm575_vm11, %v447_v5, %v703_v16  ;;  %v448_v17 = vadd.f32 %v1516_v30, %v307_v18  ;;  %v449_v32 = vadd.f32 %v1518_v31, %v308_v19  ;;  %v64_v16 = vld [vmem:[%s2148_s0 + $0x1a8] sm:$0xff] }
  0x9b   :  { %v1430_v37 = vpack.c.bf16 %v831_v27, %v830_v24  ;;  %v309_v38 = vmul.f32 %v1512_v28, %v169_v25  ;;  %v310_v39 = vmul.f32 %v1514_v29, %v170_v26  ;;  %v171_v40 = vunpack.c.l.bf16 %v59_v20 }
  0x9c   :  { %1296 = vst [vmem:[%s2150_s2 + $0x160] sm:$0xff] %v1429_v36  ;;  %vm576_vm12 = vcmp.ge.f32.partialorder %v448_v17, 0.0  ;;  %vm577_vm13 = vcmp.ge.f32.partialorder %v449_v32, 0.0  ;;  %v704_v42 = vmul.f32 0.2, %v448_v17  ;;  %v172_v34 = vunpack.c.h.bf16 %v59_v20 }
  0x9d   :  { %v705_v43 = vmul.f32 0.2, %v449_v32  ;;  %1297 = vst [vmem:[%s2150_s2 + $0x168] sm:$0xff] %v1430_v37  ;;  %v450_v22 = vadd.f32 %v1516_v30, %v309_v38  ;;  %v451_v33 = vadd.f32 %v1518_v31, %v310_v39  ;;  %v311_v44 = vmul.f32 %v1512_v28, %v171_v40 }
  0x9e   :  { %v832_v45 = vsel %vm576_vm12, %v448_v17, %v704_v42  ;;  %v173_v47 = vunpack.c.l.bf16 %v60_v41  ;;  %v174_v48 = vunpack.c.h.bf16 %v60_v41  ;;  %v312_v23 = vmul.f32 %v1514_v29, %v172_v34 }
  0x9f   :  { %v833_v46 = vsel %vm577_vm13, %v449_v32, %v705_v43  ;;  %vm578_vm14 = vcmp.ge.f32.partialorder %v450_v22, 0.0  ;;  %vm579_vm15 = vcmp.ge.f32.partialorder %v451_v33, 0.0  ;;  %v706_v51 = vmul.f32 0.2, %v450_v22 }
  0xa0   :  { %v1431_v50 = vpack.c.bf16 %v833_v46, %v832_v45  ;;  %v707_v52 = vmul.f32 0.2, %v451_v33  ;;  %v452_v35 = vadd.f32 %v1516_v30, %v311_v44  ;;  %v313_v53 = vmul.f32 %v1512_v28, %v173_v47 }
  0xa1   :  { %v834_v54 = vsel %vm578_vm14, %v450_v22, %v706_v51  ;;  %v314_v55 = vmul.f32 %v1514_v29, %v174_v48  ;;  %v175_v56 = vunpack.c.l.bf16 %v61_v49  ;;  %v176_v57 = vunpack.c.h.bf16 %v61_v49  ;;  %v65_v22 = vld [vmem:[%s2148_s0 + $0x1b0] sm:$0xff] }
  0xa2   :  { %1298 = vst [vmem:[%s2150_s2 + $0x170] sm:$0xff] %v1431_v50  ;;  %v835_v58 = vsel %vm579_vm15, %v451_v33, %v707_v52  ;;  %v453_v59 = vadd.f32 %v1518_v31, %v312_v23  ;;  %vm580_vm0 = vcmp.ge.f32.partialorder %v452_v35, 0.0  ;;  %v708_v60 = vmul.f32 0.2, %v452_v35 }
  0xa3   :  { %v1432_v61 = vpack.c.bf16 %v835_v58, %v834_v54  ;;  %v454_v62 = vadd.f32 %v1516_v30, %v313_v53  ;;  %v455_v63 = vadd.f32 %v1518_v31, %v314_v55  ;;  %v315_v0 = vmul.f32 %v1512_v28, %v175_v56 }
  0xa4   :  { %vm581_vm1 = vcmp.ge.f32.partialorder %v453_v59, 0.0  ;;  %v709_v2 = vmul.f32 0.2, %v453_v59  ;;  %v836_v3 = vsel %vm580_vm0, %v452_v35, %v708_v60  ;;  %v316_v4 = vmul.f32 %v1514_v29, %v176_v57  ;;  %v66_v35 = vld [vmem:[%s2148_s0 + $0x1b8] sm:$0xff] }
  0xa5   :  { %1299 = vst [vmem:[%s2150_s2 + $0x178] sm:$0xff] %v1432_v61  ;;  %vm582_vm2 = vcmp.ge.f32.partialorder %v454_v62, 0.0  ;;  %vm583_vm3 = vcmp.ge.f32.partialorder %v455_v63, 0.0  ;;  %v710_v5 = vmul.f32 0.2, %v454_v62  ;;  %v456_v8 = vadd.f32 %v1516_v30, %v315_v0 }
  0xa6   :  { %v711_v6 = vmul.f32 0.2, %v455_v63  ;;  %v837_v7 = vsel %vm581_vm1, %v453_v59, %v709_v2  ;;  %v457_v9 = vadd.f32 %v1518_v31, %v316_v4  ;;  %v177_v10 = vunpack.c.l.bf16 %v62_v1  ;;  %v67_v59 = vld [vmem:[%s2148_s0 + $0x1c0] sm:$0xff] }
  0xa7   :  { %v1433_v12 = vpack.c.bf16 %v837_v7, %v836_v3  ;;  %v838_v13 = vsel %vm582_vm2, %v454_v62, %v710_v5  ;;  %v178_v15 = vunpack.c.h.bf16 %v62_v1  ;;  %vm584_vm4 = vcmp.ge.f32.partialorder %v456_v8, 0.0 }
  0xa8   :  { %v839_v14 = vsel %vm583_vm3, %v455_v63, %v711_v6  ;;  %vm585_vm5 = vcmp.ge.f32.partialorder %v457_v9, 0.0  ;;  %v712_v19 = vmul.f32 0.2, %v456_v8  ;;  %v713_v20 = vmul.f32 0.2, %v457_v9 }
  0xa9   :  { %v1434_v18 = vpack.c.bf16 %v839_v14, %v838_v13  ;;  %1300 = vst [vmem:[%s2150_s2 + $0x180] sm:$0xff] %v1433_v12  ;;  %v317_v21 = vmul.f32 %v1512_v28, %v177_v10  ;;  %v318_v24 = vmul.f32 %v1514_v29, %v178_v15  ;;  %v179_v25 = vunpack.c.l.bf16 %v63_v11 }
  0xaa   :  { %v840_v26 = vsel %vm584_vm4, %v456_v8, %v712_v19  ;;  %v180_v36 = vunpack.c.h.bf16 %v63_v11  ;;  %v181_v27 = vunpack.c.l.bf16 %v64_v16  ;;  %v182_v17 = vunpack.c.h.bf16 %v64_v16  ;;  %v68_v8 = vld [vmem:[%s2148_s0 + $0x1c8] sm:$0xff] }
  0xab   :  { %1301 = vst [vmem:[%s2150_s2 + $0x188] sm:$0xff] %v1434_v18  ;;  %v841_v32 = vsel %vm585_vm5, %v457_v9, %v713_v20  ;;  %v458_v37 = vadd.f32 %v1516_v30, %v317_v21  ;;  %v459_v38 = vadd.f32 %v1518_v31, %v318_v24  ;;  %v319_v39 = vmul.f32 %v1512_v28, %v179_v25  ;;  %v69_v20 = vld [vmem:[%s2148_s0 + $0x1d0] sm:$0xff] }
  0xac   :  { %v1435_v40 = vpack.c.bf16 %v841_v32, %v840_v26  ;;  %v320_v41 = vmul.f32 %v1514_v29, %v180_v36  ;;  %v321_v42 = vmul.f32 %v1512_v28, %v181_v27  ;;  %v322_v43 = vmul.f32 %v1514_v29, %v182_v17 }
  0xad   :  { %vm586_vm6 = vcmp.ge.f32.partialorder %v458_v37, 0.0  ;;  %vm587_vm7 = vcmp.ge.f32.partialorder %v459_v38, 0.0  ;;  %v714_v33 = vmul.f32 0.2, %v458_v37  ;;  %v715_v34 = vmul.f32 0.2, %v459_v38 }
  0xae   :  { %1302 = vst [vmem:[%s2150_s2 + $0x190] sm:$0xff] %v1435_v40  ;;  %v460_v44 = vadd.f32 %v1516_v30, %v319_v39  ;;  %v461_v45 = vadd.f32 %v1518_v31, %v320_v41  ;;  %v462_v46 = vadd.f32 %v1516_v30, %v321_v42  ;;  %v463_v47 = vadd.f32 %v1518_v31, %v322_v43 }
  0xaf   :  { %v842_v48 = vsel %vm586_vm6, %v458_v37, %v714_v33  ;;  %v843_v49 = vsel %vm587_vm7, %v459_v38, %v715_v34  ;;  %v183_v50 = vunpack.c.l.bf16 %v65_v22  ;;  %v184_v51 = vunpack.c.h.bf16 %v65_v22  ;;  %v70_v34 = vld [vmem:[%s2148_s0 + $0x1d8] sm:$0xff] }
  0xb0   :  { %v1436_v52 = vpack.c.bf16 %v843_v49, %v842_v48  ;;  %vm588_vm8 = vcmp.ge.f32.partialorder %v460_v44, 0.0  ;;  %vm589_vm9 = vcmp.ge.f32.partialorder %v461_v45, 0.0  ;;  %v716_v23 = vmul.f32 0.2, %v460_v44 }
  0xb1   :  { %v717_v53 = vmul.f32 0.2, %v461_v45  ;;  %vm590_vm10 = vcmp.ge.f32.partialorder %v462_v46, 0.0  ;;  %vm591_vm11 = vcmp.ge.f32.partialorder %v463_v47, 0.0  ;;  %v718_v54 = vmul.f32 0.2, %v462_v46 }
  0xb2   :  { %1303 = vst [vmem:[%s2150_s2 + $0x198] sm:$0xff] %v1436_v52  ;;  %v844_v55 = vsel %vm588_vm8, %v460_v44, %v716_v23  ;;  %v719_v56 = vmul.f32 0.2, %v463_v47  ;;  %v323_v57 = vmul.f32 %v1512_v28, %v183_v50  ;;  %v324_v58 = vmul.f32 %v1514_v29, %v184_v51  ;;  %v71_v23 = vld [vmem:[%s2148_s0 + $0x1e0] sm:$0xff] }
  0xb3   :  { %v845_v60 = vsel %vm589_vm9, %v461_v45, %v717_v53  ;;  %v846_v61 = vsel %vm590_vm10, %v462_v46, %v718_v54  ;;  %v185_v62 = vunpack.c.l.bf16 %v66_v35  ;;  %v186_v63 = vunpack.c.h.bf16 %v66_v35 }
  0xb4   :  { %v1437_v0 = vpack.c.bf16 %v845_v60, %v844_v55  ;;  %v847_v1 = vsel %vm591_vm11, %v463_v47, %v719_v56  ;;  %v464_v2 = vadd.f32 %v1516_v30, %v323_v57  ;;  %v465_v3 = vadd.f32 %v1518_v31, %v324_v58  ;;  %v72_v56 = vld [vmem:[%s2148_s0 + $0x1e8] sm:$0xff] }
  0xb5   :  { %v1438_v4 = vpack.c.bf16 %v847_v1, %v846_v61  ;;  %v325_v5 = vmul.f32 %v1512_v28, %v185_v62  ;;  %v326_v6 = vmul.f32 %v1514_v29, %v186_v63  ;;  %v187_v7 = vunpack.c.l.bf16 %v67_v59 }
  0xb6   :  { %1304 = vst [vmem:[%s2150_s2 + $0x1a0] sm:$0xff] %v1437_v0  ;;  %vm592_vm12 = vcmp.ge.f32.partialorder %v464_v2, 0.0  ;;  %vm593_vm13 = vcmp.ge.f32.partialorder %v465_v3, 0.0  ;;  %v720_v9 = vmul.f32 0.2, %v464_v2  ;;  %v188_v13 = vunpack.c.h.bf16 %v67_v59 }
  0xb7   :  { %v721_v10 = vmul.f32 0.2, %v465_v3  ;;  %1305 = vst [vmem:[%s2150_s2 + $0x1a8] sm:$0xff] %v1438_v4  ;;  %v466_v11 = vadd.f32 %v1516_v30, %v325_v5  ;;  %v467_v12 = vadd.f32 %v1518_v31, %v326_v6  ;;  %v327_v14 = vmul.f32 %v1512_v28, %v187_v7 }
  0xb8   :  { %v848_v15 = vsel %vm592_vm12, %v464_v2, %v720_v9  ;;  %v189_v18 = vunpack.c.l.bf16 %v68_v8  ;;  %v190_v19 = vunpack.c.h.bf16 %v68_v8  ;;  %v328_v26 = vmul.f32 %v1514_v29, %v188_v13 }
  0xb9   :  { %v849_v16 = vsel %vm593_vm13, %v465_v3, %v721_v10  ;;  %vm594_vm14 = vcmp.ge.f32.partialorder %v466_v11, 0.0  ;;  %vm595_vm15 = vcmp.ge.f32.partialorder %v467_v12, 0.0  ;;  %v722_v24 = vmul.f32 0.2, %v466_v11 }
  0xba   :  { %v1439_v21 = vpack.c.bf16 %v849_v16, %v848_v15  ;;  %v723_v25 = vmul.f32 0.2, %v467_v12  ;;  %v468_v36 = vadd.f32 %v1516_v30, %v327_v14  ;;  %v329_v27 = vmul.f32 %v1512_v28, %v189_v18 }
  0xbb   :  { %v850_v17 = vsel %vm594_vm14, %v466_v11, %v722_v24  ;;  %v330_v32 = vmul.f32 %v1514_v29, %v190_v19  ;;  %v191_v37 = vunpack.c.l.bf16 %v69_v20  ;;  %v192_v38 = vunpack.c.h.bf16 %v69_v20  ;;  %v73_v11 = vld [vmem:[%s2148_s0 + $0x1f0] sm:$0xff] }
  0xbc   :  { %1306 = vst [vmem:[%s2150_s2 + $0x1b0] sm:$0xff] %v1439_v21  ;;  %v851_v39 = vsel %vm595_vm15, %v467_v12, %v723_v25  ;;  %v469_v40 = vadd.f32 %v1518_v31, %v328_v26  ;;  %vm596_vm0 = vcmp.ge.f32.partialorder %v468_v36, 0.0  ;;  %v724_v41 = vmul.f32 0.2, %v468_v36 }
  0xbd   :  { %v1440_v42 = vpack.c.bf16 %v851_v39, %v850_v17  ;;  %v470_v43 = vadd.f32 %v1516_v30, %v329_v27  ;;  %v471_v22 = vadd.f32 %v1518_v31, %v330_v32  ;;  %v331_v33 = vmul.f32 %v1512_v28, %v191_v37 }
  0xbe   :  { %vm597_vm1 = vcmp.ge.f32.partialorder %v469_v40, 0.0  ;;  %v725_v44 = vmul.f32 0.2, %v469_v40  ;;  %v852_v45 = vsel %vm596_vm0, %v468_v36, %v724_v41  ;;  %v332_v46 = vmul.f32 %v1514_v29, %v192_v38  ;;  %v74_v36 = vld [vmem:[%s2148_s0 + $0x1f8] sm:$0xff] }
  0xbf   :  { %1307 = vst [vmem:[%s2150_s2 + $0x1b8] sm:$0xff] %v1440_v42  ;;  %vm598_vm2 = vcmp.ge.f32.partialorder %v470_v43, 0.0  ;;  %vm599_vm3 = vcmp.ge.f32.partialorder %v471_v22, 0.0  ;;  %v726_v47 = vmul.f32 0.2, %v470_v43  ;;  %v472_v50 = vadd.f32 %v1516_v30, %v331_v33 }
  0xc0   :  { %v727_v48 = vmul.f32 0.2, %v471_v22  ;;  %v853_v49 = vsel %vm597_vm1, %v469_v40, %v725_v44  ;;  %v473_v51 = vadd.f32 %v1518_v31, %v332_v46  ;;  %v193_v52 = vunpack.c.l.bf16 %v70_v34 }
  0xc1   :  { %v1441_v35 = vpack.c.bf16 %v853_v49, %v852_v45  ;;  %v854_v53 = vsel %vm598_vm2, %v470_v43, %v726_v47  ;;  %v194_v55 = vunpack.c.h.bf16 %v70_v34  ;;  %vm600_vm4 = vcmp.ge.f32.partialorder %v472_v50, 0.0 }
  0xc2   :  { %v855_v54 = vsel %vm599_vm3, %v471_v22, %v727_v48  ;;  %vm601_vm5 = vcmp.ge.f32.partialorder %v473_v51, 0.0  ;;  %v728_v58 = vmul.f32 0.2, %v472_v50  ;;  %v729_v59 = vmul.f32 0.2, %v473_v51 }
  0xc3   :  { %v1442_v57 = vpack.c.bf16 %v855_v54, %v854_v53  ;;  %1308 = vst [vmem:[%s2150_s2 + $0x1c0] sm:$0xff] %v1441_v35  ;;  %v333_v60 = vmul.f32 %v1512_v28, %v193_v52  ;;  %v334_v61 = vmul.f32 %v1514_v29, %v194_v55  ;;  %v195_v62 = vunpack.c.l.bf16 %v71_v23 }
  0xc4   :  { %v856_v63 = vsel %vm600_vm4, %v472_v50, %v728_v58  ;;  %v196_v0 = vunpack.c.h.bf16 %v71_v23  ;;  %v197_v1 = vunpack.c.l.bf16 %v72_v56  ;;  %v198_v2 = vunpack.c.h.bf16 %v72_v56 }
  0xc5   :  { %1309 = vst [vmem:[%s2150_s2 + $0x1c8] sm:$0xff] %v1442_v57  ;;  %v857_v3 = vsel %vm601_vm5, %v473_v51, %v729_v59  ;;  %v474_v4 = vadd.f32 %v1516_v30, %v333_v60  ;;  %v475_v5 = vadd.f32 %v1518_v31, %v334_v61  ;;  %v335_v6 = vmul.f32 %v1512_v28, %v195_v62 }
  0xc6   :  { %v1443_v7 = vpack.c.bf16 %v857_v3, %v856_v63  ;;  %v336_v8 = vmul.f32 %v1514_v29, %v196_v0  ;;  %v337_v9 = vmul.f32 %v1512_v28, %v197_v1  ;;  %v338_v10 = vmul.f32 %v1514_v29, %v198_v2 }
  0xc7   :  { %vm602_vm6 = vcmp.ge.f32.partialorder %v474_v4, 0.0  ;;  %vm603_vm7 = vcmp.ge.f32.partialorder %v475_v5, 0.0  ;;  %v730_v12 = vmul.f32 0.2, %v474_v4  ;;  %v731_v13 = vmul.f32 0.2, %v475_v5 }
  0xc8   :  { %1310 = vst [vmem:[%s2150_s2 + $0x1d0] sm:$0xff] %v1443_v7  ;;  %v476_v14 = vadd.f32 %v1516_v30, %v335_v6  ;;  %v477_v15 = vadd.f32 %v1518_v31, %v336_v8  ;;  %v478_v16 = vadd.f32 %v1516_v30, %v337_v9  ;;  %v479_v18 = vadd.f32 %v1518_v31, %v338_v10 }
  0xc9   :  { %v858_v19 = vsel %vm602_vm6, %v474_v4, %v730_v12  ;;  %v859_v20 = vsel %vm603_vm7, %v475_v5, %v731_v13  ;;  %v199_v21 = vunpack.c.l.bf16 %v73_v11  ;;  %v200_v24 = vunpack.c.h.bf16 %v73_v11 }
  0xca   :  { %v1444_v25 = vpack.c.bf16 %v859_v20, %v858_v19  ;;  %vm604_vm8 = vcmp.ge.f32.partialorder %v476_v14, 0.0  ;;  %vm605_vm9 = vcmp.ge.f32.partialorder %v477_v15, 0.0  ;;  %v732_v26 = vmul.f32 0.2, %v476_v14 }
  0xcb   :  { %v733_v27 = vmul.f32 0.2, %v477_v15  ;;  %vm606_vm10 = vcmp.ge.f32.partialorder %v478_v16, 0.0  ;;  %vm607_vm11 = vcmp.ge.f32.partialorder %v479_v18, 0.0  ;;  %v734_v17 = vmul.f32 0.2, %v478_v16 }
  0xcc   :  { %1311 = vst [vmem:[%s2150_s2 + $0x1d8] sm:$0xff] %v1444_v25  ;;  %v860_v32 = vsel %vm604_vm8, %v476_v14, %v732_v26  ;;  %v735_v37 = vmul.f32 0.2, %v479_v18  ;;  %v339_v38 = vmul.f32 %v1512_v28, %v199_v21  ;;  %v340_v39 = vmul.f32 %v1514_v29, %v200_v24 }
  0xcd   :  { %v861_v40 = vsel %vm605_vm9, %v477_v15, %v733_v27  ;;  %v862_v41 = vsel %vm606_vm10, %v478_v16, %v734_v17  ;;  %v201_v42 = vunpack.c.l.bf16 %v74_v36  ;;  %v202_v43 = vunpack.c.h.bf16 %v74_v36 }
  0xce   :  { %v1445_v22 = vpack.c.bf16 %v861_v40, %v860_v32  ;;  %v863_v33 = vsel %vm607_vm11, %v479_v18, %v735_v37  ;;  %v480_v34 = vadd.f32 %v1516_v30, %v339_v38  ;;  %v481_v44 = vadd.f32 %v1518_v31, %v340_v39 }
  0xcf   :  { %v1446_v45 = vpack.c.bf16 %v863_v33, %v862_v41  ;;  %v341_v46 = vmul.f32 %v1512_v28, %v201_v42  ;;  %v342_v47 = vmul.f32 %v1514_v29, %v202_v43 }
  0xd0   :  { %1312 = vst [vmem:[%s2150_s2 + $0x1e0] sm:$0xff] %v1445_v22  ;;  %vm608_vm12 = vcmp.ge.f32.partialorder %v480_v34, 0.0  ;;  %vm609_vm13 = vcmp.ge.f32.partialorder %v481_v44, 0.0  ;;  %v736_v48 = vmul.f32 0.2, %v480_v34 }
  0xd1   :  { %v737_v49 = vmul.f32 0.2, %v481_v44  ;;  %1313 = vst [vmem:[%s2150_s2 + $0x1e8] sm:$0xff] %v1446_v45  ;;  %v482_v50 = vadd.f32 %v1516_v30, %v341_v46  ;;  %v483_v51 = vadd.f32 %v1518_v31, %v342_v47 }
  0xd2   :  { %v864_v52 = vsel %vm608_vm12, %v480_v34, %v736_v48 }
  0xd3   :  { %v865_v28 = vsel %vm609_vm13, %v481_v44, %v737_v49  ;;  %vm610_vm14 = vcmp.ge.f32.partialorder %v482_v50, 0.0  ;;  %vm611_vm15 = vcmp.ge.f32.partialorder %v483_v51, 0.0  ;;  %v738_v29 = vmul.f32 0.2, %v482_v50 }
  0xd4   :  { %v1447_v23 = vpack.c.bf16 %v865_v28, %v864_v52  ;;  %v739_v35 = vmul.f32 0.2, %v483_v51 }
  0xd5   :  { %v866_v53 = vsel %vm610_vm14, %v482_v50, %v738_v29 }
  0xd6   :  { %1314 = vst [vmem:[%s2150_s2 + $0x1f0] sm:$0xff] %v1447_v23  ;;  %v867_v54 = vsel %vm611_vm15, %v483_v51, %v739_v35 }
  0xd7   :  { %v1448_v55 = vpack.c.bf16 %v867_v54, %v866_v53 }
  0xd9   :  { %1315 = vst [vmem:[%s2150_s2 + $0x1f8] sm:$0xff] %v1448_v55 }

// kernel: forward.13
= control target key start
LH: loop header
LB: loop body
LE: loop exit
PB: predicated region body
PF: predicated region fallthrough
CT: control target
= control target key end

     0   :  { %v109_v0 = vlaneseq  ;;  %s1130_s0 = inlined_call_operand.vmem [shape: bf16[128,512], index: 0, kind: input, shape index: {}]   ;;  %s1131_s1 = inlined_call_operand.vmem [shape: f32[8,512], index: 1, kind: input, shape index: {}]   ;;  %s1132_s2 = inlined_call_operand.vmem [shape: bf16[128,512], index: 2, kind: output, shape index: {}]  }
   0x1   :  { %v11_v1 = vld [vmem:[%s1130_s0] sm:$0xff]  ;;  %v12_v2 = vld [vmem:[%s1130_s0 + $0x8] sm:$0xff]  ;;  %v13_v8 = vld [vmem:[%s1130_s0 + $0x10] sm:$0xff] }
   0x2   :  { %v43_v3 = vunpack.c.l.bf16 %v11_v1  ;;  %v44_v4 = vunpack.c.h.bf16 %v11_v1  ;;  %v107_v5 = vld [vmem:[%s1131_s1] ss:$8 sm:$0xf]  ;;  %v110_v6 = vshrl.u32 %v109_v0, 7  ;;  %v45_v7 = vunpack.c.l.bf16 %v12_v2 }
   0x3   :  { %v14_v9 = vld [vmem:[%s1130_s0 + $0x18] sm:$0xff]  ;;  %v46_v11 = vunpack.c.h.bf16 %v12_v2  ;;  %v47_v12 = vunpack.c.l.bf16 %v13_v8  ;;  %v48_v13 = vunpack.c.h.bf16 %v13_v8  ;;  %v801_v15 = vld [vmem:[%s1130_s0 + $0x20] sm:$0xff]  ;;  %v806_v16 = vld [vmem:[%s1130_s0 + $0x28] sm:$0xff] }
   0x4   :  { %v700_v10 = vld [vmem:[%s1131_s1 + $0x1] ss:$8 sm:$0xf]  ;;  %v49_v14 = vunpack.c.l.bf16 %v14_v9  ;;  %v111_v17 = vsub.s32 0, %v110_v6  ;;  %v115_v18 = vsub.s32 1, %v110_v6  ;;  %v119_v19 = vsub.s32 2, %v110_v6 }
   0x5   :  { %v123_v20 = vsub.s32 3, %v110_v6  ;;  %v50_v21 = vunpack.c.h.bf16 %v14_v9  ;;  %v51_v22 = vunpack.c.l.bf16 %v801_v15  ;;  %v52_v23 = vunpack.c.h.bf16 %v801_v15 }
   0x6   :  { %v53_v24 = vunpack.c.l.bf16 %v806_v16  ;;  %v811_v25 = vrot.slane %v107_v5, %v111_v17  ;;  %v813_v26 = vrot.slane %v107_v5, %v115_v18  ;;  %v815_v27 = vrot.slane %v700_v10, %v111_v17  ;;  %v18_v17 = vld [vmem:[%s1130_s0 + $0x38] sm:$0xff] }
   0x7   :  { %v817_v28 = vrot.slane %v700_v10, %v115_v18  ;;  %v819_v29 = vrot.slane %v107_v5, %v119_v19  ;;  %v821_v30 = vrot.slane %v107_v5, %v123_v20  ;;  %v823_v31 = vrot.slane %v700_v10, %v119_v19  ;;  %v17_v5 = vld [vmem:[%s1130_s0 + $0x30] sm:$0xff] }
   0x8   :  { %v825_v32 = vrot.slane %v700_v10, %v123_v20  ;;  %v129_v33 = vmul.f32 %v811_v25, %v43_v3  ;;  %v130_v34 = vmul.f32 %v813_v26, %v44_v4  ;;  %v133_v35 = vmul.f32 %v811_v25, %v47_v12 }
   0x9   :  { %v134_v36 = vmul.f32 %v813_v26, %v48_v13  ;;  %v131_v37 = vmul.f32 %v819_v29, %v45_v7  ;;  %v132_v38 = vmul.f32 %v821_v30, %v46_v11  ;;  %v135_v39 = vmul.f32 %v819_v29, %v49_v14 }
   0xa   :  { %v136_v40 = vmul.f32 %v821_v30, %v50_v21  ;;  %v216_v41 = vadd.f32 %v815_v27, %v129_v33  ;;  %v217_v42 = vadd.f32 %v817_v28, %v130_v34  ;;  %v220_v43 = vadd.f32 %v815_v27, %v133_v35 }
   0xb   :  { %v221_v44 = vadd.f32 %v817_v28, %v134_v36  ;;  %v218_v45 = vadd.f32 %v823_v31, %v131_v37  ;;  %v219_v46 = vadd.f32 %v825_v32, %v132_v38  ;;  %v222_v47 = vadd.f32 %v823_v31, %v135_v39 }
   0xc   :  { %v223_v48 = vadd.f32 %v825_v32, %v136_v40  ;;  %vm280_vm0 = vcmp.ge.f32.partialorder %v216_v41, 0.0  ;;  %vm281_vm1 = vcmp.ge.f32.partialorder %v217_v42, 0.0  ;;  %v344_v49 = vmul.f32 0.2, %v216_v41 }
   0xd   :  { %v345_v50 = vmul.f32 0.2, %v217_v42  ;;  %vm282_vm2 = vcmp.ge.f32.partialorder %v218_v45, 0.0  ;;  %vm283_vm3 = vcmp.ge.f32.partialorder %v219_v46, 0.0  ;;  %v346_v51 = vmul.f32 0.2, %v218_v45 }
   0xe   :  { %v347_v52 = vmul.f32 0.2, %v219_v46  ;;  %v408_v53 = vsel %vm280_vm0, %v216_v41, %v344_v49  ;;  %vm284_vm4 = vcmp.ge.f32.partialorder %v220_v43, 0.0  ;;  %vm285_vm5 = vcmp.ge.f32.partialorder %v221_v44, 0.0 }
   0xf   :  { %v409_v54 = vsel %vm281_vm1, %v217_v42, %v345_v50  ;;  %v410_v56 = vsel %vm282_vm2, %v218_v45, %v346_v51  ;;  %v348_v58 = vmul.f32 0.2, %v220_v43  ;;  %v349_v60 = vmul.f32 0.2, %v221_v44 }
  0x10   :  { %v733_v55 = vpack.c.bf16 %v409_v54, %v408_v53  ;;  %v411_v57 = vsel %vm283_vm3, %v219_v46, %v347_v52  ;;  %vm286_vm6 = vcmp.ge.f32.partialorder %v222_v47, 0.0  ;;  %vm287_vm7 = vcmp.ge.f32.partialorder %v223_v48, 0.0 }
  0x11   :  { %v734_v59 = vpack.c.bf16 %v411_v57, %v410_v56  ;;  %v412_v61 = vsel %vm284_vm4, %v220_v43, %v348_v58  ;;  %v350_v62 = vmul.f32 0.2, %v222_v47  ;;  %v351_v63 = vmul.f32 0.2, %v223_v48 }
  0x12   :  { %664 = vst [vmem:[%s1132_s2] sm:$0xff] %v733_v55  ;;  %v137_v0 = vmul.f32 %v811_v25, %v51_v22  ;;  %v413_v1 = vsel %vm285_vm5, %v221_v44, %v349_v60  ;;  %v138_v2 = vmul.f32 %v813_v26, %v52_v23  ;;  %v54_v3 = vunpack.c.h.bf16 %v806_v16  ;;  %v20_v44 = vld [vmem:[%s1130_s0 + $0x48] sm:$0xff] }
  0x13   :  { %665 = vst [vmem:[%s1132_s2 + $0x8] sm:$0xff] %v734_v59  ;;  %v139_v4 = vmul.f32 %v819_v29, %v53_v24  ;;  %v735_v6 = vpack.c.bf16 %v413_v1, %v412_v61  ;;  %v414_v7 = vsel %vm286_vm6, %v222_v47, %v350_v62  ;;  %v415_v8 = vsel %vm287_vm7, %v223_v48, %v351_v63  ;;  %v19_v24 = vld [vmem:[%s1130_s0 + $0x40] sm:$0xff]  ;;  %v21_v62 = vld [vmem:[%s1130_s0 + $0x50] sm:$0xff] }
  0x14   :  { %v224_v9 = vadd.f32 %v815_v27, %v137_v0  ;;  %v736_v10 = vpack.c.bf16 %v415_v8, %v414_v7  ;;  %v225_v11 = vadd.f32 %v817_v28, %v138_v2  ;;  %v140_v12 = vmul.f32 %v821_v30, %v54_v3 }
  0x15   :  { %v226_v13 = vadd.f32 %v823_v31, %v139_v4  ;;  %666 = vst [vmem:[%s1132_s2 + $0x10] sm:$0xff] %v735_v6  ;;  %v55_v15 = vunpack.c.l.bf16 %v17_v5  ;;  %v56_v16 = vunpack.c.h.bf16 %v17_v5  ;;  %v57_v35 = vunpack.c.l.bf16 %v18_v17 }
  0x16   :  { %vm288_vm8 = vcmp.ge.f32.partialorder %v224_v9, 0.0  ;;  %v352_v14 = vmul.f32 0.2, %v224_v9  ;;  %667 = vst [vmem:[%s1132_s2 + $0x18] sm:$0xff] %v736_v10  ;;  %vm289_vm9 = vcmp.ge.f32.partialorder %v225_v11, 0.0  ;;  %v227_v19 = vadd.f32 %v825_v32, %v140_v12 }
  0x17   :  { %v353_v18 = vmul.f32 0.2, %v225_v11  ;;  %vm290_vm10 = vcmp.ge.f32.partialorder %v226_v13, 0.0  ;;  %v354_v21 = vmul.f32 0.2, %v226_v13  ;;  %v141_v22 = vmul.f32 %v811_v25, %v55_v15 }
  0x18   :  { %v416_v20 = vsel %vm288_vm8, %v224_v9, %v352_v14  ;;  %v142_v23 = vmul.f32 %v813_v26, %v56_v16  ;;  %vm291_vm11 = vcmp.ge.f32.partialorder %v227_v19, 0.0  ;;  %v355_v34 = vmul.f32 0.2, %v227_v19  ;;  %v22_v9 = vld [vmem:[%s1130_s0 + $0x58] sm:$0xff] }
  0x19   :  { %v417_v33 = vsel %vm289_vm9, %v225_v11, %v353_v18  ;;  %v418_v37 = vsel %vm290_vm10, %v226_v13, %v354_v21  ;;  %v228_v38 = vadd.f32 %v815_v27, %v141_v22  ;;  %v58_v41 = vunpack.c.h.bf16 %v18_v17 }
  0x1a   :  { %v737_v36 = vpack.c.bf16 %v417_v33, %v416_v20  ;;  %v229_v39 = vadd.f32 %v817_v28, %v142_v23  ;;  %v419_v40 = vsel %vm291_vm11, %v227_v19, %v355_v34  ;;  %v143_v42 = vmul.f32 %v819_v29, %v57_v35  ;;  %v23_v19 = vld [vmem:[%s1130_s0 + $0x60] sm:$0xff]  ;;  %v24_v20 = vld [vmem:[%s1130_s0 + $0x68] sm:$0xff] }
  0x1b   :  { %v59_v43 = vunpack.c.l.bf16 %v19_v24  ;;  %v738_v45 = vpack.c.bf16 %v419_v40, %v418_v37  ;;  %vm292_vm12 = vcmp.ge.f32.partialorder %v228_v38, 0.0  ;;  %v356_v46 = vmul.f32 0.2, %v228_v38 }
  0x1c   :  { %668 = vst [vmem:[%s1132_s2 + $0x20] sm:$0xff] %v737_v36  ;;  %vm293_vm13 = vcmp.ge.f32.partialorder %v229_v39, 0.0  ;;  %v357_v47 = vmul.f32 0.2, %v229_v39  ;;  %v144_v48 = vmul.f32 %v821_v30, %v58_v41  ;;  %v230_v49 = vadd.f32 %v823_v31, %v143_v42 }
  0x1d   :  { %v60_v50 = vunpack.c.h.bf16 %v19_v24  ;;  %669 = vst [vmem:[%s1132_s2 + $0x28] sm:$0xff] %v738_v45  ;;  %v420_v51 = vsel %vm292_vm12, %v228_v38, %v356_v46  ;;  %v145_v52 = vmul.f32 %v811_v25, %v59_v43  ;;  %v61_v53 = vunpack.c.l.bf16 %v20_v44 }
  0x1e   :  { %v62_v54 = vunpack.c.h.bf16 %v20_v44  ;;  %v421_v55 = vsel %vm293_vm13, %v229_v39, %v357_v47  ;;  %v231_v56 = vadd.f32 %v825_v32, %v144_v48  ;;  %vm294_vm14 = vcmp.ge.f32.partialorder %v230_v49, 0.0 }
  0x1f   :  { %v358_v57 = vmul.f32 0.2, %v230_v49  ;;  %v739_v58 = vpack.c.bf16 %v421_v55, %v420_v51  ;;  %v146_v59 = vmul.f32 %v813_v26, %v60_v50  ;;  %v232_v60 = vadd.f32 %v815_v27, %v145_v52  ;;  %v25_v51 = vld [vmem:[%s1130_s0 + $0x70] sm:$0xff] }
  0x20   :  { %v147_v61 = vmul.f32 %v819_v29, %v61_v53  ;;  %vm295_vm15 = vcmp.ge.f32.partialorder %v231_v56, 0.0  ;;  %v359_v63 = vmul.f32 0.2, %v231_v56  ;;  %v148_v1 = vmul.f32 %v821_v30, %v62_v54 }
  0x21   :  { %v422_v0 = vsel %vm294_vm14, %v230_v49, %v358_v57  ;;  %670 = vst [vmem:[%s1132_s2 + $0x30] sm:$0xff] %v739_v58  ;;  %v233_v2 = vadd.f32 %v817_v28, %v146_v59  ;;  %vm296_vm0 = vcmp.ge.f32.partialorder %v232_v60, 0.0  ;;  %v360_v3 = vmul.f32 0.2, %v232_v60 }
  0x22   :  { %v234_v4 = vadd.f32 %v823_v31, %v147_v61  ;;  %v423_v5 = vsel %vm295_vm15, %v231_v56, %v359_v63  ;;  %v235_v6 = vadd.f32 %v825_v32, %v148_v1  ;;  %v63_v7 = vunpack.c.l.bf16 %v21_v62 }
  0x23   :  { %v64_v8 = vunpack.c.h.bf16 %v21_v62  ;;  %v740_v10 = vpack.c.bf16 %v423_v5, %v422_v0  ;;  %vm297_vm1 = vcmp.ge.f32.partialorder %v233_v2, 0.0  ;;  %v361_v11 = vmul.f32 0.2, %v233_v2  ;;  %v26_v0 = vld [vmem:[%s1130_s0 + $0x78] sm:$0xff] }
  0x24   :  { %v424_v12 = vsel %vm296_vm0, %v232_v60, %v360_v3  ;;  %vm298_vm2 = vcmp.ge.f32.partialorder %v234_v4, 0.0  ;;  %vm299_vm3 = vcmp.ge.f32.partialorder %v235_v6, 0.0  ;;  %v362_v13 = vmul.f32 0.2, %v234_v4 }
  0x25   :  { %v363_v14 = vmul.f32 0.2, %v235_v6  ;;  %671 = vst [vmem:[%s1132_s2 + $0x38] sm:$0xff] %v740_v10  ;;  %v425_v15 = vsel %vm297_vm1, %v233_v2, %v361_v11  ;;  %v149_v16 = vmul.f32 %v811_v25, %v63_v7  ;;  %v150_v17 = vmul.f32 %v813_v26, %v64_v8  ;;  %v27_v8 = vld [vmem:[%s1130_s0 + $0x80] sm:$0xff] }
  0x26   :  { %v65_v18 = vunpack.c.l.bf16 %v22_v9  ;;  %v741_v21 = vpack.c.bf16 %v425_v15, %v424_v12  ;;  %v426_v22 = vsel %vm298_vm2, %v234_v4, %v362_v13  ;;  %v66_v24 = vunpack.c.h.bf16 %v22_v9 }
  0x27   :  { %v427_v23 = vsel %vm299_vm3, %v235_v6, %v363_v14  ;;  %v236_v34 = vadd.f32 %v815_v27, %v149_v16  ;;  %v237_v35 = vadd.f32 %v817_v28, %v150_v17  ;;  %v67_v38 = vunpack.c.l.bf16 %v23_v19 }
  0x28   :  { %v742_v33 = vpack.c.bf16 %v427_v23, %v426_v22  ;;  %v151_v36 = vmul.f32 %v819_v29, %v65_v18  ;;  %672 = vst [vmem:[%s1132_s2 + $0x40] sm:$0xff] %v741_v21  ;;  %v152_v37 = vmul.f32 %v821_v30, %v66_v24  ;;  %v68_v39 = vunpack.c.h.bf16 %v23_v19 }
  0x29   :  { %v69_v40 = vunpack.c.l.bf16 %v24_v20  ;;  %vm300_vm4 = vcmp.ge.f32.partialorder %v236_v34, 0.0  ;;  %vm301_vm5 = vcmp.ge.f32.partialorder %v237_v35, 0.0  ;;  %v364_v41 = vmul.f32 0.2, %v236_v34 }
  0x2a   :  { %673 = vst [vmem:[%s1132_s2 + $0x48] sm:$0xff] %v742_v33  ;;  %v365_v42 = vmul.f32 0.2, %v237_v35  ;;  %v238_v43 = vadd.f32 %v823_v31, %v151_v36  ;;  %v239_v44 = vadd.f32 %v825_v32, %v152_v37  ;;  %v153_v45 = vmul.f32 %v811_v25, %v67_v38 }
  0x2b   :  { %v154_v46 = vmul.f32 %v813_v26, %v68_v39  ;;  %v428_v47 = vsel %vm300_vm4, %v236_v34, %v364_v41  ;;  %v70_v49 = vunpack.c.h.bf16 %v24_v20  ;;  %v155_v50 = vmul.f32 %v819_v29, %v69_v40  ;;  %v28_v20 = vld [vmem:[%s1130_s0 + $0x88] sm:$0xff] }
  0x2c   :  { %v429_v48 = vsel %vm301_vm5, %v237_v35, %v365_v42  ;;  %vm302_vm6 = vcmp.ge.f32.partialorder %v238_v43, 0.0  ;;  %vm303_vm7 = vcmp.ge.f32.partialorder %v239_v44, 0.0  ;;  %v366_v53 = vmul.f32 0.2, %v238_v43 }
  0x2d   :  { %v743_v52 = vpack.c.bf16 %v429_v48, %v428_v47  ;;  %v367_v54 = vmul.f32 0.2, %v239_v44  ;;  %v240_v55 = vadd.f32 %v815_v27, %v153_v45  ;;  %v241_v56 = vadd.f32 %v817_v28, %v154_v46  ;;  %v29_v46 = vld [vmem:[%s1130_s0 + $0x90] sm:$0xff] }
  0x2e   :  { %v156_v57 = vmul.f32 %v821_v30, %v70_v49  ;;  %v430_v58 = vsel %vm302_vm6, %v238_v43, %v366_v53  ;;  %v242_v59 = vadd.f32 %v823_v31, %v155_v50  ;;  %v71_v60 = vunpack.c.l.bf16 %v25_v51 }
  0x2f   :  { %674 = vst [vmem:[%s1132_s2 + $0x50] sm:$0xff] %v743_v52  ;;  %v72_v61 = vunpack.c.h.bf16 %v25_v51  ;;  %v431_v62 = vsel %vm303_vm7, %v239_v44, %v367_v54  ;;  %vm304_vm8 = vcmp.ge.f32.partialorder %v240_v55, 0.0  ;;  %vm305_vm9 = vcmp.ge.f32.partialorder %v241_v56, 0.0 }
  0x30   :  { %v368_v63 = vmul.f32 0.2, %v240_v55  ;;  %v744_v1 = vpack.c.bf16 %v431_v62, %v430_v58  ;;  %v369_v2 = vmul.f32 0.2, %v241_v56  ;;  %v243_v3 = vadd.f32 %v825_v32, %v156_v57  ;;  %v30_v57 = vld [vmem:[%s1130_s0 + $0x98] sm:$0xff] }
  0x31   :  { %vm306_vm10 = vcmp.ge.f32.partialorder %v242_v59, 0.0  ;;  %v370_v5 = vmul.f32 0.2, %v242_v59  ;;  %v157_v6 = vmul.f32 %v811_v25, %v71_v60  ;;  %v158_v7 = vmul.f32 %v813_v26, %v72_v61 }
  0x32   :  { %v432_v4 = vsel %vm304_vm8, %v240_v55, %v368_v63  ;;  %675 = vst [vmem:[%s1132_s2 + $0x58] sm:$0xff] %v744_v1  ;;  %v433_v9 = vsel %vm305_vm9, %v241_v56, %v369_v2  ;;  %vm307_vm11 = vcmp.ge.f32.partialorder %v243_v3, 0.0  ;;  %v371_v10 = vmul.f32 0.2, %v243_v3 }
  0x33   :  { %v73_v11 = vunpack.c.l.bf16 %v26_v0  ;;  %v745_v12 = vpack.c.bf16 %v433_v9, %v432_v4  ;;  %v434_v13 = vsel %vm306_vm10, %v242_v59, %v370_v5  ;;  %v244_v14 = vadd.f32 %v815_v27, %v157_v6  ;;  %v32_v4 = vld [vmem:[%s1130_s0 + $0xa8] sm:$0xff] }
  0x34   :  { %v245_v15 = vadd.f32 %v817_v28, %v158_v7  ;;  %v435_v16 = vsel %vm307_vm11, %v243_v3, %v371_v10  ;;  %v74_v17 = vunpack.c.h.bf16 %v26_v0  ;;  %v75_v19 = vunpack.c.l.bf16 %v27_v8  ;;  %v31_v3 = vld [vmem:[%s1130_s0 + $0xa0] sm:$0xff] }
  0x35   :  { %v159_v18 = vmul.f32 %v819_v29, %v73_v11  ;;  %676 = vst [vmem:[%s1132_s2 + $0x60] sm:$0xff] %v745_v12  ;;  %v746_v21 = vpack.c.bf16 %v435_v16, %v434_v13  ;;  %vm308_vm12 = vcmp.ge.f32.partialorder %v244_v14, 0.0  ;;  %v372_v22 = vmul.f32 0.2, %v244_v14 }
  0x36   :  { %vm309_vm13 = vcmp.ge.f32.partialorder %v245_v15, 0.0  ;;  %v373_v23 = vmul.f32 0.2, %v245_v15  ;;  %v160_v24 = vmul.f32 %v821_v30, %v74_v17  ;;  %v76_v34 = vunpack.c.h.bf16 %v27_v8 }
  0x37   :  { %v246_v33 = vadd.f32 %v823_v31, %v159_v18  ;;  %677 = vst [vmem:[%s1132_s2 + $0x68] sm:$0xff] %v746_v21  ;;  %v436_v35 = vsel %vm308_vm12, %v244_v14, %v372_v22  ;;  %v161_v36 = vmul.f32 %v811_v25, %v75_v19  ;;  %v77_v37 = vunpack.c.l.bf16 %v28_v20 }
  0x38   :  { %v78_v38 = vunpack.c.h.bf16 %v28_v20  ;;  %v437_v39 = vsel %vm309_vm13, %v245_v15, %v373_v23  ;;  %v247_v40 = vadd.f32 %v825_v32, %v160_v24  ;;  %v162_v43 = vmul.f32 %v813_v26, %v76_v34 }
  0x39   :  { %vm310_vm14 = vcmp.ge.f32.partialorder %v246_v33, 0.0  ;;  %v374_v41 = vmul.f32 0.2, %v246_v33  ;;  %v747_v42 = vpack.c.bf16 %v437_v39, %v436_v35  ;;  %v248_v44 = vadd.f32 %v815_v27, %v161_v36  ;;  %v33_v35 = vld [vmem:[%s1130_s0 + $0xb0] sm:$0xff] }
  0x3a   :  { %v163_v45 = vmul.f32 %v819_v29, %v77_v37  ;;  %vm311_vm15 = vcmp.ge.f32.partialorder %v247_v40, 0.0  ;;  %v375_v47 = vmul.f32 0.2, %v247_v40  ;;  %v164_v49 = vmul.f32 %v821_v30, %v78_v38 }
  0x3b   :  { %v438_v48 = vsel %vm310_vm14, %v246_v33, %v374_v41  ;;  %678 = vst [vmem:[%s1132_s2 + $0x70] sm:$0xff] %v747_v42  ;;  %v249_v50 = vadd.f32 %v817_v28, %v162_v43  ;;  %vm312_vm0 = vcmp.ge.f32.partialorder %v248_v44, 0.0  ;;  %v376_v51 = vmul.f32 0.2, %v248_v44 }
  0x3c   :  { %v250_v52 = vadd.f32 %v823_v31, %v163_v45  ;;  %v439_v53 = vsel %vm311_vm15, %v247_v40, %v375_v47  ;;  %v251_v54 = vadd.f32 %v825_v32, %v164_v49  ;;  %v79_v55 = vunpack.c.l.bf16 %v29_v46 }
  0x3d   :  { %v80_v56 = vunpack.c.h.bf16 %v29_v46  ;;  %v748_v58 = vpack.c.bf16 %v439_v53, %v438_v48  ;;  %vm313_vm1 = vcmp.ge.f32.partialorder %v249_v50, 0.0  ;;  %v377_v59 = vmul.f32 0.2, %v249_v50  ;;  %v34_v48 = vld [vmem:[%s1130_s0 + $0xb8] sm:$0xff] }
  0x3e   :  { %v440_v60 = vsel %vm312_vm0, %v248_v44, %v376_v51  ;;  %vm314_vm2 = vcmp.ge.f32.partialorder %v250_v52, 0.0  ;;  %vm315_vm3 = vcmp.ge.f32.partialorder %v251_v54, 0.0  ;;  %v378_v61 = vmul.f32 0.2, %v250_v52 }
  0x3f   :  { %v379_v62 = vmul.f32 0.2, %v251_v54  ;;  %679 = vst [vmem:[%s1132_s2 + $0x78] sm:$0xff] %v748_v58  ;;  %v441_v63 = vsel %vm313_vm1, %v249_v50, %v377_v59  ;;  %v165_v0 = vmul.f32 %v811_v25, %v79_v55  ;;  %v166_v1 = vmul.f32 %v813_v26, %v80_v56  ;;  %v35_v56 = vld [vmem:[%s1130_s0 + $0xc0] sm:$0xff] }
  0x40   :  { %v81_v2 = vunpack.c.l.bf16 %v30_v57  ;;  %v749_v5 = vpack.c.bf16 %v441_v63, %v440_v60  ;;  %v442_v6 = vsel %vm314_vm2, %v250_v52, %v378_v61  ;;  %v82_v8 = vunpack.c.h.bf16 %v30_v57 }
  0x41   :  { %v443_v7 = vsel %vm315_vm3, %v251_v54, %v379_v62  ;;  %v252_v10 = vadd.f32 %v815_v27, %v165_v0  ;;  %v253_v11 = vadd.f32 %v817_v28, %v166_v1  ;;  %v83_v14 = vunpack.c.l.bf16 %v31_v3 }
  0x42   :  { %v750_v9 = vpack.c.bf16 %v443_v7, %v442_v6  ;;  %v167_v12 = vmul.f32 %v819_v29, %v81_v2  ;;  %680 = vst [vmem:[%s1132_s2 + $0x80] sm:$0xff] %v749_v5  ;;  %v168_v13 = vmul.f32 %v821_v30, %v82_v8  ;;  %v84_v15 = vunpack.c.h.bf16 %v31_v3 }
  0x43   :  { %v85_v16 = vunpack.c.l.bf16 %v32_v4  ;;  %vm316_vm4 = vcmp.ge.f32.partialorder %v252_v10, 0.0  ;;  %vm317_vm5 = vcmp.ge.f32.partialorder %v253_v11, 0.0  ;;  %v380_v17 = vmul.f32 0.2, %v252_v10 }
  0x44   :  { %681 = vst [vmem:[%s1132_s2 + $0x88] sm:$0xff] %v750_v9  ;;  %v381_v18 = vmul.f32 0.2, %v253_v11  ;;  %v254_v19 = vadd.f32 %v823_v31, %v167_v12  ;;  %v255_v20 = vadd.f32 %v825_v32, %v168_v13  ;;  %v169_v21 = vmul.f32 %v811_v25, %v83_v14 }
  0x45   :  { %v170_v22 = vmul.f32 %v813_v26, %v84_v15  ;;  %v444_v23 = vsel %vm316_vm4, %v252_v10, %v380_v17  ;;  %v86_v33 = vunpack.c.h.bf16 %v32_v4  ;;  %v171_v34 = vmul.f32 %v819_v29, %v85_v16  ;;  %v36_v4 = vld [vmem:[%s1130_s0 + $0xc8] sm:$0xff] }
  0x46   :  { %v445_v24 = vsel %vm317_vm5, %v253_v11, %v381_v18  ;;  %vm318_vm6 = vcmp.ge.f32.partialorder %v254_v19, 0.0  ;;  %vm319_vm7 = vcmp.ge.f32.partialorder %v255_v20, 0.0  ;;  %v382_v37 = vmul.f32 0.2, %v254_v19 }
  0x47   :  { %v751_v36 = vpack.c.bf16 %v445_v24, %v444_v23  ;;  %v383_v38 = vmul.f32 0.2, %v255_v20  ;;  %v256_v39 = vadd.f32 %v815_v27, %v169_v21  ;;  %v257_v40 = vadd.f32 %v817_v28, %v170_v22  ;;  %v37_v22 = vld [vmem:[%s1130_s0 + $0xd0] sm:$0xff] }
  0x48   :  { %v172_v41 = vmul.f32 %v821_v30, %v86_v33  ;;  %v446_v42 = vsel %vm318_vm6, %v254_v19, %v382_v37  ;;  %v258_v43 = vadd.f32 %v823_v31, %v171_v34  ;;  %v87_v44 = vunpack.c.l.bf16 %v33_v35 }
  0x49   :  { %682 = vst [vmem:[%s1132_s2 + $0x90] sm:$0xff] %v751_v36  ;;  %v88_v45 = vunpack.c.h.bf16 %v33_v35  ;;  %v447_v46 = vsel %vm319_vm7, %v255_v20, %v383_v38  ;;  %vm320_vm8 = vcmp.ge.f32.partialorder %v256_v39, 0.0  ;;  %vm321_vm9 = vcmp.ge.f32.partialorder %v257_v40, 0.0 }
  0x4a   :  { %v384_v47 = vmul.f32 0.2, %v256_v39  ;;  %v752_v49 = vpack.c.bf16 %v447_v46, %v446_v42  ;;  %v385_v50 = vmul.f32 0.2, %v257_v40  ;;  %v259_v51 = vadd.f32 %v825_v32, %v172_v41  ;;  %v38_v41 = vld [vmem:[%s1130_s0 + $0xd8] sm:$0xff] }
  0x4b   :  { %vm322_vm10 = vcmp.ge.f32.partialorder %v258_v43, 0.0  ;;  %v386_v53 = vmul.f32 0.2, %v258_v43  ;;  %v173_v54 = vmul.f32 %v811_v25, %v87_v44  ;;  %v174_v55 = vmul.f32 %v813_v26, %v88_v45 }
  0x4c   :  { %v448_v52 = vsel %vm320_vm8, %v256_v39, %v384_v47  ;;  %683 = vst [vmem:[%s1132_s2 + $0x98] sm:$0xff] %v752_v49  ;;  %v449_v57 = vsel %vm321_vm9, %v257_v40, %v385_v50  ;;  %vm323_vm11 = vcmp.ge.f32.partialorder %v259_v51, 0.0  ;;  %v387_v58 = vmul.f32 0.2, %v259_v51 }
  0x4d   :  { %v89_v59 = vunpack.c.l.bf16 %v34_v48  ;;  %v753_v60 = vpack.c.bf16 %v449_v57, %v448_v52  ;;  %v450_v61 = vsel %vm322_vm10, %v258_v43, %v386_v53  ;;  %v260_v62 = vadd.f32 %v815_v27, %v173_v54  ;;  %v40_v52 = vld [vmem:[%s1130_s0 + $0xe8] sm:$0xff] }
  0x4e   :  { %v261_v63 = vadd.f32 %v817_v28, %v174_v55  ;;  %v451_v0 = vsel %vm323_vm11, %v259_v51, %v387_v58  ;;  %v90_v1 = vunpack.c.h.bf16 %v34_v48  ;;  %v91_v3 = vunpack.c.l.bf16 %v35_v56  ;;  %v39_v51 = vld [vmem:[%s1130_s0 + $0xe0] sm:$0xff] }
  0x4f   :  { %v175_v2 = vmul.f32 %v819_v29, %v89_v59  ;;  %684 = vst [vmem:[%s1132_s2 + $0xa0] sm:$0xff] %v753_v60  ;;  %v754_v5 = vpack.c.bf16 %v451_v0, %v450_v61  ;;  %vm324_vm12 = vcmp.ge.f32.partialorder %v260_v62, 0.0  ;;  %v388_v6 = vmul.f32 0.2, %v260_v62 }
  0x50   :  { %vm325_vm13 = vcmp.ge.f32.partialorder %v261_v63, 0.0  ;;  %v389_v7 = vmul.f32 0.2, %v261_v63  ;;  %v176_v8 = vmul.f32 %v821_v30, %v90_v1  ;;  %v92_v10 = vunpack.c.h.bf16 %v35_v56 }
  0x51   :  { %v262_v9 = vadd.f32 %v823_v31, %v175_v2  ;;  %685 = vst [vmem:[%s1132_s2 + $0xa8] sm:$0xff] %v754_v5  ;;  %v452_v11 = vsel %vm324_vm12, %v260_v62, %v388_v6  ;;  %v177_v12 = vmul.f32 %v811_v25, %v91_v3  ;;  %v93_v13 = vunpack.c.l.bf16 %v36_v4 }
  0x52   :  { %v94_v14 = vunpack.c.h.bf16 %v36_v4  ;;  %v453_v15 = vsel %vm325_vm13, %v261_v63, %v389_v7  ;;  %v263_v16 = vadd.f32 %v825_v32, %v176_v8  ;;  %v178_v19 = vmul.f32 %v813_v26, %v92_v10 }
  0x53   :  { %vm326_vm14 = vcmp.ge.f32.partialorder %v262_v9, 0.0  ;;  %v390_v17 = vmul.f32 0.2, %v262_v9  ;;  %v755_v18 = vpack.c.bf16 %v453_v15, %v452_v11  ;;  %v264_v20 = vadd.f32 %v815_v27, %v177_v12  ;;  %v41_v11 = vld [vmem:[%s1130_s0 + $0xf0] sm:$0xff] }
  0x54   :  { %v179_v21 = vmul.f32 %v819_v29, %v93_v13  ;;  %vm327_vm15 = vcmp.ge.f32.partialorder %v263_v16, 0.0  ;;  %v391_v23 = vmul.f32 0.2, %v263_v16  ;;  %v180_v33 = vmul.f32 %v821_v30, %v94_v14 }
  0x55   :  { %v454_v24 = vsel %vm326_vm14, %v262_v9, %v390_v17  ;;  %686 = vst [vmem:[%s1132_s2 + $0xb0] sm:$0xff] %v755_v18  ;;  %v265_v34 = vadd.f32 %v817_v28, %v178_v19  ;;  %vm328_vm0 = vcmp.ge.f32.partialorder %v264_v20, 0.0  ;;  %v392_v35 = vmul.f32 0.2, %v264_v20 }
  0x56   :  { %v266_v36 = vadd.f32 %v823_v31, %v179_v21  ;;  %v455_v37 = vsel %vm327_vm15, %v263_v16, %v391_v23  ;;  %v267_v38 = vadd.f32 %v825_v32, %v180_v33  ;;  %v95_v39 = vunpack.c.l.bf16 %v37_v22 }
  0x57   :  { %v96_v40 = vunpack.c.h.bf16 %v37_v22  ;;  %v756_v42 = vpack.c.bf16 %v455_v37, %v454_v24  ;;  %vm329_vm1 = vcmp.ge.f32.partialorder %v265_v34, 0.0  ;;  %v393_v43 = vmul.f32 0.2, %v265_v34  ;;  %v42_v24 = vld [vmem:[%s1130_s0 + $0xf8] sm:$0xff] }
  0x58   :  { %v456_v44 = vsel %vm328_vm0, %v264_v20, %v392_v35  ;;  %vm330_vm2 = vcmp.ge.f32.partialorder %v266_v36, 0.0  ;;  %vm331_vm3 = vcmp.ge.f32.partialorder %v267_v38, 0.0  ;;  %v394_v45 = vmul.f32 0.2, %v266_v36 }
  0x59   :  { %v395_v46 = vmul.f32 0.2, %v267_v38  ;;  %687 = vst [vmem:[%s1132_s2 + $0xb8] sm:$0xff] %v756_v42  ;;  %v457_v47 = vsel %vm329_vm1, %v265_v34, %v393_v43  ;;  %v181_v48 = vmul.f32 %v811_v25, %v95_v39  ;;  %v182_v49 = vmul.f32 %v813_v26, %v96_v40 }
  0x5a   :  { %v97_v50 = vunpack.c.l.bf16 %v38_v41  ;;  %v757_v53 = vpack.c.bf16 %v457_v47, %v456_v44  ;;  %v458_v54 = vsel %vm330_vm2, %v266_v36, %v394_v45  ;;  %v98_v56 = vunpack.c.h.bf16 %v38_v41 }
  0x5b   :  { %v459_v55 = vsel %vm331_vm3, %v267_v38, %v395_v46  ;;  %v268_v58 = vadd.f32 %v815_v27, %v181_v48  ;;  %v269_v59 = vadd.f32 %v817_v28, %v182_v49  ;;  %v99_v62 = vunpack.c.l.bf16 %v39_v51 }
  0x5c   :  { %v758_v57 = vpack.c.bf16 %v459_v55, %v458_v54  ;;  %v183_v60 = vmul.f32 %v819_v29, %v97_v50  ;;  %688 = vst [vmem:[%s1132_s2 + $0xc0] sm:$0xff] %v757_v53  ;;  %v184_v61 = vmul.f32 %v821_v30, %v98_v56  ;;  %v100_v63 = vunpack.c.h.bf16 %v39_v51 }
  0x5d   :  { %v101_v0 = vunpack.c.l.bf16 %v40_v52  ;;  %vm332_vm4 = vcmp.ge.f32.partialorder %v268_v58, 0.0  ;;  %vm333_vm5 = vcmp.ge.f32.partialorder %v269_v59, 0.0  ;;  %v396_v1 = vmul.f32 0.2, %v268_v58 }
  0x5e   :  { %689 = vst [vmem:[%s1132_s2 + $0xc8] sm:$0xff] %v758_v57  ;;  %v397_v2 = vmul.f32 0.2, %v269_v59  ;;  %v270_v3 = vadd.f32 %v823_v31, %v183_v60  ;;  %v271_v4 = vadd.f32 %v825_v32, %v184_v61  ;;  %v185_v5 = vmul.f32 %v811_v25, %v99_v62 }
  0x5f   :  { %v186_v6 = vmul.f32 %v813_v26, %v100_v63  ;;  %v460_v7 = vsel %vm332_vm4, %v268_v58, %v396_v1  ;;  %v102_v9 = vunpack.c.h.bf16 %v40_v52  ;;  %v187_v10 = vmul.f32 %v819_v29, %v101_v0 }
  0x60   :  { %v461_v8 = vsel %vm333_vm5, %v269_v59, %v397_v2  ;;  %vm334_vm6 = vcmp.ge.f32.partialorder %v270_v3, 0.0  ;;  %vm335_vm7 = vcmp.ge.f32.partialorder %v271_v4, 0.0  ;;  %v398_v13 = vmul.f32 0.2, %v270_v3 }
  0x61   :  { %v759_v12 = vpack.c.bf16 %v461_v8, %v460_v7  ;;  %v399_v14 = vmul.f32 0.2, %v271_v4  ;;  %v272_v15 = vadd.f32 %v815_v27, %v185_v5  ;;  %v273_v16 = vadd.f32 %v817_v28, %v186_v6 }
  0x62   :  { %v188_v17 = vmul.f32 %v821_v30, %v102_v9  ;;  %v462_v18 = vsel %vm334_vm6, %v270_v3, %v398_v13  ;;  %v274_v19 = vadd.f32 %v823_v31, %v187_v10  ;;  %v103_v20 = vunpack.c.l.bf16 %v41_v11 }
  0x63   :  { %690 = vst [vmem:[%s1132_s2 + $0xd0] sm:$0xff] %v759_v12  ;;  %v104_v21 = vunpack.c.h.bf16 %v41_v11  ;;  %v463_v22 = vsel %vm335_vm7, %v271_v4, %v399_v14  ;;  %vm336_vm8 = vcmp.ge.f32.partialorder %v272_v15, 0.0  ;;  %vm337_vm9 = vcmp.ge.f32.partialorder %v273_v16, 0.0 }
  0x64   :  { %v400_v23 = vmul.f32 0.2, %v272_v15  ;;  %v760_v33 = vpack.c.bf16 %v463_v22, %v462_v18  ;;  %v401_v34 = vmul.f32 0.2, %v273_v16  ;;  %v275_v35 = vadd.f32 %v825_v32, %v188_v17 }
  0x65   :  { %vm338_vm10 = vcmp.ge.f32.partialorder %v274_v19, 0.0  ;;  %v402_v37 = vmul.f32 0.2, %v274_v19  ;;  %v189_v38 = vmul.f32 %v811_v25, %v103_v20  ;;  %v190_v39 = vmul.f32 %v813_v26, %v104_v21 }
  0x66   :  { %v464_v36 = vsel %vm336_vm8, %v272_v15, %v400_v23  ;;  %691 = vst [vmem:[%s1132_s2 + $0xd8] sm:$0xff] %v760_v33  ;;  %v465_v40 = vsel %vm337_vm9, %v273_v16, %v401_v34  ;;  %vm339_vm11 = vcmp.ge.f32.partialorder %v275_v35, 0.0  ;;  %v403_v41 = vmul.f32 0.2, %v275_v35 }
  0x67   :  { %v105_v42 = vunpack.c.l.bf16 %v42_v24  ;;  %v761_v43 = vpack.c.bf16 %v465_v40, %v464_v36  ;;  %v466_v44 = vsel %vm338_vm10, %v274_v19, %v402_v37  ;;  %v276_v45 = vadd.f32 %v815_v27, %v189_v38 }
  0x68   :  { %v277_v46 = vadd.f32 %v817_v28, %v190_v39  ;;  %v467_v47 = vsel %vm339_vm11, %v275_v35, %v403_v41  ;;  %v106_v48 = vunpack.c.h.bf16 %v42_v24 }
  0x69   :  { %v191_v25 = vmul.f32 %v819_v29, %v105_v42  ;;  %692 = vst [vmem:[%s1132_s2 + $0xe0] sm:$0xff] %v761_v43  ;;  %v762_v26 = vpack.c.bf16 %v467_v47, %v466_v44  ;;  %vm340_vm12 = vcmp.ge.f32.partialorder %v276_v45, 0.0  ;;  %v404_v49 = vmul.f32 0.2, %v276_v45 }
  0x6a   :  { %vm341_vm13 = vcmp.ge.f32.partialorder %v277_v46, 0.0  ;;  %v405_v50 = vmul.f32 0.2, %v277_v46  ;;  %v192_v51 = vmul.f32 %v821_v30, %v106_v48 }
  0x6b   :  { %v278_v52 = vadd.f32 %v823_v31, %v191_v25  ;;  %693 = vst [vmem:[%s1132_s2 + $0xe8] sm:$0xff] %v762_v26  ;;  %v468_v27 = vsel %vm340_vm12, %v276_v45, %v404_v49 }
  0x6c   :  { %v469_v28 = vsel %vm341_vm13, %v277_v46, %v405_v50  ;;  %v279_v29 = vadd.f32 %v825_v32, %v192_v51 }
  0x6d   :  { %vm342_vm14 = vcmp.ge.f32.partialorder %v278_v52, 0.0  ;;  %v406_v53 = vmul.f32 0.2, %v278_v52  ;;  %v763_v54 = vpack.c.bf16 %v469_v28, %v468_v27 }
  0x6e   :  { %vm343_vm15 = vcmp.ge.f32.partialorder %v279_v29, 0.0  ;;  %v407_v55 = vmul.f32 0.2, %v279_v29 }
  0x6f   :  { %v470_v56 = vsel %vm342_vm14, %v278_v52, %v406_v53  ;;  %694 = vst [vmem:[%s1132_s2 + $0xf0] sm:$0xff] %v763_v54 }
  0x70   :  { %v471_v30 = vsel %vm343_vm15, %v279_v29, %v407_v55 }
  0x71   :  { %v764_v31 = vpack.c.bf16 %v471_v30, %v470_v56 }
  0x73   :  { %695 = vst [vmem:[%s1132_s2 + $0xf8] sm:$0xff] %v764_v31 }

// kernel: forward.12
= control target key start
LH: loop header
LB: loop body
LE: loop exit
PB: predicated region body
PF: predicated region fallthrough
CT: control target
= control target key end

     0   :  { %s6163_s12 = smov 0   ;;  %s6165_s13 = smov 0   ;;  %s6938_s0 = inlined_call_operand.vmem [shape: bf16[128,2304], index: 0, kind: input, shape index: {}]   ;;  %s6939_s1 = inlined_call_operand.vmem [shape: bf16[2304,512], index: 1, kind: input, shape index: {}]   ;;  %s6940_s2 = inlined_call_operand.vmem [shape: bf16[128,512], index: 2, kind: output, shape index: {0}]   ;;  %s6941_s3 = inlined_call_operand.vmem [shape: f32[8,512], index: 3, kind: output, shape index: {1}]  }
   0x1   :  { %s6167_s14 = smov 0   ;;  %s6169_s15 = smov 0  }
   0x2   :  { %s6171_s16 = smov 0  }
   0x3 LB: > { %s26_s17 = sadd.s32 1, %s6133_s15  ;;  %p49_p1 = scmp.ne.s32.totalorder %s6125_s13, %s6121_s12  ;;  %s6137_s16 = sphi %s6171_s16, %s14_s16   ;;  %s6133_s15 = sphi %s6169_s15, %s6945_s15   ;;  %s6129_s14 = sphi %s6167_s14, %s6944_s14   ;;  %s6125_s13 = sphi %s6165_s13, %s6943_s13   ;;  %s6121_s12 = sphi %s6163_s12, %s6942_s12  }
   0x4   : > { %p27_p0 = scmp.ge.s32.totalorder %s26_s17, 2  ;;  %p50_p2 = scmp.eq.s32.totalorder %s6137_s16, 0 }
   0x5   : > { %s42_s19 = sadd.s32 1, %s6125_s13  ;;  %p4789_p5 = scmp.ge.s32.totalorder %s6137_s16, 2 }
   0x6   : > { %s6947_s17 = smov (%p27_p0, %s26_s17), 0  ;;  %p51_p3 = por %p50_p2, %p49_p1 }
   0x7   : > { %s38_s18 = ssub.s32 %s6133_s15, %s6947_s17  ;;  %159 = sbr.rel (%p4789_p5) target bundleno = 61 (0x3d), region = 16 }
   0x8   : > { %p40_p4 = scmp.eq.s32.totalorder %s38_s18, 0 }
   0xa   : > { %s6198_s20 = scalar_select %p40_p4, %s6125_s13, %s42_s19  }
   0xe   : > { %162 = sbr.rel (!%p51_p3) target bundleno = 61 (0x3d), region = 20  ;;  %s164_s21 = sand.u32 (%p51_p3), 1, %s6125_s13  }
   0xf   : > { %s5227_s22 = smul.u32 (%p51_p3), 36, %s6133_s15 }
  0x10   : > { %s5517_s23 = smul.u32 (%p51_p3), 576, %s164_s21 }
  0x11   : > { %s6206_s26 = scalar_lea.vmem (%p51_p3), %s6938_s0, %s5227_s22 }
  0x12   : > { %v187_v0 = vld [vmem:[%s6206_s26] sm:$0xff] (%p51_p3)  ;;  %v189_v1 = vld [vmem:[%s6206_s26 + $0x8] sm:$0xff] (%p51_p3)  ;;  %v191_v2 = vld [vmem:[%s6206_s26 + $0x10] sm:$0xff] (%p51_p3)  ;;  %s6211_s27 = scalar_lea.vmem (%p51_p3), [#allocation3], %s5517_s23 }
  0x13   : > { %188 = vst [vmem:[%s6211_s27] sm:$0xff] (%p51_p3), %v187_v0  ;;  %190 = vst [vmem:[%s6211_s27 + $0x8] sm:$0xff] (%p51_p3), %v189_v1  ;;  %v193_v3 = vld [vmem:[%s6206_s26 + $0x18] sm:$0xff] (%p51_p3)  ;;  %v195_v4 = vld [vmem:[%s6206_s26 + $0x48] sm:$0xff] (%p51_p3) }
  0x14   : > { %192 = vst [vmem:[%s6211_s27 + $0x10] sm:$0xff] (%p51_p3), %v191_v2  ;;  %v197_v5 = vld [vmem:[%s6206_s26 + $0x50] sm:$0xff] (%p51_p3)  ;;  %194 = vst [vmem:[%s6211_s27 + $0x18] sm:$0xff] (%p51_p3), %v193_v3  ;;  %v199_v6 = vld [vmem:[%s6206_s26 + $0x58] sm:$0xff] (%p51_p3) }
  0x15   : > { %196 = vst [vmem:[%s6211_s27 + $0x24] sm:$0xff] %v195_v4  ;;  %198 = vst [vmem:[%s6211_s27 + $0x2c] sm:$0xff] %v197_v5  ;;  %v201_v7 = vld [vmem:[%s6206_s26 + $0x60] sm:$0xff]  ;;  %v203_v8 = vld [vmem:[%s6206_s26 + $0x90] sm:$0xff] }
  0x16   : > { %200 = vst [vmem:[%s6211_s27 + $0x34] sm:$0xff] %v199_v6  ;;  %202 = vst [vmem:[%s6211_s27 + $0x3c] sm:$0xff] %v201_v7  ;;  %v205_v9 = vld [vmem:[%s6206_s26 + $0x98] sm:$0xff]  ;;  %v207_v10 = vld [vmem:[%s6206_s26 + $0xa0] sm:$0xff] }
  0x17   : > { %204 = vst [vmem:[%s6211_s27 + $0x48] sm:$0xff] %v203_v8  ;;  %v209_v11 = vld [vmem:[%s6206_s26 + $0xa8] sm:$0xff]  ;;  %206 = vst [vmem:[%s6211_s27 + $0x50] sm:$0xff] %v205_v9  ;;  %v211_v12 = vld [vmem:[%s6206_s26 + $0xd8] sm:$0xff] }
  0x18   : > { %208 = vst [vmem:[%s6211_s27 + $0x58] sm:$0xff] %v207_v10  ;;  %210 = vst [vmem:[%s6211_s27 + $0x60] sm:$0xff] %v209_v11  ;;  %v213_v13 = vld [vmem:[%s6206_s26 + $0xe0] sm:$0xff]  ;;  %v215_v14 = vld [vmem:[%s6206_s26 + $0xe8] sm:$0xff] }
  0x19   : > { %212 = vst [vmem:[%s6211_s27 + $0x6c] sm:$0xff] %v211_v12  ;;  %214 = vst [vmem:[%s6211_s27 + $0x74] sm:$0xff] %v213_v13  ;;  %v217_v15 = vld [vmem:[%s6206_s26 + $0xf0] sm:$0xff]  ;;  %v219_v16 = vld [vmem:[%s6206_s26 + $0x120] sm:$0xff] }
  0x1a   : > { %216 = vst [vmem:[%s6211_s27 + $0x7c] sm:$0xff] %v215_v14  ;;  %v221_v17 = vld [vmem:[%s6206_s26 + $0x128] sm:$0xff]  ;;  %218 = vst [vmem:[%s6211_s27 + $0x84] sm:$0xff] %v217_v15  ;;  %v223_v18 = vld [vmem:[%s6206_s26 + $0x130] sm:$0xff] }
  0x1b   : > { %220 = vst [vmem:[%s6211_s27 + $0x90] sm:$0xff] %v219_v16  ;;  %222 = vst [vmem:[%s6211_s27 + $0x98] sm:$0xff] %v221_v17  ;;  %v225_v19 = vld [vmem:[%s6206_s26 + $0x138] sm:$0xff]  ;;  %v227_v20 = vld [vmem:[%s6206_s26 + $0x168] sm:$0xff] }
  0x1c   : > { %224 = vst [vmem:[%s6211_s27 + $0xa0] sm:$0xff] %v223_v18  ;;  %226 = vst [vmem:[%s6211_s27 + $0xa8] sm:$0xff] %v225_v19  ;;  %v229_v21 = vld [vmem:[%s6206_s26 + $0x170] sm:$0xff]  ;;  %v231_v22 = vld [vmem:[%s6206_s26 + $0x178] sm:$0xff] }
  0x1d   : > { %228 = vst [vmem:[%s6211_s27 + $0xb4] sm:$0xff] %v227_v20  ;;  %v233_v23 = vld [vmem:[%s6206_s26 + $0x180] sm:$0xff]  ;;  %230 = vst [vmem:[%s6211_s27 + $0xbc] sm:$0xff] %v229_v21  ;;  %v235_v24 = vld [vmem:[%s6206_s26 + $0x1b0] sm:$0xff] }
  0x1e   : > { %232 = vst [vmem:[%s6211_s27 + $0xc4] sm:$0xff] %v231_v22  ;;  %234 = vst [vmem:[%s6211_s27 + $0xcc] sm:$0xff] %v233_v23  ;;  %v237_v25 = vld [vmem:[%s6206_s26 + $0x1b8] sm:$0xff]  ;;  %v239_v26 = vld [vmem:[%s6206_s26 + $0x1c0] sm:$0xff] }
  0x1f   : > { %236 = vst [vmem:[%s6211_s27 + $0xd8] sm:$0xff] %v235_v24  ;;  %238 = vst [vmem:[%s6211_s27 + $0xe0] sm:$0xff] %v237_v25  ;;  %v241_v27 = vld [vmem:[%s6206_s26 + $0x1c8] sm:$0xff]  ;;  %v243_v28 = vld [vmem:[%s6206_s26 + $0x1f8] sm:$0xff] }
  0x20   : > { %240 = vst [vmem:[%s6211_s27 + $0xe8] sm:$0xff] %v239_v26  ;;  %v245_v29 = vld [vmem:[%s6206_s26 + $0x200] sm:$0xff]  ;;  %242 = vst [vmem:[%s6211_s27 + $0xf0] sm:$0xff] %v241_v27  ;;  %v247_v30 = vld [vmem:[%s6206_s26 + $0x208] sm:$0xff] }
  0x21   : > { %244 = vst [vmem:[%s6211_s27 + $0xfc] sm:$0xff] %v243_v28  ;;  %246 = vst [vmem:[%s6211_s27 + $0x104] sm:$0xff] %v245_v29  ;;  %v249_v31 = vld [vmem:[%s6206_s26 + $0x210] sm:$0xff]  ;;  %v251_v32 = vld [vmem:[%s6206_s26 + $0x240] sm:$0xff] }
  0x22   : > { %248 = vst [vmem:[%s6211_s27 + $0x10c] sm:$0xff] %v247_v30  ;;  %250 = vst [vmem:[%s6211_s27 + $0x114] sm:$0xff] %v249_v31  ;;  %v253_v33 = vld [vmem:[%s6206_s26 + $0x248] sm:$0xff]  ;;  %v255_v34 = vld [vmem:[%s6206_s26 + $0x250] sm:$0xff] }
  0x23   : > { %252 = vst [vmem:[%s6211_s27 + $0x120] sm:$0xff] %v251_v32  ;;  %v257_v35 = vld [vmem:[%s6206_s26 + $0x258] sm:$0xff]  ;;  %254 = vst [vmem:[%s6211_s27 + $0x128] sm:$0xff] %v253_v33  ;;  %v259_v36 = vld [vmem:[%s6206_s26 + $0x288] sm:$0xff] }
  0x24   : > { %256 = vst [vmem:[%s6211_s27 + $0x130] sm:$0xff] %v255_v34  ;;  %258 = vst [vmem:[%s6211_s27 + $0x138] sm:$0xff] %v257_v35  ;;  %v261_v37 = vld [vmem:[%s6206_s26 + $0x290] sm:$0xff]  ;;  %v263_v38 = vld [vmem:[%s6206_s26 + $0x298] sm:$0xff] }
  0x25   : > { %260 = vst [vmem:[%s6211_s27 + $0x144] sm:$0xff] %v259_v36  ;;  %262 = vst [vmem:[%s6211_s27 + $0x14c] sm:$0xff] %v261_v37  ;;  %v265_v39 = vld [vmem:[%s6206_s26 + $0x2a0] sm:$0xff]  ;;  %v267_v40 = vld [vmem:[%s6206_s26 + $0x2d0] sm:$0xff] }
  0x26   : > { %264 = vst [vmem:[%s6211_s27 + $0x154] sm:$0xff] %v263_v38  ;;  %v269_v41 = vld [vmem:[%s6206_s26 + $0x2d8] sm:$0xff]  ;;  %266 = vst [vmem:[%s6211_s27 + $0x15c] sm:$0xff] %v265_v39  ;;  %v271_v42 = vld [vmem:[%s6206_s26 + $0x2e0] sm:$0xff] }
  0x27   : > { %268 = vst [vmem:[%s6211_s27 + $0x168] sm:$0xff] %v267_v40  ;;  %270 = vst [vmem:[%s6211_s27 + $0x170] sm:$0xff] %v269_v41  ;;  %v273_v43 = vld [vmem:[%s6206_s26 + $0x2e8] sm:$0xff]  ;;  %v275_v44 = vld [vmem:[%s6206_s26 + $0x318] sm:$0xff] }
  0x28   : > { %272 = vst [vmem:[%s6211_s27 + $0x178] sm:$0xff] %v271_v42  ;;  %274 = vst [vmem:[%s6211_s27 + $0x180] sm:$0xff] %v273_v43  ;;  %v277_v45 = vld [vmem:[%s6206_s26 + $0x320] sm:$0xff]  ;;  %v279_v46 = vld [vmem:[%s6206_s26 + $0x328] sm:$0xff] }
  0x29   : > { %276 = vst [vmem:[%s6211_s27 + $0x18c] sm:$0xff] %v275_v44  ;;  %v281_v47 = vld [vmem:[%s6206_s26 + $0x330] sm:$0xff]  ;;  %278 = vst [vmem:[%s6211_s27 + $0x194] sm:$0xff] %v277_v45  ;;  %v283_v48 = vld [vmem:[%s6206_s26 + $0x360] sm:$0xff] }
  0x2a   : > { %280 = vst [vmem:[%s6211_s27 + $0x19c] sm:$0xff] %v279_v46  ;;  %282 = vst [vmem:[%s6211_s27 + $0x1a4] sm:$0xff] %v281_v47  ;;  %v285_v49 = vld [vmem:[%s6206_s26 + $0x368] sm:$0xff]  ;;  %v287_v50 = vld [vmem:[%s6206_s26 + $0x370] sm:$0xff] }
  0x2b   : > { %284 = vst [vmem:[%s6211_s27 + $0x1b0] sm:$0xff] %v283_v48  ;;  %286 = vst [vmem:[%s6211_s27 + $0x1b8] sm:$0xff] %v285_v49  ;;  %v289_v51 = vld [vmem:[%s6206_s26 + $0x378] sm:$0xff]  ;;  %v291_v52 = vld [vmem:[%s6206_s26 + $0x3a8] sm:$0xff] }
  0x2c   : > { %288 = vst [vmem:[%s6211_s27 + $0x1c0] sm:$0xff] %v287_v50  ;;  %v293_v53 = vld [vmem:[%s6206_s26 + $0x3b0] sm:$0xff]  ;;  %290 = vst [vmem:[%s6211_s27 + $0x1c8] sm:$0xff] %v289_v51  ;;  %v295_v54 = vld [vmem:[%s6206_s26 + $0x3b8] sm:$0xff] }
  0x2d   : > { %292 = vst [vmem:[%s6211_s27 + $0x1d4] sm:$0xff] %v291_v52  ;;  %294 = vst [vmem:[%s6211_s27 + $0x1dc] sm:$0xff] %v293_v53  ;;  %v297_v55 = vld [vmem:[%s6206_s26 + $0x3c0] sm:$0xff]  ;;  %v299_v56 = vld [vmem:[%s6206_s26 + $0x3f0] sm:$0xff] }
  0x2e   : > { %296 = vst [vmem:[%s6211_s27 + $0x1e4] sm:$0xff] %v295_v54  ;;  %298 = vst [vmem:[%s6211_s27 + $0x1ec] sm:$0xff] %v297_v55  ;;  %v301_v57 = vld [vmem:[%s6206_s26 + $0x3f8] sm:$0xff]  ;;  %v303_v58 = vld [vmem:[%s6206_s26 + $0x400] sm:$0xff] }
  0x2f   : > { %300 = vst [vmem:[%s6211_s27 + $0x1f8] sm:$0xff] %v299_v56  ;;  %v305_v59 = vld [vmem:[%s6206_s26 + $0x408] sm:$0xff]  ;;  %302 = vst [vmem:[%s6211_s27 + $0x200] sm:$0xff] %v301_v57  ;;  %v307_v60 = vld [vmem:[%s6206_s26 + $0x438] sm:$0xff] }
  0x30   : > { %304 = vst [vmem:[%s6211_s27 + $0x208] sm:$0xff] %v303_v58  ;;  %306 = vst [vmem:[%s6211_s27 + $0x210] sm:$0xff] %v305_v59  ;;  %v309_v61 = vld [vmem:[%s6206_s26 + $0x440] sm:$0xff]  ;;  %v311_v62 = vld [vmem:[%s6206_s26 + $0x448] sm:$0xff] }
  0x31   : > { %308 = vst [vmem:[%s6211_s27 + $0x21c] sm:$0xff] %v307_v60  ;;  %310 = vst [vmem:[%s6211_s27 + $0x224] sm:$0xff] %v309_v61  ;;  %v313_v63 = vld [vmem:[%s6206_s26 + $0x450] sm:$0xff]  ;;  %v4791_v0 = vld [vmem:[%s6206_s26 + $0x20] sm:$0xf] }
  0x32   : > { %312 = vst [vmem:[%s6211_s27 + $0x22c] sm:$0xff] %v311_v62  ;;  %v4793_v1 = vld [vmem:[%s6206_s26 + $0x68] sm:$0xf]  ;;  %314 = vst [vmem:[%s6211_s27 + $0x234] sm:$0xff] %v313_v63  ;;  %v4795_v2 = vld [vmem:[%s6206_s26 + $0xb0] sm:$0xf] }
  0x33   : > { %4792 = vst [vmem:[%s6211_s27 + $0x20] sm:$0xf] %v4791_v0  ;;  %4794 = vst [vmem:[%s6211_s27 + $0x44] sm:$0xf] %v4793_v1  ;;  %v4797_v3 = vld [vmem:[%s6206_s26 + $0xf8] sm:$0xf] }
  0x34   : > { %v4799_v4 = vld [vmem:[%s6206_s26 + $0x140] sm:$0xf]  ;;  %4796 = vst [vmem:[%s6211_s27 + $0x68] sm:$0xf] %v4795_v2  ;;  %4798 = vst [vmem:[%s6211_s27 + $0x8c] sm:$0xf] %v4797_v3 }
  0x35   : > { %4800 = vst [vmem:[%s6211_s27 + $0xb0] sm:$0xf] %v4799_v4  ;;  %v4801_v5 = vld [vmem:[%s6206_s26 + $0x188] sm:$0xf]  ;;  %v4803_v6 = vld [vmem:[%s6206_s26 + $0x1d0] sm:$0xf] }
  0x36   : > { %v4805_v7 = vld [vmem:[%s6206_s26 + $0x218] sm:$0xf]  ;;  %4802 = vst [vmem:[%s6211_s27 + $0xd4] sm:$0xf] %v4801_v5  ;;  %4804 = vst [vmem:[%s6211_s27 + $0xf8] sm:$0xf] %v4803_v6 }
  0x37   : > { %4806 = vst [vmem:[%s6211_s27 + $0x11c] sm:$0xf] %v4805_v7  ;;  %v4807_v8 = vld [vmem:[%s6206_s26 + $0x260] sm:$0xf]  ;;  %v4809_v9 = vld [vmem:[%s6206_s26 + $0x2a8] sm:$0xf] }
  0x38   : > { %v4811_v10 = vld [vmem:[%s6206_s26 + $0x2f0] sm:$0xf]  ;;  %4808 = vst [vmem:[%s6211_s27 + $0x140] sm:$0xf] %v4807_v8  ;;  %4810 = vst [vmem:[%s6211_s27 + $0x164] sm:$0xf] %v4809_v9 }
  0x39   : > { %4812 = vst [vmem:[%s6211_s27 + $0x188] sm:$0xf] %v4811_v10  ;;  %v4813_v11 = vld [vmem:[%s6206_s26 + $0x338] sm:$0xf]  ;;  %v4815_v12 = vld [vmem:[%s6206_s26 + $0x380] sm:$0xf] }
  0x3a   : > { %v4817_v13 = vld [vmem:[%s6206_s26 + $0x3c8] sm:$0xf]  ;;  %4814 = vst [vmem:[%s6211_s27 + $0x1ac] sm:$0xf] %v4813_v11  ;;  %4816 = vst [vmem:[%s6211_s27 + $0x1d0] sm:$0xf] %v4815_v12 }
  0x3b   : > { %4818 = vst [vmem:[%s6211_s27 + $0x1f4] sm:$0xf] %v4817_v13  ;;  %v4819_v14 = vld [vmem:[%s6206_s26 + $0x410] sm:$0xf]  ;;  %v4821_v15 = vld [vmem:[%s6206_s26 + $0x458] sm:$0xf] }
  0x3c   : > { %4820 = vst [vmem:[%s6211_s27 + $0x218] sm:$0xf] %v4819_v14  ;;  %4822 = vst [vmem:[%s6211_s27 + $0x23c] sm:$0xf] %v4821_v15 }
  0x3d PF: > { %p4823_p6 = scmp.ge.s32.totalorder %s6137_s16, 1  ;;  %p373_p7 = scmp.lt.s32.totalorder %s6137_s16, 3 }
  0x3f   : > { %p374_p8 = pnand %p4823_p6, %p373_p7 }
  0x40   : > { %s380_s28 = sand.u32 (!%p374_p8), 1, %s6121_s12   ;;  %s429_s29 = smul.u32 (!%p374_p8), 144, %s6129_s14 }
  0x41   : > { %377 = sbr.rel (%p374_p8) target bundleno = 770 (0x302), region = 50  ;;  %p4826_p10 = scmp.ne.s32.totalorder (!%p374_p8), %s6129_s14, 0 }
  0x42   : > { %s5518_s30 = smul.u32 (!%p374_p8), 576, %s380_s28  ;;  %p431_p9 = scmp.lt.s32.totalorder (!%p374_p8), %s429_s29, 287 }
  0x44   : > { %s6379_s8 = scalar_lea.vmem (!%p374_p8), [#allocation3], %s5518_s30 }
  0x48   : > { %s6949_s29 = smov (!%p431_p9, %s429_s29), 287  ;;  %467 = sbr.rel (%p4826_p10) target bundleno = 106 (0x6a), region = 58 }
  0x49   : > { %s5228_s4 = sshll.u32 %s6949_s29, 4  ;;  %v6139_v16 = vmov (!%p4826_p10), 0.0  }
  0x4a   : > { %s6377_s7 = scalar_lea.vmem %s6939_s1, %s5228_s4  ;;  %468 = vst [vmem:[#allocation2] sm:$0xff] (!%p4826_p10), %v6139_v16  ;;  %469 = vst [vmem:[#allocation2 + $0x8] sm:$0xff] (!%p4826_p10), %v6139_v16 }
  0x4b   : > { %470 = vst [vmem:[#allocation2 + $0x10] sm:$0xff] (!%p4826_p10), %v6139_v16  ;;  %471 = vst [vmem:[#allocation2 + $0x18] sm:$0xff] (!%p4826_p10), %v6139_v16 }
  0x4c   : > { %472 = vst [vmem:[#allocation2 + $0x20] sm:$0xff] (!%p4826_p10), %v6139_v16  ;;  %473 = vst [vmem:[#allocation2 + $0x28] sm:$0xff] (!%p4826_p10), %v6139_v16 }
  0x4d   : > { %474 = vst [vmem:[#allocation2 + $0x30] sm:$0xff] (!%p4826_p10), %v6139_v16  ;;  %475 = vst [vmem:[#allocation2 + $0x38] sm:$0xff] (!%p4826_p10), %v6139_v16 }
  0x4e   : > { %476 = vst [vmem:[#allocation2 + $0x40] sm:$0xff] (!%p4826_p10), %v6139_v16  ;;  %477 = vst [vmem:[#allocation2 + $0x48] sm:$0xff] (!%p4826_p10), %v6139_v16 }
  0x4f   : > { %478 = vst [vmem:[#allocation2 + $0x50] sm:$0xff] %v6139_v16  ;;  %479 = vst [vmem:[#allocation2 + $0x58] sm:$0xff] %v6139_v16 }
  0x50   : > { %480 = vst [vmem:[#allocation2 + $0x60] sm:$0xff] %v6139_v16  ;;  %481 = vst [vmem:[#allocation2 + $0x68] sm:$0xff] %v6139_v16 }
  0x51   : > { %482 = vst [vmem:[#allocation2 + $0x70] sm:$0xff] %v6139_v16  ;;  %483 = vst [vmem:[#allocation2 + $0x78] sm:$0xff] %v6139_v16 }
  0x52   : > { %484 = vst [vmem:[#allocation2 + $0x80] sm:$0xff] %v6139_v16  ;;  %485 = vst [vmem:[#allocation2 + $0x88] sm:$0xff] %v6139_v16 }
  0x53   : > { %486 = vst [vmem:[#allocation2 + $0x90] sm:$0xff] %v6139_v16  ;;  %487 = vst [vmem:[#allocation2 + $0x98] sm:$0xff] %v6139_v16 }
  0x54   : > { %488 = vst [vmem:[#allocation2 + $0xa0] sm:$0xff] %v6139_v16  ;;  %489 = vst [vmem:[#allocation2 + $0xa8] sm:$0xff] %v6139_v16 }
  0x55   : > { %490 = vst [vmem:[#allocation2 + $0xb0] sm:$0xff] %v6139_v16  ;;  %491 = vst [vmem:[#allocation2 + $0xb8] sm:$0xff] %v6139_v16 }
  0x56   : > { %492 = vst [vmem:[#allocation2 + $0xc0] sm:$0xff] %v6139_v16  ;;  %493 = vst [vmem:[#allocation2 + $0xc8] sm:$0xff] %v6139_v16 }
  0x57   : > { %494 = vst [vmem:[#allocation2 + $0xd0] sm:$0xff] %v6139_v16  ;;  %495 = vst [vmem:[#allocation2 + $0xd8] sm:$0xff] %v6139_v16 }
  0x58   : > { %496 = vst [vmem:[#allocation2 + $0xe0] sm:$0xff] %v6139_v16  ;;  %497 = vst [vmem:[#allocation2 + $0xe8] sm:$0xff] %v6139_v16 }
  0x59   : > { %498 = vst [vmem:[#allocation2 + $0xf0] sm:$0xff] %v6139_v16  ;;  %499 = vst [vmem:[#allocation2 + $0xf8] sm:$0xff] %v6139_v16 }
  0x5a   : > { %500 = vst [vmem:[#allocation2 + $0x100] sm:$0xff] %v6139_v16  ;;  %501 = vst [vmem:[#allocation2 + $0x108] sm:$0xff] %v6139_v16 }
  0x5b   : > { %502 = vst [vmem:[#allocation2 + $0x110] sm:$0xff] %v6139_v16  ;;  %503 = vst [vmem:[#allocation2 + $0x118] sm:$0xff] %v6139_v16 }
  0x5c   : > { %504 = vst [vmem:[#allocation2 + $0x120] sm:$0xff] %v6139_v16  ;;  %505 = vst [vmem:[#allocation2 + $0x128] sm:$0xff] %v6139_v16 }
  0x5d   : > { %506 = vst [vmem:[#allocation2 + $0x130] sm:$0xff] %v6139_v16  ;;  %507 = vst [vmem:[#allocation2 + $0x138] sm:$0xff] %v6139_v16 }
  0x5e   : > { %508 = vst [vmem:[#allocation2 + $0x140] sm:$0xff] %v6139_v16  ;;  %509 = vst [vmem:[#allocation2 + $0x148] sm:$0xff] %v6139_v16 }
  0x5f   : > { %510 = vst [vmem:[#allocation2 + $0x150] sm:$0xff] %v6139_v16  ;;  %511 = vst [vmem:[#allocation2 + $0x158] sm:$0xff] %v6139_v16 }
  0x60   : > { %512 = vst [vmem:[#allocation2 + $0x160] sm:$0xff] %v6139_v16  ;;  %513 = vst [vmem:[#allocation2 + $0x168] sm:$0xff] %v6139_v16 }
  0x61   : > { %514 = vst [vmem:[#allocation2 + $0x170] sm:$0xff] %v6139_v16  ;;  %515 = vst [vmem:[#allocation2 + $0x178] sm:$0xff] %v6139_v16 }
  0x62   : > { %516 = vst [vmem:[#allocation2 + $0x180] sm:$0xff] %v6139_v16  ;;  %517 = vst [vmem:[#allocation2 + $0x188] sm:$0xff] %v6139_v16 }
  0x63   : > { %518 = vst [vmem:[#allocation2 + $0x190] sm:$0xff] %v6139_v16  ;;  %519 = vst [vmem:[#allocation2 + $0x198] sm:$0xff] %v6139_v16 }
  0x64   : > { %520 = vst [vmem:[#allocation2 + $0x1a0] sm:$0xff] %v6139_v16  ;;  %521 = vst [vmem:[#allocation2 + $0x1a8] sm:$0xff] %v6139_v16 }
  0x65   : > { %522 = vst [vmem:[#allocation2 + $0x1b0] sm:$0xff] %v6139_v16  ;;  %523 = vst [vmem:[#allocation2 + $0x1b8] sm:$0xff] %v6139_v16 }
  0x66   : > { %524 = vst [vmem:[#allocation2 + $0x1c0] sm:$0xff] %v6139_v16  ;;  %525 = vst [vmem:[#allocation2 + $0x1c8] sm:$0xff] %v6139_v16 }
  0x67   : > { %526 = vst [vmem:[#allocation2 + $0x1d0] sm:$0xff] %v6139_v16  ;;  %527 = vst [vmem:[#allocation2 + $0x1d8] sm:$0xff] %v6139_v16 }
  0x68   : > { %528 = vst [vmem:[#allocation2 + $0x1e0] sm:$0xff] %v6139_v16  ;;  %529 = vst [vmem:[#allocation2 + $0x1e8] sm:$0xff] %v6139_v16 }
  0x69   : > { %530 = vst [vmem:[#allocation2 + $0x1f0] sm:$0xff] %v6139_v16  ;;  %531 = vst [vmem:[#allocation2 + $0x1f8] sm:$0xff] %v6139_v16 }
  0x6a PF: > { %v5563_v17 = vld [vmem:[%s6377_s7 + $0x4] ss:$16 sps:$4 sm:$0xff]   ;;  %v5565_v18 = vld [vmem:[%s6377_s7 + $0xc] ss:$16 sps:$4 sm:$0xff]   ;;  %v5567_v19 = vld [vmem:[%s6377_s7] ss:$16 sps:$4 sm:$0xff]  }
  0x6b   : > { %2772 = vmatprep.subr.bf16.mxu0 %v5563_v17  ;;  %v5568_v20 = vld [vmem:[%s6377_s7 + $0x8] ss:$16 sps:$4 sm:$0xff]   ;;  %3337 = vmatprep.subr.bf16.mxu1 %v5565_v18  ;;  %v5569_v21 = vld [vmem:[%s6377_s7 + $0x24] ss:$16 sps:$4 sm:$0xff]   ;;  %v5571_v22 = vld [vmem:[%s6377_s7 + $0x2c] ss:$16 sps:$4 sm:$0xff]  }
  0x6c   : > { %2773 = vmatpush1.bf16.msra.mxu0 %v5567_v19  ;;  %3338 = vmatpush1.bf16.msra.mxu1 %v5568_v20  ;;  %v5573_v23 = vld [vmem:[%s6377_s7 + $0x20] ss:$16 sps:$4 sm:$0xff]   ;;  %v5574_v24 = vld [vmem:[%s6377_s7 + $0x28] ss:$16 sps:$4 sm:$0xff]   ;;  %v5575_v25 = vld [vmem:[%s6377_s7 + $0x44] ss:$16 sps:$4 sm:$0xff]  }
  0x6d   : > { %2774 = vmatprep.subr.bf16.mxu0 %v5569_v21  ;;  %3339 = vmatprep.subr.bf16.mxu1 %v5571_v22  ;;  %v5577_v26 = vld [vmem:[%s6377_s7 + $0x4c] ss:$16 sps:$4 sm:$0xff]   ;;  %v5579_v27 = vld [vmem:[%s6377_s7 + $0x40] ss:$16 sps:$4 sm:$0xff]   ;;  %v5580_v28 = vld [vmem:[%s6377_s7 + $0x48] ss:$16 sps:$4 sm:$0xff]  }
  0x6e   : > { %v5581_v29 = vld [vmem:[%s6377_s7 + $0x64] ss:$16 sps:$4 sm:$0xff]   ;;  %v5583_v30 = vld [vmem:[%s6377_s7 + $0x6c] ss:$16 sps:$4 sm:$0xff]   ;;  %v5585_v31 = vld [vmem:[%s6377_s7 + $0x60] ss:$16 sps:$4 sm:$0xff]  }
  0x6f   : > { %v5586_v32 = vld [vmem:[%s6377_s7 + $0x68] ss:$16 sps:$4 sm:$0xff]   ;;  %v5587_v33 = vld [vmem:[%s6377_s7 + $0x84] ss:$16 sps:$4 sm:$0xff]   ;;  %v5589_v34 = vld [vmem:[%s6377_s7 + $0x8c] ss:$16 sps:$4 sm:$0xff]  }
  0x70   : > { %2775 = vmatpush1.bf16.msra.mxu0 %v5573_v23  ;;  %3340 = vmatpush1.bf16.msra.mxu1 %v5574_v24  ;;  %v5591_v35 = vld [vmem:[%s6377_s7 + $0x80] ss:$16 sps:$4 sm:$0xff]   ;;  %v5592_v36 = vld [vmem:[%s6377_s7 + $0x88] ss:$16 sps:$4 sm:$0xff]   ;;  %v5593_v37 = vld [vmem:[%s6377_s7 + $0xa4] ss:$16 sps:$4 sm:$0xff]  }
  0x71   : > { %2776 = vmatprep.subr.bf16.mxu0 %v5575_v25  ;;  %3341 = vmatprep.subr.bf16.mxu1 %v5577_v26  ;;  %v5595_v38 = vld [vmem:[%s6377_s7 + $0xac] ss:$16 sps:$4 sm:$0xff]   ;;  %v5597_v39 = vld [vmem:[%s6377_s7 + $0xa0] ss:$16 sps:$4 sm:$0xff]   ;;  %v5598_v40 = vld [vmem:[%s6377_s7 + $0xa8] ss:$16 sps:$4 sm:$0xff]  }
  0x72   : > { %v5599_v41 = vld [vmem:[%s6377_s7 + $0xc4] ss:$16 sps:$4 sm:$0xff]   ;;  %v5601_v42 = vld [vmem:[%s6377_s7 + $0xcc] ss:$16 sps:$4 sm:$0xff]   ;;  %v5603_v43 = vld [vmem:[%s6377_s7 + $0xc0] ss:$16 sps:$4 sm:$0xff]  }
  0x73   : > { %v5604_v44 = vld [vmem:[%s6377_s7 + $0xc8] ss:$16 sps:$4 sm:$0xff]   ;;  %v5605_v45 = vld [vmem:[%s6377_s7 + $0xe4] ss:$16 sps:$4 sm:$0xff]   ;;  %v5607_v46 = vld [vmem:[%s6377_s7 + $0xec] ss:$16 sps:$4 sm:$0xff]  }
  0x74   : > { %2777 = vmatpush1.bf16.msra.mxu0 %v5579_v27  ;;  %3342 = vmatpush1.bf16.msra.mxu1 %v5580_v28  ;;  %v5609_v47 = vld [vmem:[%s6377_s7 + $0xe0] ss:$16 sps:$4 sm:$0xff]   ;;  %v5610_v48 = vld [vmem:[%s6377_s7 + $0xe8] ss:$16 sps:$4 sm:$0xff]   ;;  %v5611_v49 = vld [vmem:[%s6377_s7 + $0x104] ss:$16 sps:$4 sm:$0xff]  }
  0x75   : > { %2778 = vmatprep.subr.bf16.mxu0 %v5581_v29  ;;  %3343 = vmatprep.subr.bf16.mxu1 %v5583_v30  ;;  %v5613_v50 = vld [vmem:[%s6377_s7 + $0x10c] ss:$16 sps:$4 sm:$0xff]   ;;  %v5615_v51 = vld [vmem:[%s6377_s7 + $0x100] ss:$16 sps:$4 sm:$0xff]   ;;  %v5616_v52 = vld [vmem:[%s6377_s7 + $0x108] ss:$16 sps:$4 sm:$0xff]  }
  0x76   : > { %v5617_v53 = vld [vmem:[%s6377_s7 + $0x124] ss:$16 sps:$4 sm:$0xff]   ;;  %v5619_v54 = vld [vmem:[%s6377_s7 + $0x12c] ss:$16 sps:$4 sm:$0xff]   ;;  %v5621_v55 = vld [vmem:[%s6377_s7 + $0x120] ss:$16 sps:$4 sm:$0xff]  }
  0x77   : > { %v5622_v56 = vld [vmem:[%s6377_s7 + $0x128] ss:$16 sps:$4 sm:$0xff]   ;;  %v5623_v57 = vld [vmem:[%s6377_s7 + $0x144] ss:$16 sps:$4 sm:$0xff]   ;;  %v5625_v58 = vld [vmem:[%s6377_s7 + $0x14c] ss:$16 sps:$4 sm:$0xff]  }
  0x78   : > { %2779 = vmatpush1.bf16.msra.mxu0 %v5585_v31  ;;  %3344 = vmatpush1.bf16.msra.mxu1 %v5586_v32  ;;  %v5627_v59 = vld [vmem:[%s6377_s7 + $0x140] ss:$16 sps:$4 sm:$0xff]   ;;  %v5628_v60 = vld [vmem:[%s6377_s7 + $0x148] ss:$16 sps:$4 sm:$0xff]   ;;  %v5629_v61 = vld [vmem:[%s6377_s7 + $0x164] ss:$16 sps:$4 sm:$0xff]  }
  0x79   : > { %2780 = vmatprep.subr.bf16.mxu0 %v5587_v33  ;;  %3345 = vmatprep.subr.bf16.mxu1 %v5589_v34  ;;  %v5631_v62 = vld [vmem:[%s6377_s7 + $0x16c] ss:$16 sps:$4 sm:$0xff]   ;;  %v5633_v63 = vld [vmem:[%s6377_s7 + $0x160] ss:$16 sps:$4 sm:$0xff]   ;;  %v5634_v0 = vld [vmem:[%s6377_s7 + $0x168] ss:$16 sps:$4 sm:$0xff]  }
  0x7a   : > { %v5661_v1 = vld [vmem:[%s6379_s8 + $0x4] ss:$36 sps:$4 sm:$0xff]   ;;  %v5637_v3 = vld [vmem:[%s6377_s7 + $0x18c] ss:$16 sps:$4 sm:$0xff]   ;;  %v5639_v4 = vld [vmem:[%s6377_s7 + $0x180] ss:$16 sps:$4 sm:$0xff]  }
  0x7b   : > { %v5635_v2 = vld [vmem:[%s6377_s7 + $0x184] ss:$16 sps:$4 sm:$0xff]   ;;  %2804 = vmatprep.mubr.bf16.mxu0 %v5661_v1  ;;  %3369 = vmatprep.mubr.bf16.mxu1 %v5661_v1  ;;  %v5640_v5 = vld [vmem:[%s6377_s7 + $0x188] ss:$16 sps:$4 sm:$0xff]   ;;  %v5643_v7 = vld [vmem:[%s6377_s7 + $0x1ac] ss:$16 sps:$4 sm:$0xff]  }
  0x7c   : > { %2781 = vmatpush1.bf16.msra.mxu0 %v5591_v35  ;;  %3346 = vmatpush1.bf16.msra.mxu1 %v5592_v36  ;;  %v5641_v6 = vld [vmem:[%s6377_s7 + $0x1a4] ss:$16 sps:$4 sm:$0xff]   ;;  %v5645_v8 = vld [vmem:[%s6377_s7 + $0x1a0] ss:$16 sps:$4 sm:$0xff]   ;;  %v5646_v9 = vld [vmem:[%s6377_s7 + $0x1a8] ss:$16 sps:$4 sm:$0xff]  }
  0x7d   : > { %2782 = vmatprep.subr.bf16.mxu0 %v5593_v37  ;;  %3347 = vmatprep.subr.bf16.mxu1 %v5595_v38  ;;  %v5647_v10 = vld [vmem:[%s6377_s7 + $0x1c4] ss:$16 sps:$4 sm:$0xff]   ;;  %v5649_v11 = vld [vmem:[%s6377_s7 + $0x1cc] ss:$16 sps:$4 sm:$0xff]   ;;  %v5651_v12 = vld [vmem:[%s6377_s7 + $0x1c0] ss:$16 sps:$4 sm:$0xff]  }
  0x7e   : > { %v5652_v13 = vld [vmem:[%s6377_s7 + $0x1c8] ss:$16 sps:$4 sm:$0xff]   ;;  %v5653_v14 = vld [vmem:[%s6377_s7 + $0x1e4] ss:$16 sps:$4 sm:$0xff]   ;;  %v5655_v15 = vld [vmem:[%s6377_s7 + $0x1ec] ss:$16 sps:$4 sm:$0xff]  }
  0x7f   : > { %v5657_v16 = vld [vmem:[%s6377_s7 + $0x1e0] ss:$16 sps:$4 sm:$0xff]   ;;  %v5658_v17 = vld [vmem:[%s6377_s7 + $0x1e8] ss:$16 sps:$4 sm:$0xff]   ;;  %v5664_v18 = vld [vmem:[%s6377_s7 + $0x204] ss:$16 sps:$4 sm:$0xff]  }
  0x80   : > { %2783 = vmatpush1.bf16.msra.mxu0 %v5597_v39  ;;  %3348 = vmatpush1.bf16.msra.mxu1 %v5598_v40  ;;  %v5667_v19 = vld [vmem:[%s6377_s7 + $0x20c] ss:$16 sps:$4 sm:$0xff]   ;;  %v5659_v20 = vld [vmem:[%s6379_s8] ss:$36 sps:$4 sm:$0xff]   ;;  %v5665_v22 = vld [vmem:[%s6377_s7 + $0x208] ss:$16 sps:$4 sm:$0xff]  }
  0x81   : > { %2784 = vmatprep.subr.bf16.mxu0 %v5599_v41  ;;  %3349 = vmatprep.subr.bf16.mxu1 %v5601_v42  ;;  %v5662_v21 = vld [vmem:[%s6377_s7 + $0x200] ss:$16 sps:$4 sm:$0xff]   ;;  %v5670_v23 = vld [vmem:[%s6377_s7 + $0x224] ss:$16 sps:$4 sm:$0xff]   ;;  %v5673_v24 = vld [vmem:[%s6377_s7 + $0x22c] ss:$16 sps:$4 sm:$0xff]  }
  0x82   : > { %v5674_v25 = vld [vmem:[%s6379_s8 + $0x4c] ss:$36 sps:$4 sm:$0xff]   ;;  %v5671_v27 = vld [vmem:[%s6377_s7 + $0x228] ss:$16 sps:$4 sm:$0xff]   ;;  %v5679_v28 = vld [vmem:[%s6377_s7 + $0x244] ss:$16 sps:$4 sm:$0xff]  }
  0x83   : > { %v5668_v26 = vld [vmem:[%s6377_s7 + $0x220] ss:$16 sps:$4 sm:$0xff]   ;;  %v5682_v29 = vld [vmem:[%s6377_s7 + $0x24c] ss:$16 sps:$4 sm:$0xff]   ;;  %v5680_v32 = vld [vmem:[%s6377_s7 + $0x248] ss:$16 sps:$4 sm:$0xff]  }
  0x84   : > { %2785 = vmatpush1.bf16.msra.mxu0 %v5603_v43  ;;  %3350 = vmatpush1.bf16.msra.mxu1 %v5604_v44  ;;  %v5676_v30 = vld [vmem:[%s6379_s8 + $0x48] ss:$36 sps:$4 sm:$0xff]   ;;  %v5677_v31 = vld [vmem:[%s6377_s7 + $0x240] ss:$16 sps:$4 sm:$0xff]   ;;  %v5685_v33 = vld [vmem:[%s6377_s7 + $0x264] ss:$16 sps:$4 sm:$0xff]  }
  0x85   : > { %2786 = vmatprep.subr.bf16.mxu0 %v5605_v45  ;;  %3351 = vmatprep.subr.bf16.mxu1 %v5607_v46  ;;  %v5688_v34 = vld [vmem:[%s6377_s7 + $0x26c] ss:$16 sps:$4 sm:$0xff]   ;;  %v5689_v35 = vld [vmem:[%s6379_s8 + $0x94] ss:$36 sps:$4 sm:$0xff]   ;;  %v5683_v36 = vld [vmem:[%s6377_s7 + $0x260] ss:$16 sps:$4 sm:$0xff]  }
  0x86   : > { %v5686_v37 = vld [vmem:[%s6377_s7 + $0x268] ss:$16 sps:$4 sm:$0xff]   ;;  %v5694_v38 = vld [vmem:[%s6377_s7 + $0x284] ss:$16 sps:$4 sm:$0xff]   ;;  %v5697_v39 = vld [vmem:[%s6377_s7 + $0x28c] ss:$16 sps:$4 sm:$0xff]  }
  0x87   : > { %v5691_v40 = vld [vmem:[%s6379_s8 + $0x90] ss:$36 sps:$4 sm:$0xff]   ;;  %v5695_v42 = vld [vmem:[%s6377_s7 + $0x288] ss:$16 sps:$4 sm:$0xff]   ;;  %v5703_v44 = vld [vmem:[%s6377_s7 + $0x2ac] ss:$16 sps:$4 sm:$0xff]  }
  0x88   : > { %2787 = vmatpush1.bf16.msra.mxu0 %v5609_v47  ;;  %3352 = vmatpush1.bf16.msra.mxu1 %v5610_v48  ;;  %v5692_v41 = vld [vmem:[%s6377_s7 + $0x280] ss:$16 sps:$4 sm:$0xff]   ;;  %v5700_v43 = vld [vmem:[%s6377_s7 + $0x2a4] ss:$16 sps:$4 sm:$0xff]   ;;  %v5701_v47 = vld [vmem:[%s6377_s7 + $0x2a8] ss:$16 sps:$4 sm:$0xff]  }
  0x89   : > { %2788 = vmatprep.subr.bf16.mxu0 %v5611_v49  ;;  %3353 = vmatprep.subr.bf16.mxu1 %v5613_v50  ;;  %v5704_v45 = vld [vmem:[%s6379_s8 + $0xdc] ss:$36 sps:$4 sm:$0xff]   ;;  %v5709_v48 = vld [vmem:[%s6377_s7 + $0x2c4] ss:$16 sps:$4 sm:$0xff]   ;;  %v5734_v1 = vld [vmem:[%s6379_s8 + $0x16c] ss:$36 sps:$4 sm:$0xff]  }
  0x8a   : > { %v5698_v46 = vld [vmem:[%s6377_s7 + $0x2a0] ss:$16 sps:$4 sm:$0xff]   ;;  %v5712_v49 = vld [vmem:[%s6377_s7 + $0x2cc] ss:$16 sps:$4 sm:$0xff]   ;;  %p5187_p11 = scmp.ne.s32.totalorder %s6129_s14, 1 }
  0x8b   : > { %v5706_v50 = vld [vmem:[%s6379_s8 + $0xd8] ss:$36 sps:$4 sm:$0xff]  }
  0x8c   : > { %2789 = vmatpush1.bf16.msra.mxu0 %v5615_v51  ;;  %3354 = vmatpush1.bf16.msra.mxu1 %v5616_v52  ;;  %v5707_v51 = vld [vmem:[%s6377_s7 + $0x2c0] ss:$16 sps:$4 sm:$0xff]   ;;  %v5710_v52 = vld [vmem:[%s6377_s7 + $0x2c8] ss:$16 sps:$4 sm:$0xff]  }
  0x8d   : > { %2790 = vmatprep.subr.bf16.mxu0 %v5617_v53  ;;  %3355 = vmatprep.subr.bf16.mxu1 %v5619_v54  ;;  %v5715_v53 = vld [vmem:[%s6377_s7 + $0x2e4] ss:$16 sps:$4 sm:$0xff]   ;;  %v5718_v54 = vld [vmem:[%s6377_s7 + $0x2ec] ss:$16 sps:$4 sm:$0xff]  }
  0x90   : > { %2791 = vmatpush1.bf16.msra.mxu0 %v5621_v55  ;;  %3356 = vmatpush1.bf16.msra.mxu1 %v5622_v56  ;;  %v5719_v55 = vld [vmem:[%s6379_s8 + $0x124] ss:$36 sps:$4 sm:$0xff]   ;;  %v5713_v56 = vld [vmem:[%s6377_s7 + $0x2e0] ss:$16 sps:$4 sm:$0xff]  }
  0x91   : > { %2792 = vmatprep.subr.bf16.mxu0 %v5623_v57  ;;  %3357 = vmatprep.subr.bf16.mxu1 %v5625_v58  ;;  %v5716_v57 = vld [vmem:[%s6377_s7 + $0x2e8] ss:$16 sps:$4 sm:$0xff]   ;;  %v5724_v58 = vld [vmem:[%s6377_s7 + $0x304] ss:$16 sps:$4 sm:$0xff]  }
  0x94   : > { %2793 = vmatpush1.bf16.msra.mxu0 %v5627_v59  ;;  %3358 = vmatpush1.bf16.msra.mxu1 %v5628_v60  ;;  %v5727_v59 = vld [vmem:[%s6377_s7 + $0x30c] ss:$16 sps:$4 sm:$0xff]   ;;  %v5721_v60 = vld [vmem:[%s6379_s8 + $0x120] ss:$36 sps:$4 sm:$0xff]  }
  0x95   : > { %2794 = vmatprep.subr.bf16.mxu0 %v5629_v61  ;;  %3359 = vmatprep.subr.bf16.mxu1 %v5631_v62  ;;  %v5722_v61 = vld [vmem:[%s6377_s7 + $0x300] ss:$16 sps:$4 sm:$0xff]   ;;  %v5725_v62 = vld [vmem:[%s6377_s7 + $0x308] ss:$16 sps:$4 sm:$0xff]  }
  0x98   : > { %2795 = vmatpush1.bf16.msra.mxu0 %v5633_v63  ;;  %3360 = vmatpush1.bf16.msra.mxu1 %v5634_v0  ;;  %v5730_v63 = vld [vmem:[%s6377_s7 + $0x324] ss:$16 sps:$4 sm:$0xff]   ;;  %v5733_v0 = vld [vmem:[%s6377_s7 + $0x32c] ss:$16 sps:$4 sm:$0xff]  }
  0x99   : > { %2796 = vmatprep.subr.bf16.mxu0 %v5635_v2  ;;  %3361 = vmatprep.subr.bf16.mxu1 %v5637_v3  ;;  %v5728_v2 = vld [vmem:[%s6377_s7 + $0x320] ss:$16 sps:$4 sm:$0xff]   ;;  %v5731_v3 = vld [vmem:[%s6377_s7 + $0x328] ss:$16 sps:$4 sm:$0xff]  }
  0x9c   : > { %2797 = vmatpush1.bf16.msra.mxu0 %v5639_v4  ;;  %3362 = vmatpush1.bf16.msra.mxu1 %v5640_v5  ;;  %v5739_v4 = vld [vmem:[%s6377_s7 + $0x344] ss:$16 sps:$4 sm:$0xff]   ;;  %v5742_v5 = vld [vmem:[%s6377_s7 + $0x34c] ss:$16 sps:$4 sm:$0xff]  }
  0x9d   : > { %2798 = vmatprep.subr.bf16.mxu0 %v5641_v6  ;;  %3363 = vmatprep.subr.bf16.mxu1 %v5643_v7  ;;  %v5736_v6 = vld [vmem:[%s6379_s8 + $0x168] ss:$36 sps:$4 sm:$0xff]   ;;  %v5737_v7 = vld [vmem:[%s6377_s7 + $0x340] ss:$16 sps:$4 sm:$0xff]  }
  0xa0   : > { %2799 = vmatpush1.bf16.msra.mxu0 %v5645_v8  ;;  %3364 = vmatpush1.bf16.msra.mxu1 %v5646_v9  ;;  %v5740_v8 = vld [vmem:[%s6377_s7 + $0x348] ss:$16 sps:$4 sm:$0xff]   ;;  %v5745_v9 = vld [vmem:[%s6377_s7 + $0x364] ss:$16 sps:$4 sm:$0xff]  }
  0xa1   : > { %2800 = vmatprep.subr.bf16.mxu0 %v5647_v10  ;;  %3365 = vmatprep.subr.bf16.mxu1 %v5649_v11  ;;  %v5748_v10 = vld [vmem:[%s6377_s7 + $0x36c] ss:$16 sps:$4 sm:$0xff]   ;;  %v5749_v11 = vld [vmem:[%s6379_s8 + $0x1b4] ss:$36 sps:$4 sm:$0xff]  }
  0xa4   : > { %2801 = vmatpush1.bf16.msra.mxu0 %v5651_v12  ;;  %3366 = vmatpush1.bf16.msra.mxu1 %v5652_v13  ;;  %v5743_v12 = vld [vmem:[%s6377_s7 + $0x360] ss:$16 sps:$4 sm:$0xff]   ;;  %v5746_v13 = vld [vmem:[%s6377_s7 + $0x368] ss:$16 sps:$4 sm:$0xff]  }
  0xa5   : > { %2802 = vmatprep.subr.bf16.mxu0 %v5653_v14  ;;  %3367 = vmatprep.subr.bf16.mxu1 %v5655_v15  ;;  %v5754_v14 = vld [vmem:[%s6377_s7 + $0x384] ss:$16 sps:$4 sm:$0xff]   ;;  %v5757_v15 = vld [vmem:[%s6377_s7 + $0x38c] ss:$16 sps:$4 sm:$0xff]  }
  0xa8   : > { %2803 = vmatpush1.bf16.msra.mxu0 %v5657_v16  ;;  %3368 = vmatpush1.bf16.msra.mxu1 %v5658_v17  ;;  %v5751_v16 = vld [vmem:[%s6379_s8 + $0x1b0] ss:$36 sps:$4 sm:$0xff]  }
  0xa9   : > { %2885 = vmatprep.subr.bf16.mxu0 %v5664_v18  ;;  %3450 = vmatprep.subr.bf16.mxu1 %v5667_v19  ;;  %v5752_v17 = vld [vmem:[%s6377_s7 + $0x380] ss:$16 sps:$4 sm:$0xff]   ;;  %v5755_v18 = vld [vmem:[%s6377_s7 + $0x388] ss:$16 sps:$4 sm:$0xff]   ;;  %v5760_v19 = vld [vmem:[%s6377_s7 + $0x3a4] ss:$16 sps:$4 sm:$0xff]  }
  0xab   : > { %2805 = vmatmul.mubr.bf16.vlgmr.msra.gmra.mrb[0].mxu0 %v5659_v20  ;;  %3370 = vmatmul.mubr.bf16.vlgmr.msra.gmra.mrb[0].mxu1 %v5659_v20  ;;  %v5763_v20 = vld [vmem:[%s6377_s7 + $0x3ac] ss:$16 sps:$4 sm:$0xff]  }
  0xac   : > { %2886 = vmatpush1.bf16.msra.mxu0 %v5662_v21  ;;  %3451 = vmatpush1.bf16.msra.mxu1 %v5665_v22  ;;  %v5764_v21 = vld [vmem:[%s6379_s8 + $0x1fc] ss:$36 sps:$4 sm:$0xff]  }
  0xad   : > { %2887 = vmatprep.subr.bf16.mxu0 %v5670_v23  ;;  %3452 = vmatprep.subr.bf16.mxu1 %v5673_v24  ;;  %v5758_v22 = vld [vmem:[%s6377_s7 + $0x3a0] ss:$16 sps:$4 sm:$0xff]   ;;  %v5761_v23 = vld [vmem:[%s6377_s7 + $0x3a8] ss:$16 sps:$4 sm:$0xff]   ;;  %v5769_v24 = vld [vmem:[%s6377_s7 + $0x3c4] ss:$16 sps:$4 sm:$0xff]  }
  0xae   : > { %2814 = vmatprep.mubr.bf16.mxu0 %v5674_v25  ;;  %3379 = vmatprep.mubr.bf16.mxu1 %v5674_v25  ;;  %v5772_v25 = vld [vmem:[%s6377_s7 + $0x3cc] ss:$16 sps:$4 sm:$0xff]  }
  0xb0   : > { %2888 = vmatpush1.bf16.msra.mxu0 %v5668_v26  ;;  %3453 = vmatpush1.bf16.msra.mxu1 %v5671_v27  ;;  %v5766_v26 = vld [vmem:[%s6379_s8 + $0x1f8] ss:$36 sps:$4 sm:$0xff]   ;;  %v5767_v27 = vld [vmem:[%s6377_s7 + $0x3c0] ss:$16 sps:$4 sm:$0xff]  }
  0xb1   : > { %2889 = vmatprep.subr.bf16.mxu0 %v5679_v28  ;;  %3454 = vmatprep.subr.bf16.mxu1 %v5682_v29  ;;  %v5770_v28 = vld [vmem:[%s6377_s7 + $0x3c8] ss:$16 sps:$4 sm:$0xff]   ;;  %v5775_v29 = vld [vmem:[%s6377_s7 + $0x3e4] ss:$16 sps:$4 sm:$0xff]  }
  0xb3   : > { %2815 = vmatmul.mubr.bf16.gmra.mrb[4].mxu0 %v5676_v30  ;;  %3380 = vmatmul.mubr.bf16.gmra.mrb[4].mxu1 %v5676_v30  ;;  %v5778_v30 = vld [vmem:[%s6377_s7 + $0x3ec] ss:$16 sps:$4 sm:$0xff]  }
  0xb4   : > { %2890 = vmatpush1.bf16.msra.mxu0 %v5677_v31  ;;  %3455 = vmatpush1.bf16.msra.mxu1 %v5680_v32  ;;  %v5781_v31 = vld [vmem:[%s6379_s8 + $0xc] ss:$36 sps:$4 sm:$0xff]  }
  0xb5   : > { %2891 = vmatprep.subr.bf16.mxu0 %v5685_v33  ;;  %3456 = vmatprep.subr.bf16.mxu1 %v5688_v34  ;;  %v5773_v32 = vld [vmem:[%s6377_s7 + $0x3e0] ss:$16 sps:$4 sm:$0xff]   ;;  %v5776_v33 = vld [vmem:[%s6377_s7 + $0x3e8] ss:$16 sps:$4 sm:$0xff]   ;;  %v5784_v34 = vld [vmem:[%s6377_s7 + $0x404] ss:$16 sps:$4 sm:$0xff]  }
  0xb6   : > { %2824 = vmatprep.mubr.bf16.mxu0 %v5689_v35  ;;  %3389 = vmatprep.mubr.bf16.mxu1 %v5689_v35  ;;  %v5787_v35 = vld [vmem:[%s6377_s7 + $0x40c] ss:$16 sps:$4 sm:$0xff]  }
  0xb8   : > { %2892 = vmatpush1.bf16.msra.mxu0 %v5683_v36  ;;  %3457 = vmatpush1.bf16.msra.mxu1 %v5686_v37  ;;  %v5779_v36 = vld [vmem:[%s6379_s8 + $0x8] ss:$36 sps:$4 sm:$0xff]   ;;  %v5782_v37 = vld [vmem:[%s6377_s7 + $0x400] ss:$16 sps:$4 sm:$0xff]  }
  0xb9   : > { %2893 = vmatprep.subr.bf16.mxu0 %v5694_v38  ;;  %3458 = vmatprep.subr.bf16.mxu1 %v5697_v39  ;;  %v5785_v38 = vld [vmem:[%s6377_s7 + $0x408] ss:$16 sps:$4 sm:$0xff]   ;;  %v5790_v39 = vld [vmem:[%s6377_s7 + $0x424] ss:$16 sps:$4 sm:$0xff]  }
  0xbb   : > { %2825 = vmatmul.mubr.bf16.gmra.mrb[8].mxu0 %v5691_v40  ;;  %3390 = vmatmul.mubr.bf16.gmra.mrb[8].mxu1 %v5691_v40  ;;  %v5793_v40 = vld [vmem:[%s6377_s7 + $0x42c] ss:$16 sps:$4 sm:$0xff]  }
  0xbc   : > { %2894 = vmatpush1.bf16.msra.mxu0 %v5692_v41  ;;  %3459 = vmatpush1.bf16.msra.mxu1 %v5695_v42  ;;  %v5794_v41 = vld [vmem:[%s6379_s8 + $0x54] ss:$36 sps:$4 sm:$0xff]   ;;  %v5788_v42 = vld [vmem:[%s6377_s7 + $0x420] ss:$16 sps:$4 sm:$0xff]  }
  0xbd   : > { %2895 = vmatprep.subr.bf16.mxu0 %v5700_v43  ;;  %3460 = vmatprep.subr.bf16.mxu1 %v5703_v44  ;;  %v5791_v43 = vld [vmem:[%s6377_s7 + $0x428] ss:$16 sps:$4 sm:$0xff]   ;;  %v5799_v44 = vld [vmem:[%s6377_s7 + $0x444] ss:$16 sps:$4 sm:$0xff]  }
  0xbe   : > { %2834 = vmatprep.mubr.bf16.mxu0 %v5704_v45  ;;  %3399 = vmatprep.mubr.bf16.mxu1 %v5704_v45  ;;  %v5802_v45 = vld [vmem:[%s6377_s7 + $0x44c] ss:$16 sps:$4 sm:$0xff]  }
  0xc0   : > { %2896 = vmatpush1.bf16.msra.mxu0 %v5698_v46  ;;  %3461 = vmatpush1.bf16.msra.mxu1 %v5701_v47  ;;  %v5796_v46 = vld [vmem:[%s6379_s8 + $0x50] ss:$36 sps:$4 sm:$0xff]  }
  0xc1   : > { %2897 = vmatprep.subr.bf16.mxu0 %v5709_v48  ;;  %3462 = vmatprep.subr.bf16.mxu1 %v5712_v49  ;;  %v5797_v47 = vld [vmem:[%s6377_s7 + $0x440] ss:$16 sps:$4 sm:$0xff]   ;;  %v5800_v48 = vld [vmem:[%s6377_s7 + $0x448] ss:$16 sps:$4 sm:$0xff]   ;;  %v5805_v49 = vld [vmem:[%s6377_s7 + $0x464] ss:$16 sps:$4 sm:$0xff]  }
  0xc3   : > { %2835 = vmatmul.mubr.bf16.gmra.mrb[12].mxu0 %v5706_v50  ;;  %3400 = vmatmul.mubr.bf16.gmra.mrb[12].mxu1 %v5706_v50  ;;  %v5808_v50 = vld [vmem:[%s6377_s7 + $0x46c] ss:$16 sps:$4 sm:$0xff]  }
  0xc4   : > { %2898 = vmatpush1.bf16.msra.mxu0 %v5707_v51  ;;  %3463 = vmatpush1.bf16.msra.mxu1 %v5710_v52  ;;  %v5809_v51 = vld [vmem:[%s6379_s8 + $0x9c] ss:$36 sps:$4 sm:$0xff]  }
  0xc5   : > { %2899 = vmatprep.subr.bf16.mxu0 %v5715_v53  ;;  %3464 = vmatprep.subr.bf16.mxu1 %v5718_v54  ;;  %v5803_v52 = vld [vmem:[%s6377_s7 + $0x460] ss:$16 sps:$4 sm:$0xff]   ;;  %v5806_v53 = vld [vmem:[%s6377_s7 + $0x468] ss:$16 sps:$4 sm:$0xff]   ;;  %v5814_v54 = vld [vmem:[%s6377_s7 + $0x484] ss:$16 sps:$4 sm:$0xff]  }
  0xc6   : > { %2844 = vmatprep.mubr.bf16.mxu0 %v5719_v55  ;;  %3409 = vmatprep.mubr.bf16.mxu1 %v5719_v55  ;;  %v5817_v55 = vld [vmem:[%s6377_s7 + $0x48c] ss:$16 sps:$4 sm:$0xff]  }
  0xc8   : > { %2900 = vmatpush1.bf16.msra.mxu0 %v5713_v56  ;;  %3465 = vmatpush1.bf16.msra.mxu1 %v5716_v57  ;;  %v5811_v56 = vld [vmem:[%s6379_s8 + $0x98] ss:$36 sps:$4 sm:$0xff]   ;;  %v5812_v57 = vld [vmem:[%s6377_s7 + $0x480] ss:$16 sps:$4 sm:$0xff]  }
  0xc9   : > { %2901 = vmatprep.subr.bf16.mxu0 %v5724_v58  ;;  %3466 = vmatprep.subr.bf16.mxu1 %v5727_v59  ;;  %v5815_v58 = vld [vmem:[%s6377_s7 + $0x488] ss:$16 sps:$4 sm:$0xff]   ;;  %v5820_v59 = vld [vmem:[%s6377_s7 + $0x4a4] ss:$16 sps:$4 sm:$0xff]  }
  0xcb   : > { %2845 = vmatmul.mubr.bf16.gmra.mrb[16].mxu0 %v5721_v60  ;;  %3410 = vmatmul.mubr.bf16.gmra.mrb[16].mxu1 %v5721_v60  ;;  %v5823_v60 = vld [vmem:[%s6377_s7 + $0x4ac] ss:$16 sps:$4 sm:$0xff]  }
  0xcc   : > { %2902 = vmatpush1.bf16.msra.mxu0 %v5722_v61  ;;  %3467 = vmatpush1.bf16.msra.mxu1 %v5725_v62  ;;  %v5824_v61 = vld [vmem:[%s6379_s8 + $0xe4] ss:$36 sps:$4 sm:$0xff]   ;;  %v5818_v62 = vld [vmem:[%s6377_s7 + $0x4a0] ss:$16 sps:$4 sm:$0xff]  }
  0xcd   : > { %2903 = vmatprep.subr.bf16.mxu0 %v5730_v63  ;;  %3468 = vmatprep.subr.bf16.mxu1 %v5733_v0  ;;  %v5821_v63 = vld [vmem:[%s6377_s7 + $0x4a8] ss:$16 sps:$4 sm:$0xff]   ;;  %v5829_v0 = vld [vmem:[%s6377_s7 + $0x4c4] ss:$16 sps:$4 sm:$0xff]  }
  0xce   : > { %2854 = vmatprep.mubr.bf16.mxu0 %v5734_v1  ;;  %3419 = vmatprep.mubr.bf16.mxu1 %v5734_v1  ;;  %v5832_v1 = vld [vmem:[%s6377_s7 + $0x4cc] ss:$16 sps:$4 sm:$0xff]  }
  0xd0   : > { %2904 = vmatpush1.bf16.msra.mxu0 %v5728_v2  ;;  %3469 = vmatpush1.bf16.msra.mxu1 %v5731_v3  ;;  %v5826_v2 = vld [vmem:[%s6379_s8 + $0xe0] ss:$36 sps:$4 sm:$0xff]  }
  0xd1   : > { %2905 = vmatprep.subr.bf16.mxu0 %v5739_v4  ;;  %3470 = vmatprep.subr.bf16.mxu1 %v5742_v5  ;;  %v5827_v3 = vld [vmem:[%s6377_s7 + $0x4c0] ss:$16 sps:$4 sm:$0xff]   ;;  %v5830_v4 = vld [vmem:[%s6377_s7 + $0x4c8] ss:$16 sps:$4 sm:$0xff]   ;;  %v5835_v5 = vld [vmem:[%s6377_s7 + $0x4e4] ss:$16 sps:$4 sm:$0xff]  }
  0xd3   : > { %2855 = vmatmul.mubr.bf16.gmra.mrb[20].mxu0 %v5736_v6  ;;  %3420 = vmatmul.mubr.bf16.gmra.mrb[20].mxu1 %v5736_v6  ;;  %v5838_v6 = vld [vmem:[%s6377_s7 + $0x4ec] ss:$16 sps:$4 sm:$0xff]  }
  0xd4   : > { %2906 = vmatpush1.bf16.msra.mxu0 %v5737_v7  ;;  %3471 = vmatpush1.bf16.msra.mxu1 %v5740_v8  ;;  %v5839_v7 = vld [vmem:[%s6379_s8 + $0x12c] ss:$36 sps:$4 sm:$0xff]  }
  0xd5   : > { %2907 = vmatprep.subr.bf16.mxu0 %v5745_v9  ;;  %3472 = vmatprep.subr.bf16.mxu1 %v5748_v10  ;;  %v5833_v8 = vld [vmem:[%s6377_s7 + $0x4e0] ss:$16 sps:$4 sm:$0xff]   ;;  %v5836_v9 = vld [vmem:[%s6377_s7 + $0x4e8] ss:$16 sps:$4 sm:$0xff]   ;;  %v5844_v10 = vld [vmem:[%s6377_s7 + $0x504] ss:$16 sps:$4 sm:$0xff]  }
  0xd6   : > { %2864 = vmatprep.mubr.bf16.mxu0 %v5749_v11  ;;  %3429 = vmatprep.mubr.bf16.mxu1 %v5749_v11  ;;  %v5847_v11 = vld [vmem:[%s6377_s7 + $0x50c] ss:$16 sps:$4 sm:$0xff]  }
  0xd8   : > { %2908 = vmatpush1.bf16.msra.mxu0 %v5743_v12  ;;  %3473 = vmatpush1.bf16.msra.mxu1 %v5746_v13  ;;  %v5841_v12 = vld [vmem:[%s6379_s8 + $0x128] ss:$36 sps:$4 sm:$0xff]   ;;  %v5842_v13 = vld [vmem:[%s6377_s7 + $0x500] ss:$16 sps:$4 sm:$0xff]  }
  0xd9   : > { %2909 = vmatprep.subr.bf16.mxu0 %v5754_v14  ;;  %3474 = vmatprep.subr.bf16.mxu1 %v5757_v15  ;;  %v5845_v14 = vld [vmem:[%s6377_s7 + $0x508] ss:$16 sps:$4 sm:$0xff]   ;;  %v5850_v15 = vld [vmem:[%s6377_s7 + $0x524] ss:$16 sps:$4 sm:$0xff]  }
  0xdb   : > { %2865 = vmatmul.mubr.bf16.gmra.mrb[24].mxu0 %v5751_v16  ;;  %3430 = vmatmul.mubr.bf16.gmra.mrb[24].mxu1 %v5751_v16  ;;  %v5853_v16 = vld [vmem:[%s6377_s7 + $0x52c] ss:$16 sps:$4 sm:$0xff]  }
  0xdc   : > { %2910 = vmatpush1.bf16.msra.mxu0 %v5752_v17  ;;  %3475 = vmatpush1.bf16.msra.mxu1 %v5755_v18  ;;  %v5854_v17 = vld [vmem:[%s6379_s8 + $0x174] ss:$36 sps:$4 sm:$0xff]   ;;  %v5848_v18 = vld [vmem:[%s6377_s7 + $0x520] ss:$16 sps:$4 sm:$0xff]  }
  0xdd   : > { %2911 = vmatprep.subr.bf16.mxu0 %v5760_v19  ;;  %3476 = vmatprep.subr.bf16.mxu1 %v5763_v20  ;;  %v5851_v19 = vld [vmem:[%s6377_s7 + $0x528] ss:$16 sps:$4 sm:$0xff]   ;;  %v5859_v20 = vld [vmem:[%s6377_s7 + $0x544] ss:$16 sps:$4 sm:$0xff]  }
  0xde   : > { %2874 = vmatprep.mubr.bf16.mxu0 %v5764_v21  ;;  %3439 = vmatprep.mubr.bf16.mxu1 %v5764_v21  ;;  %v5862_v21 = vld [vmem:[%s6377_s7 + $0x54c] ss:$16 sps:$4 sm:$0xff]  }
  0xe0   : > { %2912 = vmatpush1.bf16.msra.mxu0 %v5758_v22  ;;  %3477 = vmatpush1.bf16.msra.mxu1 %v5761_v23  ;;  %v5856_v22 = vld [vmem:[%s6379_s8 + $0x170] ss:$36 sps:$4 sm:$0xff]  }
  0xe1   : > { %2913 = vmatprep.subr.bf16.mxu0 %v5769_v24  ;;  %3478 = vmatprep.subr.bf16.mxu1 %v5772_v25  ;;  %v5857_v23 = vld [vmem:[%s6377_s7 + $0x540] ss:$16 sps:$4 sm:$0xff]   ;;  %v5860_v24 = vld [vmem:[%s6377_s7 + $0x548] ss:$16 sps:$4 sm:$0xff]   ;;  %v5865_v25 = vld [vmem:[%s6377_s7 + $0x564] ss:$16 sps:$4 sm:$0xff]  }
  0xe3   : > { %2875 = vmatmul.mubr.bf16.gmra.mrb[28].mxu0 %v5766_v26  ;;  %3440 = vmatmul.mubr.bf16.gmra.mrb[28].mxu1 %v5766_v26  ;;  %v5868_v26 = vld [vmem:[%s6377_s7 + $0x56c] ss:$16 sps:$4 sm:$0xff]  }
  0xe4   : > { %2914 = vmatpush1.bf16.msra.mxu0 %v5767_v27  ;;  %3479 = vmatpush1.bf16.msra.mxu1 %v5770_v28  ;;  %v5869_v27 = vld [vmem:[%s6379_s8 + $0x1bc] ss:$36 sps:$4 sm:$0xff]  }
  0xe5   : > { %2915 = vmatprep.subr.bf16.mxu0 %v5775_v29  ;;  %3480 = vmatprep.subr.bf16.mxu1 %v5778_v30  ;;  %v5863_v28 = vld [vmem:[%s6377_s7 + $0x560] ss:$16 sps:$4 sm:$0xff]   ;;  %v5866_v29 = vld [vmem:[%s6377_s7 + $0x568] ss:$16 sps:$4 sm:$0xff]   ;;  %v5874_v30 = vld [vmem:[%s6377_s7 + $0x584] ss:$16 sps:$4 sm:$0xff]  }
  0xe6   : > { %2917 = vmatprep.mubr.bf16.mxu0 %v5781_v31  ;;  %3482 = vmatprep.mubr.bf16.mxu1 %v5781_v31  ;;  %v5877_v31 = vld [vmem:[%s6377_s7 + $0x58c] ss:$16 sps:$4 sm:$0xff]  }
  0xe8   : > { %2916 = vmatpush1.bf16.msra.mxu0 %v5773_v32  ;;  %3481 = vmatpush1.bf16.msra.mxu1 %v5776_v33  ;;  %v5871_v32 = vld [vmem:[%s6379_s8 + $0x1b8] ss:$36 sps:$4 sm:$0xff]   ;;  %v5872_v33 = vld [vmem:[%s6377_s7 + $0x580] ss:$16 sps:$4 sm:$0xff]  }
  0xe9   : > { %2998 = vmatprep.subr.bf16.mxu0 %v5784_v34  ;;  %3563 = vmatprep.subr.bf16.mxu1 %v5787_v35  ;;  %v5875_v34 = vld [vmem:[%s6377_s7 + $0x588] ss:$16 sps:$4 sm:$0xff]   ;;  %v5880_v35 = vld [vmem:[%s6377_s7 + $0x5a4] ss:$16 sps:$4 sm:$0xff]  }
  0xeb   : > { %2918 = vmatmul.mubr.bf16.vlgmr.msra.gmra.mrb[0].mxu0 %v5779_v36  ;;  %3483 = vmatmul.mubr.bf16.vlgmr.msra.gmra.mrb[0].mxu1 %v5779_v36  ;;  %v5883_v36 = vld [vmem:[%s6377_s7 + $0x5ac] ss:$16 sps:$4 sm:$0xff]  }
  0xec   : > { %2999 = vmatpush1.bf16.msra.mxu0 %v5782_v37  ;;  %3564 = vmatpush1.bf16.msra.mxu1 %v5785_v38  ;;  %v5884_v37 = vld [vmem:[%s6379_s8 + $0x204] ss:$36 sps:$4 sm:$0xff]   ;;  %v5878_v38 = vld [vmem:[%s6377_s7 + $0x5a0] ss:$16 sps:$4 sm:$0xff]  }
  0xed   : > { %3000 = vmatprep.subr.bf16.mxu0 %v5790_v39  ;;  %3565 = vmatprep.subr.bf16.mxu1 %v5793_v40  ;;  %v5881_v39 = vld [vmem:[%s6377_s7 + $0x5a8] ss:$16 sps:$4 sm:$0xff]   ;;  %v5889_v40 = vld [vmem:[%s6377_s7 + $0x5c4] ss:$16 sps:$4 sm:$0xff]  }
  0xee   : > { %2927 = vmatprep.mubr.bf16.mxu0 %v5794_v41  ;;  %3492 = vmatprep.mubr.bf16.mxu1 %v5794_v41  ;;  %v5892_v41 = vld [vmem:[%s6377_s7 + $0x5cc] ss:$16 sps:$4 sm:$0xff]  }
  0xf0   : > { %3001 = vmatpush1.bf16.msra.mxu0 %v5788_v42  ;;  %3566 = vmatpush1.bf16.msra.mxu1 %v5791_v43  ;;  %v5886_v42 = vld [vmem:[%s6379_s8 + $0x200] ss:$36 sps:$4 sm:$0xff]  }
  0xf1   : > { %3002 = vmatprep.subr.bf16.mxu0 %v5799_v44  ;;  %3567 = vmatprep.subr.bf16.mxu1 %v5802_v45  ;;  %v5887_v43 = vld [vmem:[%s6377_s7 + $0x5c0] ss:$16 sps:$4 sm:$0xff]   ;;  %v5890_v44 = vld [vmem:[%s6377_s7 + $0x5c8] ss:$16 sps:$4 sm:$0xff]   ;;  %v5895_v45 = vld [vmem:[%s6377_s7 + $0x5e4] ss:$16 sps:$4 sm:$0xff]  }
  0xf3   : > { %2928 = vmatmul.mubr.bf16.gmra.mrb[4].mxu0 %v5796_v46  ;;  %3493 = vmatmul.mubr.bf16.gmra.mrb[4].mxu1 %v5796_v46  ;;  %v5898_v46 = vld [vmem:[%s6377_s7 + $0x5ec] ss:$16 sps:$4 sm:$0xff]  }
  0xf4   : > { %3003 = vmatpush1.bf16.msra.mxu0 %v5797_v47  ;;  %3568 = vmatpush1.bf16.msra.mxu1 %v5800_v48  ;;  %v5901_v47 = vld [vmem:[%s6379_s8 + $0x14] ss:$36 sps:$4 sm:$0xff]   ;;  %v5893_v48 = vld [vmem:[%s6377_s7 + $0x5e0] ss:$16 sps:$4 sm:$0xff]  }
  0xf5   : > { %3004 = vmatprep.subr.bf16.mxu0 %v5805_v49  ;;  %3569 = vmatprep.subr.bf16.mxu1 %v5808_v50  ;;  %v5896_v49 = vld [vmem:[%s6377_s7 + $0x5e8] ss:$16 sps:$4 sm:$0xff]   ;;  %v5904_v50 = vld [vmem:[%s6377_s7 + $0x604] ss:$16 sps:$4 sm:$0xff]  }
  0xf6   : > { %2937 = vmatprep.mubr.bf16.mxu0 %v5809_v51  ;;  %3502 = vmatprep.mubr.bf16.mxu1 %v5809_v51  ;;  %v5907_v51 = vld [vmem:[%s6377_s7 + $0x60c] ss:$16 sps:$4 sm:$0xff]  }
  0xf8   : > { %3005 = vmatpush1.bf16.msra.mxu0 %v5803_v52  ;;  %3570 = vmatpush1.bf16.msra.mxu1 %v5806_v53  ;;  %v5899_v52 = vld [vmem:[%s6379_s8 + $0x10] ss:$36 sps:$4 sm:$0xff]  }
  0xf9   : > { %3006 = vmatprep.subr.bf16.mxu0 %v5814_v54  ;;  %3571 = vmatprep.subr.bf16.mxu1 %v5817_v55  ;;  %v5902_v53 = vld [vmem:[%s6377_s7 + $0x600] ss:$16 sps:$4 sm:$0xff]   ;;  %v5905_v54 = vld [vmem:[%s6377_s7 + $0x608] ss:$16 sps:$4 sm:$0xff]   ;;  %v5910_v55 = vld [vmem:[%s6377_s7 + $0x624] ss:$16 sps:$4 sm:$0xff]  }
  0xfb   : > { %2938 = vmatmul.mubr.bf16.gmra.mrb[8].mxu0 %v5811_v56  ;;  %3503 = vmatmul.mubr.bf16.gmra.mrb[8].mxu1 %v5811_v56  ;;  %v5913_v56 = vld [vmem:[%s6377_s7 + $0x62c] ss:$16 sps:$4 sm:$0xff]  }
  0xfc   : > { %3007 = vmatpush1.bf16.msra.mxu0 %v5812_v57  ;;  %3572 = vmatpush1.bf16.msra.mxu1 %v5815_v58  ;;  %v5914_v57 = vld [vmem:[%s6379_s8 + $0x5c] ss:$36 sps:$4 sm:$0xff]  }
  0xfd   : > { %3008 = vmatprep.subr.bf16.mxu0 %v5820_v59  ;;  %3573 = vmatprep.subr.bf16.mxu1 %v5823_v60  ;;  %v5908_v58 = vld [vmem:[%s6377_s7 + $0x620] ss:$16 sps:$4 sm:$0xff]   ;;  %v5911_v59 = vld [vmem:[%s6377_s7 + $0x628] ss:$16 sps:$4 sm:$0xff]   ;;  %v5919_v60 = vld [vmem:[%s6377_s7 + $0x644] ss:$16 sps:$4 sm:$0xff]  }
  0xfe   : > { %2947 = vmatprep.mubr.bf16.mxu0 %v5824_v61  ;;  %3512 = vmatprep.mubr.bf16.mxu1 %v5824_v61  ;;  %v5922_v61 = vld [vmem:[%s6377_s7 + $0x64c] ss:$16 sps:$4 sm:$0xff]  }
 0x100   : > { %3009 = vmatpush1.bf16.msra.mxu0 %v5818_v62  ;;  %3574 = vmatpush1.bf16.msra.mxu1 %v5821_v63  ;;  %v5916_v62 = vld [vmem:[%s6379_s8 + $0x58] ss:$36 sps:$4 sm:$0xff]   ;;  %v5917_v63 = vld [vmem:[%s6377_s7 + $0x640] ss:$16 sps:$4 sm:$0xff]  }
 0x101   : > { %3010 = vmatprep.subr.bf16.mxu0 %v5829_v0  ;;  %3575 = vmatprep.subr.bf16.mxu1 %v5832_v1  ;;  %v5920_v0 = vld [vmem:[%s6377_s7 + $0x648] ss:$16 sps:$4 sm:$0xff]   ;;  %v5925_v1 = vld [vmem:[%s6377_s7 + $0x664] ss:$16 sps:$4 sm:$0xff]  }
 0x103   : > { %2948 = vmatmul.mubr.bf16.gmra.mrb[12].mxu0 %v5826_v2  ;;  %3513 = vmatmul.mubr.bf16.gmra.mrb[12].mxu1 %v5826_v2  ;;  %v5928_v2 = vld [vmem:[%s6377_s7 + $0x66c] ss:$16 sps:$4 sm:$0xff]  }
 0x104   : > { %3011 = vmatpush1.bf16.msra.mxu0 %v5827_v3  ;;  %3576 = vmatpush1.bf16.msra.mxu1 %v5830_v4  ;;  %v5929_v3 = vld [vmem:[%s6379_s8 + $0xa4] ss:$36 sps:$4 sm:$0xff]   ;;  %v5923_v4 = vld [vmem:[%s6377_s7 + $0x660] ss:$16 sps:$4 sm:$0xff]  }
 0x105   : > { %3012 = vmatprep.subr.bf16.mxu0 %v5835_v5  ;;  %3577 = vmatprep.subr.bf16.mxu1 %v5838_v6  ;;  %v5926_v5 = vld [vmem:[%s6377_s7 + $0x668] ss:$16 sps:$4 sm:$0xff]   ;;  %v5934_v6 = vld [vmem:[%s6377_s7 + $0x684] ss:$16 sps:$4 sm:$0xff]  }
 0x106   : > { %2957 = vmatprep.mubr.bf16.mxu0 %v5839_v7  ;;  %3522 = vmatprep.mubr.bf16.mxu1 %v5839_v7  ;;  %v5937_v7 = vld [vmem:[%s6377_s7 + $0x68c] ss:$16 sps:$4 sm:$0xff]  }
 0x108   : > { %3013 = vmatpush1.bf16.msra.mxu0 %v5833_v8  ;;  %3578 = vmatpush1.bf16.msra.mxu1 %v5836_v9  ;;  %v5931_v8 = vld [vmem:[%s6379_s8 + $0xa0] ss:$36 sps:$4 sm:$0xff]  }
 0x109   : > { %3014 = vmatprep.subr.bf16.mxu0 %v5844_v10  ;;  %3579 = vmatprep.subr.bf16.mxu1 %v5847_v11  ;;  %v5932_v9 = vld [vmem:[%s6377_s7 + $0x680] ss:$16 sps:$4 sm:$0xff]   ;;  %v5935_v10 = vld [vmem:[%s6377_s7 + $0x688] ss:$16 sps:$4 sm:$0xff]   ;;  %v5940_v11 = vld [vmem:[%s6377_s7 + $0x6a4] ss:$16 sps:$4 sm:$0xff]  }
 0x10b   : > { %2958 = vmatmul.mubr.bf16.gmra.mrb[16].mxu0 %v5841_v12  ;;  %3523 = vmatmul.mubr.bf16.gmra.mrb[16].mxu1 %v5841_v12  ;;  %v5943_v12 = vld [vmem:[%s6377_s7 + $0x6ac] ss:$16 sps:$4 sm:$0xff]  }
 0x10c   : > { %3015 = vmatpush1.bf16.msra.mxu0 %v5842_v13  ;;  %3580 = vmatpush1.bf16.msra.mxu1 %v5845_v14  ;;  %v5944_v13 = vld [vmem:[%s6379_s8 + $0xec] ss:$36 sps:$4 sm:$0xff]  }
 0x10d   : > { %3016 = vmatprep.subr.bf16.mxu0 %v5850_v15  ;;  %3581 = vmatprep.subr.bf16.mxu1 %v5853_v16  ;;  %v5938_v14 = vld [vmem:[%s6377_s7 + $0x6a0] ss:$16 sps:$4 sm:$0xff]   ;;  %v5941_v15 = vld [vmem:[%s6377_s7 + $0x6a8] ss:$16 sps:$4 sm:$0xff]   ;;  %v5949_v16 = vld [vmem:[%s6377_s7 + $0x6c4] ss:$16 sps:$4 sm:$0xff]  }
 0x10e   : > { %2967 = vmatprep.mubr.bf16.mxu0 %v5854_v17  ;;  %3532 = vmatprep.mubr.bf16.mxu1 %v5854_v17  ;;  %v5952_v17 = vld [vmem:[%s6377_s7 + $0x6cc] ss:$16 sps:$4 sm:$0xff]  }
 0x110   : > { %3017 = vmatpush1.bf16.msra.mxu0 %v5848_v18  ;;  %3582 = vmatpush1.bf16.msra.mxu1 %v5851_v19  ;;  %v5946_v18 = vld [vmem:[%s6379_s8 + $0xe8] ss:$36 sps:$4 sm:$0xff]   ;;  %v5947_v19 = vld [vmem:[%s6377_s7 + $0x6c0] ss:$16 sps:$4 sm:$0xff]  }
 0x111   : > { %3018 = vmatprep.subr.bf16.mxu0 %v5859_v20  ;;  %3583 = vmatprep.subr.bf16.mxu1 %v5862_v21  ;;  %v5950_v20 = vld [vmem:[%s6377_s7 + $0x6c8] ss:$16 sps:$4 sm:$0xff]   ;;  %v5955_v21 = vld [vmem:[%s6377_s7 + $0x6e4] ss:$16 sps:$4 sm:$0xff]  }
 0x113   : > { %2968 = vmatmul.mubr.bf16.gmra.mrb[20].mxu0 %v5856_v22  ;;  %3533 = vmatmul.mubr.bf16.gmra.mrb[20].mxu1 %v5856_v22  ;;  %v5958_v22 = vld [vmem:[%s6377_s7 + $0x6ec] ss:$16 sps:$4 sm:$0xff]  }
 0x114   : > { %3019 = vmatpush1.bf16.msra.mxu0 %v5857_v23  ;;  %3584 = vmatpush1.bf16.msra.mxu1 %v5860_v24  ;;  %v5959_v23 = vld [vmem:[%s6379_s8 + $0x134] ss:$36 sps:$4 sm:$0xff]   ;;  %v5953_v24 = vld [vmem:[%s6377_s7 + $0x6e0] ss:$16 sps:$4 sm:$0xff]  }
 0x115   : > { %3020 = vmatprep.subr.bf16.mxu0 %v5865_v25  ;;  %3585 = vmatprep.subr.bf16.mxu1 %v5868_v26  ;;  %v5956_v25 = vld [vmem:[%s6377_s7 + $0x6e8] ss:$16 sps:$4 sm:$0xff]   ;;  %v5964_v26 = vld [vmem:[%s6377_s7 + $0x704] ss:$16 sps:$4 sm:$0xff]  }
 0x116   : > { %2977 = vmatprep.mubr.bf16.mxu0 %v5869_v27  ;;  %3542 = vmatprep.mubr.bf16.mxu1 %v5869_v27  ;;  %v5967_v27 = vld [vmem:[%s6377_s7 + $0x70c] ss:$16 sps:$4 sm:$0xff]  }
 0x118   : > { %3021 = vmatpush1.bf16.msra.mxu0 %v5863_v28  ;;  %3586 = vmatpush1.bf16.msra.mxu1 %v5866_v29  ;;  %v5961_v28 = vld [vmem:[%s6379_s8 + $0x130] ss:$36 sps:$4 sm:$0xff]  }
 0x119   : > { %3022 = vmatprep.subr.bf16.mxu0 %v5874_v30  ;;  %3587 = vmatprep.subr.bf16.mxu1 %v5877_v31  ;;  %v5962_v29 = vld [vmem:[%s6377_s7 + $0x700] ss:$16 sps:$4 sm:$0xff]   ;;  %v5965_v30 = vld [vmem:[%s6377_s7 + $0x708] ss:$16 sps:$4 sm:$0xff]   ;;  %v5970_v31 = vld [vmem:[%s6377_s7 + $0x724] ss:$16 sps:$4 sm:$0xff]  }
 0x11b   : > { %2978 = vmatmul.mubr.bf16.gmra.mrb[24].mxu0 %v5871_v32  ;;  %3543 = vmatmul.mubr.bf16.gmra.mrb[24].mxu1 %v5871_v32  ;;  %v5973_v32 = vld [vmem:[%s6377_s7 + $0x72c] ss:$16 sps:$4 sm:$0xff]  }
 0x11c   : > { %3023 = vmatpush1.bf16.msra.mxu0 %v5872_v33  ;;  %3588 = vmatpush1.bf16.msra.mxu1 %v5875_v34  ;;  %v5974_v33 = vld [vmem:[%s6379_s8 + $0x17c] ss:$36 sps:$4 sm:$0xff]  }
 0x11d   : > { %3024 = vmatprep.subr.bf16.mxu0 %v5880_v35  ;;  %3589 = vmatprep.subr.bf16.mxu1 %v5883_v36  ;;  %v5968_v34 = vld [vmem:[%s6377_s7 + $0x720] ss:$16 sps:$4 sm:$0xff]   ;;  %v5971_v35 = vld [vmem:[%s6377_s7 + $0x728] ss:$16 sps:$4 sm:$0xff]   ;;  %v5979_v36 = vld [vmem:[%s6377_s7 + $0x744] ss:$16 sps:$4 sm:$0xff]  }
 0x11e   : > { %2987 = vmatprep.mubr.bf16.mxu0 %v5884_v37  ;;  %3552 = vmatprep.mubr.bf16.mxu1 %v5884_v37  ;;  %v5982_v37 = vld [vmem:[%s6377_s7 + $0x74c] ss:$16 sps:$4 sm:$0xff]  }
 0x120   : > { %3025 = vmatpush1.bf16.msra.mxu0 %v5878_v38  ;;  %3590 = vmatpush1.bf16.msra.mxu1 %v5881_v39  ;;  %v5976_v38 = vld [vmem:[%s6379_s8 + $0x178] ss:$36 sps:$4 sm:$0xff]   ;;  %v5977_v39 = vld [vmem:[%s6377_s7 + $0x740] ss:$16 sps:$4 sm:$0xff]  }
 0x121   : > { %3026 = vmatprep.subr.bf16.mxu0 %v5889_v40  ;;  %3591 = vmatprep.subr.bf16.mxu1 %v5892_v41  ;;  %v5980_v40 = vld [vmem:[%s6377_s7 + $0x748] ss:$16 sps:$4 sm:$0xff]   ;;  %v5985_v41 = vld [vmem:[%s6377_s7 + $0x764] ss:$16 sps:$4 sm:$0xff]  }
 0x123   : > { %2988 = vmatmul.mubr.bf16.gmra.mrb[28].mxu0 %v5886_v42  ;;  %3553 = vmatmul.mubr.bf16.gmra.mrb[28].mxu1 %v5886_v42  ;;  %v5988_v42 = vld [vmem:[%s6377_s7 + $0x76c] ss:$16 sps:$4 sm:$0xff]  }
 0x124   : > { %3027 = vmatpush1.bf16.msra.mxu0 %v5887_v43  ;;  %3592 = vmatpush1.bf16.msra.mxu1 %v5890_v44  ;;  %v5983_v43 = vld [vmem:[%s6377_s7 + $0x760] ss:$16 sps:$4 sm:$0xff]   ;;  %v5989_v44 = vld [vmem:[%s6379_s8 + $0x1c4] ss:$36 sps:$4 sm:$0xff]  }
 0x125   : > { %3028 = vmatprep.subr.bf16.mxu0 %v5895_v45  ;;  %3593 = vmatprep.subr.bf16.mxu1 %v5898_v46  ;;  %v5986_v45 = vld [vmem:[%s6377_s7 + $0x768] ss:$16 sps:$4 sm:$0xff]   ;;  %v5994_v46 = vld [vmem:[%s6377_s7 + $0x784] ss:$16 sps:$4 sm:$0xff]  }
 0x126   : > { %3030 = vmatprep.mubr.bf16.mxu0 %v5901_v47  ;;  %3595 = vmatprep.mubr.bf16.mxu1 %v5901_v47  ;;  %v5991_v47 = vld [vmem:[%s6379_s8 + $0x1c0] ss:$36 sps:$4 sm:$0xff]  }
 0x128   : > { %3029 = vmatpush1.bf16.msra.mxu0 %v5893_v48  ;;  %3594 = vmatpush1.bf16.msra.mxu1 %v5896_v49  ;;  %v5997_v48 = vld [vmem:[%s6377_s7 + $0x78c] ss:$16 sps:$4 sm:$0xff]   ;;  %v5992_v49 = vld [vmem:[%s6377_s7 + $0x780] ss:$16 sps:$4 sm:$0xff]  }
 0x129   : > { %3111 = vmatprep.subr.bf16.mxu0 %v5904_v50  ;;  %3676 = vmatprep.subr.bf16.mxu1 %v5907_v51  ;;  %v5995_v50 = vld [vmem:[%s6377_s7 + $0x788] ss:$16 sps:$4 sm:$0xff]   ;;  %v6000_v51 = vld [vmem:[%s6377_s7 + $0x7a4] ss:$16 sps:$4 sm:$0xff]  }
 0x12b   : > { %3031 = vmatmul.mubr.bf16.vlgmr.msra.gmra.mrb[0].mxu0 %v5899_v52  ;;  %3596 = vmatmul.mubr.bf16.vlgmr.msra.gmra.mrb[0].mxu1 %v5899_v52  ;;  %v6003_v52 = vld [vmem:[%s6377_s7 + $0x7ac] ss:$16 sps:$4 sm:$0xff]  }
 0x12c   : > { %3112 = vmatpush1.bf16.msra.mxu0 %v5902_v53  ;;  %3677 = vmatpush1.bf16.msra.mxu1 %v5905_v54  ;;  %v6004_v53 = vld [vmem:[%s6379_s8 + $0x20c] ss:$36 sps:$4 sm:$0xff]  }
 0x12d   : > { %3113 = vmatprep.subr.bf16.mxu0 %v5910_v55  ;;  %3678 = vmatprep.subr.bf16.mxu1 %v5913_v56  ;;  %v5998_v54 = vld [vmem:[%s6377_s7 + $0x7a0] ss:$16 sps:$4 sm:$0xff]   ;;  %v6001_v55 = vld [vmem:[%s6377_s7 + $0x7a8] ss:$16 sps:$4 sm:$0xff]   ;;  %v6009_v56 = vld [vmem:[%s6377_s7 + $0x7c4] ss:$16 sps:$4 sm:$0xff]  }
 0x12e   : > { %3040 = vmatprep.mubr.bf16.mxu0 %v5914_v57  ;;  %3605 = vmatprep.mubr.bf16.mxu1 %v5914_v57  ;;  %v6012_v57 = vld [vmem:[%s6377_s7 + $0x7cc] ss:$16 sps:$4 sm:$0xff]  }
 0x130   : > { %3114 = vmatpush1.bf16.msra.mxu0 %v5908_v58  ;;  %3679 = vmatpush1.bf16.msra.mxu1 %v5911_v59  ;;  %v6006_v58 = vld [vmem:[%s6379_s8 + $0x208] ss:$36 sps:$4 sm:$0xff]   ;;  %v6007_v59 = vld [vmem:[%s6377_s7 + $0x7c0] ss:$16 sps:$4 sm:$0xff]  }
 0x131   : > { %3115 = vmatprep.subr.bf16.mxu0 %v5919_v60  ;;  %3680 = vmatprep.subr.bf16.mxu1 %v5922_v61  ;;  %v6010_v60 = vld [vmem:[%s6377_s7 + $0x7c8] ss:$16 sps:$4 sm:$0xff]   ;;  %v6015_v61 = vld [vmem:[%s6377_s7 + $0x7e4] ss:$16 sps:$4 sm:$0xff]  }
 0x133   : > { %3041 = vmatmul.mubr.bf16.gmra.mrb[4].mxu0 %v5916_v62  ;;  %3606 = vmatmul.mubr.bf16.gmra.mrb[4].mxu1 %v5916_v62  ;;  %v6018_v62 = vld [vmem:[%s6377_s7 + $0x7ec] ss:$16 sps:$4 sm:$0xff]  }
 0x134   : > { %3116 = vmatpush1.bf16.msra.mxu0 %v5917_v63  ;;  %3681 = vmatpush1.bf16.msra.mxu1 %v5920_v0  ;;  %v6021_v63 = vld [vmem:[%s6379_s8 + $0x1c] ss:$36 sps:$4 sm:$0xff]  }
 0x135   : > { %3117 = vmatprep.subr.bf16.mxu0 %v5925_v1  ;;  %3682 = vmatprep.subr.bf16.mxu1 %v5928_v2  ;;  %v6013_v0 = vld [vmem:[%s6377_s7 + $0x7e0] ss:$16 sps:$4 sm:$0xff]   ;;  %v6016_v1 = vld [vmem:[%s6377_s7 + $0x7e8] ss:$16 sps:$4 sm:$0xff]   ;;  %v6024_v2 = vld [vmem:[%s6377_s7 + $0x804] ss:$16 sps:$4 sm:$0xff]  }
 0x136   : > { %3050 = vmatprep.mubr.bf16.mxu0 %v5929_v3  ;;  %3615 = vmatprep.mubr.bf16.mxu1 %v5929_v3  ;;  %v6027_v3 = vld [vmem:[%s6377_s7 + $0x80c] ss:$16 sps:$4 sm:$0xff]  }
 0x138   : > { %3118 = vmatpush1.bf16.msra.mxu0 %v5923_v4  ;;  %3683 = vmatpush1.bf16.msra.mxu1 %v5926_v5  ;;  %v6019_v4 = vld [vmem:[%s6379_s8 + $0x18] ss:$36 sps:$4 sm:$0xff]   ;;  %v6022_v5 = vld [vmem:[%s6377_s7 + $0x800] ss:$16 sps:$4 sm:$0xff]  }
 0x139   : > { %3119 = vmatprep.subr.bf16.mxu0 %v5934_v6  ;;  %3684 = vmatprep.subr.bf16.mxu1 %v5937_v7  ;;  %v6025_v6 = vld [vmem:[%s6377_s7 + $0x808] ss:$16 sps:$4 sm:$0xff]  }
 0x13a   : > { %v6028_v7 = vld [vmem:[%s6379_s8 + $0x64] ss:$36 sps:$4 sm:$0xff]  }
 0x13b   : > { %3051 = vmatmul.mubr.bf16.gmra.mrb[8].mxu0 %v5931_v8  ;;  %3616 = vmatmul.mubr.bf16.gmra.mrb[8].mxu1 %v5931_v8  ;;  %v6033_v8 = vld [vmem:[%s6377_s7 + $0x824] ss:$16 sps:$4 sm:$0xff]  }
 0x13c   : > { %3120 = vmatpush1.bf16.msra.mxu0 %v5932_v9  ;;  %3685 = vmatpush1.bf16.msra.mxu1 %v5935_v10  ;;  %v6036_v9 = vld [vmem:[%s6377_s7 + $0x82c] ss:$16 sps:$4 sm:$0xff]   ;;  %v6031_v10 = vld [vmem:[%s6377_s7 + $0x820] ss:$16 sps:$4 sm:$0xff]  }
 0x13d   : > { %3121 = vmatprep.subr.bf16.mxu0 %v5940_v11  ;;  %3686 = vmatprep.subr.bf16.mxu1 %v5943_v12  ;;  %v6034_v11 = vld [vmem:[%s6377_s7 + $0x828] ss:$16 sps:$4 sm:$0xff]   ;;  %v6042_v12 = vld [vmem:[%s6377_s7 + $0x844] ss:$16 sps:$4 sm:$0xff]  }
 0x13e   : > { %3060 = vmatprep.mubr.bf16.mxu0 %v5944_v13  ;;  %3625 = vmatprep.mubr.bf16.mxu1 %v5944_v13  ;;  %v6045_v13 = vld [vmem:[%s6377_s7 + $0x84c] ss:$16 sps:$4 sm:$0xff]  }
 0x140   : > { %3122 = vmatpush1.bf16.msra.mxu0 %v5938_v14  ;;  %3687 = vmatpush1.bf16.msra.mxu1 %v5941_v15  ;;  %v6030_v14 = vld [vmem:[%s6379_s8 + $0x60] ss:$36 sps:$4 sm:$0xff]   ;;  %v6037_v15 = vld [vmem:[%s6379_s8 + $0xac] ss:$36 sps:$4 sm:$0xff]  }
 0x141   : > { %3123 = vmatprep.subr.bf16.mxu0 %v5949_v16  ;;  %3688 = vmatprep.subr.bf16.mxu1 %v5952_v17  ;;  %v6040_v16 = vld [vmem:[%s6377_s7 + $0x840] ss:$16 sps:$4 sm:$0xff]   ;;  %v6043_v17 = vld [vmem:[%s6377_s7 + $0x848] ss:$16 sps:$4 sm:$0xff]  }
 0x143   : > { %3061 = vmatmul.mubr.bf16.gmra.mrb[12].mxu0 %v5946_v18  ;;  %3626 = vmatmul.mubr.bf16.gmra.mrb[12].mxu1 %v5946_v18  ;;  %v6051_v18 = vld [vmem:[%s6377_s7 + $0x864] ss:$16 sps:$4 sm:$0xff]  }
 0x144   : > { %3124 = vmatpush1.bf16.msra.mxu0 %v5947_v19  ;;  %3689 = vmatpush1.bf16.msra.mxu1 %v5950_v20  ;;  %v6054_v19 = vld [vmem:[%s6377_s7 + $0x86c] ss:$16 sps:$4 sm:$0xff]   ;;  %v6049_v20 = vld [vmem:[%s6377_s7 + $0x860] ss:$16 sps:$4 sm:$0xff]  }
 0x145   : > { %3125 = vmatprep.subr.bf16.mxu0 %v5955_v21  ;;  %3690 = vmatprep.subr.bf16.mxu1 %v5958_v22  ;;  %v6052_v21 = vld [vmem:[%s6377_s7 + $0x868] ss:$16 sps:$4 sm:$0xff]   ;;  %v6060_v22 = vld [vmem:[%s6377_s7 + $0x884] ss:$16 sps:$4 sm:$0xff]  }
 0x146   : > { %3070 = vmatprep.mubr.bf16.mxu0 %v5959_v23  ;;  %3635 = vmatprep.mubr.bf16.mxu1 %v5959_v23  ;;  %v6063_v23 = vld [vmem:[%s6377_s7 + $0x88c] ss:$16 sps:$4 sm:$0xff]  }
 0x148   : > { %3126 = vmatpush1.bf16.msra.mxu0 %v5953_v24  ;;  %3691 = vmatpush1.bf16.msra.mxu1 %v5956_v25  ;;  %v6039_v24 = vld [vmem:[%s6379_s8 + $0xa8] ss:$36 sps:$4 sm:$0xff]   ;;  %v6046_v25 = vld [vmem:[%s6379_s8 + $0xf4] ss:$36 sps:$4 sm:$0xff]  }
 0x149   : > { %3127 = vmatprep.subr.bf16.mxu0 %v5964_v26  ;;  %3692 = vmatprep.subr.bf16.mxu1 %v5967_v27  ;;  %v6058_v26 = vld [vmem:[%s6377_s7 + $0x880] ss:$16 sps:$4 sm:$0xff]   ;;  %v6061_v27 = vld [vmem:[%s6377_s7 + $0x888] ss:$16 sps:$4 sm:$0xff]  }
 0x14b   : > { %3071 = vmatmul.mubr.bf16.gmra.mrb[16].mxu0 %v5961_v28  ;;  %3636 = vmatmul.mubr.bf16.gmra.mrb[16].mxu1 %v5961_v28  ;;  %v6069_v28 = vld [vmem:[%s6377_s7 + $0x8a4] ss:$16 sps:$4 sm:$0xff]  }
 0x14c   : > { %3128 = vmatpush1.bf16.msra.mxu0 %v5962_v29  ;;  %3693 = vmatpush1.bf16.msra.mxu1 %v5965_v30  ;;  %v6072_v29 = vld [vmem:[%s6377_s7 + $0x8ac] ss:$16 sps:$4 sm:$0xff]   ;;  %v6067_v30 = vld [vmem:[%s6377_s7 + $0x8a0] ss:$16 sps:$4 sm:$0xff]  }
 0x14d   : > { %3129 = vmatprep.subr.bf16.mxu0 %v5970_v31  ;;  %3694 = vmatprep.subr.bf16.mxu1 %v5973_v32  ;;  %v6070_v31 = vld [vmem:[%s6377_s7 + $0x8a8] ss:$16 sps:$4 sm:$0xff]   ;;  %v6078_v32 = vld [vmem:[%s6377_s7 + $0x8c4] ss:$16 sps:$4 sm:$0xff]  }
 0x14e   : > { %3080 = vmatprep.mubr.bf16.mxu0 %v5974_v33  ;;  %3645 = vmatprep.mubr.bf16.mxu1 %v5974_v33  ;;  %v6081_v33 = vld [vmem:[%s6377_s7 + $0x8cc] ss:$16 sps:$4 sm:$0xff]  }
 0x150   : > { %3130 = vmatpush1.bf16.msra.mxu0 %v5968_v34  ;;  %3695 = vmatpush1.bf16.msra.mxu1 %v5971_v35  ;;  %v6048_v34 = vld [vmem:[%s6379_s8 + $0xf0] ss:$36 sps:$4 sm:$0xff]   ;;  %v6055_v35 = vld [vmem:[%s6379_s8 + $0x13c] ss:$36 sps:$4 sm:$0xff]  }
 0x151   : > { %3131 = vmatprep.subr.bf16.mxu0 %v5979_v36  ;;  %3696 = vmatprep.subr.bf16.mxu1 %v5982_v37  ;;  %v6076_v36 = vld [vmem:[%s6377_s7 + $0x8c0] ss:$16 sps:$4 sm:$0xff]   ;;  %v6079_v37 = vld [vmem:[%s6377_s7 + $0x8c8] ss:$16 sps:$4 sm:$0xff]  }
 0x153   : > { %3081 = vmatmul.mubr.bf16.gmra.mrb[20].mxu0 %v5976_v38  ;;  %3646 = vmatmul.mubr.bf16.gmra.mrb[20].mxu1 %v5976_v38  ;;  %v6087_v38 = vld [vmem:[%s6377_s7 + $0x8e4] ss:$16 sps:$4 sm:$0xff]  }
 0x154   : > { %3132 = vmatpush1.bf16.msra.mxu0 %v5977_v39  ;;  %3697 = vmatpush1.bf16.msra.mxu1 %v5980_v40  ;;  %v6090_v39 = vld [vmem:[%s6377_s7 + $0x8ec] ss:$16 sps:$4 sm:$0xff]   ;;  %v6085_v40 = vld [vmem:[%s6377_s7 + $0x8e0] ss:$16 sps:$4 sm:$0xff]  }
 0x155   : > { %3133 = vmatprep.subr.bf16.mxu0 %v5985_v41  ;;  %3698 = vmatprep.subr.bf16.mxu1 %v5988_v42  ;;  %v6088_v41 = vld [vmem:[%s6377_s7 + $0x8e8] ss:$16 sps:$4 sm:$0xff]  }
 0x156   : > { %3090 = vmatprep.mubr.bf16.mxu0 %v5989_v44  ;;  %3655 = vmatprep.mubr.bf16.mxu1 %v5989_v44  ;;  %v6057_v42 = vld [vmem:[%s6379_s8 + $0x138] ss:$36 sps:$4 sm:$0xff]   ;;  %v6066_v44 = vld [vmem:[%s6379_s8 + $0x180] ss:$36 sps:$4 sm:$0xff]  }
 0x158   : > { %3134 = vmatpush1.bf16.msra.mxu0 %v5983_v43  ;;  %3699 = vmatpush1.bf16.msra.mxu1 %v5986_v45  ;;  %v6064_v43 = vld [vmem:[%s6379_s8 + $0x184] ss:$36 sps:$4 sm:$0xff]   ;;  %v6073_v45 = vld [vmem:[%s6379_s8 + $0x1cc] ss:$36 sps:$4 sm:$0xff]  }
 0x159   : > { %3135 = vmatprep.subr.bf16.mxu0 %v5994_v46  ;;  %3700 = vmatprep.subr.bf16.mxu1 %v5997_v48  ;;  %v6075_v46 = vld [vmem:[%s6379_s8 + $0x1c8] ss:$36 sps:$4 sm:$0xff]   ;;  %v6084_v48 = vld [vmem:[%s6379_s8 + $0x210] ss:$36 sps:$4 sm:$0xff]  }
 0x15b   : > { %3091 = vmatmul.mubr.bf16.gmra.mrb[24].mxu0 %v5991_v47  ;;  %3656 = vmatmul.mubr.bf16.gmra.mrb[24].mxu1 %v5991_v47  ;;  %v6082_v47 = vld [vmem:[%s6379_s8 + $0x214] ss:$36 sps:$4 sm:$0xff]  }
 0x15c   : > { %3136 = vmatpush1.bf16.msra.mxu0 %v5992_v49  ;;  %3701 = vmatpush1.bf16.msra.mxu1 %v5995_v50  ;;  %v6140_v49 = vmov 0   ;;  %v6091_v50 = vld [vmem:[%s6379_s8 + $0x20] ss:$36 sps:$4 sm:$0xff]  }
 0x15d   : > { %3137 = vmatprep.subr.bf16.mxu0 %v6000_v51  ;;  %3702 = vmatprep.subr.bf16.mxu1 %v6003_v52  ;;  %v6092_v51 = vld [vmem:[%s6379_s8 + $0x68] ss:$36 sps:$4 sm:$0xff]   ;;  %v6093_v52 = vld [vmem:[%s6379_s8 + $0xb0] ss:$36 sps:$4 sm:$0xff]  }
 0x15e   : > { %3100 = vmatprep.mubr.bf16.mxu0 %v6004_v53  ;;  %3665 = vmatprep.mubr.bf16.mxu1 %v6004_v53  ;;  %v6094_v53 = vld [vmem:[%s6379_s8 + $0xf8] ss:$36 sps:$4 sm:$0xff]  }
 0x160   : > { %3138 = vmatpush1.bf16.msra.mxu0 %v5998_v54  ;;  %3703 = vmatpush1.bf16.msra.mxu1 %v6001_v55  ;;  %v6095_v54 = vld [vmem:[%s6379_s8 + $0x140] ss:$36 sps:$4 sm:$0xff]   ;;  %v6096_v55 = vld [vmem:[%s6379_s8 + $0x188] ss:$36 sps:$4 sm:$0xff]  }
 0x161   : > { %3139 = vmatprep.subr.bf16.mxu0 %v6009_v56  ;;  %3704 = vmatprep.subr.bf16.mxu1 %v6012_v57  ;;  %v6097_v56 = vld [vmem:[%s6379_s8 + $0x1d0] ss:$36 sps:$4 sm:$0xff]   ;;  %v6098_v57 = vld [vmem:[%s6379_s8 + $0x218] ss:$36 sps:$4 sm:$0xff]  }
 0x163   : > { %3101 = vmatmul.mubr.bf16.gmra.mrb[28].mxu0 %v6006_v58  ;;  %3666 = vmatmul.mubr.bf16.gmra.mrb[28].mxu1 %v6006_v58  ;;  %v532_v58 = vld [vmem:[#allocation2] sm:$0xff] }
 0x164   : > { %3140 = vmatpush1.bf16.msra.mxu0 %v6007_v59  ;;  %3705 = vmatpush1.bf16.msra.mxu1 %v6010_v60  ;;  %v534_v59 = vld [vmem:[#allocation2 + $0x10] sm:$0xff]  ;;  %v533_v60 = vld [vmem:[#allocation2 + $0x8] sm:$0xff] }
 0x165   : > { %3141 = vmatprep.subr.bf16.mxu0 %v6015_v61  ;;  %3706 = vmatprep.subr.bf16.mxu1 %v6018_v62  ;;  %v535_v61 = vld [vmem:[#allocation2 + $0x18] sm:$0xff] }
 0x166   : > { %3143 = vmatprep.mubr.bf16.mxu0 %v6021_v63  ;;  %3708 = vmatprep.mubr.bf16.mxu1 %v6021_v63 }
 0x168   : > { %3142 = vmatpush1.bf16.msra.mxu0 %v6013_v0  ;;  %3707 = vmatpush1.bf16.msra.mxu1 %v6016_v1  ;;  %v536_v0 = vld [vmem:[#allocation2 + $0x20] sm:$0xff]  ;;  %v538_v1 = vld [vmem:[#allocation2 + $0x30] sm:$0xff] }
 0x169   : > { %3224 = vmatprep.subr.bf16.mxu0 %v6024_v2  ;;  %3789 = vmatprep.subr.bf16.mxu1 %v6027_v3 }
 0x16b   : > { %3144 = vmatmul.mubr.bf16.vlgmr.msra.gmra.mrb[0].mxu0 %v6019_v4  ;;  %3709 = vmatmul.mubr.bf16.vlgmr.msra.gmra.mrb[0].mxu1 %v6019_v4 }
 0x16c   : > { %3225 = vmatpush1.bf16.msra.mxu0 %v6022_v5  ;;  %3790 = vmatpush1.bf16.msra.mxu1 %v6025_v6  ;;  %v537_v6 = vld [vmem:[#allocation2 + $0x28] sm:$0xff] }
 0x16d   : > { %3153 = vmatprep.mubr.bf16.mxu0 %v6028_v7  ;;  %3718 = vmatprep.mubr.bf16.mxu1 %v6028_v7  ;;  %v539_v7 = vld [vmem:[#allocation2 + $0x38] sm:$0xff] }
 0x16e   : > { %3226 = vmatprep.subr.bf16.mxu0 %v6033_v8  ;;  %3791 = vmatprep.subr.bf16.mxu1 %v6036_v9 }
 0x170   : > { %3227 = vmatpush1.bf16.msra.mxu0 %v6031_v10  ;;  %3792 = vmatpush1.bf16.msra.mxu1 %v6034_v11 }
 0x171   : > { %3228 = vmatprep.subr.bf16.mxu0 %v6042_v12  ;;  %3793 = vmatprep.subr.bf16.mxu1 %v6045_v13 }
 0x173   : > { %3154 = vmatmul.mubr.bf16.gmra.mrb[4].mxu0 %v6030_v14  ;;  %3719 = vmatmul.mubr.bf16.gmra.mrb[4].mxu1 %v6030_v14 }
 0x174   : > { %3163 = vmatprep.mubr.bf16.mxu0 %v6037_v15  ;;  %3728 = vmatprep.mubr.bf16.mxu1 %v6037_v15 }
 0x175   : > { %3229 = vmatpush1.bf16.msra.mxu0 %v6040_v16  ;;  %3794 = vmatpush1.bf16.msra.mxu1 %v6043_v17 }
 0x176   : > { %3230 = vmatprep.subr.bf16.mxu0 %v6051_v18  ;;  %3795 = vmatprep.subr.bf16.mxu1 %v6054_v19  ;;  %v540_v18 = vld [vmem:[#allocation2 + $0x40] sm:$0xff]  ;;  %v542_v19 = vld [vmem:[#allocation2 + $0x50] sm:$0xff] }
 0x179   : > { %3231 = vmatpush1.bf16.msra.mxu0 %v6049_v20  ;;  %3796 = vmatpush1.bf16.msra.mxu1 %v6052_v21  ;;  %v541_v20 = vld [vmem:[#allocation2 + $0x48] sm:$0xff]  ;;  %v543_v21 = vld [vmem:[#allocation2 + $0x58] sm:$0xff] }
 0x17a   : > { %3232 = vmatprep.subr.bf16.mxu0 %v6060_v22  ;;  %3797 = vmatprep.subr.bf16.mxu1 %v6063_v23 }
 0x17b   : > { %3164 = vmatmul.mubr.bf16.gmra.mrb[8].mxu0 %v6039_v24  ;;  %3729 = vmatmul.mubr.bf16.gmra.mrb[8].mxu1 %v6039_v24  ;;  %v544_v24 = vld [vmem:[#allocation2 + $0x60] sm:$0xff] }
 0x17c   : > { %3173 = vmatprep.mubr.bf16.mxu0 %v6046_v25  ;;  %3738 = vmatprep.mubr.bf16.mxu1 %v6046_v25  ;;  %v546_v25 = vld [vmem:[#allocation2 + $0x70] sm:$0xff] }
 0x17d   : > { %3233 = vmatpush1.bf16.msra.mxu0 %v6058_v26  ;;  %3798 = vmatpush1.bf16.msra.mxu1 %v6061_v27 }
 0x17e   : > { %3234 = vmatprep.subr.bf16.mxu0 %v6069_v28  ;;  %3799 = vmatprep.subr.bf16.mxu1 %v6072_v29 }
 0x181   : > { %3235 = vmatpush1.bf16.msra.mxu0 %v6067_v30  ;;  %3800 = vmatpush1.bf16.msra.mxu1 %v6070_v31  ;;  %v545_v30 = vld [vmem:[#allocation2 + $0x68] sm:$0xff]  ;;  %v547_v31 = vld [vmem:[#allocation2 + $0x78] sm:$0xff] }
 0x182   : > { %3236 = vmatprep.subr.bf16.mxu0 %v6078_v32  ;;  %3801 = vmatprep.subr.bf16.mxu1 %v6081_v33 }
 0x183   : > { %3174 = vmatmul.mubr.bf16.gmra.mrb[12].mxu0 %v6048_v34  ;;  %3739 = vmatmul.mubr.bf16.gmra.mrb[12].mxu1 %v6048_v34 }
 0x184   : > { %3183 = vmatprep.mubr.bf16.mxu0 %v6055_v35  ;;  %3748 = vmatprep.mubr.bf16.mxu1 %v6055_v35 }
 0x185   : > { %3237 = vmatpush1.bf16.msra.mxu0 %v6076_v36  ;;  %3802 = vmatpush1.bf16.msra.mxu1 %v6079_v37 }
 0x186   : > { %3238 = vmatprep.subr.bf16.mxu0 %v6087_v38  ;;  %3803 = vmatprep.subr.bf16.mxu1 %v6090_v39 }
 0x189   : > { %3239 = vmatpush1.bf16.msra.mxu0 %v6085_v40  ;;  %3804 = vmatpush1.bf16.msra.mxu1 %v6088_v41 }
 0x18b   : > { %3184 = vmatmul.mubr.bf16.gmra.mrb[16].mxu0 %v6057_v42  ;;  %3749 = vmatmul.mubr.bf16.gmra.mrb[16].mxu1 %v6057_v42  ;;  %v548_v42 = vld [vmem:[#allocation2 + $0x80] sm:$0xff] }
 0x18c   : > { %3193 = vmatprep.mubr.bf16.mxu0 %v6064_v43  ;;  %3758 = vmatprep.mubr.bf16.mxu1 %v6064_v43  ;;  %v550_v43 = vld [vmem:[#allocation2 + $0x90] sm:$0xff] }
 0x193   : > { %3194 = vmatmul.mubr.bf16.gmra.mrb[20].mxu0 %v6066_v44  ;;  %3759 = vmatmul.mubr.bf16.gmra.mrb[20].mxu1 %v6066_v44  ;;  %v549_v44 = vld [vmem:[#allocation2 + $0x88] sm:$0xff] }
 0x194   : > { %3203 = vmatprep.mubr.bf16.mxu0 %v6073_v45  ;;  %3768 = vmatprep.mubr.bf16.mxu1 %v6073_v45  ;;  %v551_v45 = vld [vmem:[#allocation2 + $0x98] sm:$0xff] }
 0x19b   : > { %3204 = vmatmul.mubr.bf16.gmra.mrb[24].mxu0 %v6075_v46  ;;  %3769 = vmatmul.mubr.bf16.gmra.mrb[24].mxu1 %v6075_v46 }
 0x19c   : > { %3213 = vmatprep.mubr.bf16.mxu0 %v6082_v47  ;;  %3778 = vmatprep.mubr.bf16.mxu1 %v6082_v47 }
 0x1a3   : > { %3214 = vmatmul.mubr.bf16.gmra.mrb[28].mxu0 %v6084_v48  ;;  %3779 = vmatmul.mubr.bf16.gmra.mrb[28].mxu1 %v6084_v48  ;;  %v552_v48 = vld [vmem:[#allocation2 + $0xa0] sm:$0xff] }
 0x1a4   : > { %3256 = vmatprep.mubr.bf16.mxu0 %v6140_v49  ;;  %3821 = vmatprep.mubr.bf16.mxu1 %v6140_v49 }
 0x1ab   : > { %3257 = vmatmul.mubr.bf16.vlgmr.msra.gmra.mrb[0].mxu0 %v6091_v50  ;;  %3822 = vmatmul.mubr.bf16.vlgmr.msra.gmra.mrb[0].mxu1 %v6091_v50 }
 0x1ac   : > { %3266 = vmatprep.mubr.bf16.mxu0 %v6140_v49  ;;  %3831 = vmatprep.mubr.bf16.mxu1 %v6140_v49 }
 0x1b3   : > { %3267 = vmatmul.mubr.bf16.gmra.mrb[4].mxu0 %v6092_v51  ;;  %3832 = vmatmul.mubr.bf16.gmra.mrb[4].mxu1 %v6092_v51 }
 0x1b4   : > { %3276 = vmatprep.mubr.bf16.mxu0 %v6140_v49  ;;  %3841 = vmatprep.mubr.bf16.mxu1 %v6140_v49 }
 0x1bb   : > { %3277 = vmatmul.mubr.bf16.gmra.mrb[8].mxu0 %v6093_v52  ;;  %3842 = vmatmul.mubr.bf16.gmra.mrb[8].mxu1 %v6093_v52 }
 0x1bc   : > { %3286 = vmatprep.mubr.bf16.mxu0 %v6140_v49  ;;  %3851 = vmatprep.mubr.bf16.mxu1 %v6140_v49 }
 0x1c3   : > { %3287 = vmatmul.mubr.bf16.gmra.mrb[12].mxu0 %v6094_v53  ;;  %3852 = vmatmul.mubr.bf16.gmra.mrb[12].mxu1 %v6094_v53 }
 0x1c4   : > { %3296 = vmatprep.mubr.bf16.mxu0 %v6140_v49  ;;  %3861 = vmatprep.mubr.bf16.mxu1 %v6140_v49 }
 0x1cb   : > { %3297 = vmatmul.mubr.bf16.gmra.mrb[16].mxu0 %v6095_v54  ;;  %3862 = vmatmul.mubr.bf16.gmra.mrb[16].mxu1 %v6095_v54  ;;  %v553_v54 = vld [vmem:[#allocation2 + $0xa8] sm:$0xff] }
 0x1cc   : > { %3306 = vmatprep.mubr.bf16.mxu0 %v6140_v49  ;;  %3871 = vmatprep.mubr.bf16.mxu1 %v6140_v49 }
 0x1d3   : > { %3307 = vmatmul.mubr.bf16.gmra.mrb[20].mxu0 %v6096_v55  ;;  %3872 = vmatmul.mubr.bf16.gmra.mrb[20].mxu1 %v6096_v55  ;;  %v555_v55 = vld [vmem:[#allocation2 + $0xb8] sm:$0xff] }
 0x1d4   : > { %3316 = vmatprep.mubr.bf16.mxu0 %v6140_v49  ;;  %3881 = vmatprep.mubr.bf16.mxu1 %v6140_v49 }
 0x1db   : > { %3317 = vmatmul.mubr.bf16.gmra.mrb[24].mxu0 %v6097_v56  ;;  %3882 = vmatmul.mubr.bf16.gmra.mrb[24].mxu1 %v6097_v56 }
 0x1dc   : > { %3326 = vmatprep.mubr.bf16.mxu0 %v6140_v49  ;;  %3891 = vmatprep.mubr.bf16.mxu1 %v6140_v49  ;;  %v554_v49 = vld [vmem:[#allocation2 + $0xb0] sm:$0xff] }
 0x1e3   : > { %3327 = vmatmul.mubr.bf16.gmra.mrb[28].mxu0 %v6098_v57  ;;  %3892 = vmatmul.mubr.bf16.gmra.mrb[28].mxu1 %v6098_v57 }
 0x27e   : > { %v3258_v62 = vpop.f32.mrb[0].mxu0  ;;  %v3823_v63 = vpop.f32.mrb[0].mxu1 }
 0x27f   : > { %v3902_v2 = vadd.f32 %v3258_v62, %v532_v58  ;;  %v3904_v3 = vadd.f32 %v3823_v63, %v534_v59  ;;  %v3260_v4 = vpop.f32.mrb[1].mxu0  ;;  %v3825_v5 = vpop.f32.mrb[1].mxu1 }
 0x280   : > { %v3903_v8 = vadd.f32 %v3260_v4, %v533_v60  ;;  %v3905_v9 = vadd.f32 %v3825_v5, %v535_v61  ;;  %v3262_v10 = vpop.f32.mrb[2].mxu0  ;;  %v3827_v11 = vpop.f32.mrb[2].mxu1  ;;  %v557_v4 = vld [vmem:[#allocation2 + $0xc8] sm:$0xff]  ;;  %v559_v5 = vld [vmem:[#allocation2 + $0xd8] sm:$0xff] }
 0x281   : > { %3966 = vst [vmem:[#allocation2] sm:$0xff] %v3902_v2  ;;  %3968 = vst [vmem:[#allocation2 + $0x10] sm:$0xff] %v3904_v3  ;;  %v3906_v12 = vadd.f32 %v3262_v10, %v536_v0  ;;  %v3908_v13 = vadd.f32 %v3827_v11, %v538_v1  ;;  %v3264_v14 = vpop.f32.mrb[3].mxu0  ;;  %v3829_v15 = vpop.f32.mrb[3].mxu1  ;;  %v556_v2 = vld [vmem:[#allocation2 + $0xc0] sm:$0xff]  ;;  %v558_v3 = vld [vmem:[#allocation2 + $0xd0] sm:$0xff] }
 0x282   : > { %3967 = vst [vmem:[#allocation2 + $0x8] sm:$0xff] %v3903_v8  ;;  %3969 = vst [vmem:[#allocation2 + $0x18] sm:$0xff] %v3905_v9  ;;  %v3907_v16 = vadd.f32 %v3264_v14, %v537_v6  ;;  %v3909_v17 = vadd.f32 %v3829_v15, %v539_v7  ;;  %v560_v8 = vld [vmem:[#allocation2 + $0xe0] sm:$0xff]  ;;  %v562_v9 = vld [vmem:[#allocation2 + $0xf0] sm:$0xff] }
 0x283   : > { %3970 = vst [vmem:[#allocation2 + $0x20] sm:$0xff] %v3906_v12  ;;  %3972 = vst [vmem:[#allocation2 + $0x30] sm:$0xff] %v3908_v13  ;;  %v561_v14 = vld [vmem:[#allocation2 + $0xe8] sm:$0xff]  ;;  %v563_v15 = vld [vmem:[#allocation2 + $0xf8] sm:$0xff] }
 0x284   : > { %3971 = vst [vmem:[#allocation2 + $0x28] sm:$0xff] %v3907_v16  ;;  %3973 = vst [vmem:[#allocation2 + $0x38] sm:$0xff] %v3909_v17 }
 0x286   : > { %v3268_v22 = vpop.f32.mrb[4].mxu0  ;;  %v3833_v23 = vpop.f32.mrb[4].mxu1 }
 0x287   : > { %v3910_v26 = vadd.f32 %v3268_v22, %v540_v18  ;;  %v3912_v27 = vadd.f32 %v3833_v23, %v542_v19  ;;  %v3270_v28 = vpop.f32.mrb[5].mxu0  ;;  %v3835_v29 = vpop.f32.mrb[5].mxu1 }
 0x288   : > { %v3911_v32 = vadd.f32 %v3270_v28, %v541_v20  ;;  %v3913_v33 = vadd.f32 %v3835_v29, %v543_v21  ;;  %v3272_v34 = vpop.f32.mrb[6].mxu0  ;;  %v3837_v35 = vpop.f32.mrb[6].mxu1  ;;  %v565_v28 = vld [vmem:[#allocation2 + $0x108] sm:$0xff]  ;;  %v567_v29 = vld [vmem:[#allocation2 + $0x118] sm:$0xff] }
 0x289   : > { %3974 = vst [vmem:[#allocation2 + $0x40] sm:$0xff] %v3910_v26  ;;  %3976 = vst [vmem:[#allocation2 + $0x50] sm:$0xff] %v3912_v27  ;;  %v3914_v36 = vadd.f32 %v3272_v34, %v544_v24  ;;  %v3916_v37 = vadd.f32 %v3837_v35, %v546_v25  ;;  %v3274_v38 = vpop.f32.mrb[7].mxu0  ;;  %v3839_v39 = vpop.f32.mrb[7].mxu1  ;;  %v564_v26 = vld [vmem:[#allocation2 + $0x100] sm:$0xff]  ;;  %v566_v27 = vld [vmem:[#allocation2 + $0x110] sm:$0xff] }
 0x28a   : > { %3975 = vst [vmem:[#allocation2 + $0x48] sm:$0xff] %v3911_v32  ;;  %3977 = vst [vmem:[#allocation2 + $0x58] sm:$0xff] %v3913_v33  ;;  %v3915_v40 = vadd.f32 %v3274_v38, %v545_v30  ;;  %v3917_v41 = vadd.f32 %v3839_v39, %v547_v31  ;;  %v568_v32 = vld [vmem:[#allocation2 + $0x120] sm:$0xff]  ;;  %v570_v33 = vld [vmem:[#allocation2 + $0x130] sm:$0xff] }
 0x28b   : > { %3978 = vst [vmem:[#allocation2 + $0x60] sm:$0xff] %v3914_v36  ;;  %3980 = vst [vmem:[#allocation2 + $0x70] sm:$0xff] %v3916_v37  ;;  %v569_v38 = vld [vmem:[#allocation2 + $0x128] sm:$0xff]  ;;  %v571_v39 = vld [vmem:[#allocation2 + $0x138] sm:$0xff] }
 0x28c   : > { %3979 = vst [vmem:[#allocation2 + $0x68] sm:$0xff] %v3915_v40  ;;  %3981 = vst [vmem:[#allocation2 + $0x78] sm:$0xff] %v3917_v41 }
 0x28e   : > { %v3278_v46 = vpop.f32.mrb[8].mxu0  ;;  %v3843_v47 = vpop.f32.mrb[8].mxu1 }
 0x28f   : > { %v3918_v50 = vadd.f32 %v3278_v46, %v548_v42  ;;  %v3920_v51 = vadd.f32 %v3843_v47, %v550_v43  ;;  %v3280_v52 = vpop.f32.mrb[9].mxu0  ;;  %v3845_v53 = vpop.f32.mrb[9].mxu1 }
 0x290   : > { %v3919_v56 = vadd.f32 %v3280_v52, %v549_v44  ;;  %v3921_v57 = vadd.f32 %v3845_v53, %v551_v45  ;;  %v3282_v58 = vpop.f32.mrb[10].mxu0  ;;  %v3847_v59 = vpop.f32.mrb[10].mxu1  ;;  %v573_v52 = vld [vmem:[#allocation2 + $0x148] sm:$0xff]  ;;  %v575_v53 = vld [vmem:[#allocation2 + $0x158] sm:$0xff] }
 0x291   : > { %3982 = vst [vmem:[#allocation2 + $0x80] sm:$0xff] %v3918_v50  ;;  %3984 = vst [vmem:[#allocation2 + $0x90] sm:$0xff] %v3920_v51  ;;  %v3922_v60 = vadd.f32 %v3282_v58, %v552_v48  ;;  %v3924_v61 = vadd.f32 %v3847_v59, %v554_v49  ;;  %v3284_v62 = vpop.f32.mrb[11].mxu0  ;;  %v3849_v63 = vpop.f32.mrb[11].mxu1  ;;  %v572_v50 = vld [vmem:[#allocation2 + $0x140] sm:$0xff]  ;;  %v574_v51 = vld [vmem:[#allocation2 + $0x150] sm:$0xff] }
 0x292   : > { %3983 = vst [vmem:[#allocation2 + $0x88] sm:$0xff] %v3919_v56  ;;  %3985 = vst [vmem:[#allocation2 + $0x98] sm:$0xff] %v3921_v57  ;;  %v3923_v0 = vadd.f32 %v3284_v62, %v553_v54  ;;  %v3925_v1 = vadd.f32 %v3849_v63, %v555_v55  ;;  %v576_v56 = vld [vmem:[#allocation2 + $0x160] sm:$0xff]  ;;  %v578_v57 = vld [vmem:[#allocation2 + $0x170] sm:$0xff] }
 0x293   : > { %3986 = vst [vmem:[#allocation2 + $0xa0] sm:$0xff] %v3922_v60  ;;  %3988 = vst [vmem:[#allocation2 + $0xb0] sm:$0xff] %v3924_v61  ;;  %v577_v62 = vld [vmem:[#allocation2 + $0x168] sm:$0xff]  ;;  %v579_v63 = vld [vmem:[#allocation2 + $0x178] sm:$0xff] }
 0x294   : > { %3987 = vst [vmem:[#allocation2 + $0xa8] sm:$0xff] %v3923_v0  ;;  %3989 = vst [vmem:[#allocation2 + $0xb8] sm:$0xff] %v3925_v1 }
 0x296   : > { %v3288_v6 = vpop.f32.mrb[12].mxu0  ;;  %v3853_v7 = vpop.f32.mrb[12].mxu1 }
 0x297   : > { %v3926_v10 = vadd.f32 %v3288_v6, %v556_v2  ;;  %v3928_v11 = vadd.f32 %v3853_v7, %v558_v3  ;;  %v3290_v12 = vpop.f32.mrb[13].mxu0  ;;  %v3855_v13 = vpop.f32.mrb[13].mxu1 }
 0x298   : > { %v3927_v16 = vadd.f32 %v3290_v12, %v557_v4  ;;  %v3929_v17 = vadd.f32 %v3855_v13, %v559_v5  ;;  %v3292_v18 = vpop.f32.mrb[14].mxu0  ;;  %v3857_v19 = vpop.f32.mrb[14].mxu1  ;;  %v581_v12 = vld [vmem:[#allocation2 + $0x188] sm:$0xff]  ;;  %v583_v13 = vld [vmem:[#allocation2 + $0x198] sm:$0xff] }
 0x299   : > { %3990 = vst [vmem:[#allocation2 + $0xc0] sm:$0xff] %v3926_v10  ;;  %3992 = vst [vmem:[#allocation2 + $0xd0] sm:$0xff] %v3928_v11  ;;  %v3930_v20 = vadd.f32 %v3292_v18, %v560_v8  ;;  %v3932_v21 = vadd.f32 %v3857_v19, %v562_v9  ;;  %v3294_v22 = vpop.f32.mrb[15].mxu0  ;;  %v3859_v23 = vpop.f32.mrb[15].mxu1  ;;  %v580_v10 = vld [vmem:[#allocation2 + $0x180] sm:$0xff]  ;;  %v582_v11 = vld [vmem:[#allocation2 + $0x190] sm:$0xff] }
 0x29a   : > { %3991 = vst [vmem:[#allocation2 + $0xc8] sm:$0xff] %v3927_v16  ;;  %3993 = vst [vmem:[#allocation2 + $0xd8] sm:$0xff] %v3929_v17  ;;  %v3931_v24 = vadd.f32 %v3294_v22, %v561_v14  ;;  %v3933_v25 = vadd.f32 %v3859_v23, %v563_v15  ;;  %v584_v16 = vld [vmem:[#allocation2 + $0x1a0] sm:$0xff]  ;;  %v586_v17 = vld [vmem:[#allocation2 + $0x1b0] sm:$0xff] }
 0x29b   : > { %3994 = vst [vmem:[#allocation2 + $0xe0] sm:$0xff] %v3930_v20  ;;  %3996 = vst [vmem:[#allocation2 + $0xf0] sm:$0xff] %v3932_v21  ;;  %v585_v22 = vld [vmem:[#allocation2 + $0x1a8] sm:$0xff]  ;;  %v587_v23 = vld [vmem:[#allocation2 + $0x1b8] sm:$0xff] }
 0x29c   : > { %3995 = vst [vmem:[#allocation2 + $0xe8] sm:$0xff] %v3931_v24  ;;  %3997 = vst [vmem:[#allocation2 + $0xf8] sm:$0xff] %v3933_v25 }
 0x29e   : > { %v3298_v30 = vpop.f32.mrb[16].mxu0  ;;  %v3863_v31 = vpop.f32.mrb[16].mxu1 }
 0x29f   : > { %v3934_v34 = vadd.f32 %v3298_v30, %v564_v26  ;;  %v3936_v35 = vadd.f32 %v3863_v31, %v566_v27  ;;  %v3300_v36 = vpop.f32.mrb[17].mxu0  ;;  %v3865_v37 = vpop.f32.mrb[17].mxu1 }
 0x2a0   : > { %v3935_v40 = vadd.f32 %v3300_v36, %v565_v28  ;;  %v3937_v41 = vadd.f32 %v3865_v37, %v567_v29  ;;  %v3302_v42 = vpop.f32.mrb[18].mxu0  ;;  %v3867_v43 = vpop.f32.mrb[18].mxu1  ;;  %v589_v36 = vld [vmem:[#allocation2 + $0x1c8] sm:$0xff]  ;;  %v591_v37 = vld [vmem:[#allocation2 + $0x1d8] sm:$0xff] }
 0x2a1   : > { %3998 = vst [vmem:[#allocation2 + $0x100] sm:$0xff] %v3934_v34  ;;  %4000 = vst [vmem:[#allocation2 + $0x110] sm:$0xff] %v3936_v35  ;;  %v3938_v44 = vadd.f32 %v3302_v42, %v568_v32  ;;  %v3940_v45 = vadd.f32 %v3867_v43, %v570_v33  ;;  %v3304_v46 = vpop.f32.mrb[19].mxu0  ;;  %v3869_v47 = vpop.f32.mrb[19].mxu1  ;;  %v588_v34 = vld [vmem:[#allocation2 + $0x1c0] sm:$0xff]  ;;  %v590_v35 = vld [vmem:[#allocation2 + $0x1d0] sm:$0xff] }
 0x2a2   : > { %3999 = vst [vmem:[#allocation2 + $0x108] sm:$0xff] %v3935_v40  ;;  %4001 = vst [vmem:[#allocation2 + $0x118] sm:$0xff] %v3937_v41  ;;  %v3939_v48 = vadd.f32 %v3304_v46, %v569_v38  ;;  %v3941_v49 = vadd.f32 %v3869_v47, %v571_v39  ;;  %v592_v40 = vld [vmem:[#allocation2 + $0x1e0] sm:$0xff]  ;;  %v594_v41 = vld [vmem:[#allocation2 + $0x1f0] sm:$0xff] }
 0x2a3   : > { %4002 = vst [vmem:[#allocation2 + $0x120] sm:$0xff] %v3938_v44  ;;  %4004 = vst [vmem:[#allocation2 + $0x130] sm:$0xff] %v3940_v45  ;;  %v593_v46 = vld [vmem:[#allocation2 + $0x1e8] sm:$0xff]  ;;  %v595_v47 = vld [vmem:[#allocation2 + $0x1f8] sm:$0xff] }
 0x2a4   : > { %4003 = vst [vmem:[#allocation2 + $0x128] sm:$0xff] %v3939_v48  ;;  %4005 = vst [vmem:[#allocation2 + $0x138] sm:$0xff] %v3941_v49 }
 0x2a6   : > { %v3308_v54 = vpop.f32.mrb[20].mxu0  ;;  %v3873_v55 = vpop.f32.mrb[20].mxu1 }
 0x2a7   : > { %v3942_v58 = vadd.f32 %v3308_v54, %v572_v50  ;;  %v3944_v59 = vadd.f32 %v3873_v55, %v574_v51  ;;  %v3310_v60 = vpop.f32.mrb[21].mxu0  ;;  %v3875_v61 = vpop.f32.mrb[21].mxu1 }
 0x2a8   : > { %v3943_v0 = vadd.f32 %v3310_v60, %v573_v52  ;;  %v3945_v1 = vadd.f32 %v3875_v61, %v575_v53  ;;  %v3312_v2 = vpop.f32.mrb[22].mxu0  ;;  %v3877_v3 = vpop.f32.mrb[22].mxu1  ;;  %v4036_v60 = vld [vmem:[#allocation2 + $0x10] sm:$0xff] (!%p5187_p11)  ;;  %v4419_v61 = vlaneseq (!%p5187_p11) }
 0x2a9   : > { %4006 = vst [vmem:[#allocation2 + $0x140] sm:$0xff] %v3942_v58  ;;  %4008 = vst [vmem:[#allocation2 + $0x150] sm:$0xff] %v3944_v59  ;;  %v3946_v4 = vadd.f32 %v3312_v2, %v576_v56  ;;  %v3948_v5 = vadd.f32 %v3877_v3, %v578_v57  ;;  %v3314_v6 = vpop.f32.mrb[23].mxu0  ;;  %v3879_v7 = vpop.f32.mrb[23].mxu1  ;;  %v4034_v58 = vld [vmem:[#allocation2] sm:$0xff] (!%p5187_p11)  ;;  %v4035_v59 = vld [vmem:[#allocation2 + $0x8] sm:$0xff] (!%p5187_p11)  ;;  %v4447_v3 = vmul.f32 (!%p5187_p11), %v4036_v60, %v4036_v60 }
 0x2aa   : > { %4007 = vst [vmem:[#allocation2 + $0x148] sm:$0xff] %v3943_v0  ;;  %4009 = vst [vmem:[#allocation2 + $0x158] sm:$0xff] %v3945_v1  ;;  %v3947_v8 = vadd.f32 %v3314_v6, %v577_v62  ;;  %v3949_v9 = vadd.f32 %v3879_v7, %v579_v63  ;;  %v6141_v62 = vmov (!%p5187_p11), 0.0   ;;  %v5229_v63 = vpack.c.bf16 (!%p5187_p11), %v4035_v59, %v4034_v58  ;;  %v4037_v2 = vld [vmem:[#allocation2 + $0x18] sm:$0xff] (!%p5187_p11) }
 0x2ab   : > { %4010 = vst [vmem:[#allocation2 + $0x160] sm:$0xff] %v3946_v4  ;;  %4012 = vst [vmem:[#allocation2 + $0x170] sm:$0xff] %v3948_v5  ;;  %v4445_v0 = vmul.f32 (!%p5187_p11), %v4034_v58, %v4034_v58  ;;  %v4446_v1 = vmul.f32 (!%p5187_p11), %v4035_v59, %v4035_v59  ;;  %v4038_v4 = vld [vmem:[#allocation2 + $0x20] sm:$0xff] (!%p5187_p11)  ;;  %v4039_v5 = vld [vmem:[#allocation2 + $0x28] sm:$0xff] (!%p5187_p11)  ;;  %v5230_v6 = vpack.c.bf16 (!%p5187_p11), %v4037_v2, %v4036_v60  ;;  %vm4441_vm0 = vcmp.lt.s32.totalorder (!%p5187_p11), %v4419_v61, 512 }
 0x2ac   : > { %4011 = vst [vmem:[#allocation2 + $0x168] sm:$0xff] %v3947_v8  ;;  %4013 = vst [vmem:[#allocation2 + $0x178] sm:$0xff] %v3949_v9  ;;  %v4448_v7 = vmul.f32 (!%p5187_p11), %v4037_v2, %v4037_v2  ;;  %v5231_v8 = vpack.c.bf16 (!%p5187_p11), %v4039_v5, %v4038_v4  ;;  %v4326_v9 = vadd.f32 (!%p5187_p11), %v4038_v4, %v4034_v58 }
 0x2ad   : > { %4322 = vst [vmem:[%s6941_s3] sm:$0xff] (!%p5187_p11), %v6141_v62  ;;  %4323 = vst [vmem:[%s6941_s3 + $0x8] sm:$0xff] (!%p5187_p11), %v6141_v62 }
 0x2ae   : > { %v3318_v14 = vpop.f32.mrb[24].mxu0  ;;  %v3883_v15 = vpop.f32.mrb[24].mxu1  ;;  %4324 = vst [vmem:[%s6941_s3 + $0x10] sm:$0xff] (!%p5187_p11), %v6141_v62  ;;  %4325 = vst [vmem:[%s6941_s3 + $0x18] sm:$0xff] (!%p5187_p11), %v6141_v62 }
 0x2af   : > { %v3950_v18 = vadd.f32 %v3318_v14, %v580_v10  ;;  %v3952_v19 = vadd.f32 %v3883_v15, %v582_v11  ;;  %v3320_v20 = vpop.f32.mrb[25].mxu0  ;;  %v3885_v21 = vpop.f32.mrb[25].mxu1  ;;  %v4040_v10 = vld [vmem:[#allocation2 + $0x30] sm:$0xff] (!%p5187_p11)  ;;  %v4041_v11 = vld [vmem:[#allocation2 + $0x38] sm:$0xff] (!%p5187_p11)  ;;  %4290 = vst [vmem:[%s6940_s2] sm:$0xff] (!%p5187_p11), %v5229_v63  ;;  %v4450_v14 = vmul.f32 (!%p5187_p11), %v4039_v5, %v4039_v5  ;;  %4291 = vst [vmem:[%s6940_s2 + $0x8] sm:$0xff] (!%p5187_p11), %v5230_v6 }
 0x2b0   : > { %v3951_v24 = vadd.f32 %v3320_v20, %v581_v12  ;;  %v3953_v25 = vadd.f32 %v3885_v21, %v583_v13  ;;  %v3322_v26 = vpop.f32.mrb[26].mxu0  ;;  %v3887_v27 = vpop.f32.mrb[26].mxu1  ;;  %v4347_v12 = vadd.f32 (!%p5187_p11), %v4039_v5, %v4035_v59  ;;  %v4449_v13 = vmul.f32 (!%p5187_p11), %v4038_v4, %v4038_v4  ;;  %4292 = vst [vmem:[%s6940_s2 + $0x10] sm:$0xff] (!%p5187_p11), %v5231_v8  ;;  %v4043_v21 = vld [vmem:[#allocation2 + $0x48] sm:$0xff] (!%p5187_p11)  ;;  %v4052_v63 = vld [vmem:[#allocation2 + $0x90] sm:$0xff] (!%p5187_p11)  ;;  %v4054_v5 = vld [vmem:[#allocation2 + $0xa0] sm:$0xff] (!%p5187_p11) }
 0x2b1   : > { %4014 = vst [vmem:[#allocation2 + $0x180] sm:$0xff] %v3950_v18  ;;  %4016 = vst [vmem:[#allocation2 + $0x190] sm:$0xff] %v3952_v19  ;;  %v3954_v28 = vadd.f32 %v3322_v26, %v584_v16  ;;  %v3956_v29 = vadd.f32 %v3887_v27, %v586_v17  ;;  %v3324_v30 = vpop.f32.mrb[27].mxu0  ;;  %v3889_v31 = vpop.f32.mrb[27].mxu1  ;;  %v5232_v15 = vpack.c.bf16 (!%p5187_p11), %v4041_v11, %v4040_v10  ;;  %v4042_v16 = vld [vmem:[#allocation2 + $0x40] sm:$0xff] (!%p5187_p11)  ;;  %v4044_v26 = vld [vmem:[#allocation2 + $0x50] sm:$0xff] (!%p5187_p11) }
 0x2b2   : > { %4015 = vst [vmem:[#allocation2 + $0x188] sm:$0xff] %v3951_v24  ;;  %4017 = vst [vmem:[#allocation2 + $0x198] sm:$0xff] %v3953_v25  ;;  %v3955_v32 = vadd.f32 %v3324_v30, %v585_v22  ;;  %v3957_v33 = vadd.f32 %v3889_v31, %v587_v23  ;;  %v4368_v17 = vadd.f32 (!%p5187_p11), %v4040_v10, %v4036_v60  ;;  %v4045_v27 = vld [vmem:[#allocation2 + $0x58] sm:$0xff] (!%p5187_p11) }
 0x2b3   : > { %4018 = vst [vmem:[#allocation2 + $0x1a0] sm:$0xff] %v3954_v28  ;;  %4020 = vst [vmem:[#allocation2 + $0x1b0] sm:$0xff] %v3956_v29  ;;  %v4389_v18 = vadd.f32 (!%p5187_p11), %v4041_v11, %v4037_v2  ;;  %v4451_v19 = vmul.f32 (!%p5187_p11), %v4040_v10, %v4040_v10  ;;  %v4452_v20 = vmul.f32 (!%p5187_p11), %v4041_v11, %v4041_v11  ;;  %v4055_v10 = vld [vmem:[#allocation2 + $0xa8] sm:$0xff] (!%p5187_p11) }
 0x2b4   : > { %4019 = vst [vmem:[#allocation2 + $0x1a8] sm:$0xff] %v3955_v32  ;;  %4021 = vst [vmem:[#allocation2 + $0x1b8] sm:$0xff] %v3957_v33  ;;  %v4509_v22 = vadd.f32 (!%p5187_p11), %v4449_v13, %v4445_v0  ;;  %v4530_v23 = vadd.f32 (!%p5187_p11), %v4450_v14, %v4446_v1  ;;  %v5233_v24 = vpack.c.bf16 (!%p5187_p11), %v4043_v21, %v4042_v16  ;;  %v4046_v32 = vld [vmem:[#allocation2 + $0x60] sm:$0xff] (!%p5187_p11)  ;;  %v4053_v0 = vld [vmem:[#allocation2 + $0x98] sm:$0xff] (!%p5187_p11) }
 0x2b5   : > { %4293 = vst [vmem:[%s6940_s2 + $0x18] sm:$0xff] (!%p5187_p11), %v5232_v15  ;;  %v4327_v25 = vadd.f32 (!%p5187_p11), %v4326_v9, %v4042_v16  ;;  %v4551_v28 = vadd.f32 (!%p5187_p11), %v4451_v19, %v4447_v3  ;;  %v4572_v29 = vadd.f32 (!%p5187_p11), %v4452_v20, %v4448_v7  ;;  %v4348_v30 = vadd.f32 (!%p5187_p11), %v4347_v12, %v4043_v21  ;;  %v4056_v15 = vld [vmem:[#allocation2 + $0xb0] sm:$0xff] (!%p5187_p11)  ;;  %v4057_v20 = vld [vmem:[#allocation2 + $0xb8] sm:$0xff] (!%p5187_p11) }
 0x2b6   : > { %v3328_v38 = vpop.f32.mrb[28].mxu0  ;;  %v3893_v39 = vpop.f32.mrb[28].mxu1  ;;  %4033 = sbr.rel (%p5187_p11) target bundleno = 770 (0x302), region = 62  ;;  %v4453_v31 = vmul.f32 (!%p5187_p11), %v4042_v16, %v4042_v16  ;;  %4294 = vst [vmem:[%s6940_s2 + $0x20] sm:$0xff] (!%p5187_p11), %v5233_v24  ;;  %v4454_v33 = vmul.f32 (!%p5187_p11), %v4043_v21, %v4043_v21  ;;  %v5238_v7 = vpack.c.bf16 (!%p5187_p11), %v4053_v0, %v4052_v63  ;;  %v4463_v13 = vmul.f32 (!%p5187_p11), %v4052_v63, %v4052_v63 }
 0x2b7   : > { %v3958_v42 = vadd.f32 %v3328_v38, %v588_v34  ;;  %v3960_v43 = vadd.f32 %v3893_v39, %v590_v35  ;;  %v3330_v44 = vpop.f32.mrb[29].mxu0  ;;  %v3895_v45 = vpop.f32.mrb[29].mxu1  ;;  %v5234_v34 = vpack.c.bf16 (!%p5187_p11), %v4045_v27, %v4044_v26  ;;  %v4369_v35 = vadd.f32 (!%p5187_p11), %v4368_v17, %v4044_v26 }
 0x2b8   : > { %v3959_v48 = vadd.f32 %v3330_v44, %v589_v36  ;;  %v3961_v49 = vadd.f32 %v3895_v45, %v591_v37  ;;  %v3332_v50 = vpop.f32.mrb[30].mxu0  ;;  %v3897_v51 = vpop.f32.mrb[30].mxu1  ;;  %v4390_v36 = vadd.f32 (!%p5187_p11), %v4389_v18, %v4045_v27  ;;  %v4047_v37 = vld [vmem:[#allocation2 + $0x68] sm:$0xff] (!%p5187_p11)  ;;  %v4510_v38 = vadd.f32 (!%p5187_p11), %v4509_v22, %v4453_v31  ;;  %4299 = vst [vmem:[%s6940_s2 + $0x48] sm:$0xff] (!%p5187_p11), %v5238_v7 }
 0x2b9   : > { %4022 = vst [vmem:[#allocation2 + $0x1c0] sm:$0xff] %v3958_v42  ;;  %4024 = vst [vmem:[#allocation2 + $0x1d0] sm:$0xff] %v3960_v43  ;;  %v3962_v52 = vadd.f32 %v3332_v50, %v592_v40  ;;  %v3964_v53 = vadd.f32 %v3897_v51, %v594_v41  ;;  %v3334_v54 = vpop.f32.mrb[31].mxu0  ;;  %v3899_v55 = vpop.f32.mrb[31].mxu1  ;;  %v4455_v39 = vmul.f32 (!%p5187_p11), %v4044_v26, %v4044_v26  ;;  %v4048_v42 = vld [vmem:[#allocation2 + $0x70] sm:$0xff] (!%p5187_p11)  ;;  %v4059_v26 = vld [vmem:[#allocation2 + $0xc8] sm:$0xff] (!%p5187_p11) }
 0x2ba   : > { %4023 = vst [vmem:[#allocation2 + $0x1c8] sm:$0xff] %v3959_v48  ;;  %4025 = vst [vmem:[#allocation2 + $0x1d8] sm:$0xff] %v3961_v49  ;;  %v3963_v56 = vadd.f32 %v3334_v54, %v593_v46  ;;  %v3965_v57 = vadd.f32 %v3899_v55, %v595_v47  ;;  %v4456_v40 = vmul.f32 (!%p5187_p11), %v4045_v27, %v4045_v27  ;;  %v4049_v47 = vld [vmem:[#allocation2 + $0x78] sm:$0xff] (!%p5187_p11) }
 0x2bb   : > { %4026 = vst [vmem:[#allocation2 + $0x1e0] sm:$0xff] %v3962_v52  ;;  %4028 = vst [vmem:[#allocation2 + $0x1f0] sm:$0xff] %v3964_v53  ;;  %v5235_v41 = vpack.c.bf16 (!%p5187_p11), %v4047_v37, %v4046_v32  ;;  %v4531_v43 = vadd.f32 (!%p5187_p11), %v4530_v23, %v4454_v33  ;;  %v4328_v44 = vadd.f32 (!%p5187_p11), %v4327_v25, %v4046_v32  ;;  %v4050_v52 = vld [vmem:[#allocation2 + $0x80] sm:$0xff] (!%p5187_p11)  ;;  %v4051_v53 = vld [vmem:[#allocation2 + $0x88] sm:$0xff] (!%p5187_p11) }
 0x2bc   : > { %4027 = vst [vmem:[#allocation2 + $0x1e8] sm:$0xff] %v3963_v56  ;;  %4029 = vst [vmem:[#allocation2 + $0x1f8] sm:$0xff] %v3965_v57  ;;  %v4349_v45 = vadd.f32 (!%p5187_p11), %v4348_v30, %v4047_v37  ;;  %v4457_v46 = vmul.f32 (!%p5187_p11), %v4046_v32, %v4046_v32  ;;  %v4552_v48 = vadd.f32 (!%p5187_p11), %v4551_v28, %v4455_v39  ;;  %v4058_v25 = vld [vmem:[#allocation2 + $0xc0] sm:$0xff] (!%p5187_p11) }
 0x2bd   : > { %4295 = vst [vmem:[%s6940_s2 + $0x28] sm:$0xff] %v5234_v34  ;;  %v4573_v49 = vadd.f32 %v4572_v29, %v4456_v40  ;;  %4296 = vst [vmem:[%s6940_s2 + $0x30] sm:$0xff] %v5235_v41  ;;  %v4458_v50 = vmul.f32 %v4047_v37, %v4047_v37  ;;  %v5236_v51 = vpack.c.bf16 %v4049_v47, %v4048_v42  ;;  %v4062_v41 = vld [vmem:[#allocation2 + $0xe0] sm:$0xff] }
 0x2be   : > { %v4511_v54 = vadd.f32 %v4510_v38, %v4457_v46  ;;  %v4370_v55 = vadd.f32 %v4369_v35, %v4048_v42  ;;  %v4391_v56 = vadd.f32 %v4390_v36, %v4049_v47  ;;  %v4459_v57 = vmul.f32 %v4048_v42, %v4048_v42  ;;  %v4060_v35 = vld [vmem:[#allocation2 + $0xd0] sm:$0xff]  ;;  %v4061_v36 = vld [vmem:[#allocation2 + $0xd8] sm:$0xff]  ;;  %v4063_v46 = vld [vmem:[#allocation2 + $0xe8] sm:$0xff] }
 0x2bf   : > { %v4532_v58 = vadd.f32 %v4531_v43, %v4458_v50  ;;  %4297 = vst [vmem:[%s6940_s2 + $0x38] sm:$0xff] %v5236_v51  ;;  %v4460_v59 = vmul.f32 %v4049_v47, %v4049_v47  ;;  %v5237_v60 = vpack.c.bf16 %v4051_v53, %v4050_v52  ;;  %v4329_v62 = vadd.f32 %v4328_v44, %v4050_v52  ;;  %v4064_v51 = vld [vmem:[#allocation2 + $0xf0] sm:$0xff] }
 0x2c0   : > { %v4553_v1 = vadd.f32 %v4552_v48, %v4459_v57  ;;  %v4350_v2 = vadd.f32 %v4349_v45, %v4051_v53  ;;  %v4461_v3 = vmul.f32 %v4050_v52, %v4050_v52  ;;  %v4462_v4 = vmul.f32 %v4051_v53, %v4051_v53 }
 0x2c1   : > { %v4574_v6 = vadd.f32 %v4573_v49, %v4460_v59  ;;  %4298 = vst [vmem:[%s6940_s2 + $0x40] sm:$0xff] %v5237_v60  ;;  %v4371_v8 = vadd.f32 %v4370_v55, %v4052_v63  ;;  %v4392_v9 = vadd.f32 %v4391_v56, %v4053_v0  ;;  %v4464_v14 = vmul.f32 %v4053_v0, %v4053_v0  ;;  %v4065_v56 = vld [vmem:[#allocation2 + $0xf8] sm:$0xff]  ;;  %v4067_v63 = vld [vmem:[#allocation2 + $0x108] sm:$0xff] }
 0x2c2   : > { %v4512_v11 = vadd.f32 %v4511_v54, %v4461_v3  ;;  %v4533_v12 = vadd.f32 %v4532_v58, %v4462_v4  ;;  %v5239_v16 = vpack.c.bf16 %v4055_v10, %v4054_v5  ;;  %v4330_v17 = vadd.f32 %v4329_v62, %v4054_v5  ;;  %v4066_v62 = vld [vmem:[#allocation2 + $0x100] sm:$0xff] }
 0x2c3   : > { %v4351_v18 = vadd.f32 %v4350_v2, %v4055_v10  ;;  %v4465_v19 = vmul.f32 %v4054_v5, %v4054_v5  ;;  %v4554_v21 = vadd.f32 %v4553_v1, %v4463_v13  ;;  %v4575_v22 = vadd.f32 %v4574_v6, %v4464_v14  ;;  %v4070_v14 = vld [vmem:[#allocation2 + $0x120] sm:$0xff] }
 0x2c4   : > { %v4466_v23 = vmul.f32 %v4055_v10, %v4055_v10  ;;  %v5240_v24 = vpack.c.bf16 %v4057_v20, %v4056_v15  ;;  %4300 = vst [vmem:[%s6940_s2 + $0x50] sm:$0xff] %v5239_v16  ;;  %v4372_v28 = vadd.f32 %v4371_v8, %v4056_v15  ;;  %v4393_v29 = vadd.f32 %v4392_v9, %v4057_v20  ;;  %v4068_v8 = vld [vmem:[#allocation2 + $0x110] sm:$0xff]  ;;  %v4069_v9 = vld [vmem:[#allocation2 + $0x118] sm:$0xff] }
 0x2c5   : > { %v4513_v27 = vadd.f32 %v4512_v11, %v4465_v19  ;;  %v4467_v30 = vmul.f32 %v4056_v15, %v4056_v15  ;;  %v4468_v32 = vmul.f32 %v4057_v20, %v4057_v20  ;;  %v5241_v33 = vpack.c.bf16 %v4059_v26, %v4058_v25  ;;  %v4071_v19 = vld [vmem:[#allocation2 + $0x128] sm:$0xff] }
 0x2c6   : > { %v4534_v31 = vadd.f32 %v4533_v12, %v4466_v23  ;;  %4301 = vst [vmem:[%s6940_s2 + $0x58] sm:$0xff] %v5240_v24  ;;  %v4331_v34 = vadd.f32 %v4330_v17, %v4058_v25  ;;  %v4352_v38 = vadd.f32 %v4351_v18, %v4059_v26  ;;  %v4469_v39 = vmul.f32 %v4058_v25, %v4058_v25  ;;  %v4072_v24 = vld [vmem:[#allocation2 + $0x130] sm:$0xff] }
 0x2c7   : > { %v4555_v37 = vadd.f32 %v4554_v21, %v4467_v30  ;;  %v4470_v40 = vmul.f32 %v4059_v26, %v4059_v26  ;;  %v4576_v42 = vadd.f32 %v4575_v22, %v4468_v32  ;;  %4302 = vst [vmem:[%s6940_s2 + $0x60] sm:$0xff] %v5241_v33  ;;  %v5242_v43 = vpack.c.bf16 %v4061_v36, %v4060_v35 }
 0x2c8   : > { %v4373_v44 = vadd.f32 %v4372_v28, %v4060_v35  ;;  %v4394_v45 = vadd.f32 %v4393_v29, %v4061_v36  ;;  %v4514_v47 = vadd.f32 %v4513_v27, %v4469_v39  ;;  %v4471_v49 = vmul.f32 %v4060_v35, %v4060_v35  ;;  %v4073_v29 = vld [vmem:[#allocation2 + $0x138] sm:$0xff]  ;;  %v4075_v35 = vld [vmem:[#allocation2 + $0x148] sm:$0xff] }
 0x2c9   : > { %v4535_v48 = vadd.f32 %v4534_v31, %v4470_v40  ;;  %v4472_v50 = vmul.f32 %v4061_v36, %v4061_v36  ;;  %4303 = vst [vmem:[%s6940_s2 + $0x68] sm:$0xff] %v5242_v43  ;;  %v5243_v52 = vpack.c.bf16 %v4063_v46, %v4062_v41  ;;  %v4332_v53 = vadd.f32 %v4331_v34, %v4062_v41  ;;  %v4074_v34 = vld [vmem:[#allocation2 + $0x140] sm:$0xff] }
 0x2ca   : > { %v4353_v54 = vadd.f32 %v4352_v38, %v4063_v46  ;;  %v4473_v55 = vmul.f32 %v4062_v41, %v4062_v41  ;;  %v4556_v57 = vadd.f32 %v4555_v37, %v4471_v49  ;;  %v4474_v59 = vmul.f32 %v4063_v46, %v4063_v46 }
 0x2cb   : > { %v4577_v58 = vadd.f32 %v4576_v42, %v4472_v50  ;;  %v5244_v60 = vpack.c.bf16 %v4065_v56, %v4064_v51  ;;  %4304 = vst [vmem:[%s6940_s2 + $0x70] sm:$0xff] %v5243_v52  ;;  %v4374_v1 = vadd.f32 %v4373_v44, %v4064_v51  ;;  %v4395_v2 = vadd.f32 %v4394_v45, %v4065_v56  ;;  %v4076_v44 = vld [vmem:[#allocation2 + $0x150] sm:$0xff]  ;;  %v4077_v45 = vld [vmem:[#allocation2 + $0x158] sm:$0xff]  ;;  %v4078_v50 = vld [vmem:[#allocation2 + $0x160] sm:$0xff] }
 0x2cc   : > { %v4515_v0 = vadd.f32 %v4514_v47, %v4473_v55  ;;  %v4475_v3 = vmul.f32 %v4064_v51, %v4064_v51  ;;  %v4536_v4 = vadd.f32 %v4535_v48, %v4474_v59  ;;  %v4476_v5 = vmul.f32 %v4065_v56, %v4065_v56  ;;  %v4079_v55 = vld [vmem:[#allocation2 + $0x168] sm:$0xff] }
 0x2cd   : > { %4305 = vst [vmem:[%s6940_s2 + $0x78] sm:$0xff] %v5244_v60  ;;  %v5245_v6 = vpack.c.bf16 %v4067_v63, %v4066_v62  ;;  %v4333_v7 = vadd.f32 %v4332_v53, %v4066_v62  ;;  %v4354_v11 = vadd.f32 %v4353_v54, %v4067_v63  ;;  %v4477_v12 = vmul.f32 %v4066_v62, %v4066_v62  ;;  %v4080_v60 = vld [vmem:[#allocation2 + $0x170] sm:$0xff] }
 0x2ce   : > { %v4557_v10 = vadd.f32 %v4556_v57, %v4475_v3  ;;  %v4478_v13 = vmul.f32 %v4067_v63, %v4067_v63  ;;  %v4578_v15 = vadd.f32 %v4577_v58, %v4476_v5  ;;  %v5246_v16 = vpack.c.bf16 %v4069_v9, %v4068_v8 }
 0x2cf   : > { %4306 = vst [vmem:[%s6940_s2 + $0x80] sm:$0xff] %v5245_v6  ;;  %v4375_v17 = vadd.f32 %v4374_v1, %v4068_v8  ;;  %v4396_v18 = vadd.f32 %v4395_v2, %v4069_v9  ;;  %v4516_v20 = vadd.f32 %v4515_v0, %v4477_v12  ;;  %v4479_v22 = vmul.f32 %v4068_v8, %v4068_v8  ;;  %v4081_v2 = vld [vmem:[#allocation2 + $0x178] sm:$0xff]  ;;  %v4083_v8 = vld [vmem:[#allocation2 + $0x188] sm:$0xff] }
 0x2d0   : > { %v4537_v21 = vadd.f32 %v4536_v4, %v4478_v13  ;;  %v4480_v23 = vmul.f32 %v4069_v9, %v4069_v9  ;;  %4307 = vst [vmem:[%s6940_s2 + $0x88] sm:$0xff] %v5246_v16  ;;  %v5247_v25 = vpack.c.bf16 %v4071_v19, %v4070_v14  ;;  %v4334_v26 = vadd.f32 %v4333_v7, %v4070_v14  ;;  %v4082_v7 = vld [vmem:[#allocation2 + $0x180] sm:$0xff] }
 0x2d1   : > { %v4355_v27 = vadd.f32 %v4354_v11, %v4071_v19  ;;  %v4481_v28 = vmul.f32 %v4070_v14, %v4070_v14  ;;  %v4558_v30 = vadd.f32 %v4557_v10, %v4479_v22  ;;  %v4482_v32 = vmul.f32 %v4071_v19, %v4071_v19 }
 0x2d2   : > { %v4579_v31 = vadd.f32 %v4578_v15, %v4480_v23  ;;  %v5248_v33 = vpack.c.bf16 %v4073_v29, %v4072_v24  ;;  %4308 = vst [vmem:[%s6940_s2 + $0x90] sm:$0xff] %v5247_v25  ;;  %v4376_v37 = vadd.f32 %v4375_v17, %v4072_v24  ;;  %v4397_v38 = vadd.f32 %v4396_v18, %v4073_v29  ;;  %v4084_v17 = vld [vmem:[#allocation2 + $0x190] sm:$0xff]  ;;  %v4085_v18 = vld [vmem:[#allocation2 + $0x198] sm:$0xff]  ;;  %v4086_v23 = vld [vmem:[#allocation2 + $0x1a0] sm:$0xff] }
 0x2d3   : > { %v4517_v36 = vadd.f32 %v4516_v20, %v4481_v28  ;;  %v4483_v39 = vmul.f32 %v4072_v24, %v4072_v24  ;;  %v4538_v40 = vadd.f32 %v4537_v21, %v4482_v32  ;;  %v4484_v41 = vmul.f32 %v4073_v29, %v4073_v29  ;;  %v4087_v28 = vld [vmem:[#allocation2 + $0x1a8] sm:$0xff] }
 0x2d4   : > { %4309 = vst [vmem:[%s6940_s2 + $0x98] sm:$0xff] %v5248_v33  ;;  %v5249_v42 = vpack.c.bf16 %v4075_v35, %v4074_v34  ;;  %v4335_v43 = vadd.f32 %v4334_v26, %v4074_v34  ;;  %v4356_v47 = vadd.f32 %v4355_v27, %v4075_v35  ;;  %v4485_v48 = vmul.f32 %v4074_v34, %v4074_v34  ;;  %v4088_v33 = vld [vmem:[#allocation2 + $0x1b0] sm:$0xff] }
 0x2d5   : > { %v4559_v46 = vadd.f32 %v4558_v30, %v4483_v39  ;;  %v4486_v49 = vmul.f32 %v4075_v35, %v4075_v35  ;;  %v4580_v51 = vadd.f32 %v4579_v31, %v4484_v41  ;;  %v5250_v52 = vpack.c.bf16 %v4077_v45, %v4076_v44 }
 0x2d6   : > { %4310 = vst [vmem:[%s6940_s2 + $0xa0] sm:$0xff] %v5249_v42  ;;  %v4377_v53 = vadd.f32 %v4376_v37, %v4076_v44  ;;  %v4398_v54 = vadd.f32 %v4397_v38, %v4077_v45  ;;  %v4518_v56 = vadd.f32 %v4517_v36, %v4485_v48  ;;  %v4487_v58 = vmul.f32 %v4076_v44, %v4076_v44  ;;  %v4089_v38 = vld [vmem:[#allocation2 + $0x1b8] sm:$0xff]  ;;  %v4091_v44 = vld [vmem:[#allocation2 + $0x1c8] sm:$0xff] }
 0x2d7   : > { %v4539_v57 = vadd.f32 %v4538_v40, %v4486_v49  ;;  %v4488_v59 = vmul.f32 %v4077_v45, %v4077_v45  ;;  %4311 = vst [vmem:[%s6940_s2 + $0xa8] sm:$0xff] %v5250_v52  ;;  %v5251_v62 = vpack.c.bf16 %v4079_v55, %v4078_v50  ;;  %v4336_v63 = vadd.f32 %v4335_v43, %v4078_v50  ;;  %v4090_v43 = vld [vmem:[#allocation2 + $0x1c0] sm:$0xff] }
 0x2d8   : > { %v4357_v0 = vadd.f32 %v4356_v47, %v4079_v55  ;;  %v4489_v1 = vmul.f32 %v4078_v50, %v4078_v50  ;;  %v4560_v3 = vadd.f32 %v4559_v46, %v4487_v58  ;;  %v4490_v5 = vmul.f32 %v4079_v55, %v4079_v55 }
 0x2d9   : > { %v4581_v4 = vadd.f32 %v4580_v51, %v4488_v59  ;;  %v5252_v6 = vpack.c.bf16 %v4081_v2, %v4080_v60  ;;  %4312 = vst [vmem:[%s6940_s2 + $0xb0] sm:$0xff] %v5251_v62  ;;  %v4378_v10 = vadd.f32 %v4377_v53, %v4080_v60  ;;  %v4399_v11 = vadd.f32 %v4398_v54, %v4081_v2  ;;  %v4092_v53 = vld [vmem:[#allocation2 + $0x1d0] sm:$0xff]  ;;  %v4093_v54 = vld [vmem:[#allocation2 + $0x1d8] sm:$0xff]  ;;  %v4094_v59 = vld [vmem:[#allocation2 + $0x1e0] sm:$0xff] }
 0x2da   : > { %v4519_v9 = vadd.f32 %v4518_v56, %v4489_v1  ;;  %v4491_v12 = vmul.f32 %v4080_v60, %v4080_v60  ;;  %v4540_v13 = vadd.f32 %v4539_v57, %v4490_v5  ;;  %v4492_v14 = vmul.f32 %v4081_v2, %v4081_v2  ;;  %v4095_v1 = vld [vmem:[#allocation2 + $0x1e8] sm:$0xff] }
 0x2db   : > { %4313 = vst [vmem:[%s6940_s2 + $0xb8] sm:$0xff] %v5252_v6  ;;  %v5253_v15 = vpack.c.bf16 %v4083_v8, %v4082_v7  ;;  %v4337_v16 = vadd.f32 %v4336_v63, %v4082_v7  ;;  %v4358_v20 = vadd.f32 %v4357_v0, %v4083_v8  ;;  %v4493_v21 = vmul.f32 %v4082_v7, %v4082_v7 }
 0x2dc   : > { %v4561_v19 = vadd.f32 %v4560_v3, %v4491_v12  ;;  %v4494_v22 = vmul.f32 %v4083_v8, %v4083_v8  ;;  %v4582_v24 = vadd.f32 %v4581_v4, %v4492_v14  ;;  %v5254_v25 = vpack.c.bf16 %v4085_v18, %v4084_v17 }
 0x2dd   : > { %4314 = vst [vmem:[%s6940_s2 + $0xc0] sm:$0xff] %v5253_v15  ;;  %v4379_v26 = vadd.f32 %v4378_v10, %v4084_v17  ;;  %v4400_v27 = vadd.f32 %v4399_v11, %v4085_v18  ;;  %v4520_v29 = vadd.f32 %v4519_v9, %v4493_v21  ;;  %v4495_v31 = vmul.f32 %v4084_v17, %v4084_v17  ;;  %v4096_v10 = vld [vmem:[#allocation2 + $0x1f0] sm:$0xff]  ;;  %v4097_v11 = vld [vmem:[#allocation2 + $0x1f8] sm:$0xff] }
 0x2de   : > { %v4541_v30 = vadd.f32 %v4540_v13, %v4494_v22  ;;  %v4496_v32 = vmul.f32 %v4085_v18, %v4085_v18  ;;  %4315 = vst [vmem:[%s6940_s2 + $0xc8] sm:$0xff] %v5254_v25  ;;  %v5255_v34 = vpack.c.bf16 %v4087_v28, %v4086_v23  ;;  %v4338_v35 = vadd.f32 %v4337_v16, %v4086_v23 }
 0x2df   : > { %v4359_v36 = vadd.f32 %v4358_v20, %v4087_v28  ;;  %v4497_v37 = vmul.f32 %v4086_v23, %v4086_v23  ;;  %v4562_v39 = vadd.f32 %v4561_v19, %v4495_v31  ;;  %v4498_v41 = vmul.f32 %v4087_v28, %v4087_v28 }
 0x2e0   : > { %v4583_v40 = vadd.f32 %v4582_v24, %v4496_v32  ;;  %v5256_v42 = vpack.c.bf16 %v4089_v38, %v4088_v33  ;;  %4316 = vst [vmem:[%s6940_s2 + $0xd0] sm:$0xff] %v5255_v34  ;;  %v4380_v46 = vadd.f32 %v4379_v26, %v4088_v33  ;;  %v4401_v47 = vadd.f32 %v4400_v27, %v4089_v38 }
 0x2e1   : > { %v4521_v45 = vadd.f32 %v4520_v29, %v4497_v37  ;;  %v4499_v48 = vmul.f32 %v4088_v33, %v4088_v33  ;;  %v4542_v49 = vadd.f32 %v4541_v30, %v4498_v41  ;;  %v4500_v50 = vmul.f32 %v4089_v38, %v4089_v38 }
 0x2e2   : > { %4317 = vst [vmem:[%s6940_s2 + $0xd8] sm:$0xff] %v5256_v42  ;;  %v5257_v51 = vpack.c.bf16 %v4091_v44, %v4090_v43  ;;  %v4339_v52 = vadd.f32 %v4338_v35, %v4090_v43  ;;  %v4360_v56 = vadd.f32 %v4359_v36, %v4091_v44  ;;  %v4501_v57 = vmul.f32 %v4090_v43, %v4090_v43 }
 0x2e3   : > { %v4563_v55 = vadd.f32 %v4562_v39, %v4499_v48  ;;  %v4502_v58 = vmul.f32 %v4091_v44, %v4091_v44  ;;  %v4584_v60 = vadd.f32 %v4583_v40, %v4500_v50  ;;  %v5258_v62 = vpack.c.bf16 %v4093_v54, %v4092_v53 }
 0x2e4   : > { %4318 = vst [vmem:[%s6940_s2 + $0xe0] sm:$0xff] %v5257_v51  ;;  %v4381_v63 = vadd.f32 %v4380_v46, %v4092_v53  ;;  %v4402_v0 = vadd.f32 %v4401_v47, %v4093_v54  ;;  %v4522_v2 = vadd.f32 %v4521_v45, %v4501_v57  ;;  %v4503_v4 = vmul.f32 %v4092_v53, %v4092_v53 }
 0x2e5   : > { %v4543_v3 = vadd.f32 %v4542_v49, %v4502_v58  ;;  %v4504_v5 = vmul.f32 %v4093_v54, %v4093_v54  ;;  %4319 = vst [vmem:[%s6940_s2 + $0xe8] sm:$0xff] %v5258_v62  ;;  %v5259_v6 = vpack.c.bf16 %v4095_v1, %v4094_v59  ;;  %v4340_v7 = vadd.f32 %v4339_v52, %v4094_v59 }
 0x2e6   : > { %v4361_v8 = vadd.f32 %v4360_v56, %v4095_v1  ;;  %v4505_v9 = vmul.f32 %v4094_v59, %v4094_v59  ;;  %v4564_v12 = vadd.f32 %v4563_v55, %v4503_v4  ;;  %v4506_v14 = vmul.f32 %v4095_v1, %v4095_v1 }
 0x2e7   : > { %v4585_v13 = vadd.f32 %v4584_v60, %v4504_v5  ;;  %v5260_v15 = vpack.c.bf16 %v4097_v11, %v4096_v10  ;;  %4320 = vst [vmem:[%s6940_s2 + $0xf0] sm:$0xff] %v5259_v6  ;;  %v4341_v16 = vrot.slane %v4340_v7, 4  ;;  %v4382_v19 = vadd.f32 %v4381_v63, %v4096_v10 }
 0x2e8   : > { %v4362_v17 = vrot.slane %v4361_v8, 4  ;;  %v4523_v18 = vadd.f32 %v4522_v2, %v4505_v9  ;;  %v4544_v20 = vadd.f32 %v4543_v3, %v4506_v14  ;;  %v4403_v21 = vadd.f32 %v4402_v0, %v4097_v11 }
 0x2e9   : > { %4321 = vst [vmem:[%s6940_s2 + $0xf8] sm:$0xff] %v5260_v15  ;;  %v4507_v22 = vmul.f32 %v4096_v10, %v4096_v10  ;;  %v4508_v23 = vmul.f32 %v4097_v11, %v4097_v11  ;;  %v4342_v24 = vadd.f32 %v4341_v16, %v4340_v7  ;;  %v4383_v27 = vrot.slane %v4382_v19, 4 }
 0x2ea   : > { %v4363_v25 = vadd.f32 %v4362_v17, %v4361_v8  ;;  %v4524_v26 = vrot.slane %v4523_v18, 4  ;;  %v4545_v28 = vrot.slane %v4544_v20, 4  ;;  %v4404_v29 = vrot.slane %v4403_v21, 4 }
 0x2eb   : > { %v4565_v30 = vadd.f32 %v4564_v12, %v4507_v22  ;;  %v4586_v31 = vadd.f32 %v4585_v13, %v4508_v23  ;;  %v4343_v32 = vrot.slane %v4342_v24, 2  ;;  %v4384_v35 = vadd.f32 %v4383_v27, %v4382_v19 }
 0x2ec   : > { %v4364_v33 = vrot.slane %v4363_v25, 2  ;;  %v4525_v34 = vadd.f32 %v4524_v26, %v4523_v18  ;;  %v4546_v36 = vadd.f32 %v4545_v28, %v4544_v20  ;;  %v4405_v37 = vadd.f32 %v4404_v29, %v4403_v21 }
 0x2ed   : > { %v4566_v38 = vrot.slane %v4565_v30, 4  ;;  %v4587_v39 = vrot.slane %v4586_v31, 4  ;;  %v4344_v40 = vadd.f32 %v4343_v32, %v4342_v24  ;;  %v4385_v43 = vrot.slane %v4384_v35, 2 }
 0x2ee   : > { %v4365_v41 = vadd.f32 %v4364_v33, %v4363_v25  ;;  %v4526_v42 = vrot.slane %v4525_v34, 2  ;;  %v4547_v44 = vrot.slane %v4546_v36, 2  ;;  %v4406_v45 = vrot.slane %v4405_v37, 2 }
 0x2ef   : > { %v4567_v46 = vadd.f32 %v4566_v38, %v4565_v30  ;;  %v4588_v47 = vadd.f32 %v4587_v39, %v4586_v31  ;;  %v4345_v48 = vrot.slane %v4344_v40, 1  ;;  %v4386_v51 = vadd.f32 %v4385_v43, %v4384_v35 }
 0x2f0   : > { %v4366_v49 = vrot.slane %v4365_v41, 1  ;;  %v4527_v50 = vadd.f32 %v4526_v42, %v4525_v34  ;;  %v4548_v52 = vadd.f32 %v4547_v44, %v4546_v36  ;;  %v4407_v53 = vadd.f32 %v4406_v45, %v4405_v37 }
 0x2f1   : > { %v4568_v54 = vrot.slane %v4567_v46, 2  ;;  %v4589_v55 = vrot.slane %v4588_v47, 2  ;;  %v4346_v56 = vadd.f32 %v4345_v48, %v4344_v40  ;;  %v4387_v59 = vrot.slane %v4386_v51, 1 }
 0x2f2   : > { %v4367_v57 = vadd.f32 %v4366_v49, %v4365_v41  ;;  %v4528_v58 = vrot.slane %v4527_v50, 1  ;;  %v4549_v60 = vrot.slane %v4548_v52, 1  ;;  %v4408_v62 = vrot.slane %v4407_v53, 1 }
 0x2f3   : > { %v4569_v63 = vadd.f32 %v4568_v54, %v4567_v46  ;;  %v4590_v0 = vadd.f32 %v4589_v55, %v4588_v47  ;;  %v4388_v2 = vadd.f32 %v4387_v59, %v4386_v51  ;;  %v6142_v3 = vmov 1966171168  }
 0x2f4   : > { %v4529_v1 = vadd.f32 %v4528_v58, %v4527_v50  ;;  %v4417_v4 = vunpack.c.l.s4 %v6142_v3  ;;  %v4550_v5 = vadd.f32 %v4549_v60, %v4548_v52  ;;  %v4409_v6 = vadd.f32 %v4408_v62, %v4407_v53 }
 0x2f5   : > { %v4570_v7 = vrot.slane %v4569_v63, 1  ;;  %v4591_v8 = vrot.slane %v4590_v0, 1  ;;  %v4414_v9 = vcombine.low %v4346_v56, %v4367_v57  ;;  %v4420_v11 = vshrl.u32 %v4419_v61, 7 }
 0x2f6   : > { %v4418_v10 = vunpack.c.0.s8 %v4417_v4  ;;  %v4597_v12 = vcombine.low %v4529_v1, %v4550_v5  ;;  %v4415_v13 = vcombine.low %v4388_v2, %v4409_v6 }
 0x2f7   : > { %v4571_v14 = vadd.f32 %v4570_v7, %v4569_v63  ;;  %v4592_v15 = vadd.f32 %v4591_v8, %v4590_v0 }
 0x2f8   : > { %v4421_v16 = vsub.s32 %v4418_v10, %v4420_v11 }
 0x2f9   : > { %v4598_v17 = vcombine.low %v4571_v14, %v4592_v15 }
 0x2fa   : > { %v4422_v18 = vrot.slane %v4414_v9, %v4421_v16  ;;  %v4429_v19 = vrot.slane %v4415_v13, %v4421_v16  ;;  %v4605_v20 = vrot.slane %v4597_v12, %v4421_v16 }
 0x2fb   : > { %v4612_v21 = vrot.slane %v4598_v17, %v4421_v16 }
 0x2fc   : > { %v4430_v22 = vcombine.low %v4422_v18, %v4429_v19 }
 0x2fd   : > { %v4613_v23 = vcombine.low %v4605_v20, %v4612_v21 }
 0x2fe   : > { %v4437_v24 = vrot.slane %v4430_v22, %v4421_v16 }
 0x2ff   : > { %v4620_v25 = vrot.slane %v4613_v23, %v4421_v16 }
 0x300   : > { %4443 = vst.msk [vmem:[%s6941_s3] ss:$8 sm:$0xf] %vm4441_vm0, %v4437_v24 }
 0x301   : > { %5220 = vst.msk [vmem:[%s6941_s3 + $0x1] ss:$8 sm:$0xf] %vm4441_vm0, %v4620_v25 }
 0x302 PF: > { %s14_s16 = sadd.s32 1, %s6137_s16   ;;  %s6942_s12 = smov %s6125_s13 }
 0x303   : > { %p11_p12 = scmp.ge.s32.totalorder %s14_s16, 4   ;;  %s6943_s13 = smov %s6198_s20 }
 0x304   : > { %s6944_s14 = smov %s6133_s15  ;;  %s6945_s15 = smov %s6947_s17 }
 0x305   :  { %13 = sbr.rel (!%p11_p12) target bundleno = 3 (0x3), region = 119 }

// kernel: forward.14
= control target key start
LH: loop header
LB: loop body
LE: loop exit
PB: predicated region body
PF: predicated region fallthrough
CT: control target
= control target key end

     0   :  { %s2037_s12 = smov 0   ;;  %s2039_s13 = smov 0   ;;  %s2267_s0 = inlined_call_operand.vmem [shape: bf16[32,12800], index: 0, kind: input, shape index: {}]   ;;  %s2268_s1 = inlined_call_operand.vmem [shape: bf16[12800,128], index: 1, kind: input, shape index: {}]   ;;  %s2269_s2 = inlined_call_operand.vmem [shape: bf16[32,128], index: 2, kind: output, shape index: {0}]   ;;  %s2270_s3 = inlined_call_operand.vmem [shape: f32[8,128], index: 3, kind: output, shape index: {1}]  }
   0x1   :  { %s2041_s14 = smov 0   ;;  %s2043_s15 = smov 0  }
   0x2   :  { %s2045_s16 = smov 0  }
   0x3 LB: > { %s26_s17 = sadd.s32 1, %s2009_s15  ;;  %p49_p1 = scmp.ne.s32.totalorder %s2001_s13, %s1997_s12  ;;  %s2013_s16 = sphi %s2045_s16, %s14_s16   ;;  %s2009_s15 = sphi %s2043_s15, %s2274_s15   ;;  %s2005_s14 = sphi %s2041_s14, %s2273_s14   ;;  %s2001_s13 = sphi %s2039_s13, %s2272_s13   ;;  %s1997_s12 = sphi %s2037_s12, %s2271_s12  }
   0x4   : > { %p27_p0 = scmp.ge.s32.totalorder %s26_s17, 10  ;;  %p50_p2 = scmp.eq.s32.totalorder %s2013_s16, 0 }
   0x5   : > { %s42_s19 = sadd.s32 1, %s2001_s13  ;;  %p1534_p5 = scmp.ge.s32.totalorder %s2013_s16, 10 }
   0x6   : > { %s2276_s17 = smov (%p27_p0, %s26_s17), 0  ;;  %p51_p3 = por %p50_p2, %p49_p1 }
   0x7   : > { %s38_s18 = ssub.s32 %s2009_s15, %s2276_s17  ;;  %159 = sbr.rel (%p1534_p5) target bundleno = 29 (0x1d), region = 16 }
   0x8   : > { %p40_p4 = scmp.eq.s32.totalorder %s38_s18, 0 }
   0xa   : > { %s2072_s20 = scalar_select %p40_p4, %s2001_s13, %s42_s19  }
   0xe   : > { %162 = sbr.rel (!%p51_p3) target bundleno = 29 (0x1d), region = 20  ;;  %s164_s21 = sand.u32 (%p51_p3), 1, %s2001_s13  }
   0xf   : > { %s1649_s22 = smul.u32 (%p51_p3), 40, %s2009_s15 }
  0x10   : > { %s1821_s23 = smul.u32 (%p51_p3), 160, %s164_s21 }
  0x11   : > { %s2080_s26 = scalar_lea.vmem (%p51_p3), %s2267_s0, %s1649_s22 }
  0x12   : > { %v185_v0 = vld [vmem:[%s2080_s26] sm:$0xff] (%p51_p3)  ;;  %v187_v1 = vld [vmem:[%s2080_s26 + $0x8] sm:$0xff] (%p51_p3)  ;;  %v189_v2 = vld [vmem:[%s2080_s26 + $0x10] sm:$0xff] (%p51_p3)  ;;  %s2085_s27 = scalar_lea.vmem (%p51_p3), [#allocation3], %s1821_s23 }
  0x13   : > { %186 = vst [vmem:[%s2085_s27] sm:$0xff] (%p51_p3), %v185_v0  ;;  %188 = vst [vmem:[%s2085_s27 + $0x8] sm:$0xff] (%p51_p3), %v187_v1  ;;  %v191_v3 = vld [vmem:[%s2080_s26 + $0x18] sm:$0xff] (%p51_p3)  ;;  %v193_v4 = vld [vmem:[%s2080_s26 + $0x20] sm:$0xff] (%p51_p3) }
  0x14   : > { %190 = vst [vmem:[%s2085_s27 + $0x10] sm:$0xff] (%p51_p3), %v189_v2  ;;  %v195_v5 = vld [vmem:[%s2080_s26 + $0x190] sm:$0xff] (%p51_p3)  ;;  %192 = vst [vmem:[%s2085_s27 + $0x18] sm:$0xff] (%p51_p3), %v191_v3  ;;  %v197_v6 = vld [vmem:[%s2080_s26 + $0x198] sm:$0xff] (%p51_p3) }
  0x15   : > { %194 = vst [vmem:[%s2085_s27 + $0x20] sm:$0xff] %v193_v4  ;;  %196 = vst [vmem:[%s2085_s27 + $0x28] sm:$0xff] %v195_v5  ;;  %v199_v7 = vld [vmem:[%s2080_s26 + $0x1a0] sm:$0xff]  ;;  %v201_v8 = vld [vmem:[%s2080_s26 + $0x1a8] sm:$0xff] }
  0x16   : > { %198 = vst [vmem:[%s2085_s27 + $0x30] sm:$0xff] %v197_v6  ;;  %200 = vst [vmem:[%s2085_s27 + $0x38] sm:$0xff] %v199_v7  ;;  %v203_v9 = vld [vmem:[%s2080_s26 + $0x1b0] sm:$0xff]  ;;  %v205_v10 = vld [vmem:[%s2080_s26 + $0x320] sm:$0xff] }
  0x17   : > { %202 = vst [vmem:[%s2085_s27 + $0x40] sm:$0xff] %v201_v8  ;;  %v207_v11 = vld [vmem:[%s2080_s26 + $0x328] sm:$0xff]  ;;  %204 = vst [vmem:[%s2085_s27 + $0x48] sm:$0xff] %v203_v9  ;;  %v209_v12 = vld [vmem:[%s2080_s26 + $0x330] sm:$0xff] }
  0x18   : > { %206 = vst [vmem:[%s2085_s27 + $0x50] sm:$0xff] %v205_v10  ;;  %208 = vst [vmem:[%s2085_s27 + $0x58] sm:$0xff] %v207_v11  ;;  %v211_v13 = vld [vmem:[%s2080_s26 + $0x338] sm:$0xff]  ;;  %v213_v14 = vld [vmem:[%s2080_s26 + $0x340] sm:$0xff] }
  0x19   : > { %210 = vst [vmem:[%s2085_s27 + $0x60] sm:$0xff] %v209_v12  ;;  %212 = vst [vmem:[%s2085_s27 + $0x68] sm:$0xff] %v211_v13  ;;  %v215_v15 = vld [vmem:[%s2080_s26 + $0x4b0] sm:$0xff]  ;;  %v217_v16 = vld [vmem:[%s2080_s26 + $0x4b8] sm:$0xff] }
  0x1a   : > { %214 = vst [vmem:[%s2085_s27 + $0x70] sm:$0xff] %v213_v14  ;;  %v219_v17 = vld [vmem:[%s2080_s26 + $0x4c0] sm:$0xff]  ;;  %216 = vst [vmem:[%s2085_s27 + $0x78] sm:$0xff] %v215_v15  ;;  %v221_v18 = vld [vmem:[%s2080_s26 + $0x4c8] sm:$0xff] }
  0x1b   : > { %218 = vst [vmem:[%s2085_s27 + $0x80] sm:$0xff] %v217_v16  ;;  %220 = vst [vmem:[%s2085_s27 + $0x88] sm:$0xff] %v219_v17  ;;  %v223_v19 = vld [vmem:[%s2080_s26 + $0x4d0] sm:$0xff] }
  0x1c   : > { %222 = vst [vmem:[%s2085_s27 + $0x90] sm:$0xff] %v221_v18  ;;  %224 = vst [vmem:[%s2085_s27 + $0x98] sm:$0xff] %v223_v19 }
  0x1d PF: > { %p1536_p6 = scmp.ge.s32.totalorder %s2013_s16, 1  ;;  %p241_p7 = scmp.lt.s32.totalorder %s2013_s16, 11 }
  0x1f   : > { %p242_p8 = pnand %p1536_p6, %p241_p7 }
  0x20   : > { %s248_s28 = sand.u32 (!%p242_p8), 1, %s1997_s12   ;;  %s291_s29 = smul.u32 (!%p242_p8), 160, %s2005_s14 }
  0x21   : > { %245 = sbr.rel (%p242_p8) target bundleno = 395 (0x18b), region = 47  ;;  %p1538_p10 = scmp.ne.s32.totalorder (!%p242_p8), %s2005_s14, 0 }
  0x22   : > { %s1822_s30 = smul.u32 (!%p242_p8), 160, %s248_s28  ;;  %p292_p9 = scmp.lt.s32.totalorder (!%p242_p8), %s291_s29, 1599 }
  0x24   : > { %s2133_s8 = scalar_lea.vmem (!%p242_p8), [#allocation3], %s1822_s30 }
  0x28   : > { %s2278_s29 = smov (!%p292_p9, %s291_s29), 1599  ;;  %320 = sbr.rel (%p1538_p10) target bundleno = 47 (0x2f), region = 55 }
  0x29   : > { %s1537_s4 = sshll.u32 %s2278_s29, 2  ;;  %v2015_v20 = vmov (!%p1538_p10), 0.0  }
  0x2a   : > { %s2131_s7 = scalar_lea.vmem %s2268_s1, %s1537_s4  ;;  %321 = vst [vmem:[#allocation2] sm:$0xff] (!%p1538_p10), %v2015_v20  ;;  %322 = vst [vmem:[#allocation2 + $0x8] sm:$0xff] (!%p1538_p10), %v2015_v20 }
  0x2b   : > { %323 = vst [vmem:[#allocation2 + $0x10] sm:$0xff] (!%p1538_p10), %v2015_v20  ;;  %324 = vst [vmem:[#allocation2 + $0x18] sm:$0xff] (!%p1538_p10), %v2015_v20 }
  0x2f PF: > { %v1865_v21 = vld [vmem:[%s2131_s7 + $0x40] sm:$0xff]   ;;  %v1869_v25 = vld [vmem:[%s2131_s7 + $0x48] sm:$0xff]   ;;  %v1873_v29 = vld [vmem:[%s2131_s7 + $0x50] sm:$0xff]   ;;  %p1639_p11 = scmp.ne.s32.totalorder %s2005_s14, 9 }
  0x30   : > { %v1866_v22 = vld [vmem:[%s2131_s7 + $0xc0] sm:$0xff]   ;;  %1665 = vmatprep.subr.bf16.mxu0 %v1865_v21  ;;  %v1870_v26 = vld [vmem:[%s2131_s7 + $0xc8] sm:$0xff]   ;;  %v1874_v30 = vld [vmem:[%s2131_s7 + $0xd0] sm:$0xff]  }
  0x31   : > { %v1867_v23 = vld [vmem:[%s2131_s7] sm:$0xff]   ;;  %1693 = vmatprep.subr.bf16.mxu1 %v1866_v22  ;;  %v1871_v27 = vld [vmem:[%s2131_s7 + $0x8] sm:$0xff]   ;;  %v1875_v31 = vld [vmem:[%s2131_s7 + $0x10] sm:$0xff]  }
  0x32   : > { %v1868_v24 = vld [vmem:[%s2131_s7 + $0x80] sm:$0xff]   ;;  %1666 = vmatpush3.bf16.msra.mxu0 %v1867_v23  ;;  %v1872_v28 = vld [vmem:[%s2131_s7 + $0x88] sm:$0xff]   ;;  %v1876_v32 = vld [vmem:[%s2131_s7 + $0x90] sm:$0xff]  }
  0x33   : > { %1694 = vmatpush3.bf16.msra.mxu1 %v1868_v24  ;;  %1667 = vmatprep.subr.bf16.mxu0 %v1869_v25  ;;  %v1877_v33 = vld [vmem:[%s2131_s7 + $0x58] sm:$0xff]   ;;  %v1881_v37 = vld [vmem:[%s2131_s7 + $0x60] sm:$0xff]   ;;  %v1885_v41 = vld [vmem:[%s2131_s7 + $0x68] sm:$0xff]  }
  0x34   : > { %1695 = vmatprep.subr.bf16.mxu1 %v1870_v26  ;;  %v1878_v34 = vld [vmem:[%s2131_s7 + $0xd8] sm:$0xff]   ;;  %v1882_v38 = vld [vmem:[%s2131_s7 + $0xe0] sm:$0xff]   ;;  %v1886_v42 = vld [vmem:[%s2131_s7 + $0xe8] sm:$0xff]  }
  0x35   : > { %v1879_v35 = vld [vmem:[%s2131_s7 + $0x18] sm:$0xff]   ;;  %v1883_v39 = vld [vmem:[%s2131_s7 + $0x20] sm:$0xff]   ;;  %v1887_v43 = vld [vmem:[%s2131_s7 + $0x28] sm:$0xff]  }
  0x36   : > { %1668 = vmatpush3.bf16.msra.mxu0 %v1871_v27  ;;  %v1880_v36 = vld [vmem:[%s2131_s7 + $0x98] sm:$0xff]   ;;  %v1884_v40 = vld [vmem:[%s2131_s7 + $0xa0] sm:$0xff]   ;;  %v1888_v44 = vld [vmem:[%s2131_s7 + $0xa8] sm:$0xff]  }
  0x37   : > { %1696 = vmatpush3.bf16.msra.mxu1 %v1872_v28  ;;  %1669 = vmatprep.subr.bf16.mxu0 %v1873_v29  ;;  %v1889_v45 = vld [vmem:[%s2131_s7 + $0x70] sm:$0xff]   ;;  %v1893_v49 = vld [vmem:[%s2131_s7 + $0x78] sm:$0xff]   ;;  %v1897_v53 = vld [vmem:[%s2133_s8] ss:$40 sps:$4 sm:$0xff]  }
  0x38   : > { %1697 = vmatprep.subr.bf16.mxu1 %v1874_v30  ;;  %v1890_v46 = vld [vmem:[%s2131_s7 + $0xf0] sm:$0xff]   ;;  %v1894_v50 = vld [vmem:[%s2131_s7 + $0xf8] sm:$0xff]   ;;  %v1899_v54 = vld [vmem:[%s2133_s8 + $0x4] ss:$40 sps:$4 sm:$0xff]  }
  0x39   : > { %v1891_v47 = vld [vmem:[%s2131_s7 + $0x30] sm:$0xff]   ;;  %v1895_v51 = vld [vmem:[%s2131_s7 + $0x38] sm:$0xff]   ;;  %1121 = vmatprep.mubr.bf16.mxu0 %v1899_v54  ;;  %v1903_v57 = vld [vmem:[%s2131_s7 + $0x140] sm:$0xff]  }
  0x3a   : > { %1670 = vmatpush3.bf16.msra.mxu0 %v1875_v31  ;;  %v1892_v48 = vld [vmem:[%s2131_s7 + $0xb0] sm:$0xff]   ;;  %v1896_v52 = vld [vmem:[%s2131_s7 + $0xb8] sm:$0xff]   ;;  %v1904_v58 = vld [vmem:[%s2131_s7 + $0x1c0] sm:$0xff]  }
  0x3b   : > { %1698 = vmatpush3.bf16.msra.mxu1 %v1876_v32  ;;  %1671 = vmatprep.subr.bf16.mxu0 %v1877_v33  ;;  %v1900_v55 = vld [vmem:[%s2133_s8 + $0x8] ss:$40 sps:$4 sm:$0xff]   ;;  %v1902_v56 = vld [vmem:[%s2133_s8 + $0xc] ss:$40 sps:$4 sm:$0xff]   ;;  %v1905_v59 = vld [vmem:[%s2131_s7 + $0x100] sm:$0xff]  }
  0x3c   : > { %1699 = vmatprep.subr.bf16.mxu1 %v1878_v34  ;;  %1170 = vmatprep.mubr.bf16.mxu1 %v1902_v56  ;;  %v1906_v60 = vld [vmem:[%s2131_s7 + $0x180] sm:$0xff]   ;;  %v1907_v61 = vld [vmem:[%s2131_s7 + $0x148] sm:$0xff]   ;;  %v1911_v1 = vld [vmem:[%s2131_s7 + $0x150] sm:$0xff]  }
  0x3d   : > { %v1908_v62 = vld [vmem:[%s2131_s7 + $0x1c8] sm:$0xff]   ;;  %v1912_v2 = vld [vmem:[%s2131_s7 + $0x1d0] sm:$0xff]   ;;  %v1915_v5 = vld [vmem:[%s2131_s7 + $0x158] sm:$0xff]  }
  0x3e   : > { %1672 = vmatpush3.bf16.msra.mxu0 %v1879_v35  ;;  %v1909_v63 = vld [vmem:[%s2131_s7 + $0x108] sm:$0xff]   ;;  %v1913_v3 = vld [vmem:[%s2131_s7 + $0x110] sm:$0xff]   ;;  %v1916_v6 = vld [vmem:[%s2131_s7 + $0x1d8] sm:$0xff]  }
  0x3f   : > { %1700 = vmatpush3.bf16.msra.mxu1 %v1880_v36  ;;  %1673 = vmatprep.subr.bf16.mxu0 %v1881_v37  ;;  %v1910_v0 = vld [vmem:[%s2131_s7 + $0x188] sm:$0xff]   ;;  %v1914_v4 = vld [vmem:[%s2131_s7 + $0x190] sm:$0xff]   ;;  %v1917_v7 = vld [vmem:[%s2131_s7 + $0x118] sm:$0xff]  }
  0x40   : > { %1701 = vmatprep.subr.bf16.mxu1 %v1882_v38  ;;  %v1918_v8 = vld [vmem:[%s2131_s7 + $0x198] sm:$0xff]   ;;  %v1919_v9 = vld [vmem:[%s2131_s7 + $0x160] sm:$0xff]   ;;  %v1923_v13 = vld [vmem:[%s2131_s7 + $0x168] sm:$0xff]  }
  0x41   : > { %v1920_v10 = vld [vmem:[%s2131_s7 + $0x1e0] sm:$0xff]   ;;  %v1924_v14 = vld [vmem:[%s2131_s7 + $0x1e8] sm:$0xff]   ;;  %v1925_v15 = vld [vmem:[%s2133_s8 + $0x54] ss:$40 sps:$4 sm:$0xff]  }
  0x42   : > { %1674 = vmatpush3.bf16.msra.mxu0 %v1883_v39  ;;  %v1921_v11 = vld [vmem:[%s2131_s7 + $0x120] sm:$0xff]   ;;  %v1929_v17 = vld [vmem:[%s2131_s7 + $0x128] sm:$0xff]   ;;  %v1931_v19 = vld [vmem:[%s2133_s8 + $0x50] ss:$40 sps:$4 sm:$0xff]  }
  0x43   : > { %1702 = vmatpush3.bf16.msra.mxu1 %v1884_v40  ;;  %1675 = vmatprep.subr.bf16.mxu0 %v1885_v41  ;;  %v1922_v12 = vld [vmem:[%s2131_s7 + $0x1a0] sm:$0xff]   ;;  %v1930_v18 = vld [vmem:[%s2131_s7 + $0x1a8] sm:$0xff]   ;;  %v1933_v21 = vld [vmem:[%s2131_s7 + $0x170] sm:$0xff]  }
  0x44   : > { %1703 = vmatprep.subr.bf16.mxu1 %v1886_v42  ;;  %v1927_v16 = vld [vmem:[%s2133_s8 + $0x5c] ss:$40 sps:$4 sm:$0xff]   ;;  %v1932_v20 = vld [vmem:[%s2133_s8 + $0x58] ss:$40 sps:$4 sm:$0xff]   ;;  %v1934_v22 = vld [vmem:[%s2131_s7 + $0x1f0] sm:$0xff]  }
  0x45   : > { %v1935_v23 = vld [vmem:[%s2131_s7 + $0x130] sm:$0xff]   ;;  %v1937_v25 = vld [vmem:[%s2131_s7 + $0x178] sm:$0xff]   ;;  %v1947_v33 = vld [vmem:[%s2131_s7 + $0x240] sm:$0xff]  }
  0x46   : > { %1676 = vmatpush3.bf16.msra.mxu0 %v1887_v43  ;;  %v1936_v24 = vld [vmem:[%s2131_s7 + $0x1b0] sm:$0xff]   ;;  %v1938_v26 = vld [vmem:[%s2131_s7 + $0x1f8] sm:$0xff]   ;;  %v1948_v34 = vld [vmem:[%s2131_s7 + $0x200] sm:$0xff]  }
  0x47   : > { %1704 = vmatpush3.bf16.msra.mxu1 %v1888_v44  ;;  %1677 = vmatprep.subr.bf16.mxu0 %v1889_v45  ;;  %v1939_v27 = vld [vmem:[%s2131_s7 + $0x138] sm:$0xff]   ;;  %v1949_v35 = vld [vmem:[%s2131_s7 + $0x248] sm:$0xff]   ;;  %v1954_v39 = vld [vmem:[%s2131_s7 + $0x250] sm:$0xff]  }
  0x48   : > { %1705 = vmatprep.subr.bf16.mxu1 %v1890_v46  ;;  %v1940_v28 = vld [vmem:[%s2131_s7 + $0x1b8] sm:$0xff]   ;;  %v1950_v36 = vld [vmem:[%s2131_s7 + $0x208] sm:$0xff]   ;;  %v1957_v41 = vld [vmem:[%s2131_s7 + $0x210] sm:$0xff]  }
  0x49   : > { %v1941_v29 = vld [vmem:[%s2133_s8 + $0x10] ss:$40 sps:$4 sm:$0xff]   ;;  %v1943_v30 = vld [vmem:[%s2133_s8 + $0x14] ss:$40 sps:$4 sm:$0xff]   ;;  %v1951_v37 = vld [vmem:[%s2133_s8 + $0x64] ss:$40 sps:$4 sm:$0xff]  }
  0x4a   : > { %1678 = vmatpush3.bf16.msra.mxu0 %v1891_v47  ;;  %v1944_v31 = vld [vmem:[%s2133_s8 + $0x18] ss:$40 sps:$4 sm:$0xff]   ;;  %v1946_v32 = vld [vmem:[%s2133_s8 + $0x1c] ss:$40 sps:$4 sm:$0xff]   ;;  %v1955_v40 = vld [vmem:[%s2133_s8 + $0x6c] ss:$40 sps:$4 sm:$0xff]  }
  0x4b   : > { %1706 = vmatpush3.bf16.msra.mxu1 %v1892_v48  ;;  %1679 = vmatprep.subr.bf16.mxu0 %v1893_v49  ;;  %v1953_v38 = vld [vmem:[%s2133_s8 + $0x60] ss:$40 sps:$4 sm:$0xff]   ;;  %v1959_v43 = vld [vmem:[%s2131_s7 + $0x258] sm:$0xff]   ;;  %v1971_v49 = vld [vmem:[%s2133_s8 + $0x24] ss:$40 sps:$4 sm:$0xff]  }
  0x4c   : > { %1707 = vmatprep.subr.bf16.mxu1 %v1894_v50  ;;  %v1958_v42 = vld [vmem:[%s2133_s8 + $0x68] ss:$40 sps:$4 sm:$0xff]   ;;  %v1960_v44 = vld [vmem:[%s2131_s7 + $0x218] sm:$0xff]   ;;  %v1961_v45 = vld [vmem:[%s2131_s7 + $0x260] sm:$0xff]  }
  0x4d   : > { %v1962_v46 = vld [vmem:[%s2131_s7 + $0x220] sm:$0xff]   ;;  %v1963_v47 = vld [vmem:[%s2131_s7 + $0x268] sm:$0xff]   ;;  %v1965_v50 = vld [vmem:[%s2131_s7 + $0x270] sm:$0xff]  }
  0x4e   : > { %1680 = vmatpush3.bf16.msra.mxu0 %v1895_v51  ;;  %v1964_v48 = vld [vmem:[%s2131_s7 + $0x228] sm:$0xff]   ;;  %v1974_v51 = vld [vmem:[%s2133_s8 + $0x74] ss:$40 sps:$4 sm:$0xff]   ;;  %v1972_v56 = vld [vmem:[%s2133_s8 + $0x70] ss:$40 sps:$4 sm:$0xff]  }
  0x4f   : > { %1708 = vmatpush3.bf16.msra.mxu1 %v1896_v52  ;;  %1721 = vmatprep.subr.bf16.mxu0 %v1903_v57  ;;  %v1966_v52 = vld [vmem:[%s2131_s7 + $0x230] sm:$0xff]   ;;  %v1968_v54 = vld [vmem:[%s2131_s7 + $0x238] sm:$0xff]  }
  0x50   : > { %1749 = vmatprep.subr.bf16.mxu1 %v1904_v58 }
  0x51   : > { %1122 = vmatmul.mubr.bf16.vlgmr.msra.gmra.mrb[0].mxu0 %v1897_v53  ;;  %v1967_v53 = vld [vmem:[%s2131_s7 + $0x278] sm:$0xff]  }
  0x52   : > { %1171 = vmatmul.mubr.bf16.vlgmr.msra.gmra.mrb[0].mxu1 %v1900_v55  ;;  %1722 = vmatpush3.bf16.msra.mxu0 %v1905_v59  ;;  %v1969_v55 = vld [vmem:[%s2133_s8 + $0x20] ss:$40 sps:$4 sm:$0xff]  }
  0x53   : > { %1750 = vmatpush3.bf16.msra.mxu1 %v1906_v60  ;;  %1723 = vmatprep.subr.bf16.mxu0 %v1907_v61 }
  0x54   : > { %1751 = vmatprep.subr.bf16.mxu1 %v1908_v62  ;;  %1129 = vmatprep.mubr.bf16.mxu0 %v1925_v15 }
  0x55   : > { %1178 = vmatprep.mubr.bf16.mxu1 %v1927_v16 }
  0x56   : > { %1724 = vmatpush3.bf16.msra.mxu0 %v1909_v63 }
  0x57   : > { %1752 = vmatpush3.bf16.msra.mxu1 %v1910_v0  ;;  %1725 = vmatprep.subr.bf16.mxu0 %v1911_v1 }
  0x58   : > { %1753 = vmatprep.subr.bf16.mxu1 %v1912_v2 }
  0x59   : > { %1130 = vmatmul.mubr.bf16.gmra.mrb[4].mxu0 %v1931_v19 }
  0x5a   : > { %1726 = vmatpush3.bf16.msra.mxu0 %v1913_v3  ;;  %1179 = vmatmul.mubr.bf16.gmra.mrb[4].mxu1 %v1932_v20 }
  0x5b   : > { %1754 = vmatpush3.bf16.msra.mxu1 %v1914_v4  ;;  %1727 = vmatprep.subr.bf16.mxu0 %v1915_v5 }
  0x5c   : > { %1755 = vmatprep.subr.bf16.mxu1 %v1916_v6  ;;  %1219 = vmatprep.mubr.bf16.mxu0 %v1943_v30 }
  0x5d   : > { %1268 = vmatprep.mubr.bf16.mxu1 %v1946_v32 }
  0x5e   : > { %1728 = vmatpush3.bf16.msra.mxu0 %v1917_v7 }
  0x5f   : > { %1756 = vmatpush3.bf16.msra.mxu1 %v1918_v8  ;;  %1729 = vmatprep.subr.bf16.mxu0 %v1919_v9 }
  0x60   : > { %1757 = vmatprep.subr.bf16.mxu1 %v1920_v10 }
  0x62   : > { %1730 = vmatpush3.bf16.msra.mxu0 %v1921_v11 }
  0x63   : > { %1758 = vmatpush3.bf16.msra.mxu1 %v1922_v12  ;;  %1731 = vmatprep.subr.bf16.mxu0 %v1923_v13 }
  0x64   : > { %1759 = vmatprep.subr.bf16.mxu1 %v1924_v14 }
  0x66   : > { %1732 = vmatpush3.bf16.msra.mxu0 %v1929_v17 }
  0x67   : > { %1760 = vmatpush3.bf16.msra.mxu1 %v1930_v18  ;;  %1733 = vmatprep.subr.bf16.mxu0 %v1933_v21 }
  0x68   : > { %1761 = vmatprep.subr.bf16.mxu1 %v1934_v22 }
  0x6a   : > { %1734 = vmatpush3.bf16.msra.mxu0 %v1935_v23 }
  0x6b   : > { %1762 = vmatpush3.bf16.msra.mxu1 %v1936_v24  ;;  %1735 = vmatprep.subr.bf16.mxu0 %v1937_v25 }
  0x6c   : > { %1763 = vmatprep.subr.bf16.mxu1 %v1938_v26 }
  0x6e   : > { %1736 = vmatpush3.bf16.msra.mxu0 %v1939_v27 }
  0x6f   : > { %1764 = vmatpush3.bf16.msra.mxu1 %v1940_v28  ;;  %1777 = vmatprep.subr.bf16.mxu0 %v1947_v33 }
  0x70   : > { %1805 = vmatprep.subr.bf16.mxu1 %v1947_v33 }
  0x71   : > { %1220 = vmatmul.mubr.bf16.vlgmr.msra.gmra.mrb[8].mxu0 %v1941_v29 }
  0x72   : > { %1269 = vmatmul.mubr.bf16.vlgmr.msra.gmra.mrb[8].mxu1 %v1944_v31  ;;  %1778 = vmatpush3.bf16.msra.mxu0 %v1948_v34 }
  0x73   : > { %1813 = vmatpush3.bf16.msra.mxu1 %v1948_v34  ;;  %1779 = vmatprep.subr.bf16.mxu0 %v1949_v35 }
  0x74   : > { %1806 = vmatprep.subr.bf16.mxu1 %v1949_v35  ;;  %1227 = vmatprep.mubr.bf16.mxu0 %v1951_v37 }
  0x75   : > { %1276 = vmatprep.mubr.bf16.mxu1 %v1955_v40 }
  0x76   : > { %1780 = vmatpush3.bf16.msra.mxu0 %v1950_v36 }
  0x77   : > { %1814 = vmatpush3.bf16.msra.mxu1 %v1950_v36  ;;  %1781 = vmatprep.subr.bf16.mxu0 %v1954_v39 }
  0x78   : > { %1807 = vmatprep.subr.bf16.mxu1 %v1954_v39 }
  0x79   : > { %1228 = vmatmul.mubr.bf16.gmra.mrb[12].mxu0 %v1953_v38 }
  0x7a   : > { %1782 = vmatpush3.bf16.msra.mxu0 %v1957_v41  ;;  %1277 = vmatmul.mubr.bf16.gmra.mrb[12].mxu1 %v1958_v42 }
  0x7b   : > { %1815 = vmatpush3.bf16.msra.mxu1 %v1957_v41  ;;  %1783 = vmatprep.subr.bf16.mxu0 %v1959_v43 }
  0x7c   : > { %1808 = vmatprep.subr.bf16.mxu1 %v1959_v43  ;;  %1317 = vmatprep.mubr.bf16.mxu0 %v1971_v49 }
  0x7d   : > { %1325 = vmatprep.mubr.bf16.mxu1 %v1974_v51 }
  0x7e   : > { %1784 = vmatpush3.bf16.msra.mxu0 %v1960_v44 }
  0x7f   : > { %1816 = vmatpush3.bf16.msra.mxu1 %v1960_v44  ;;  %1785 = vmatprep.subr.bf16.mxu0 %v1961_v45 }
  0x80   : > { %1809 = vmatprep.subr.bf16.mxu1 %v1961_v45 }
  0x82   : > { %1786 = vmatpush3.bf16.msra.mxu0 %v1962_v46 }
  0x83   : > { %1817 = vmatpush3.bf16.msra.mxu1 %v1962_v46  ;;  %1787 = vmatprep.subr.bf16.mxu0 %v1963_v47 }
  0x84   : > { %1810 = vmatprep.subr.bf16.mxu1 %v1963_v47 }
  0x86   : > { %1788 = vmatpush3.bf16.msra.mxu0 %v1964_v48 }
  0x87   : > { %1818 = vmatpush3.bf16.msra.mxu1 %v1964_v48  ;;  %1789 = vmatprep.subr.bf16.mxu0 %v1965_v50 }
  0x88   : > { %1811 = vmatprep.subr.bf16.mxu1 %v1965_v50 }
  0x8a   : > { %1790 = vmatpush3.bf16.msra.mxu0 %v1966_v52 }
  0x8b   : > { %1819 = vmatpush3.bf16.msra.mxu1 %v1966_v52  ;;  %1791 = vmatprep.subr.bf16.mxu0 %v1967_v53 }
  0x8c   : > { %1812 = vmatprep.subr.bf16.mxu1 %v1967_v53 }
  0x8e   : > { %1792 = vmatpush3.bf16.msra.mxu0 %v1968_v54 }
  0x8f   : > { %1820 = vmatpush3.bf16.msra.mxu1 %v1968_v54 }
  0x91   : > { %1318 = vmatmul.mubr.bf16.vlgmr.msra.gmra.mrb[16].mxu0 %v1969_v55 }
  0x92   : > { %1326 = vmatmul.mubr.bf16.vlgmr.msra.gmra.mrb[16].mxu1 %v1972_v56 }
 0x124   : > { %v1681_v57 = vpop.f32.mrb[0].mxu0 }
 0x125   : > { %v1709_v58 = vpop.f32.mrb[0].mxu1  ;;  %v1682_v59 = vpop.f32.mrb[1].mxu0 }
 0x126   : > { %v1683_v60 = vadd.f32 %v1682_v59, %v1681_v57  ;;  %v1710_v61 = vpop.f32.mrb[1].mxu1  ;;  %v1684_v62 = vpop.f32.mrb[2].mxu0  ;;  %v325_v59 = vld [vmem:[#allocation2] sm:$0xff] }
 0x127   : > { %v1711_v63 = vadd.f32 %v1710_v61, %v1709_v58  ;;  %v1712_v0 = vpop.f32.mrb[2].mxu1  ;;  %v1685_v1 = vpop.f32.mrb[3].mxu0 }
 0x128   : > { %v1686_v2 = vadd.f32 %v1685_v1, %v1684_v62  ;;  %v1713_v3 = vpop.f32.mrb[3].mxu1 }
 0x129   : > { %v1173_v4 = vadd.f32 %v1711_v63, %v1683_v60  ;;  %v1714_v5 = vadd.f32 %v1713_v3, %v1712_v0  ;;  %v327_v0 = vld [vmem:[#allocation2 + $0x10] sm:$0xff] }
 0x12b   : > { %v1176_v6 = vadd.f32 %v1714_v5, %v1686_v2 }
 0x12c   : > { %v1687_v7 = vpop.f32.mrb[4].mxu0 }
 0x12d   : > { %v1715_v8 = vpop.f32.mrb[4].mxu1  ;;  %v1688_v9 = vpop.f32.mrb[5].mxu0 }
 0x12e   : > { %v1689_v10 = vadd.f32 %v1688_v9, %v1687_v7  ;;  %v1716_v11 = vpop.f32.mrb[5].mxu1  ;;  %v1690_v12 = vpop.f32.mrb[6].mxu0 }
 0x12f   : > { %v1717_v13 = vadd.f32 %v1716_v11, %v1715_v8  ;;  %v1718_v14 = vpop.f32.mrb[6].mxu1  ;;  %v1691_v15 = vpop.f32.mrb[7].mxu0  ;;  %v328_v8 = vld [vmem:[#allocation2 + $0x18] sm:$0xff] }
 0x130   : > { %v1692_v16 = vadd.f32 %v1691_v15, %v1690_v12  ;;  %v1719_v17 = vpop.f32.mrb[7].mxu1 }
 0x131   : > { %v1181_v18 = vadd.f32 %v1717_v13, %v1689_v10  ;;  %v1720_v19 = vadd.f32 %v1719_v17, %v1718_v14 }
 0x133   : > { %v1184_v20 = vadd.f32 %v1720_v19, %v1692_v16  ;;  %v2016_v16 = vmov (!%p1639_p11), 0.0  }
 0x134   : > { %1370 = vst [vmem:[%s2270_s3] sm:$0xff] (!%p1639_p11), %v2016_v16 }
 0x144   : > { %v1737_v21 = vpop.f32.mrb[8].mxu0 }
 0x145   : > { %v1765_v22 = vpop.f32.mrb[8].mxu1  ;;  %v1738_v23 = vpop.f32.mrb[9].mxu0 }
 0x146   : > { %v1739_v24 = vadd.f32 %v1738_v23, %v1737_v21  ;;  %v1766_v25 = vpop.f32.mrb[9].mxu1  ;;  %v1740_v26 = vpop.f32.mrb[10].mxu0 }
 0x147   : > { %v1767_v27 = vadd.f32 %v1766_v25, %v1765_v22  ;;  %v1768_v28 = vpop.f32.mrb[10].mxu1  ;;  %v1741_v29 = vpop.f32.mrb[11].mxu0 }
 0x148   : > { %v1222_v30 = vadd.f32 %v1739_v24, %v1173_v4  ;;  %v1742_v31 = vadd.f32 %v1741_v29, %v1740_v26  ;;  %v1769_v32 = vpop.f32.mrb[11].mxu1  ;;  %v326_v4 = vld [vmem:[#allocation2 + $0x8] sm:$0xff] }
 0x149   : > { %v1770_v33 = vadd.f32 %v1769_v32, %v1768_v28 }
 0x14a   : > { %v1271_v34 = vadd.f32 %v1767_v27, %v1222_v30  ;;  %v1225_v35 = vadd.f32 %v1742_v31, %v1176_v6 }
 0x14c   : > { %v1274_v36 = vadd.f32 %v1770_v33, %v1225_v35  ;;  %v1743_v37 = vpop.f32.mrb[12].mxu0 }
 0x14d   : > { %v1744_v38 = vpop.f32.mrb[13].mxu0  ;;  %v1771_v41 = vpop.f32.mrb[12].mxu1 }
 0x14e   : > { %v1745_v39 = vadd.f32 %v1744_v38, %v1743_v37  ;;  %v1746_v40 = vpop.f32.mrb[14].mxu0  ;;  %v1772_v43 = vpop.f32.mrb[13].mxu1 }
 0x14f   : > { %v1747_v42 = vpop.f32.mrb[15].mxu0  ;;  %v1773_v46 = vadd.f32 %v1772_v43, %v1771_v41  ;;  %v1774_v47 = vpop.f32.mrb[14].mxu1 }
 0x150   : > { %v1230_v44 = vadd.f32 %v1745_v39, %v1181_v18  ;;  %v1748_v45 = vadd.f32 %v1747_v42, %v1746_v40  ;;  %v1775_v48 = vpop.f32.mrb[15].mxu1 }
 0x151   : > { %v1776_v51 = vadd.f32 %v1775_v48, %v1774_v47 }
 0x152   : > { %v1233_v49 = vadd.f32 %v1748_v45, %v1184_v20  ;;  %v1279_v50 = vadd.f32 %v1773_v46, %v1230_v44 }
 0x154   : > { %v1282_v52 = vadd.f32 %v1776_v51, %v1233_v49 }
 0x164   : > { %v1793_v53 = vpop.f32.mrb[16].mxu0 }
 0x165   : > { %v1799_v54 = vpop.f32.mrb[16].mxu1  ;;  %v1794_v55 = vpop.f32.mrb[17].mxu0 }
 0x166   : > { %v1795_v56 = vadd.f32 %v1794_v55, %v1793_v53  ;;  %v1800_v57 = vpop.f32.mrb[17].mxu1  ;;  %v1796_v58 = vpop.f32.mrb[18].mxu0 }
 0x167   : > { %v1801_v60 = vadd.f32 %v1800_v57, %v1799_v54  ;;  %v1802_v61 = vpop.f32.mrb[18].mxu1  ;;  %v1797_v62 = vpop.f32.mrb[19].mxu0 }
 0x168   : > { %v1320_v63 = vadd.f32 %v1795_v56, %v1271_v34  ;;  %v1798_v1 = vadd.f32 %v1797_v62, %v1796_v58  ;;  %v1803_v2 = vpop.f32.mrb[19].mxu1 }
 0x169   : > { %v1328_v3 = vadd.f32 %v1801_v60, %v1279_v50  ;;  %v1804_v5 = vadd.f32 %v1803_v2, %v1802_v61  ;;  %1345 = sbr.rel (%p1639_p11) target bundleno = 395 (0x18b), region = 59 }
 0x16a   : > { %v1334_v6 = vadd.f32 %v1320_v63, %v325_v59  ;;  %v1323_v7 = vadd.f32 %v1798_v1, %v1274_v36 }
 0x16b   : > { %v1336_v9 = vadd.f32 %v1328_v3, %v327_v0  ;;  %v1331_v10 = vadd.f32 %v1804_v5, %v1282_v52 }
 0x16c   : > { %1338 = vst [vmem:[#allocation2] sm:$0xff] %v1334_v6  ;;  %v1335_v11 = vadd.f32 %v1323_v7, %v326_v4 }
 0x16d   : > { %1340 = vst [vmem:[#allocation2 + $0x10] sm:$0xff] %v1336_v9  ;;  %v1337_v12 = vadd.f32 %v1331_v10, %v328_v8 }
 0x16e   : > { %1339 = vst [vmem:[#allocation2 + $0x8] sm:$0xff] %v1335_v11 }
 0x16f   : > { %1341 = vst [vmem:[#allocation2 + $0x18] sm:$0xff] %v1337_v12 }
 0x173   : > { %v1346_v13 = vld [vmem:[#allocation2] sm:$0xff] }
 0x174   : > { %v1348_v15 = vld [vmem:[#allocation2 + $0x10] sm:$0xff]  ;;  %v1381_v19 = vmul.f32 %v1346_v13, %v1346_v13 }
 0x175   : > { %v1347_v14 = vld [vmem:[#allocation2 + $0x8] sm:$0xff]  ;;  %v1383_v23 = vmul.f32 %v1348_v15, %v1348_v15 }
 0x176   : > { %v1657_v17 = vpack.c.bf16 %v1347_v14, %v1346_v13  ;;  %v1371_v18 = vadd.f32 %v1347_v14, %v1346_v13  ;;  %v1382_v20 = vmul.f32 %v1347_v14, %v1347_v14  ;;  %v1349_v21 = vld [vmem:[#allocation2 + $0x18] sm:$0xff] }
 0x177   : > { %v1662_v22 = vpack.c.bf16 %v1349_v21, %v1348_v15  ;;  %v1384_v26 = vmul.f32 %v1349_v21, %v1349_v21 }
 0x178   : > { %1658 = vst [vmem:[%s2269_s2] sm:$0xff] %v1657_v17   ;;  %v1385_v24 = vadd.f32 %v1382_v20, %v1381_v19  ;;  %v1372_v25 = vadd.f32 %v1371_v18, %v1348_v15 }
 0x179   : > { %1664 = vst [vmem:[%s2269_s2 + $0x8] sm:$0xff] %v1662_v22  }
 0x17a   : > { %v1373_v27 = vadd.f32 %v1372_v25, %v1349_v21  ;;  %v1386_v28 = vadd.f32 %v1385_v24, %v1383_v23 }
 0x17c   : > { %v1374_v29 = vrot.slane %v1373_v27, 4  ;;  %v1387_v30 = vadd.f32 %v1386_v28, %v1384_v26 }
 0x17e   : > { %v1375_v31 = vadd.f32 %v1374_v29, %v1373_v27  ;;  %v1388_v32 = vrot.slane %v1387_v30, 4 }
 0x180   : > { %v1376_v33 = vrot.slane %v1375_v31, 2  ;;  %v1389_v34 = vadd.f32 %v1388_v32, %v1387_v30 }
 0x182   : > { %v1377_v35 = vadd.f32 %v1376_v33, %v1375_v31  ;;  %v1390_v36 = vrot.slane %v1389_v34, 2 }
 0x184   : > { %v1378_v37 = vrot.slane %v1377_v35, 1  ;;  %v1391_v38 = vadd.f32 %v1390_v36, %v1389_v34 }
 0x186   : > { %v1379_v39 = vadd.f32 %v1378_v37, %v1377_v35  ;;  %v1392_v40 = vrot.slane %v1391_v38, 1 }
 0x188   : > { %1380 = vst [vmem:[%s2270_s3] sm:$0x1] %v1379_v39  ;;  %v1393_v41 = vadd.f32 %v1392_v40, %v1391_v38 }
 0x18a   : > { %1394 = vst [vmem:[%s2270_s3 + $0x1] sm:$0x1] %v1393_v41 }
 0x18b PF: > { %s14_s16 = sadd.s32 1, %s2013_s16   ;;  %s2271_s12 = smov %s2001_s13 }
 0x18c   : > { %p11_p12 = scmp.ge.s32.totalorder %s14_s16, 12   ;;  %s2272_s13 = smov %s2072_s20 }
 0x18d   : > { %s2273_s14 = smov %s2009_s15  ;;  %s2274_s15 = smov %s2276_s17 }
 0x18e   :  { %13 = sbr.rel (!%p11_p12) target bundleno = 3 (0x3), region = 109 }

// kernel: forward.15
= control target key start
LH: loop header
LB: loop body
LE: loop exit
PB: predicated region body
PF: predicated region fallthrough
CT: control target
= control target key end

     0   :  { %s136_s0 = inlined_call_operand.vmem [shape: bf16[32,128], index: 0, kind: input, shape index: {}]   ;;  %s137_s1 = inlined_call_operand.vmem [shape: f32[8,128], index: 1, kind: input, shape index: {}]   ;;  %s138_s2 = inlined_call_operand.vmem [shape: bf16[32,128], index: 2, kind: output, shape index: {}]  }
   0x1   :  { %v84_v0 = vld [vmem:[%s136_s0] sm:$0xff]   ;;  %v101_v4 = vld [vmem:[%s136_s0 + $0x8] sm:$0xff]  }
   0x2   :  { %v73_v1 = vld [vmem:[%s137_s1] ss:$0 sm:$0xff]  ;;  %v85_v2 = vunpack.c.l.bf16 %v84_v0  ;;  %v86_v3 = vunpack.c.h.bf16 %v84_v0  ;;  %v74_v5 = vld [vmem:[%s137_s1 + $0x1] ss:$0 sm:$0xff]  ;;  %v89_v6 = vunpack.c.l.bf16 %v101_v4  ;;  %v90_v7 = vunpack.c.h.bf16 %v101_v4 }
   0x4   :  { %v24_v8 = vmul.f32 %v85_v2, %v73_v1  ;;  %v25_v9 = vmul.f32 %v86_v3, %v73_v1  ;;  %v26_v10 = vmul.f32 %v89_v6, %v73_v1  ;;  %v27_v11 = vmul.f32 %v90_v7, %v73_v1 }
   0x6   :  { %v33_v12 = vadd.f32 %v74_v5, %v24_v8  ;;  %v34_v13 = vadd.f32 %v74_v5, %v25_v9  ;;  %v35_v14 = vadd.f32 %v74_v5, %v26_v10  ;;  %v36_v15 = vadd.f32 %v74_v5, %v27_v11 }
   0x8   :  { %vm37_vm0 = vcmp.ge.f32.partialorder %v33_v12, 0.0  ;;  %vm38_vm1 = vcmp.ge.f32.partialorder %v34_v13, 0.0  ;;  %v41_v16 = vmul.f32 0.2, %v33_v12  ;;  %v42_v17 = vmul.f32 0.2, %v34_v13 }
   0x9   :  { %vm39_vm2 = vcmp.ge.f32.partialorder %v35_v14, 0.0  ;;  %vm40_vm3 = vcmp.ge.f32.partialorder %v36_v15, 0.0  ;;  %v43_v18 = vmul.f32 0.2, %v35_v14  ;;  %v44_v19 = vmul.f32 0.2, %v36_v15 }
   0xa   :  { %v45_v20 = vsel %vm37_vm0, %v33_v12, %v41_v16  ;;  %v46_v21 = vsel %vm38_vm1, %v34_v13, %v42_v17 }
   0xb   :  { %v94_v22 = vpack.c.bf16 %v46_v21, %v45_v20  ;;  %v47_v23 = vsel %vm39_vm2, %v35_v14, %v43_v18  ;;  %v48_v24 = vsel %vm40_vm3, %v36_v15, %v44_v19 }
   0xc   :  { %v99_v25 = vpack.c.bf16 %v48_v24, %v47_v23 }
   0xd   :  { %95 = vst [vmem:[%s138_s2] sm:$0xff] %v94_v22  }
   0xe   :  { %102 = vst [vmem:[%s138_s2 + $0x8] sm:$0xff] %v99_v25  }

// kernel: forward.16
= control target key start
LH: loop header
LB: loop body
LE: loop exit
PB: predicated region body
PF: predicated region fallthrough
CT: control target
= control target key end

     0   :  { %vm40_vm0 = vcmask 195584   ;;  %vm47_vm1 = vcmask 1043456   ;;  %v196_v5 = vmov 0.0   ;;  %s244_s1 = inlined_call_operand.vmem [shape: bf16[24,128], index: 1, kind: input, shape index: {}]   ;;  %s245_s0 = inlined_call_operand.vmem [shape: bf16[32,24], index: 0, kind: input, shape index: {}]   ;;  %s246_s3 = inlined_call_operand.vmem [shape: f32[8,128], index: 3, kind: output, shape index: {1}]   ;;  %s247_s2 = inlined_call_operand.vmem [shape: bf16[32,128], index: 2, kind: output, shape index: {0}]  }
   0x1   :  { %v192_v0 = vld [vmem:[%s244_s1] sm:$0xff]   ;;  %v193_v1 = vld [vmem:[%s244_s1 + $0x8] ss:$0 sps:$4 sm:$0xff]   ;;  %120 = vst [vmem:[%s246_s3] sm:$0xff] %v196_v5 }
   0x2   :  { %v194_v2 = vld [vmem:[%s245_s0] sm:$0xff]   ;;  %182 = vmatprep.subr.bf16.mxu0 %v192_v0  ;;  %v49_v3 = vsel %vm47_vm1, %v193_v1, 0  ;;  %v195_v4 = vld [vmem:[%s245_s0 + $0x8] sm:$0xff]  }
   0x3   :  { %183 = vmatpush3.bf16.msra.mxu0 %v192_v0  ;;  %186 = vmatprep.mubr.msk.bf16.mxu0 %vm40_vm0, %v194_v2 }
   0x4   :  { %190 = vmatprep.subr.msk.bf16.mxu0 %vm47_vm1, %v193_v1 }
   0x7   :  { %185 = vmatpush3.bf16.msra.mxu0 %v49_v3 }
   0xa   :  { %187 = vmatmul.mubr.msk.bf16.vlgmr.msra.gmra.mrb[0].mxu0 %vm40_vm0, %v195_v4 }
  0xdd   :  { %v188_v6 = vpop.f32.mrb[0].mxu0 }
  0xde   :  { %v85_v7 = vpop.f32.mrb[1].mxu0  ;;  %v133_v15 = vmul.f32 %v188_v6, %v188_v6 }
  0xdf   :  { %v189_v8 = vpop.f32.mrb[2].mxu0  ;;  %v131_v11 = vmul.f32 %v85_v7, %v85_v7 }
  0xe0   :  { %v175_v9 = vpack.c.bf16 %v189_v8, %v188_v6  ;;  %v88_v10 = vpop.f32.mrb[3].mxu0  ;;  %v134_v18 = vmul.f32 %v189_v8, %v189_v8 }
  0xe1   :  { %v170_v12 = vpack.c.bf16 %v88_v10, %v85_v7  ;;  %v121_v13 = vadd.f32 %v88_v10, %v85_v7  ;;  %v132_v14 = vmul.f32 %v88_v10, %v88_v10 }
  0xe2   :  { %177 = vst [vmem:[%s247_s2 + $0x8] sm:$0xff] %v175_v9  }
  0xe3   :  { %171 = vst [vmem:[%s247_s2] sm:$0xff] %v170_v12   ;;  %v122_v16 = vadd.f32 %v188_v6, %v121_v13  ;;  %v135_v17 = vadd.f32 %v132_v14, %v131_v11 }
  0xe5   :  { %v123_v19 = vadd.f32 %v189_v8, %v122_v16  ;;  %v136_v20 = vadd.f32 %v135_v17, %v133_v15 }
  0xe7   :  { %v124_v21 = vrot.slane %v123_v19, 4  ;;  %v137_v22 = vadd.f32 %v136_v20, %v134_v18 }
  0xe9   :  { %v125_v23 = vadd.f32 %v124_v21, %v123_v19  ;;  %v138_v24 = vrot.slane %v137_v22, 4 }
  0xeb   :  { %v126_v25 = vrot.slane %v125_v23, 2  ;;  %v139_v26 = vadd.f32 %v138_v24, %v137_v22 }
  0xed   :  { %v127_v27 = vadd.f32 %v126_v25, %v125_v23  ;;  %v140_v28 = vrot.slane %v139_v26, 2 }
  0xef   :  { %v128_v29 = vrot.slane %v127_v27, 1  ;;  %v141_v30 = vadd.f32 %v140_v28, %v139_v26 }
  0xf1   :  { %v129_v31 = vadd.f32 %v128_v29, %v127_v27  ;;  %v142_v32 = vrot.slane %v141_v30, 1 }
  0xf3   :  { %130 = vst [vmem:[%s246_s3] sm:$0x1] %v129_v31  ;;  %v143_v33 = vadd.f32 %v142_v32, %v141_v30 }
  0xf5   :  { %144 = vst [vmem:[%s246_s3 + $0x1] sm:$0x1] %v143_v33 }

</bundles_post_ra>
